<compile_context>
chip_gen: v7x
topology: tpu7x:2x2x1
jax: 0.10.0
libtpu: 0.0.40
codegen_flags: <defaults>
</compile_context>

<pallas_src>
import functools
import math

import jax
import jax.numpy as jnp
from jax import lax
from jax.experimental import pallas as pl
from jax.experimental.pallas import tpu as pltpu

F32 = jnp.float32
BF16 = jnp.bfloat16
LANE = 128
VMEM_LIMIT = 32 * 1024 * 1024


def _round_up(x, m):
    return ((x + m - 1) // m) * m


def _full_spec(shape):
    zeros = (0,) * len(shape)
    return pl.BlockSpec(shape, lambda n, _z=zeros: _z)


# ---------------------------------------------------------------------------
# in-kernel helpers
# ---------------------------------------------------------------------------

def _bn_relu(x, s_ref, b_ref):
    """Eval-mode BatchNorm (folded scale/bias) + ReLU, f32 VPU math."""
    cp = s_ref.shape[-1]
    shp = (1,) * (x.ndim - 1) + (cp,)
    return jnp.maximum(x.astype(F32) * s_ref[...].reshape(shp)
                       + b_ref[...].reshape(shp), 0.0)


def _conv3x3_s1(a, w_ref, pad_ref, col_ref, Hc, Wc, Cp):
    """3x3 stride-1 'same' conv as ONE im2col MXU matmul.

    a:       (Hc*Wc, Cp) or (Hc, Wc, Cp) f32 activation (padded lanes are zero).
    pad_ref: (Hc+2, Wc+2, Cp) f32 scratch; the 1-px halo is zeroed once (program 0)
             and never written again; the interior is fully rewritten here.
    col_ref: (Hc, Wc, 9*Cp) f32 im2col scratch; every tap's lane block is fully
             rewritten, so no cross-iteration zeroing is needed.
    w_ref:   (9*Cp, Cp) bf16 weights, row block k = 3*dh + dw (HWIO order).
    Returns (Hc*Wc, Cp) f32.
    """
    pad_ref[1:Hc + 1, 1:Wc + 1, :] = a.reshape(Hc, Wc, Cp)
    for dh in range(3):
        for dw in range(3):
            k = 3 * dh + dw
            col_ref[:, :, k * Cp:(k + 1) * Cp] = pad_ref[dh:dh + Hc, dw:dw + Wc, :]
    lhs = col_ref[...].reshape(Hc * Wc, 9 * Cp).astype(BF16)
    return jnp.dot(lhs, w_ref[...], preferred_element_type=F32)


def _conv3x3_s2(phases, w_ref, col_ref, Ho, Wo, Cp):
    """3x3 stride-2 'same' conv as ONE im2col matmul over the 4 spatial phases.

    phases[rp][cq] = relu(bn1(x))[rp::2, cq::2], each (Ho, Wo, Cp) f32.
    For output (p, q), tap (dh, dw) reads the activated input at row 2p+dh-1 and
    column 2q+dw-1, i.e. phase(row/col parity) shifted by the tap's -1 offset.
    Out-of-range (-1) positions are the conv's zero padding, written here as explicit
    zero strips (they may hold stale data from a previous grid step).
    """
    for dh in range(3):
        rp, roff = (0, 0) if dh == 1 else (1, 1 if dh == 0 else 0)
        for dw in range(3):
            cq, coff = (0, 0) if dw == 1 else (1, 1 if dw == 0 else 0)
            k = 3 * dh + dw
            lo, hi = k * Cp, (k + 1) * Cp
            if roff:                                   # top halo row must be zero
                col_ref[0:1, :, lo:hi] = jnp.zeros((1, Wo, Cp), F32)
            if coff:                                   # left halo column must be zero
                col_ref[:, 0:1, lo:hi] = jnp.zeros((Ho, 1, Cp), F32)
            col_ref[roff:Ho, coff:Wo, lo:hi] = (
                phases[rp][cq][:Ho - roff, :Wo - coff, :])
    lhs = col_ref[...].reshape(Ho * Wo, 9 * Cp).astype(BF16)
    return jnp.dot(lhs, w_ref[...], preferred_element_type=F32)


# ---------------------------------------------------------------------------
# fused NetworkBlock kernel (all BasicBlocks, one image per grid step)
# ---------------------------------------------------------------------------

def _network_block_kernel(stride0, equal_flags, Hc, Wc, Cp, *refs):
    n_in = 4 if stride0 == 2 else 1
    in_refs = refs[:n_in]
    pos = n_in
    layer_refs = []
    for eq in equal_flags:
        n = 6 if eq else 7
        layer_refs.append(refs[pos:pos + n])
        pos += n
    o_ref, pad_ref, col_ref = refs[pos], refs[pos + 1], refs[pos + 2]

    # One-time scratch init (review item): only pad_ref's 1-px halo is ever read
    # before being written; scratch persists across grid steps, so zero it once.
    @pl.when(pl.program_id(0) == 0)
    def _():
        pad_ref[...] = jnp.zeros((Hc + 2, Wc + 2, Cp), F32)

    P = Hc * Wc
    x_cur = None
    for li, eq in enumerate(equal_flags):
        prm = layer_refs[li]
        s1, b1, w1, s2, b2, w2 = prm[:6]
        wsc = None if eq else prm[6]

        if li == 0 and stride0 == 2:
            # First layer, stride 2 (necessarily has a 1x1 stride-2 conv shortcut).
            phases = [[_bn_relu(in_refs[0][0], s1, b1),
                       _bn_relu(in_refs[1][0], s1, b1)],
                      [_bn_relu(in_refs[2][0], s1, b1),
                       _bn_relu(in_refs[3][0], s1, b1)]]
            h = _conv3x3_s2(phases, w1, col_ref, Hc, Wc, Cp)
            a2 = _bn_relu(h, s2, b2)
            out = _conv3x3_s1(a2, w2, pad_ref, col_ref, Hc, Wc, Cp)
            # 1x1 stride-2 shortcut on relu(bn1(x)) == its (0, 0) spatial phase.
            sc = jnp.dot(phases[0][0].reshape(P, Cp).astype(BF16), wsc[...],
                         preferred_element_type=F32)
            x_cur = out + sc
        else:
            x_in = in_refs[0][0].reshape(P, Cp) if li == 0 else x_cur
            a1 = _bn_relu(x_in, s1, b1)
            h = _conv3x3_s1(a1, w1, pad_ref, col_ref, Hc, Wc, Cp)
            a2 = _bn_relu(h, s2, b2)
            out = _conv3x3_s1(a2, w2, pad_ref, col_ref, Hc, Wc, Cp)
            if eq:
                x_cur = out + x_in                      # identity shortcut on raw x
            else:                                       # 1x1 stride-1 conv shortcut
                x_cur = out + jnp.dot(a1.astype(BF16), wsc[...],
                                      preferred_element_type=F32)

    o_ref[0] = x_cur.reshape(Hc, Wc, Cp)


# ---------------------------------------------------------------------------
# parameter packing (channel padding to 128 lanes, BN fold, bf16 weights)
# ---------------------------------------------------------------------------

def _fold_bn(bn, cpad, eps=1e-5):
    scale = bn["gamma"] / jnp.sqrt(bn["var"] + eps)
    bias = bn["beta"] - bn["mean"] * scale
    c = scale.shape[0]
    scale = jnp.pad(scale, (0, cpad - c)).reshape(1, cpad).astype(F32)
    bias = jnp.pad(bias, (0, cpad - c)).reshape(1, cpad).astype(F32)
    return scale, bias


def _conv3x3_to_mat(w_oihw, cpad):
    o, i, _, _ = w_oihw.shape
    w = jnp.transpose(w_oihw, (2, 3, 1, 0))                      # HWIO
    w = jnp.pad(w, ((0, 0), (0, 0), (0, cpad - i), (0, cpad - o)))
    return w.reshape(9 * cpad, cpad).astype(BF16)                # row k*Cp + cin


def _conv1x1_to_mat(w_oihw, cpad):
    o, i = w_oihw.shape[:2]
    w = jnp.transpose(w_oihw[:, :, 0, 0], (1, 0))                # (I, O)
    w = jnp.pad(w, ((0, cpad - i), (0, cpad - o)))
    return w.astype(BF16)


def _prepare_kernel_params(layers, cpad):
    flat, equal_flags = [], []
    for lp in layers:
        s1, b1 = _fold_bn(lp["bn1"], cpad)
        s2, b2 = _fold_bn(lp["bn2"], cpad)
        flat += [s1, b1, _conv3x3_to_mat(lp["conv1"], cpad),
                 s2, b2, _conv3x3_to_mat(lp["conv2"], cpad)]
        if lp["shortcut"] is not None:
            flat.append(_conv1x1_to_mat(lp["shortcut"], cpad))
        equal_flags.append(lp["shortcut"] is None)
    return flat, equal_flags


# ---------------------------------------------------------------------------
# wrapper
# ---------------------------------------------------------------------------

def network_block_apply(x_nchw, layers):
    """Fused NetworkBlock forward (eval semantics).  x_nchw: (N, C, H, W) float32."""
    N, cin, H, W = x_nchw.shape
    stride0 = layers[0]["stride"]
    cout = layers[-1]["conv2"].shape[0]
    assert H % stride0 == 0 and W % stride0 == 0
    Hc, Wc = H // stride0, W // stride0
    assert W % 8 == 0 and Wc % 8 == 0, "spatial dims must be sublane (8) aligned"

    cmax = max([cin] + [l["conv2"].shape[0] for l in layers])
    Cp = max(LANE, _round_up(cmax, LANE))

    # NCHW -> NHWC, channels zero-padded to a full 128-lane vreg width (lane-dense).
    x = jnp.transpose(x_nchw, (0, 2, 3, 1)).astype(F32)
    x = jnp.pad(x, ((0, 0), (0, 0), (0, 0), (0, Cp - cin)))

    flat_params, equal_flags = _prepare_kernel_params(layers, Cp)

    if stride0 == 2:
        assert not equal_flags[0], "a stride-2 first layer needs a conv shortcut"
        # 4 spatial phases (cheap strided slices); bn1/relu commutes with subsampling.
        inputs = [x[:, 0::2, 0::2, :], x[:, 0::2, 1::2, :],
                  x[:, 1::2, 0::2, :], x[:, 1::2, 1::2, :]]
        in_specs = [pl.BlockSpec((1, Hc, Wc, Cp), lambda n: (n, 0, 0, 0))
                    for _ in inputs]
    else:
        inputs = [x]
        in_specs = [pl.BlockSpec((1, H, W, Cp), lambda n: (n, 0, 0, 0))]
    in_specs += [_full_spec(p.shape) for p in flat_params]

    kernel = functools.partial(_network_block_kernel, stride0,
                               tuple(equal_flags), Hc, Wc, Cp)
    out = pl.pallas_call(
        kernel,
        out_shape=jax.ShapeDtypeStruct((N, Hc, Wc, Cp), F32),
        grid=(N,),
        in_specs=in_specs,
        out_specs=pl.BlockSpec((1, Hc, Wc, Cp), lambda n: (n, 0, 0, 0)),
        scratch_shapes=[pltpu.VMEM((Hc + 2, Wc + 2, Cp), F32),   # zero-halo buffer
                        pltpu.VMEM((Hc, Wc, 9 * Cp), F32)],      # im2col tile
        compiler_params=pltpu.CompilerParams(
            dimension_semantics=("parallel",),
            vmem_limit_bytes=VMEM_LIMIT),
    )(*inputs, *flat_params)

    # back to the module's NCHW layout and true channel count
    return jnp.transpose(out[:, :, :, :cout], (0, 3, 1, 2))


# ---------------------------------------------------------------------------
# parameter init (PyTorch-equivalent) and pure-JAX reference
# ---------------------------------------------------------------------------

def _init_bn(key, c):
    k1, k2, k3, k4 = jax.random.split(key, 4)
    # Non-trivial (as-if-trained) running stats to exercise the general BN fold.
    return dict(gamma=1.0 + 0.2 * jax.random.normal(k1, (c,), F32),
                beta=0.1 * jax.random.normal(k2, (c,), F32),
                mean=0.1 * jax.random.normal(k3, (c,), F32),
                var=1.0 + 0.4 * jax.random.uniform(k4, (c,), F32))


def _init_conv(key, k, cin, cout):
    std = math.sqrt(2.0 / (k * k * cout))            # matches nn.Conv2d init in WRN
    return std * jax.random.normal(key, (cout, cin, k, k), F32)


def init_network_block_params(key, nb_layers, in_planes, out_planes, stride):
    layers = []
    for i in range(nb_layers):
        key, k1, k2, k3, k4, k5 = jax.random.split(key, 6)
        cin = in_planes if i == 0 else out_planes
        st = stride if i == 0 else 1
        equal = (cin == out_planes)
        layers.append(dict(
            stride=st,
            bn1=_init_bn(k1, cin),
            conv1=_init_conv(k2, 3, cin, out_planes),
            bn2=_init_bn(k3, out_planes),
            conv2=_init_conv(k4, 3, out_planes, out_planes),
            shortcut=None if equal else _init_conv(k5, 1, cin, out_planes),
        ))
    return layers


def _bn_ref(x, bn, eps=1e-5):
    return (x - bn["mean"]) * (bn["gamma"] / jnp.sqrt(bn["var"] + eps)) + bn["beta"]


def _conv_ref(x_nhwc, w_oihw, stride, pad):
    w = jnp.transpose(w_oihw, (2, 3, 1, 0))
    return lax.conv_general_dilated(x_nhwc, w, (stride, stride), pad,
                                    dimension_numbers=("NHWC", "HWIO", "NHWC"))


def network_block_ref(x_nchw, layers):
    """Pure-JAX replica of the PyTorch NetworkBlock forward (eval, drop_rate=0)."""
    x = jnp.transpose(x_nchw, (0, 2, 3, 1)).astype(F32)
    for lp in layers:
        st, equal = lp["stride"], lp["shortcut"] is None
        act = jax.nn.relu(_bn_ref(x, lp["bn1"]))
        out = jax.nn.relu(_bn_ref(_conv_ref(act, lp["conv1"], st, ((1, 1), (1, 1))),
                                  lp["bn2"]))
        out = _conv_ref(out, lp["conv2"], 1, ((1, 1), (1, 1)))   # dropout: no-op
        skip = x if equal else _conv_ref(act, lp["shortcut"], st, ((0, 0), (0, 0)))
        x = skip + out
    return jnp.transpose(x, (0, 3, 1, 2))


# ---------------------------------------------------------------------------
# main
# ---------------------------------------------------------------------------

if __name__ == "__main__":
    root = jax.random.PRNGKey(0)

    configs = [
        # (nb_layers, in_planes, out_planes, stride, N, H, W)
        (2, 16, 32, 1, 2, 16, 16),   # WRN block1-style: widen on layer 0, stride 1
        (2, 32, 64, 2, 2, 16, 16),   # WRN block2/3-style: downsample on layer 0
    ]
    for ci, (nb, cin, cout, st, N, H, W) in enumerate(configs):
        kp, kx = jax.random.split(jax.random.fold_in(root, ci))
        layers = init_network_block_params(kp, nb, cin, cout, st)
        x = jax.random.normal(kx, (N, cin, H, W), F32)

        out = jax.block_until_ready(network_block_apply(x, layers))
        ref = network_block_ref(x, layers)

        assert out.shape == ref.shape == (N, cout, H // st, W // st)
        assert bool(jnp.all(jnp.isfinite(out)))
        rel_err = float(jnp.linalg.norm(out - ref) /
                        (jnp.linalg.norm(ref) + 1e-12))
        # bf16 MXU operands with f32 accumulation -> ~1e-2 relative error budget.
        assert rel_err < 5e-2, f"config {ci}: relative error {rel_err:.4f}"

    print("KERNEL_OK")
</pallas_src>

<mosaic_0001>
module attributes {stable_mosaic.version = 11 : i64} {
  func.func @_network_block_kernel(%arg0: i32, %arg1: memref<1x16x16x128xf32, #tpu.memory_space<vmem>>, %arg2: memref<1x128xf32, #tpu.memory_space<vmem>>, %arg3: memref<1x128xf32, #tpu.memory_space<vmem>>, %arg4: memref<1152x128xbf16, #tpu.memory_space<vmem>>, %arg5: memref<1x128xf32, #tpu.memory_space<vmem>>, %arg6: memref<1x128xf32, #tpu.memory_space<vmem>>, %arg7: memref<1152x128xbf16, #tpu.memory_space<vmem>>, %arg8: memref<128x128xbf16, #tpu.memory_space<vmem>>, %arg9: memref<1x128xf32, #tpu.memory_space<vmem>>, %arg10: memref<1x128xf32, #tpu.memory_space<vmem>>, %arg11: memref<1152x128xbf16, #tpu.memory_space<vmem>>, %arg12: memref<1x128xf32, #tpu.memory_space<vmem>>, %arg13: memref<1x128xf32, #tpu.memory_space<vmem>>, %arg14: memref<1152x128xbf16, #tpu.memory_space<vmem>>, %arg15: memref<1x16x16x128xf32, #tpu.memory_space<vmem>>, %arg16: memref<18x18x128xf32, #tpu.memory_space<vmem>>, %arg17: memref<16x16x1152xf32, #tpu.memory_space<vmem>>) attributes {dimension_semantics = [#tpu.dimension_semantics<parallel>], iteration_bounds = array<i64: 2>, scalar_prefetch = 0 : i64, scratch_operands = 2 : i64, tpu.core_type = #tpu.core_type<tc>, window_params = [{transform_indices = @transform_0, window_bounds = array<i64: 1, 16, 16, 128>}, {pipeline_mode = #tpu.pipeline_mode<synchronous>, transform_indices = @transform_1, window_bounds = array<i64: 1, 128>}, {pipeline_mode = #tpu.pipeline_mode<synchronous>, transform_indices = @transform_2, window_bounds = array<i64: 1, 128>}, {pipeline_mode = #tpu.pipeline_mode<synchronous>, transform_indices = @transform_3, window_bounds = array<i64: 1152, 128>}, {pipeline_mode = #tpu.pipeline_mode<synchronous>, transform_indices = @transform_4, window_bounds = array<i64: 1, 128>}, {pipeline_mode = #tpu.pipeline_mode<synchronous>, transform_indices = @transform_5, window_bounds = array<i64: 1, 128>}, {pipeline_mode = #tpu.pipeline_mode<synchronous>, transform_indices = @transform_6, window_bounds = array<i64: 1152, 128>}, {pipeline_mode = #tpu.pipeline_mode<synchronous>, transform_indices = @transform_7, window_bounds = array<i64: 128, 128>}, {pipeline_mode = #tpu.pipeline_mode<synchronous>, transform_indices = @transform_8, window_bounds = array<i64: 1, 128>}, {pipeline_mode = #tpu.pipeline_mode<synchronous>, transform_indices = @transform_9, window_bounds = array<i64: 1, 128>}, {pipeline_mode = #tpu.pipeline_mode<synchronous>, transform_indices = @transform_10, window_bounds = array<i64: 1152, 128>}, {pipeline_mode = #tpu.pipeline_mode<synchronous>, transform_indices = @transform_11, window_bounds = array<i64: 1, 128>}, {pipeline_mode = #tpu.pipeline_mode<synchronous>, transform_indices = @transform_12, window_bounds = array<i64: 1, 128>}, {pipeline_mode = #tpu.pipeline_mode<synchronous>, transform_indices = @transform_13, window_bounds = array<i64: 1152, 128>}, {transform_indices = @transform_14, window_bounds = array<i64: 1, 16, 16, 128>}]} {
    %c0_i32 = arith.constant 0 : i32
    %0 = arith.cmpi eq, %arg0, %c0_i32 : i32
    %1 = arith.extui %0 : i1 to i32
    %c0_i32_0 = arith.constant 0 : i32
    %2 = arith.cmpi ne, %1, %c0_i32_0 : i32
    scf.if %2 {
      %cst_272 = arith.constant 0.000000e+00 : f32
      %147 = vector.broadcast %cst_272 : f32 to vector<18x18x128xf32>
      %c0_273 = arith.constant 0 : index
      %c0_274 = arith.constant 0 : index
      %c0_275 = arith.constant 0 : index
      %148 = vector.load %arg16[%c0_273, %c0_274, %c0_275] : memref<18x18x128xf32, #tpu.memory_space<vmem>>, vector<18x18x128xf32>
      tpu.vector_store %arg16[%c0_273, %c0_274, %c0_275], %147 {strides = array<i32>} : memref<18x18x128xf32, #tpu.memory_space<vmem>>, vector<18x18x128xf32>,
    } else {
    }
    %c0 = arith.constant 0 : index
    %c0_1 = arith.constant 0 : index
    %c0_2 = arith.constant 0 : index
    %c0_3 = arith.constant 0 : index
    %3 = vector.load %arg1[%c0, %c0_1, %c0_2, %c0_3] : memref<1x16x16x128xf32, #tpu.memory_space<vmem>>, vector<1x16x16x128xf32>
    %4 = vector.shape_cast %3 : vector<1x16x16x128xf32> to vector<16x16x128xf32>
    %5 = vector.shape_cast %4 : vector<16x16x128xf32> to vector<256x128xf32>
    %c0_4 = arith.constant 0 : index
    %c0_5 = arith.constant 0 : index
    %6 = vector.load %arg2[%c0_4, %c0_5] : memref<1x128xf32, #tpu.memory_space<vmem>>, vector<1x128xf32>
    %7 = vector.broadcast %6 : vector<1x128xf32> to vector<256x128xf32>
    %8 = arith.mulf %5, %7 : vector<256x128xf32>
    %c0_6 = arith.constant 0 : index
    %c0_7 = arith.constant 0 : index
    %9 = vector.load %arg3[%c0_6, %c0_7] : memref<1x128xf32, #tpu.memory_space<vmem>>, vector<1x128xf32>
    %10 = vector.broadcast %9 : vector<1x128xf32> to vector<256x128xf32>
    %11 = arith.addf %8, %10 : vector<256x128xf32>
    %cst = arith.constant 0.000000e+00 : f32
    %12 = vector.broadcast %cst : f32 to vector<256x128xf32>
    %13 = arith.maximumf %11, %12 : vector<256x128xf32>
    %14 = vector.shape_cast %13 : vector<256x128xf32> to vector<16x16x128xf32>
    %c1 = arith.constant 1 : index
    %c1_8 = arith.constant 1 : index
    %c0_9 = arith.constant 0 : index
    %15 = vector.load %arg16[%c1, %c1_8, %c0_9] : memref<18x18x128xf32, #tpu.memory_space<vmem>>, vector<16x16x128xf32>
    tpu.vector_store %arg16[%c1, %c1_8, %c0_9], %14 {strides = array<i32>} : memref<18x18x128xf32, #tpu.memory_space<vmem>>, vector<16x16x128xf32>,
    %c0_10 = arith.constant 0 : index
    %c0_11 = arith.constant 0 : index
    %c0_12 = arith.constant 0 : index
    %16 = vector.load %arg16[%c0_10, %c0_11, %c0_12] : memref<18x18x128xf32, #tpu.memory_space<vmem>>, vector<16x16x128xf32>
    %c0_13 = arith.constant 0 : index
    %c0_14 = arith.constant 0 : index
    %c0_15 = arith.constant 0 : index
    %17 = vector.load %arg17[%c0_13, %c0_14, %c0_15] : memref<16x16x1152xf32, #tpu.memory_space<vmem>>, vector<16x16x128xf32>
    tpu.vector_store %arg17[%c0_13, %c0_14, %c0_15], %16 {strides = array<i32>} : memref<16x16x1152xf32, #tpu.memory_space<vmem>>, vector<16x16x128xf32>,
    %c0_16 = arith.constant 0 : index
    %c1_17 = arith.constant 1 : index
    %c0_18 = arith.constant 0 : index
    %18 = vector.load %arg16[%c0_16, %c1_17, %c0_18] : memref<18x18x128xf32, #tpu.memory_space<vmem>>, vector<16x16x128xf32>
    %c0_19 = arith.constant 0 : index
    %c0_20 = arith.constant 0 : index
    %c128 = arith.constant 128 : index
    %19 = vector.load %arg17[%c0_19, %c0_20, %c128] : memref<16x16x1152xf32, #tpu.memory_space<vmem>>, vector<16x16x128xf32>
    tpu.vector_store %arg17[%c0_19, %c0_20, %c128], %18 {strides = array<i32>} : memref<16x16x1152xf32, #tpu.memory_space<vmem>>, vector<16x16x128xf32>,
    %c0_21 = arith.constant 0 : index
    %c2 = arith.constant 2 : index
    %c0_22 = arith.constant 0 : index
    %20 = vector.load %arg16[%c0_21, %c2, %c0_22] : memref<18x18x128xf32, #tpu.memory_space<vmem>>, vector<16x16x128xf32>
    %c0_23 = arith.constant 0 : index
    %c0_24 = arith.constant 0 : index
    %c256 = arith.constant 256 : index
    %21 = vector.load %arg17[%c0_23, %c0_24, %c256] : memref<16x16x1152xf32, #tpu.memory_space<vmem>>, vector<16x16x128xf32>
    tpu.vector_store %arg17[%c0_23, %c0_24, %c256], %20 {strides = array<i32>} : memref<16x16x1152xf32, #tpu.memory_space<vmem>>, vector<16x16x128xf32>,
    %c1_25 = arith.constant 1 : index
    %c0_26 = arith.constant 0 : index
    %c0_27 = arith.constant 0 : index
    %22 = vector.load %arg16[%c1_25, %c0_26, %c0_27] : memref<18x18x128xf32, #tpu.memory_space<vmem>>, vector<16x16x128xf32>
    %c0_28 = arith.constant 0 : index
    %c0_29 = arith.constant 0 : index
    %c384 = arith.constant 384 : index
    %23 = vector.load %arg17[%c0_28, %c0_29, %c384] : memref<16x16x1152xf32, #tpu.memory_space<vmem>>, vector<16x16x128xf32>
    tpu.vector_store %arg17[%c0_28, %c0_29, %c384], %22 {strides = array<i32>} : memref<16x16x1152xf32, #tpu.memory_space<vmem>>, vector<16x16x128xf32>,
    %c1_30 = arith.constant 1 : index
    %c1_31 = arith.constant 1 : index
    %c0_32 = arith.constant 0 : index
    %24 = vector.load %arg16[%c1_30, %c1_31, %c0_32] : memref<18x18x128xf32, #tpu.memory_space<vmem>>, vector<16x16x128xf32>
    %c0_33 = arith.constant 0 : index
    %c0_34 = arith.constant 0 : index
    %c512 = arith.constant 512 : index
    %25 = vector.load %arg17[%c0_33, %c0_34, %c512] : memref<16x16x1152xf32, #tpu.memory_space<vmem>>, vector<16x16x128xf32>
    tpu.vector_store %arg17[%c0_33, %c0_34, %c512], %24 {strides = array<i32>} : memref<16x16x1152xf32, #tpu.memory_space<vmem>>, vector<16x16x128xf32>,
    %c1_35 = arith.constant 1 : index
    %c2_36 = arith.constant 2 : index
    %c0_37 = arith.constant 0 : index
    %26 = vector.load %arg16[%c1_35, %c2_36, %c0_37] : memref<18x18x128xf32, #tpu.memory_space<vmem>>, vector<16x16x128xf32>
    %c0_38 = arith.constant 0 : index
    %c0_39 = arith.constant 0 : index
    %c640 = arith.constant 640 : index
    %27 = vector.load %arg17[%c0_38, %c0_39, %c640] : memref<16x16x1152xf32, #tpu.memory_space<vmem>>, vector<16x16x128xf32>
    tpu.vector_store %arg17[%c0_38, %c0_39, %c640], %26 {strides = array<i32>} : memref<16x16x1152xf32, #tpu.memory_space<vmem>>, vector<16x16x128xf32>,
    %c2_40 = arith.constant 2 : index
    %c0_41 = arith.constant 0 : index
    %c0_42 = arith.constant 0 : index
    %28 = vector.load %arg16[%c2_40, %c0_41, %c0_42] : memref<18x18x128xf32, #tpu.memory_space<vmem>>, vector<16x16x128xf32>
    %c0_43 = arith.constant 0 : index
    %c0_44 = arith.constant 0 : index
    %c768 = arith.constant 768 : index
    %29 = vector.load %arg17[%c0_43, %c0_44, %c768] : memref<16x16x1152xf32, #tpu.memory_space<vmem>>, vector<16x16x128xf32>
    tpu.vector_store %arg17[%c0_43, %c0_44, %c768], %28 {strides = array<i32>} : memref<16x16x1152xf32, #tpu.memory_space<vmem>>, vector<16x16x128xf32>,
    %c2_45 = arith.constant 2 : index
    %c1_46 = arith.constant 1 : index
    %c0_47 = arith.constant 0 : index
    %30 = vector.load %arg16[%c2_45, %c1_46, %c0_47] : memref<18x18x128xf32, #tpu.memory_space<vmem>>, vector<16x16x128xf32>
    %c0_48 = arith.constant 0 : index
    %c0_49 = arith.constant 0 : index
    %c896 = arith.constant 896 : index
    %31 = vector.load %arg17[%c0_48, %c0_49, %c896] : memref<16x16x1152xf32, #tpu.memory_space<vmem>>, vector<16x16x128xf32>
    tpu.vector_store %arg17[%c0_48, %c0_49, %c896], %30 {strides = array<i32>} : memref<16x16x1152xf32, #tpu.memory_space<vmem>>, vector<16x16x128xf32>,
    %c2_50 = arith.constant 2 : index
    %c2_51 = arith.constant 2 : index
    %c0_52 = arith.constant 0 : index
    %32 = vector.load %arg16[%c2_50, %c2_51, %c0_52] : memref<18x18x128xf32, #tpu.memory_space<vmem>>, vector<16x16x128xf32>
    %c0_53 = arith.constant 0 : index
    %c0_54 = arith.constant 0 : index
    %c1024 = arith.constant 1024 : index
    %33 = vector.load %arg17[%c0_53, %c0_54, %c1024] : memref<16x16x1152xf32, #tpu.memory_space<vmem>>, vector<16x16x128xf32>
    tpu.vector_store %arg17[%c0_53, %c0_54, %c1024], %32 {strides = array<i32>} : memref<16x16x1152xf32, #tpu.memory_space<vmem>>, vector<16x16x128xf32>,
    %c0_55 = arith.constant 0 : index
    %c0_56 = arith.constant 0 : index
    %c0_57 = arith.constant 0 : index
    %34 = vector.load %arg17[%c0_55, %c0_56, %c0_57] : memref<16x16x1152xf32, #tpu.memory_space<vmem>>, vector<16x16x1152xf32>
    %35 = vector.shape_cast %34 : vector<16x16x1152xf32> to vector<256x1152xf32>
    %36 = arith.truncf %35 : vector<256x1152xf32> to vector<256x1152xbf16>
    %c0_58 = arith.constant 0 : index
    %c0_59 = arith.constant 0 : index
    %37 = vector.load %arg4[%c0_58, %c0_59] : memref<1152x128xbf16, #tpu.memory_space<vmem>>, vector<1152x128xbf16>
    %cst_60 = arith.constant dense<0.000000e+00> : vector<256x128xf32>
    %38 = tpu.matmul %36, %37, %cst_60 {dimension_numbers = #tpu.dot_dimension_numbers<[1], [0], [0], [1], [0, 0, 1, 1], [], []>} : vector<256x1152xbf16>, vector<1152x128xbf16>, vector<256x128xf32> -> vector<256x128xf32>
    %c0_61 = arith.constant 0 : index
    %c0_62 = arith.constant 0 : index
    %39 = vector.load %arg5[%c0_61, %c0_62] : memref<1x128xf32, #tpu.memory_space<vmem>>, vector<1x128xf32>
    %40 = vector.broadcast %39 : vector<1x128xf32> to vector<256x128xf32>
    %41 = arith.mulf %38, %40 : vector<256x128xf32>
    %c0_63 = arith.constant 0 : index
    %c0_64 = arith.constant 0 : index
    %42 = vector.load %arg6[%c0_63, %c0_64] : memref<1x128xf32, #tpu.memory_space<vmem>>, vector<1x128xf32>
    %43 = vector.broadcast %42 : vector<1x128xf32> to vector<256x128xf32>
    %44 = arith.addf %41, %43 : vector<256x128xf32>
    %cst_65 = arith.constant 0.000000e+00 : f32
    %45 = vector.broadcast %cst_65 : f32 to vector<256x128xf32>
    %46 = arith.maximumf %44, %45 : vector<256x128xf32>
    %47 = vector.shape_cast %46 : vector<256x128xf32> to vector<16x16x128xf32>
    %c1_66 = arith.constant 1 : index
    %c1_67 = arith.constant 1 : index
    %c0_68 = arith.constant 0 : index
    %48 = vector.load %arg16[%c1_66, %c1_67, %c0_68] : memref<18x18x128xf32, #tpu.memory_space<vmem>>, vector<16x16x128xf32>
    tpu.vector_store %arg16[%c1_66, %c1_67, %c0_68], %47 {strides = array<i32>} : memref<18x18x128xf32, #tpu.memory_space<vmem>>, vector<16x16x128xf32>,
    %c0_69 = arith.constant 0 : index
    %c0_70 = arith.constant 0 : index
    %c0_71 = arith.constant 0 : index
    %49 = vector.load %arg16[%c0_69, %c0_70, %c0_71] : memref<18x18x128xf32, #tpu.memory_space<vmem>>, vector<16x16x128xf32>
    %c0_72 = arith.constant 0 : index
    %c0_73 = arith.constant 0 : index
    %c0_74 = arith.constant 0 : index
    %50 = vector.load %arg17[%c0_72, %c0_73, %c0_74] : memref<16x16x1152xf32, #tpu.memory_space<vmem>>, vector<16x16x128xf32>
    tpu.vector_store %arg17[%c0_72, %c0_73, %c0_74], %49 {strides = array<i32>} : memref<16x16x1152xf32, #tpu.memory_space<vmem>>, vector<16x16x128xf32>,
    %c0_75 = arith.constant 0 : index
    %c1_76 = arith.constant 1 : index
    %c0_77 = arith.constant 0 : index
    %51 = vector.load %arg16[%c0_75, %c1_76, %c0_77] : memref<18x18x128xf32, #tpu.memory_space<vmem>>, vector<16x16x128xf32>
    %c0_78 = arith.constant 0 : index
    %c0_79 = arith.constant 0 : index
    %c128_80 = arith.constant 128 : index
    %52 = vector.load %arg17[%c0_78, %c0_79, %c128_80] : memref<16x16x1152xf32, #tpu.memory_space<vmem>>, vector<16x16x128xf32>
    tpu.vector_store %arg17[%c0_78, %c0_79, %c128_80], %51 {strides = array<i32>} : memref<16x16x1152xf32, #tpu.memory_space<vmem>>, vector<16x16x128xf32>,
    %c0_81 = arith.constant 0 : index
    %c2_82 = arith.constant 2 : index
    %c0_83 = arith.constant 0 : index
    %53 = vector.load %arg16[%c0_81, %c2_82, %c0_83] : memref<18x18x128xf32, #tpu.memory_space<vmem>>, vector<16x16x128xf32>
    %c0_84 = arith.constant 0 : index
    %c0_85 = arith.constant 0 : index
    %c256_86 = arith.constant 256 : index
    %54 = vector.load %arg17[%c0_84, %c0_85, %c256_86] : memref<16x16x1152xf32, #tpu.memory_space<vmem>>, vector<16x16x128xf32>
    tpu.vector_store %arg17[%c0_84, %c0_85, %c256_86], %53 {strides = array<i32>} : memref<16x16x1152xf32, #tpu.memory_space<vmem>>, vector<16x16x128xf32>,
    %c1_87 = arith.constant 1 : index
    %c0_88 = arith.constant 0 : index
    %c0_89 = arith.constant 0 : index
    %55 = vector.load %arg16[%c1_87, %c0_88, %c0_89] : memref<18x18x128xf32, #tpu.memory_space<vmem>>, vector<16x16x128xf32>
    %c0_90 = arith.constant 0 : index
    %c0_91 = arith.constant 0 : index
    %c384_92 = arith.constant 384 : index
    %56 = vector.load %arg17[%c0_90, %c0_91, %c384_92] : memref<16x16x1152xf32, #tpu.memory_space<vmem>>, vector<16x16x128xf32>
    tpu.vector_store %arg17[%c0_90, %c0_91, %c384_92], %55 {strides = array<i32>} : memref<16x16x1152xf32, #tpu.memory_space<vmem>>, vector<16x16x128xf32>,
    %c1_93 = arith.constant 1 : index
    %c1_94 = arith.constant 1 : index
    %c0_95 = arith.constant 0 : index
    %57 = vector.load %arg16[%c1_93, %c1_94, %c0_95] : memref<18x18x128xf32, #tpu.memory_space<vmem>>, vector<16x16x128xf32>
    %c0_96 = arith.constant 0 : index
    %c0_97 = arith.constant 0 : index
    %c512_98 = arith.constant 512 : index
    %58 = vector.load %arg17[%c0_96, %c0_97, %c512_98] : memref<16x16x1152xf32, #tpu.memory_space<vmem>>, vector<16x16x128xf32>
    tpu.vector_store %arg17[%c0_96, %c0_97, %c512_98], %57 {strides = array<i32>} : memref<16x16x1152xf32, #tpu.memory_space<vmem>>, vector<16x16x128xf32>,
    %c1_99 = arith.constant 1 : index
    %c2_100 = arith.constant 2 : index
    %c0_101 = arith.constant 0 : index
    %59 = vector.load %arg16[%c1_99, %c2_100, %c0_101] : memref<18x18x128xf32, #tpu.memory_space<vmem>>, vector<16x16x128xf32>
    %c0_102 = arith.constant 0 : index
    %c0_103 = arith.constant 0 : index
    %c640_104 = arith.constant 640 : index
    %60 = vector.load %arg17[%c0_102, %c0_103, %c640_104] : memref<16x16x1152xf32, #tpu.memory_space<vmem>>, vector<16x16x128xf32>
    tpu.vector_store %arg17[%c0_102, %c0_103, %c640_104], %59 {strides = array<i32>} : memref<16x16x1152xf32, #tpu.memory_space<vmem>>, vector<16x16x128xf32>,
    %c2_105 = arith.constant 2 : index
    %c0_106 = arith.constant 0 : index
    %c0_107 = arith.constant 0 : index
    %61 = vector.load %arg16[%c2_105, %c0_106, %c0_107] : memref<18x18x128xf32, #tpu.memory_space<vmem>>, vector<16x16x128xf32>
    %c0_108 = arith.constant 0 : index
    %c0_109 = arith.constant 0 : index
    %c768_110 = arith.constant 768 : index
    %62 = vector.load %arg17[%c0_108, %c0_109, %c768_110] : memref<16x16x1152xf32, #tpu.memory_space<vmem>>, vector<16x16x128xf32>
    tpu.vector_store %arg17[%c0_108, %c0_109, %c768_110], %61 {strides = array<i32>} : memref<16x16x1152xf32, #tpu.memory_space<vmem>>, vector<16x16x128xf32>,
    %c2_111 = arith.constant 2 : index
    %c1_112 = arith.constant 1 : index
    %c0_113 = arith.constant 0 : index
    %63 = vector.load %arg16[%c2_111, %c1_112, %c0_113] : memref<18x18x128xf32, #tpu.memory_space<vmem>>, vector<16x16x128xf32>
    %c0_114 = arith.constant 0 : index
    %c0_115 = arith.constant 0 : index
    %c896_116 = arith.constant 896 : index
    %64 = vector.load %arg17[%c0_114, %c0_115, %c896_116] : memref<16x16x1152xf32, #tpu.memory_space<vmem>>, vector<16x16x128xf32>
    tpu.vector_store %arg17[%c0_114, %c0_115, %c896_116], %63 {strides = array<i32>} : memref<16x16x1152xf32, #tpu.memory_space<vmem>>, vector<16x16x128xf32>,
    %c2_117 = arith.constant 2 : index
    %c2_118 = arith.constant 2 : index
    %c0_119 = arith.constant 0 : index
    %65 = vector.load %arg16[%c2_117, %c2_118, %c0_119] : memref<18x18x128xf32, #tpu.memory_space<vmem>>, vector<16x16x128xf32>
    %c0_120 = arith.constant 0 : index
    %c0_121 = arith.constant 0 : index
    %c1024_122 = arith.constant 1024 : index
    %66 = vector.load %arg17[%c0_120, %c0_121, %c1024_122] : memref<16x16x1152xf32, #tpu.memory_space<vmem>>, vector<16x16x128xf32>
    tpu.vector_store %arg17[%c0_120, %c0_121, %c1024_122], %65 {strides = array<i32>} : memref<16x16x1152xf32, #tpu.memory_space<vmem>>, vector<16x16x128xf32>,
    %c0_123 = arith.constant 0 : index
    %c0_124 = arith.constant 0 : index
    %c0_125 = arith.constant 0 : index
    %67 = vector.load %arg17[%c0_123, %c0_124, %c0_125] : memref<16x16x1152xf32, #tpu.memory_space<vmem>>, vector<16x16x1152xf32>
    %68 = vector.shape_cast %67 : vector<16x16x1152xf32> to vector<256x1152xf32>
    %69 = arith.truncf %68 : vector<256x1152xf32> to vector<256x1152xbf16>
    %c0_126 = arith.constant 0 : index
    %c0_127 = arith.constant 0 : index
    %70 = vector.load %arg7[%c0_126, %c0_127] : memref<1152x128xbf16, #tpu.memory_space<vmem>>, vector<1152x128xbf16>
    %cst_128 = arith.constant dense<0.000000e+00> : vector<256x128xf32>
    %71 = tpu.matmul %69, %70, %cst_128 {dimension_numbers = #tpu.dot_dimension_numbers<[1], [0], [0], [1], [0, 0, 1, 1], [], []>} : vector<256x1152xbf16>, vector<1152x128xbf16>, vector<256x128xf32> -> vector<256x128xf32>
    %72 = arith.truncf %13 : vector<256x128xf32> to vector<256x128xbf16>
    %c0_129 = arith.constant 0 : index
    %c0_130 = arith.constant 0 : index
    %73 = vector.load %arg8[%c0_129, %c0_130] : memref<128x128xbf16, #tpu.memory_space<vmem>>, vector<128x128xbf16>
    %cst_131 = arith.constant dense<0.000000e+00> : vector<256x128xf32>
    %74 = tpu.matmul %72, %73, %cst_131 {dimension_numbers = #tpu.dot_dimension_numbers<[1], [0], [0], [1], [0, 0, 1, 1], [], []>} : vector<256x128xbf16>, vector<128x128xbf16>, vector<256x128xf32> -> vector<256x128xf32>
    %75 = arith.addf %71, %74 : vector<256x128xf32>
    %c0_132 = arith.constant 0 : index
    %c0_133 = arith.constant 0 : index
    %76 = vector.load %arg9[%c0_132, %c0_133] : memref<1x128xf32, #tpu.memory_space<vmem>>, vector<1x128xf32>
    %77 = vector.broadcast %76 : vector<1x128xf32> to vector<256x128xf32>
    %78 = arith.mulf %75, %77 : vector<256x128xf32>
    %c0_134 = arith.constant 0 : index
    %c0_135 = arith.constant 0 : index
    %79 = vector.load %arg10[%c0_134, %c0_135] : memref<1x128xf32, #tpu.memory_space<vmem>>, vector<1x128xf32>
    %80 = vector.broadcast %79 : vector<1x128xf32> to vector<256x128xf32>
    %81 = arith.addf %78, %80 : vector<256x128xf32>
    %cst_136 = arith.constant 0.000000e+00 : f32
    %82 = vector.broadcast %cst_136 : f32 to vector<256x128xf32>
    %83 = arith.maximumf %81, %82 : vector<256x128xf32>
    %84 = vector.shape_cast %83 : vector<256x128xf32> to vector<16x16x128xf32>
    %c1_137 = arith.constant 1 : index
    %c1_138 = arith.constant 1 : index
    %c0_139 = arith.constant 0 : index
    %85 = vector.load %arg16[%c1_137, %c1_138, %c0_139] : memref<18x18x128xf32, #tpu.memory_space<vmem>>, vector<16x16x128xf32>
    tpu.vector_store %arg16[%c1_137, %c1_138, %c0_139], %84 {strides = array<i32>} : memref<18x18x128xf32, #tpu.memory_space<vmem>>, vector<16x16x128xf32>,
    %c0_140 = arith.constant 0 : index
    %c0_141 = arith.constant 0 : index
    %c0_142 = arith.constant 0 : index
    %86 = vector.load %arg16[%c0_140, %c0_141, %c0_142] : memref<18x18x128xf32, #tpu.memory_space<vmem>>, vector<16x16x128xf32>
    %c0_143 = arith.constant 0 : index
    %c0_144 = arith.constant 0 : index
    %c0_145 = arith.constant 0 : index
    %87 = vector.load %arg17[%c0_143, %c0_144, %c0_145] : memref<16x16x1152xf32, #tpu.memory_space<vmem>>, vector<16x16x128xf32>
    tpu.vector_store %arg17[%c0_143, %c0_144, %c0_145], %86 {strides = array<i32>} : memref<16x16x1152xf32, #tpu.memory_space<vmem>>, vector<16x16x128xf32>,
    %c0_146 = arith.constant 0 : index
    %c1_147 = arith.constant 1 : index
    %c0_148 = arith.constant 0 : index
    %88 = vector.load %arg16[%c0_146, %c1_147, %c0_148] : memref<18x18x128xf32, #tpu.memory_space<vmem>>, vector<16x16x128xf32>
    %c0_149 = arith.constant 0 : index
    %c0_150 = arith.constant 0 : index
    %c128_151 = arith.constant 128 : index
    %89 = vector.load %arg17[%c0_149, %c0_150, %c128_151] : memref<16x16x1152xf32, #tpu.memory_space<vmem>>, vector<16x16x128xf32>
    tpu.vector_store %arg17[%c0_149, %c0_150, %c128_151], %88 {strides = array<i32>} : memref<16x16x1152xf32, #tpu.memory_space<vmem>>, vector<16x16x128xf32>,
    %c0_152 = arith.constant 0 : index
    %c2_153 = arith.constant 2 : index
    %c0_154 = arith.constant 0 : index
    %90 = vector.load %arg16[%c0_152, %c2_153, %c0_154] : memref<18x18x128xf32, #tpu.memory_space<vmem>>, vector<16x16x128xf32>
    %c0_155 = arith.constant 0 : index
    %c0_156 = arith.constant 0 : index
    %c256_157 = arith.constant 256 : index
    %91 = vector.load %arg17[%c0_155, %c0_156, %c256_157] : memref<16x16x1152xf32, #tpu.memory_space<vmem>>, vector<16x16x128xf32>
    tpu.vector_store %arg17[%c0_155, %c0_156, %c256_157], %90 {strides = array<i32>} : memref<16x16x1152xf32, #tpu.memory_space<vmem>>, vector<16x16x128xf32>,
    %c1_158 = arith.constant 1 : index
    %c0_159 = arith.constant 0 : index
    %c0_160 = arith.constant 0 : index
    %92 = vector.load %arg16[%c1_158, %c0_159, %c0_160] : memref<18x18x128xf32, #tpu.memory_space<vmem>>, vector<16x16x128xf32>
    %c0_161 = arith.constant 0 : index
    %c0_162 = arith.constant 0 : index
    %c384_163 = arith.constant 384 : index
    %93 = vector.load %arg17[%c0_161, %c0_162, %c384_163] : memref<16x16x1152xf32, #tpu.memory_space<vmem>>, vector<16x16x128xf32>
    tpu.vector_store %arg17[%c0_161, %c0_162, %c384_163], %92 {strides = array<i32>} : memref<16x16x1152xf32, #tpu.memory_space<vmem>>, vector<16x16x128xf32>,
    %c1_164 = arith.constant 1 : index
    %c1_165 = arith.constant 1 : index
    %c0_166 = arith.constant 0 : index
    %94 = vector.load %arg16[%c1_164, %c1_165, %c0_166] : memref<18x18x128xf32, #tpu.memory_space<vmem>>, vector<16x16x128xf32>
    %c0_167 = arith.constant 0 : index
    %c0_168 = arith.constant 0 : index
    %c512_169 = arith.constant 512 : index
    %95 = vector.load %arg17[%c0_167, %c0_168, %c512_169] : memref<16x16x1152xf32, #tpu.memory_space<vmem>>, vector<16x16x128xf32>
    tpu.vector_store %arg17[%c0_167, %c0_168, %c512_169], %94 {strides = array<i32>} : memref<16x16x1152xf32, #tpu.memory_space<vmem>>, vector<16x16x128xf32>,
    %c1_170 = arith.constant 1 : index
    %c2_171 = arith.constant 2 : index
    %c0_172 = arith.constant 0 : index
    %96 = vector.load %arg16[%c1_170, %c2_171, %c0_172] : memref<18x18x128xf32, #tpu.memory_space<vmem>>, vector<16x16x128xf32>
    %c0_173 = arith.constant 0 : index
    %c0_174 = arith.constant 0 : index
    %c640_175 = arith.constant 640 : index
    %97 = vector.load %arg17[%c0_173, %c0_174, %c640_175] : memref<16x16x1152xf32, #tpu.memory_space<vmem>>, vector<16x16x128xf32>
    tpu.vector_store %arg17[%c0_173, %c0_174, %c640_175], %96 {strides = array<i32>} : memref<16x16x1152xf32, #tpu.memory_space<vmem>>, vector<16x16x128xf32>,
    %c2_176 = arith.constant 2 : index
    %c0_177 = arith.constant 0 : index
    %c0_178 = arith.constant 0 : index
    %98 = vector.load %arg16[%c2_176, %c0_177, %c0_178] : memref<18x18x128xf32, #tpu.memory_space<vmem>>, vector<16x16x128xf32>
    %c0_179 = arith.constant 0 : index
    %c0_180 = arith.constant 0 : index
    %c768_181 = arith.constant 768 : index
    %99 = vector.load %arg17[%c0_179, %c0_180, %c768_181] : memref<16x16x1152xf32, #tpu.memory_space<vmem>>, vector<16x16x128xf32>
    tpu.vector_store %arg17[%c0_179, %c0_180, %c768_181], %98 {strides = array<i32>} : memref<16x16x1152xf32, #tpu.memory_space<vmem>>, vector<16x16x128xf32>,
    %c2_182 = arith.constant 2 : index
    %c1_183 = arith.constant 1 : index
    %c0_184 = arith.constant 0 : index
    %100 = vector.load %arg16[%c2_182, %c1_183, %c0_184] : memref<18x18x128xf32, #tpu.memory_space<vmem>>, vector<16x16x128xf32>
    %c0_185 = arith.constant 0 : index
    %c0_186 = arith.constant 0 : index
    %c896_187 = arith.constant 896 : index
    %101 = vector.load %arg17[%c0_185, %c0_186, %c896_187] : memref<16x16x1152xf32, #tpu.memory_space<vmem>>, vector<16x16x128xf32>
    tpu.vector_store %arg17[%c0_185, %c0_186, %c896_187], %100 {strides = array<i32>} : memref<16x16x1152xf32, #tpu.memory_space<vmem>>, vector<16x16x128xf32>,
    %c2_188 = arith.constant 2 : index
    %c2_189 = arith.constant 2 : index
    %c0_190 = arith.constant 0 : index
    %102 = vector.load %arg16[%c2_188, %c2_189, %c0_190] : memref<18x18x128xf32, #tpu.memory_space<vmem>>, vector<16x16x128xf32>
    %c0_191 = arith.constant 0 : index
    %c0_192 = arith.constant 0 : index
    %c1024_193 = arith.constant 1024 : index
    %103 = vector.load %arg17[%c0_191, %c0_192, %c1024_193] : memref<16x16x1152xf32, #tpu.memory_space<vmem>>, vector<16x16x128xf32>
    tpu.vector_store %arg17[%c0_191, %c0_192, %c1024_193], %102 {strides = array<i32>} : memref<16x16x1152xf32, #tpu.memory_space<vmem>>, vector<16x16x128xf32>,
    %c0_194 = arith.constant 0 : index
    %c0_195 = arith.constant 0 : index
    %c0_196 = arith.constant 0 : index
    %104 = vector.load %arg17[%c0_194, %c0_195, %c0_196] : memref<16x16x1152xf32, #tpu.memory_space<vmem>>, vector<16x16x1152xf32>
    %105 = vector.shape_cast %104 : vector<16x16x1152xf32> to vector<256x1152xf32>
    %106 = arith.truncf %105 : vector<256x1152xf32> to vector<256x1152xbf16>
    %c0_197 = arith.constant 0 : index
    %c0_198 = arith.constant 0 : index
    %107 = vector.load %arg11[%c0_197, %c0_198] : memref<1152x128xbf16, #tpu.memory_space<vmem>>, vector<1152x128xbf16>
    %cst_199 = arith.constant dense<0.000000e+00> : vector<256x128xf32>
    %108 = tpu.matmul %106, %107, %cst_199 {dimension_numbers = #tpu.dot_dimension_numbers<[1], [0], [0], [1], [0, 0, 1, 1], [], []>} : vector<256x1152xbf16>, vector<1152x128xbf16>, vector<256x128xf32> -> vector<256x128xf32>
    %c0_200 = arith.constant 0 : index
    %c0_201 = arith.constant 0 : index
    %109 = vector.load %arg12[%c0_200, %c0_201] : memref<1x128xf32, #tpu.memory_space<vmem>>, vector<1x128xf32>
    %110 = vector.broadcast %109 : vector<1x128xf32> to vector<256x128xf32>
    %111 = arith.mulf %108, %110 : vector<256x128xf32>
    %c0_202 = arith.constant 0 : index
    %c0_203 = arith.constant 0 : index
    %112 = vector.load %arg13[%c0_202, %c0_203] : memref<1x128xf32, #tpu.memory_space<vmem>>, vector<1x128xf32>
    %113 = vector.broadcast %112 : vector<1x128xf32> to vector<256x128xf32>
    %114 = arith.addf %111, %113 : vector<256x128xf32>
    %cst_204 = arith.constant 0.000000e+00 : f32
    %115 = vector.broadcast %cst_204 : f32 to vector<256x128xf32>
    %116 = arith.maximumf %114, %115 : vector<256x128xf32>
    %117 = vector.shape_cast %116 : vector<256x128xf32> to vector<16x16x128xf32>
    %c1_205 = arith.constant 1 : index
    %c1_206 = arith.constant 1 : index
    %c0_207 = arith.constant 0 : index
    %118 = vector.load %arg16[%c1_205, %c1_206, %c0_207] : memref<18x18x128xf32, #tpu.memory_space<vmem>>, vector<16x16x128xf32>
    tpu.vector_store %arg16[%c1_205, %c1_206, %c0_207], %117 {strides = array<i32>} : memref<18x18x128xf32, #tpu.memory_space<vmem>>, vector<16x16x128xf32>,
    %c0_208 = arith.constant 0 : index
    %c0_209 = arith.constant 0 : index
    %c0_210 = arith.constant 0 : index
    %119 = vector.load %arg16[%c0_208, %c0_209, %c0_210] : memref<18x18x128xf32, #tpu.memory_space<vmem>>, vector<16x16x128xf32>
    %c0_211 = arith.constant 0 : index
    %c0_212 = arith.constant 0 : index
    %c0_213 = arith.constant 0 : index
    %120 = vector.load %arg17[%c0_211, %c0_212, %c0_213] : memref<16x16x1152xf32, #tpu.memory_space<vmem>>, vector<16x16x128xf32>
    tpu.vector_store %arg17[%c0_211, %c0_212, %c0_213], %119 {strides = array<i32>} : memref<16x16x1152xf32, #tpu.memory_space<vmem>>, vector<16x16x128xf32>,
    %c0_214 = arith.constant 0 : index
    %c1_215 = arith.constant 1 : index
    %c0_216 = arith.constant 0 : index
    %121 = vector.load %arg16[%c0_214, %c1_215, %c0_216] : memref<18x18x128xf32, #tpu.memory_space<vmem>>, vector<16x16x128xf32>
    %c0_217 = arith.constant 0 : index
    %c0_218 = arith.constant 0 : index
    %c128_219 = arith.constant 128 : index
    %122 = vector.load %arg17[%c0_217, %c0_218, %c128_219] : memref<16x16x1152xf32, #tpu.memory_space<vmem>>, vector<16x16x128xf32>
    tpu.vector_store %arg17[%c0_217, %c0_218, %c128_219], %121 {strides = array<i32>} : memref<16x16x1152xf32, #tpu.memory_space<vmem>>, vector<16x16x128xf32>,
    %c0_220 = arith.constant 0 : index
    %c2_221 = arith.constant 2 : index
    %c0_222 = arith.constant 0 : index
    %123 = vector.load %arg16[%c0_220, %c2_221, %c0_222] : memref<18x18x128xf32, #tpu.memory_space<vmem>>, vector<16x16x128xf32>
    %c0_223 = arith.constant 0 : index
    %c0_224 = arith.constant 0 : index
    %c256_225 = arith.constant 256 : index
    %124 = vector.load %arg17[%c0_223, %c0_224, %c256_225] : memref<16x16x1152xf32, #tpu.memory_space<vmem>>, vector<16x16x128xf32>
    tpu.vector_store %arg17[%c0_223, %c0_224, %c256_225], %123 {strides = array<i32>} : memref<16x16x1152xf32, #tpu.memory_space<vmem>>, vector<16x16x128xf32>,
    %c1_226 = arith.constant 1 : index
    %c0_227 = arith.constant 0 : index
    %c0_228 = arith.constant 0 : index
    %125 = vector.load %arg16[%c1_226, %c0_227, %c0_228] : memref<18x18x128xf32, #tpu.memory_space<vmem>>, vector<16x16x128xf32>
    %c0_229 = arith.constant 0 : index
    %c0_230 = arith.constant 0 : index
    %c384_231 = arith.constant 384 : index
    %126 = vector.load %arg17[%c0_229, %c0_230, %c384_231] : memref<16x16x1152xf32, #tpu.memory_space<vmem>>, vector<16x16x128xf32>
    tpu.vector_store %arg17[%c0_229, %c0_230, %c384_231], %125 {strides = array<i32>} : memref<16x16x1152xf32, #tpu.memory_space<vmem>>, vector<16x16x128xf32>,
    %c1_232 = arith.constant 1 : index
    %c1_233 = arith.constant 1 : index
    %c0_234 = arith.constant 0 : index
    %127 = vector.load %arg16[%c1_232, %c1_233, %c0_234] : memref<18x18x128xf32, #tpu.memory_space<vmem>>, vector<16x16x128xf32>
    %c0_235 = arith.constant 0 : index
    %c0_236 = arith.constant 0 : index
    %c512_237 = arith.constant 512 : index
    %128 = vector.load %arg17[%c0_235, %c0_236, %c512_237] : memref<16x16x1152xf32, #tpu.memory_space<vmem>>, vector<16x16x128xf32>
    tpu.vector_store %arg17[%c0_235, %c0_236, %c512_237], %127 {strides = array<i32>} : memref<16x16x1152xf32, #tpu.memory_space<vmem>>, vector<16x16x128xf32>,
    %c1_238 = arith.constant 1 : index
    %c2_239 = arith.constant 2 : index
    %c0_240 = arith.constant 0 : index
    %129 = vector.load %arg16[%c1_238, %c2_239, %c0_240] : memref<18x18x128xf32, #tpu.memory_space<vmem>>, vector<16x16x128xf32>
    %c0_241 = arith.constant 0 : index
    %c0_242 = arith.constant 0 : index
    %c640_243 = arith.constant 640 : index
    %130 = vector.load %arg17[%c0_241, %c0_242, %c640_243] : memref<16x16x1152xf32, #tpu.memory_space<vmem>>, vector<16x16x128xf32>
    tpu.vector_store %arg17[%c0_241, %c0_242, %c640_243], %129 {strides = array<i32>} : memref<16x16x1152xf32, #tpu.memory_space<vmem>>, vector<16x16x128xf32>,
    %c2_244 = arith.constant 2 : index
    %c0_245 = arith.constant 0 : index
    %c0_246 = arith.constant 0 : index
    %131 = vector.load %arg16[%c2_244, %c0_245, %c0_246] : memref<18x18x128xf32, #tpu.memory_space<vmem>>, vector<16x16x128xf32>
    %c0_247 = arith.constant 0 : index
    %c0_248 = arith.constant 0 : index
    %c768_249 = arith.constant 768 : index
    %132 = vector.load %arg17[%c0_247, %c0_248, %c768_249] : memref<16x16x1152xf32, #tpu.memory_space<vmem>>, vector<16x16x128xf32>
    tpu.vector_store %arg17[%c0_247, %c0_248, %c768_249], %131 {strides = array<i32>} : memref<16x16x1152xf32, #tpu.memory_space<vmem>>, vector<16x16x128xf32>,
    %c2_250 = arith.constant 2 : index
    %c1_251 = arith.constant 1 : index
    %c0_252 = arith.constant 0 : index
    %133 = vector.load %arg16[%c2_250, %c1_251, %c0_252] : memref<18x18x128xf32, #tpu.memory_space<vmem>>, vector<16x16x128xf32>
    %c0_253 = arith.constant 0 : index
    %c0_254 = arith.constant 0 : index
    %c896_255 = arith.constant 896 : index
    %134 = vector.load %arg17[%c0_253, %c0_254, %c896_255] : memref<16x16x1152xf32, #tpu.memory_space<vmem>>, vector<16x16x128xf32>
    tpu.vector_store %arg17[%c0_253, %c0_254, %c896_255], %133 {strides = array<i32>} : memref<16x16x1152xf32, #tpu.memory_space<vmem>>, vector<16x16x128xf32>,
    %c2_256 = arith.constant 2 : index
    %c2_257 = arith.constant 2 : index
    %c0_258 = arith.constant 0 : index
    %135 = vector.load %arg16[%c2_256, %c2_257, %c0_258] : memref<18x18x128xf32, #tpu.memory_space<vmem>>, vector<16x16x128xf32>
    %c0_259 = arith.constant 0 : index
    %c0_260 = arith.constant 0 : index
    %c1024_261 = arith.constant 1024 : index
    %136 = vector.load %arg17[%c0_259, %c0_260, %c1024_261] : memref<16x16x1152xf32, #tpu.memory_space<vmem>>, vector<16x16x128xf32>
    tpu.vector_store %arg17[%c0_259, %c0_260, %c1024_261], %135 {strides = array<i32>} : memref<16x16x1152xf32, #tpu.memory_space<vmem>>, vector<16x16x128xf32>,
    %c0_262 = arith.constant 0 : index
    %c0_263 = arith.constant 0 : index
    %c0_264 = arith.constant 0 : index
    %137 = vector.load %arg17[%c0_262, %c0_263, %c0_264] : memref<16x16x1152xf32, #tpu.memory_space<vmem>>, vector<16x16x1152xf32>
    %138 = vector.shape_cast %137 : vector<16x16x1152xf32> to vector<256x1152xf32>
    %139 = arith.truncf %138 : vector<256x1152xf32> to vector<256x1152xbf16>
    %c0_265 = arith.constant 0 : index
    %c0_266 = arith.constant 0 : index
    %140 = vector.load %arg14[%c0_265, %c0_266] : memref<1152x128xbf16, #tpu.memory_space<vmem>>, vector<1152x128xbf16>
    %cst_267 = arith.constant dense<0.000000e+00> : vector<256x128xf32>
    %141 = tpu.matmul %139, %140, %cst_267 {dimension_numbers = #tpu.dot_dimension_numbers<[1], [0], [0], [1], [0, 0, 1, 1], [], []>} : vector<256x1152xbf16>, vector<1152x128xbf16>, vector<256x128xf32> -> vector<256x128xf32>
    %142 = arith.addf %141, %75 : vector<256x128xf32>
    %143 = vector.shape_cast %142 : vector<256x128xf32> to vector<16x16x128xf32>
    %c0_268 = arith.constant 0 : index
    %c0_269 = arith.constant 0 : index
    %c0_270 = arith.constant 0 : index
    %c0_271 = arith.constant 0 : index
    %144 = vector.load %arg15[%c0_268, %c0_269, %c0_270, %c0_271] : memref<1x16x16x128xf32, #tpu.memory_space<vmem>>, vector<1x16x16x128xf32>
    %145 = vector.shape_cast %144 : vector<1x16x16x128xf32> to vector<16x16x128xf32>
    %146 = vector.shape_cast %143 : vector<16x16x128xf32> to vector<1x16x16x128xf32>
    tpu.vector_store %arg15[%c0_268, %c0_269, %c0_270, %c0_271], %146 {strides = array<i32>} : memref<1x16x16x128xf32, #tpu.memory_space<vmem>>, vector<1x16x16x128xf32>,
    return
  }
  func.func @transform_0(%arg0: i32) -> (i32, i32, i32, i32) {
    %c0_i32 = arith.constant 0 : i32
    %c0_i32_0 = arith.constant 0 : i32
    %c0_i32_1 = arith.constant 0 : i32
    %c0_i32_2 = arith.constant 0 : i32
    return %arg0, %c0_i32, %c0_i32_0, %c0_i32_1 : i32, i32, i32, i32
  }
  func.func @transform_1(%arg0: i32) -> (i32, i32) {
    %c0_i32 = arith.constant 0 : i32
    %c0_i32_0 = arith.constant 0 : i32
    %c0_i32_1 = arith.constant 0 : i32
    return %c0_i32, %c0_i32_0 : i32, i32
  }
  func.func @transform_2(%arg0: i32) -> (i32, i32) {
    %c0_i32 = arith.constant 0 : i32
    %c0_i32_0 = arith.constant 0 : i32
    %c0_i32_1 = arith.constant 0 : i32
    return %c0_i32, %c0_i32_0 : i32, i32
  }
  func.func @transform_3(%arg0: i32) -> (i32, i32) {
    %c0_i32 = arith.constant 0 : i32
    %c0_i32_0 = arith.constant 0 : i32
    %c0_i32_1 = arith.constant 0 : i32
    return %c0_i32, %c0_i32_0 : i32, i32
  }
  func.func @transform_4(%arg0: i32) -> (i32, i32) {
    %c0_i32 = arith.constant 0 : i32
    %c0_i32_0 = arith.constant 0 : i32
    %c0_i32_1 = arith.constant 0 : i32
    return %c0_i32, %c0_i32_0 : i32, i32
  }
  func.func @transform_5(%arg0: i32) -> (i32, i32) {
    %c0_i32 = arith.constant 0 : i32
    %c0_i32_0 = arith.constant 0 : i32
    %c0_i32_1 = arith.constant 0 : i32
    return %c0_i32, %c0_i32_0 : i32, i32
  }
  func.func @transform_6(%arg0: i32) -> (i32, i32) {
    %c0_i32 = arith.constant 0 : i32
    %c0_i32_0 = arith.constant 0 : i32
    %c0_i32_1 = arith.constant 0 : i32
    return %c0_i32, %c0_i32_0 : i32, i32
  }
  func.func @transform_7(%arg0: i32) -> (i32, i32) {
    %c0_i32 = arith.constant 0 : i32
    %c0_i32_0 = arith.constant 0 : i32
    %c0_i32_1 = arith.constant 0 : i32
    return %c0_i32, %c0_i32_0 : i32, i32
  }
  func.func @transform_8(%arg0: i32) -> (i32, i32) {
    %c0_i32 = arith.constant 0 : i32
    %c0_i32_0 = arith.constant 0 : i32
    %c0_i32_1 = arith.constant 0 : i32
    return %c0_i32, %c0_i32_0 : i32, i32
  }
  func.func @transform_9(%arg0: i32) -> (i32, i32) {
    %c0_i32 = arith.constant 0 : i32
    %c0_i32_0 = arith.constant 0 : i32
    %c0_i32_1 = arith.constant 0 : i32
    return %c0_i32, %c0_i32_0 : i32, i32
  }
  func.func @transform_10(%arg0: i32) -> (i32, i32) {
    %c0_i32 = arith.constant 0 : i32
    %c0_i32_0 = arith.constant 0 : i32
    %c0_i32_1 = arith.constant 0 : i32
    return %c0_i32, %c0_i32_0 : i32, i32
  }
  func.func @transform_11(%arg0: i32) -> (i32, i32) {
    %c0_i32 = arith.constant 0 : i32
    %c0_i32_0 = arith.constant 0 : i32
    %c0_i32_1 = arith.constant 0 : i32
    return %c0_i32, %c0_i32_0 : i32, i32
  }
  func.func @transform_12(%arg0: i32) -> (i32, i32) {
    %c0_i32 = arith.constant 0 : i32
    %c0_i32_0 = arith.constant 0 : i32
    %c0_i32_1 = arith.constant 0 : i32
    return %c0_i32, %c0_i32_0 : i32, i32
  }
  func.func @transform_13(%arg0: i32) -> (i32, i32) {
    %c0_i32 = arith.constant 0 : i32
    %c0_i32_0 = arith.constant 0 : i32
    %c0_i32_1 = arith.constant 0 : i32
    return %c0_i32, %c0_i32_0 : i32, i32
  }
  func.func @transform_14(%arg0: i32) -> (i32, i32, i32, i32) {
    %c0_i32 = arith.constant 0 : i32
    %c0_i32_0 = arith.constant 0 : i32
    %c0_i32_1 = arith.constant 0 : i32
    %c0_i32_2 = arith.constant 0 : i32
    return %arg0, %c0_i32, %c0_i32_0, %c0_i32_1 : i32, i32, i32, i32
  }
}

</mosaic_0001>

<bundles_post_ra>
// kernel: tpu_custom_call.1
= control target key start
LH: loop header
LB: loop body
LE: loop exit
PB: predicated region body
PF: predicated region fallthrough
CT: control target
= control target key end

     0   :  { %s17375_s0 = inlined_call_operand.hbm [shape: f32[2,16,16,128], index: 0, kind: input, shape index: {}]   ;;  %s17376_s1 = inlined_call_operand.vmem [shape: f32[1,128], index: 1, kind: input, shape index: {}]   ;;  %s17377_s2 = inlined_call_operand.vmem [shape: f32[1,128], index: 2, kind: input, shape index: {}]   ;;  %s17378_s3 = inlined_call_operand.hbm [shape: bf16[1152,128], index: 3, kind: input, shape index: {}]   ;;  %s17379_s4 = inlined_call_operand.vmem [shape: f32[1,128], index: 4, kind: input, shape index: {}]   ;;  %s17380_s5 = inlined_call_operand.vmem [shape: f32[1,128], index: 5, kind: input, shape index: {}]   ;;  %s17381_s6 = inlined_call_operand.hbm [shape: bf16[1152,128], index: 6, kind: input, shape index: {}]   ;;  %s17382_s7 = inlined_call_operand.hbm [shape: bf16[128,128], index: 7, kind: input, shape index: {}]   ;;  %s17383_s8 = inlined_call_operand.vmem [shape: f32[1,128], index: 8, kind: input, shape index: {}]   ;;  %s17384_s9 = inlined_call_operand.vmem [shape: f32[1,128], index: 9, kind: input, shape index: {}]   ;;  %s17385_s10 = inlined_call_operand.hbm [shape: bf16[1152,128], index: 10, kind: input, shape index: {}]   ;;  %s17386_s11 = inlined_call_operand.vmem [shape: f32[1,128], index: 11, kind: input, shape index: {}]   ;;  %s17387_s12 = inlined_call_operand.vmem [shape: f32[1,128], index: 12, kind: input, shape index: {}]   ;;  %s17388_s13 = inlined_call_operand.hbm [shape: bf16[1152,128], index: 13, kind: input, shape index: {}]   ;;  %s17389_s14 = inlined_call_operand.hbm [shape: f32[2,16,16,128], index: 14, kind: output, shape index: {}]  }
   0x1   :  { %17437 = sst [smem:[#allocation42_spill]] %s17378_s3 }
   0x2   :  { %17438 = sst [smem:[#allocation43_spill]] %s17380_s5 }
   0x3   :  { %17439 = sst [smem:[#allocation44_spill]] %s17383_s8 }
   0x4   :  { %17440 = sst [smem:[#allocation45_spill]] %s17384_s9 }
   0x5   :  { %17441 = sst [smem:[#allocation46_spill]] %s17386_s11 }
   0x6   :  { %17442 = sst [smem:[#allocation47_spill]] %s17387_s12 }
   0x7   :  { %17443 = sst [smem:[#allocation48_spill]] %s17389_s14 }
   0x8   :  { %19 = vsyncpa [#allocation5], 0 }
   0x9   :  { %21 = vsyncpa [#allocation5 + $0x1], 0 }
   0xa   :  { %22 = vsyncpa [#allocation8], 0 }
   0xb   :  { %23 = vsyncpa [#allocation11], 0 }
   0xc   :  { %24 = vsyncpa [#allocation14], 0 }
   0xd   :  { %25 = vsyncpa [#allocation6], 0 }
   0xe   :  { %27 = vsyncpa [#allocation6 + $0x1], 0  ;;  %s14614_s29 = smov 0   ;;  %s14616_s30 = smov 0  }
   0xf   :  { %s14618_s15 = smov 0   ;;  %s14620_s16 = smov 0  }
  0x10 LB: > { %s14525_s17 = smov [#allocation7]   ;;  %s14635_s19 = sadd.s32 4294967295, %s14523_s16   ;;  %s14523_s16 = sphi %s14620_s16, %s17537_s16   ;;  %s14519_s15 = sphi %s14618_s15, %s17536_s15   ;;  %s14515_s30 = sphi %s14616_s30, %s17535_s30   ;;  %s14511_s29 = sphi %s14614_s29, %s17534_s29  }
  0x11   : > { %s381_s18 = sshll.u32 %s14525_s17, 4  ;;  %p11185_p0 = scmp.ge.s32.totalorder %s14523_s16, 1  ;;  %s14641_s18 = int_to_ptr.vmem [resolvable:$true] %s381_s18 }
  0x12   : > { %p17391_p1 = scmp.eq.s32.totalorder %s14635_s19, 0  ;;  %p363_p2 = scmp.lt.s32.totalorder %s14523_s16, 3 }
  0x13   : > { %s14526_s21 = smov [#allocation10]   ;;  %s14527_s24 = smov [#allocation9]  }
  0x14   : > { %p14643_p4 = pnand %p11185_p0, %p363_p2  ;;  %s413_s22 = sshll.u32 %s14526_s21, 4  ;;  %s14656_s22 = int_to_ptr.vmem [resolvable:$true] %s413_s22 }
  0x15   : > { %s400_s25 = sshll.u32 %s14527_s24, 4  ;;  %s17446_s3 = sld [smem:[#allocation42_spill]]  ;;  %s14658_s25 = int_to_ptr.vmem [resolvable:$true] %s400_s25 }
  0x16   : > { %s17444_s20 = scalar_select %p14643_p4, 1, 0 }
  0x17   : > { %p13867_p6 = pneg %p14643_p4 }
  0x19   : > { %p14652_p7 = pnand %p13867_p6, %p17391_p1 }
  0x1b   : > { %s14275_s28 = scalar_lea.hbm %s17446_s3, 9216  ;;  %p14668_p9 = pneg %p14652_p7 }
  0x1c   : > { %p14276_p8 = scmp.ne.s32.totalorder %s17446_s3, %s14275_s28  ;;  %p14282_p12 = scmp.lt.u32.totalorder %s14275_s28, %s17446_s3 }
  0x1e   : > { %p14278_p10 = pnand %p14668_p9, %p14276_p8 }
  0x20   : > { %p14279_p11 = pneg %p14278_p10 }
  0x22   : > { %p14284_p13 = pnand %p14282_p12, %p14279_p11 }
  0x24   : > { %14287 = shalt.err (!%p14284_p13)
}
  0x25   : > { %s14288_s14 = scalar_lea.vmem %s14641_s18, 9216  ;;  %p14296_p5 = scmp.lt.s32.totalorder %s14641_s18, %s14641_s18 }
  0x26   : > { %p14289_p0 = scmp.ne.s32.totalorder %s14641_s18, %s14288_s14  ;;  %p14297_p3 = scmp.lt.s32.totalorder %s14288_s14, %s14288_s14 }
  0x28   : > { %p14291_p2 = pnand %p14289_p0, %p14668_p9  ;;  %p14298_p8 = por %p14297_p3, %p14296_p5 }
  0x2a   : > { %p14292_p6 = pneg %p14291_p2 }
  0x2c   : > { %p14299_p10 = pnand %p14298_p8, %p14292_p6 }
  0x2e   : > { %14302 = shalt.err (!%p14299_p10)
}
  0x2f   : > { %s14528_s26 = smov 64   ;;  %s14529_s12 = smov 4  }
  0x30   : > { %13870 = dma.hbm_to_vmem [thread:$0]  (!%p14652_p7), %s17446_s3, 9216, %s14641_s18, [#allocation8], %s14528_s26, %s14528_s26, %s14529_s12  }
  0x31   : > { %s14303_s14 = scalar_lea.hbm %s17382_s7, 1024 }
  0x32   : > { %p14304_p3 = scmp.ne.s32.totalorder %s17382_s7, %s14303_s14  ;;  %p14310_p12 = scmp.lt.u32.totalorder %s14303_s14, %s17382_s7 }
  0x34   : > { %p14306_p5 = pnand %p14304_p3, %p14668_p9 }
  0x36   : > { %p14307_p11 = pneg %p14306_p5 }
  0x38   : > { %p14312_p13 = pnand %p14310_p12, %p14307_p11 }
  0x3a   : > { %14315 = shalt.err (!%p14312_p13)
}
  0x3b   : > { %s14316_s18 = scalar_lea.vmem %s14656_s22, 1024  ;;  %p14324_p8 = scmp.lt.s32.totalorder %s14656_s22, %s14656_s22 }
  0x3c   : > { %p14317_p0 = scmp.ne.s32.totalorder %s14656_s22, %s14316_s18  ;;  %p14325_p10 = scmp.lt.s32.totalorder %s14316_s18, %s14316_s18 }
  0x3e   : > { %p14319_p2 = pnand %p14317_p0, %p14668_p9  ;;  %p14326_p3 = por %p14325_p10, %p14324_p8 }
  0x40   : > { %p14320_p6 = pneg %p14319_p2 }
  0x42   : > { %p14327_p5 = pnand %p14326_p3, %p14320_p6 }
  0x44   : > { %14330 = shalt.err (!%p14327_p5)
}
  0x45   : > { %13876 = dma.hbm_to_vmem [thread:$0]  (!%p14652_p7), %s17382_s7, 1024, %s14656_s22, [#allocation11], %s14528_s26, %s14528_s26, %s14529_s12  }
  0x46   : > { %s14331_s27 = scalar_lea.hbm %s17381_s6, 9216 }
  0x47   : > { %p14332_p11 = scmp.ne.s32.totalorder %s17381_s6, %s14331_s27  ;;  %p14338_p0 = scmp.lt.u32.totalorder %s14331_s27, %s17381_s6 }
  0x49   : > { %p14334_p12 = pnand %p14332_p11, %p14668_p9 }
  0x4b   : > { %p14335_p13 = pneg %p14334_p12 }
  0x4d   : > { %p14340_p2 = pnand %p14338_p0, %p14335_p13 }
  0x4f   : > { %14343 = shalt.err (!%p14340_p2)
}
  0x50   : > { %s14344_s22 = scalar_lea.vmem %s14658_s25, 9216  ;;  %p14352_p3 = scmp.lt.s32.totalorder %s14658_s25, %s14658_s25 }
  0x51   : > { %p14345_p6 = scmp.ne.s32.totalorder %s14658_s25, %s14344_s22  ;;  %p14353_p5 = scmp.lt.s32.totalorder %s14344_s22, %s14344_s22 }
  0x53   : > { %p14347_p8 = pnand %p14345_p6, %p14668_p9  ;;  %p14354_p11 = por %p14353_p5, %p14352_p3 }
  0x55   : > { %p14348_p10 = pneg %p14347_p8 }
  0x57   : > { %p14355_p12 = pnand %p14354_p11, %p14348_p10 }
  0x59   : > { %14358 = shalt.err (!%p14355_p12)
}
  0x5a   : > { %13873 = dma.hbm_to_vmem [thread:$0]  (!%p14652_p7), %s17381_s6, 9216, %s14658_s25, [#allocation8], %s14528_s26, %s14528_s26, %s14529_s12  }
  0x5b   : > { %s14530_s8 = smov [#allocation12]   ;;  %s14531_s11 = smov [#allocation13]  }
  0x5c   : > { %s432_s9 = sshll.u32 %s14530_s8, 4  ;;  %s451_s27 = sshll.u32 %s14531_s11, 4  ;;  %s433_s9 = int_to_ptr.vmem [resolvable:$true] %s432_s9  ;;  %s452_s27 = int_to_ptr.vmem [resolvable:$true] %s451_s27 }
  0x5d   : > { %s14359_s24 = scalar_lea.hbm %s17385_s10, 9216 }
  0x5e   : > { %p14360_p13 = scmp.ne.s32.totalorder %s17385_s10, %s14359_s24  ;;  %p14366_p6 = scmp.lt.u32.totalorder %s14359_s24, %s17385_s10 }
  0x60   : > { %p14362_p0 = pnand %p14360_p13, %p14668_p9 }
  0x62   : > { %p14363_p2 = pneg %p14362_p0 }
  0x64   : > { %p14368_p8 = pnand %p14366_p6, %p14363_p2 }
  0x66   : > { %14371 = shalt.err (!%p14368_p8)
}
  0x67   : > { %s14372_s25 = scalar_lea.vmem %s433_s9, 9216  ;;  %p14380_p11 = scmp.lt.s32.totalorder %s433_s9, %s433_s9 }
  0x68   : > { %p14373_p10 = scmp.ne.s32.totalorder %s433_s9, %s14372_s25  ;;  %p14381_p12 = scmp.lt.s32.totalorder %s14372_s25, %s14372_s25 }
  0x6a   : > { %p14375_p3 = pnand %p14373_p10, %p14668_p9  ;;  %p14382_p1 = por %p14381_p12, %p14380_p11 }
  0x6c   : > { %p14376_p5 = pneg %p14375_p3 }
  0x6e   : > { %p14383_p4 = pnand %p14382_p1, %p14376_p5 }
  0x70   : > { %14386 = shalt.err (!%p14383_p4)
}
  0x71   : > { %13879 = dma.hbm_to_vmem [thread:$0]  (!%p14652_p7), %s17385_s10, 9216, %s433_s9, [#allocation11], %s14528_s26, %s14528_s26, %s14529_s12  }
  0x72   : > { %s14387_s28 = scalar_lea.hbm %s17388_s13, 9216 }
  0x73   : > { %p14388_p1 = scmp.ne.s32.totalorder %s17388_s13, %s14387_s28  ;;  %p14394_p0 = scmp.lt.u32.totalorder %s14387_s28, %s17388_s13 }
  0x75   : > { %p14390_p4 = pnand %p14388_p1, %p14668_p9 }
  0x77   : > { %p14391_p13 = pneg %p14390_p4 }
  0x79   : > { %p14396_p2 = pnand %p14394_p0, %p14391_p13 }
  0x7b   : > { %14399 = shalt.err (!%p14396_p2)
}
  0x7c   : > { %s14400_s18 = scalar_lea.vmem %s452_s27, 9216  ;;  %p14408_p3 = scmp.lt.s32.totalorder %s452_s27, %s452_s27 }
  0x7d   : > { %p14401_p6 = scmp.ne.s32.totalorder %s452_s27, %s14400_s18  ;;  %p14409_p5 = scmp.lt.s32.totalorder %s14400_s18, %s14400_s18 }
  0x7f   : > { %p14403_p8 = pnand %p14401_p6, %p14668_p9  ;;  %p14410_p11 = por %p14409_p5, %p14408_p3 }
  0x81   : > { %p14404_p10 = pneg %p14403_p8 }
  0x83   : > { %p14411_p12 = pnand %p14410_p11, %p14404_p10 }
  0x85   : > { %14414 = shalt.err (!%p14411_p12)
}
  0x86   : > { %13882 = dma.hbm_to_vmem [thread:$0]  (!%p14652_p7), %s17388_s13, 9216, %s452_s27, [#allocation14], %s14528_s26, %s14528_s26, %s14529_s12  }
  0x87   : > { %s11184_s23 = sadd.s32 4294967294, %s14523_s16   ;;  %s14788_s21 = sadd.s32 1, %s14523_s16  }
  0x88   : > { %s40_s3 = sadd.s32 1, %s14519_s15  ;;  %s37_s5 = ssub.s32 %s14523_s16, %s14788_s21 }
  0x89   : > { %p47_p9 = scmp.ne.s32.totalorder %s14519_s15, %s14515_s30  ;;  %p38_p1 = scmp.eq.s32.totalorder %s37_s5, 0 }
  0x8a   : > { %p48_p4 = scmp.eq.s32.totalorder %s14523_s16, 0  ;;  %p53_p13 = scmp.ne.s32.totalorder %s14515_s30, %s14511_s29 }
  0x8b   : > { %p350_p0 = scmp.eq.s32.totalorder %s14635_s19, 1  ;;  %p17448_p6 = scmp.eq.s32.totalorder %s14635_s19, 0 }
  0x8c   : > { %s14800_s8 = scalar_select %p38_p1, %s14519_s15, %s40_s3  }
  0x8d   : > { %p49_p2 = por %p48_p4, %p47_p9  ;;  %p14804_p8 = por %p17448_p6, %p53_p13 }
  0x8e   : > { %p14808_p7 = por %p350_p0, %p47_p9  ;;  %p356_p10 = scmp.eq.s32.totalorder %s11184_s23, 1 }
  0x8f   : > { %p13896_p3 = scmp.lt.s32.totalorder %s14523_s16, 2  ;;  %s465_s12 = sand.u32 1, %s14519_s15  }
  0x90   : > { %s17450_s26 = scalar_select %p14808_p7, 1, 0 }
  0x91   : > { %p14814_p5 = por %p356_p10, %p53_p13  ;;  %s11192_s28 = sshll.u32 %s465_s12, 8 }
  0x92   : > { %s11513_s17 = sshll.u32 %s14523_s16, 12  ;;  %s469_s18 = scalar_lea.vmem [#allocation4], %s11192_s28 }
  0x93   : > { %s17451_s27 = scalar_select %p14814_p5, 1, 0 }
  0x94   : > { %s14822_s22 = scalar_lea.hbm %s17375_s0, %s11513_s17  ;;  %s476_s9 = sshll.u32 %s469_s18, 4  ;;  %s14828_s9 = int_to_ptr.vmem [resolvable:$true] %s476_s9 }
  0x95   : > { %p14824_p11 = pnand %p13896_p3, %p49_p2  ;;  %s14830_s23 = scalar_lea.sflag [#allocation5], %s465_s12 }
  0x96   : > { %s14415_s3 = scalar_lea.hbm %s14822_s22, 4096  ;;  %s14420_s17 = scalar_lea.hbm %s17375_s0, 8192 }
  0x97   : > { %p14416_p12 = scmp.ne.s32.totalorder %s14822_s22, %s14415_s3  ;;  %p14417_p9 = pneg %p14824_p11 }
  0x98   : > { %p14421_p13 = scmp.lt.u32.totalorder %s14822_s22, %s17375_s0  ;;  %p14422_p0 = scmp.lt.u32.totalorder %s14420_s17, %s14415_s3 }
  0x99   : > { %p14418_p1 = pnand %p14417_p9, %p14416_p12  ;;  %p14424_p6 = scmp.lt.u32.totalorder %s14415_s3, %s14822_s22 }
  0x9a   : > { %p14423_p2 = por %p14422_p0, %p14421_p13 }
  0x9b   : > { %p14419_p4 = pneg %p14418_p1 }
  0x9c   : > { %p14425_p10 = por %p14424_p6, %p14423_p2 }
  0x9e   : > { %p14426_p3 = pnand %p14425_p10, %p14419_p4 }
  0xa0   : > { %14429 = shalt.err (!%p14426_p3)
}
  0xa1   : > { %s14430_s12 = scalar_lea.vmem %s14828_s9, 4096  ;;  %s14532_s18 = smov [#allocation4]  }
  0xa2   : > { %p14431_p12 = scmp.ne.s32.totalorder %s14828_s9, %s14430_s12  ;;  %s14435_s5 = sshll.u32 %s14532_s18, 4  ;;  %s14436_s5 = int_to_ptr.vmem [resolvable:$false] %s14435_s5 }
  0xa3   : > { %s14437_s28 = scalar_lea.vmem %s14436_s5, 8192  ;;  %p14438_p7 = scmp.lt.s32.totalorder %s14828_s9, %s14436_s5 }
  0xa4   : > { %p14433_p1 = pnand %p14431_p12, %p14417_p9  ;;  %p14439_p13 = scmp.lt.s32.totalorder %s14437_s28, %s14430_s12 }
  0xa6   : > { %p14434_p5 = pneg %p14433_p1  ;;  %p14440_p0 = por %p14439_p13, %p14438_p7 }
  0xa8   : > { %p14441_p2 = pnand %p14440_p0, %p14434_p5 }
  0xaa   : > { %14444 = shalt.err (!%p14441_p2)
}
  0xab   : > { %s14533_s3 = smov 128   ;;  %s14534_s17 = smov 8  }
  0xac   : > { %13886 = dma.hbm_to_vmem [thread:$0]  (!%p14824_p11), %s14822_s22, 4096, %s14828_s9, %s14830_s23, %s14533_s3, %s14533_s3, %s14534_s17  }
  0xad   : > { %p17453_p9 = scmp.ne.s32.totalorder %s17444_s20, 0 }
  0xaf   : > { %488 = sbr.rel (%p17453_p9) target bundleno = 2222 (0x8ae), region = 76 }
  0xb6   : > { %s14861_s24 = sand.u32 1, %s14515_s30  }
  0xb7   : > { %s11196_s14 = sshll.u32 %s14861_s24, 8  ;;  %s491_s12 = scalar_lea.sflag [#allocation5], %s14861_s24 }
  0xb8   : > { %s14865_s18 = scalar_lea.vmem [#allocation4], %s11196_s14 }
  0xb9   : > { %14490 = dma.done.wait (%p14804_p8), %s491_s12, 4096  }
  0xba   : > { %14492 = vsyncadd (%p14804_p8), %s491_s12, 4294963200  ;;  %p17454_p7 = scmp.eq.s32.totalorder %s14635_s19, 0 }
  0xbc   : > { %14494 = dma.done.wait (%p17454_p7), [#allocation8], 18432   ;;  %p17455_p5 = pmov %p17454_p7 }
  0xbe   : > { %14496 = vsyncadd (%p17455_p5), [#allocation8], 4294948864  ;;  %p17456_p11 = pmov %p17455_p5 }
  0xbf   : > { %p17457_p4 = pmov %p17455_p5 }
  0xc0   : > { %14498 = dma.done.wait (%p17456_p11), [#allocation11], 10240  }
  0xc1   : > { %14500 = vsyncadd (%p17457_p4), [#allocation11], 4294957056  ;;  %p17458_p6 = pmov %p17457_p4 }
  0xc2   : > { %p17459_p10 = pmov %p17457_p4 }
  0xc3   : > { %14502 = dma.done.wait (%p17458_p6), [#allocation14], 9216  }
  0xc4   : > { %14504 = vsyncadd (%p17459_p10), [#allocation14], 4294958080  ;;  %s14883_s20 = scalar_lea.vmem [#allocation15], %s11196_s14  ;;  %p17460_p8 = scmp.ne.s32.totalorder %s14635_s19, 0 }
  0xc5   : > { %v14535_v0 = vmov (!%p17460_p8), 0.0  }
  0xc6   : > { %563 = sbr.rel (%p17460_p8) target bundleno = 225 (0xe1), region = 104  ;;  %564 = vst [vmem:[#allocation2] sm:$0xff] (!%p17460_p8), %v14535_v0  ;;  %565 = vst [vmem:[#allocation2 + $0x8] sm:$0xff] (!%p17460_p8), %v14535_v0 }
  0xc7   : > { %566 = vst [vmem:[#allocation2 + $0x10] sm:$0x3] (!%p17460_p8), %v14535_v0  ;;  %567 = vst [vmem:[#allocation2 + $0x18] sm:$0xff] (!%p17460_p8), %v14535_v0 }
  0xc8   : > { %568 = vst [vmem:[#allocation2 + $0x20] sm:$0xff] (!%p17460_p8), %v14535_v0  ;;  %569 = vst [vmem:[#allocation2 + $0x28] sm:$0x3] (!%p17460_p8), %v14535_v0 }
  0xc9   : > { %570 = vst [vmem:[#allocation2 + $0x30] sm:$0xff] (!%p17460_p8), %v14535_v0  ;;  %571 = vst [vmem:[#allocation2 + $0x38] sm:$0xff] (!%p17460_p8), %v14535_v0 }
  0xca   : > { %572 = vst [vmem:[#allocation2 + $0x40] sm:$0x3] (!%p17460_p8), %v14535_v0  ;;  %573 = vst [vmem:[#allocation2 + $0x48] sm:$0xff] (!%p17460_p8), %v14535_v0 }
  0xcb   : > { %574 = vst [vmem:[#allocation2 + $0x50] sm:$0xff] (!%p17460_p8), %v14535_v0  ;;  %575 = vst [vmem:[#allocation2 + $0x58] sm:$0x3] (!%p17460_p8), %v14535_v0 }
  0xcc   : > { %576 = vst [vmem:[#allocation2 + $0x60] sm:$0xff] (!%p17460_p8), %v14535_v0  ;;  %577 = vst [vmem:[#allocation2 + $0x68] sm:$0xff] (!%p17460_p8), %v14535_v0 }
  0xcd   : > { %578 = vst [vmem:[#allocation2 + $0x70] sm:$0x3] %v14535_v0  ;;  %579 = vst [vmem:[#allocation2 + $0x78] sm:$0xff] %v14535_v0 }
  0xce   : > { %580 = vst [vmem:[#allocation2 + $0x80] sm:$0xff] %v14535_v0  ;;  %581 = vst [vmem:[#allocation2 + $0x88] sm:$0x3] %v14535_v0 }
  0xcf   : > { %582 = vst [vmem:[#allocation2 + $0x90] sm:$0xff] %v14535_v0  ;;  %583 = vst [vmem:[#allocation2 + $0x98] sm:$0xff] %v14535_v0 }
  0xd0   : > { %584 = vst [vmem:[#allocation2 + $0xa0] sm:$0x3] %v14535_v0  ;;  %585 = vst [vmem:[#allocation2 + $0xa8] sm:$0xff] %v14535_v0 }
  0xd1   : > { %586 = vst [vmem:[#allocation2 + $0xb0] sm:$0xff] %v14535_v0  ;;  %587 = vst [vmem:[#allocation2 + $0xb8] sm:$0x3] %v14535_v0 }
  0xd2   : > { %588 = vst [vmem:[#allocation2 + $0xc0] sm:$0xff] %v14535_v0  ;;  %589 = vst [vmem:[#allocation2 + $0xc8] sm:$0xff] %v14535_v0 }
  0xd3   : > { %590 = vst [vmem:[#allocation2 + $0xd0] sm:$0x3] %v14535_v0  ;;  %591 = vst [vmem:[#allocation2 + $0xd8] sm:$0xff] %v14535_v0 }
  0xd4   : > { %592 = vst [vmem:[#allocation2 + $0xe0] sm:$0xff] %v14535_v0  ;;  %593 = vst [vmem:[#allocation2 + $0xe8] sm:$0x3] %v14535_v0 }
  0xd5   : > { %594 = vst [vmem:[#allocation2 + $0xf0] sm:$0xff] %v14535_v0  ;;  %595 = vst [vmem:[#allocation2 + $0xf8] sm:$0xff] %v14535_v0 }
  0xd6   : > { %596 = vst [vmem:[#allocation2 + $0x100] sm:$0x3] %v14535_v0  ;;  %597 = vst [vmem:[#allocation2 + $0x108] sm:$0xff] %v14535_v0 }
  0xd7   : > { %598 = vst [vmem:[#allocation2 + $0x110] sm:$0xff] %v14535_v0  ;;  %599 = vst [vmem:[#allocation2 + $0x118] sm:$0x3] %v14535_v0 }
  0xd8   : > { %600 = vst [vmem:[#allocation2 + $0x120] sm:$0xff] %v14535_v0  ;;  %601 = vst [vmem:[#allocation2 + $0x128] sm:$0xff] %v14535_v0 }
  0xd9   : > { %602 = vst [vmem:[#allocation2 + $0x130] sm:$0x3] %v14535_v0  ;;  %603 = vst [vmem:[#allocation2 + $0x138] sm:$0xff] %v14535_v0 }
  0xda   : > { %604 = vst [vmem:[#allocation2 + $0x140] sm:$0xff] %v14535_v0  ;;  %605 = vst [vmem:[#allocation2 + $0x148] sm:$0x3] %v14535_v0 }
  0xdb   : > { %606 = vst [vmem:[#allocation2 + $0x150] sm:$0xff] %v14535_v0  ;;  %607 = vst [vmem:[#allocation2 + $0x158] sm:$0xff] %v14535_v0 }
  0xdc   : > { %608 = vst [vmem:[#allocation2 + $0x160] sm:$0x3] %v14535_v0  ;;  %609 = vst [vmem:[#allocation2 + $0x168] sm:$0xff] %v14535_v0 }
  0xdd   : > { %610 = vst [vmem:[#allocation2 + $0x170] sm:$0xff] %v14535_v0  ;;  %611 = vst [vmem:[#allocation2 + $0x178] sm:$0x3] %v14535_v0 }
  0xde   : > { %612 = vst [vmem:[#allocation2 + $0x180] sm:$0xff] %v14535_v0  ;;  %613 = vst [vmem:[#allocation2 + $0x188] sm:$0xff] %v14535_v0 }
  0xdf   : > { %614 = vst [vmem:[#allocation2 + $0x190] sm:$0x3] %v14535_v0  ;;  %615 = vst [vmem:[#allocation2 + $0x198] sm:$0xff] %v14535_v0 }
  0xe0   : > { %616 = vst [vmem:[#allocation2 + $0x1a0] sm:$0xff] %v14535_v0  ;;  %617 = vst [vmem:[#allocation2 + $0x1a8] sm:$0x3] %v14535_v0 }
  0xe1 PF: > { %v13947_v1 = vld [vmem:[#allocation7 + $0x40] sm:$0xff]   ;;  %v13949_v3 = vld [vmem:[#allocation7 + $0x48] sm:$0xff]   ;;  %v13951_v5 = vld [vmem:[#allocation7 + $0x50] sm:$0xff]   ;;  %s17461_s17 = sld [smem:[#allocation43_spill]]  ;;  %s17463_s9 = sld [smem:[#allocation45_spill]] }
  0xe2   : > { %v13948_v2 = vld [vmem:[#allocation7] sm:$0xff]   ;;  %11515 = vmatprep.subr.bf16.mxu0 %v13947_v1  ;;  %13667 = vmatprep.subr.bf16.mxu1 %v13947_v1  ;;  %v13950_v4 = vld [vmem:[#allocation7 + $0x8] sm:$0xff]   ;;  %v13952_v6 = vld [vmem:[#allocation7 + $0x10] sm:$0xff]   ;;  %s17507_s5 = sld [smem:[#allocation46_spill]]  ;;  %s11514_s14 = sshll.u32 %s14635_s19, 12 }
  0xe3   : > { %11516 = vmatpush3.bf16.msra.mxu0 %v13948_v2  ;;  %13675 = vmatpush3.bf16.msra.mxu1 %v13948_v2  ;;  %v13953_v7 = vld [vmem:[#allocation7 + $0x58] sm:$0xff]   ;;  %v13955_v9 = vld [vmem:[#allocation7 + $0x60] sm:$0xff]   ;;  %v13957_v11 = vld [vmem:[#allocation7 + $0x68] sm:$0xff]   ;;  %s11063_s12 = sshll.u32 %s14883_s20, 4  ;;  %s17530_s22 = sld [smem:[#allocation48_spill]]  ;;  %s17327_s12 = int_to_ptr.vmem [resolvable:$true] %s11063_s12 }
  0xe4   : > { %11517 = vmatprep.subr.bf16.mxu0 %v13949_v3  ;;  %13668 = vmatprep.subr.bf16.mxu1 %v13949_v3  ;;  %v13954_v8 = vld [vmem:[#allocation7 + $0x18] sm:$0xff]   ;;  %v13956_v10 = vld [vmem:[#allocation7 + $0x20] sm:$0xff]   ;;  %v640_v14 = vld [vmem:[%s14865_s18 + $0xb0] sm:$0xff]  ;;  %s11050_s19 = scalar_lea.sflag [#allocation6], %s14861_s24  ;;  %s14445_s25 = scalar_lea.vmem %s17327_s12, 4096 }
  0xe5   : > { %v857_v12 = vld [vmem:[#allocation2 + $0x1] sm:$0xff]  ;;  %v858_v13 = vld [vmem:[#allocation2 + $0x9] sm:$0xff]  ;;  %v14892_v17 = vld [vmem:[%s17376_s1] ss:$0 sm:$0xff]  ;;  %p14446_p3 = scmp.ne.s32.totalorder %s17327_s12, %s14445_s25  ;;  %p17531_p12 = scmp.ne.s32.totalorder %s17450_s26, 0 }
  0xe6   : > { %v1659_v15 = vpack.c.bf16 %v858_v13, %v857_v12  ;;  %v641_v16 = vld [vmem:[%s14865_s18 + $0xb8] sm:$0xff]  ;;  %v14897_v18 = vld [vmem:[%s17377_s2] ss:$0 sm:$0xff]  ;;  %v679_v19 = vmul.f32 %v14892_v17, %v640_v14  ;;  %v13958_v21 = vld [vmem:[#allocation7 + $0x28] sm:$0xff]   ;;  %s14536_s23 = smov [#allocation15]  }
  0xe7   : > { %11518 = vmatpush3.bf16.msra.mxu0 %v13950_v4  ;;  %13676 = vmatpush3.bf16.msra.mxu1 %v13950_v4  ;;  %v680_v20 = vmul.f32 %v14892_v17, %v641_v16  ;;  %v13959_v22 = vld [vmem:[#allocation7 + $0x70] sm:$0xff]   ;;  %v13961_v28 = vld [vmem:[#allocation7 + $0x78] sm:$0xff]   ;;  %v618_v30 = vld [vmem:[%s14865_s18] sm:$0xff]  ;;  %p14447_p1 = pnand %p14446_p3, %p17531_p12 }
  0xe8   : > { %11519 = vmatprep.subr.bf16.mxu0 %v13951_v5  ;;  %13669 = vmatprep.subr.bf16.mxu1 %v13951_v5  ;;  %v718_v23 = vadd.f32 %v14897_v18, %v679_v19  ;;  %v13960_v25 = vld [vmem:[#allocation7 + $0x30] sm:$0xff]   ;;  %v13962_v31 = vld [vmem:[#allocation7 + $0x38] sm:$0xff]   ;;  %v619_v33 = vld [vmem:[%s14865_s18 + $0x8] sm:$0xff]  ;;  %v657_v34 = vmul.f32 %v14892_v17, %v618_v30 }
  0xe9   : > { %v719_v24 = vadd.f32 %v14897_v18, %v680_v20  ;;  %2410 = vmatprep.mubr.bf16.mxu0 %v1659_v15  ;;  %v793_v32 = vld [vmem:[#allocation2] sm:$0xff]  ;;  %v642_v35 = vld [vmem:[%s14865_s18 + $0xc0] sm:$0xff]  ;;  %v643_v36 = vld [vmem:[%s14865_s18 + $0xc8] sm:$0xff]  ;;  %v658_v38 = vmul.f32 %v14892_v17, %v619_v33  ;;  %p14448_p13 = pneg %p14447_p1 }
  0xea   : > { %v750_v26 = vmax.f32 %v718_v23, 0.0  ;;  %v794_v37 = vld [vmem:[#allocation2 + $0x8] sm:$0xff]  ;;  %v681_v39 = vmul.f32 %v14892_v17, %v642_v35  ;;  %v682_v40 = vmul.f32 %v14892_v17, %v643_v36  ;;  %v13963_v41 = vld [vmem:[#allocation7 + $0xc0] sm:$0xff]   ;;  %v696_v42 = vadd.f32 %v14897_v18, %v657_v34  ;;  %v13967_v51 = vld [vmem:[#allocation7 + $0xc8] sm:$0xff]  }
  0xeb   : > { %11520 = vmatpush3.bf16.msra.mxu0 %v13952_v6  ;;  %13677 = vmatpush3.bf16.msra.mxu1 %v13952_v6  ;;  %v751_v27 = vmax.f32 %v719_v24, 0.0  ;;  %v13964_v43 = vld [vmem:[#allocation7 + $0x140] sm:$0xff]   ;;  %v697_v44 = vadd.f32 %v14897_v18, %v658_v38  ;;  %v1658_v50 = vpack.c.bf16 %v794_v37, %v793_v32  ;;  %v13972_v59 = vld [vmem:[#allocation7 + $0x148] sm:$0xff]   ;;  %v620_v62 = vld [vmem:[%s14865_s18 + $0x10] sm:$0xff] }
  0xec   : > { %11521 = vmatprep.subr.bf16.mxu0 %v13953_v7  ;;  %13670 = vmatprep.subr.bf16.mxu1 %v13953_v7  ;;  %783 = vst [vmem:[#allocation2 + $0x121] sm:$0xff] %v750_v26  ;;  %v720_v45 = vadd.f32 %v14897_v18, %v681_v39  ;;  %v721_v46 = vadd.f32 %v14897_v18, %v682_v40  ;;  %v13965_v47 = vld [vmem:[#allocation7 + $0x80] sm:$0xff]   ;;  %v728_v49 = vmax.f32 %v696_v42, 0.0  ;;  %v13968_v60 = vld [vmem:[#allocation7 + $0x88] sm:$0xff]   ;;  %v621_v63 = vld [vmem:[%s14865_s18 + $0x18] sm:$0xff] }
  0xed   : > { %784 = vst [vmem:[#allocation2 + $0x129] sm:$0xff] %v751_v27  ;;  %v1767_v29 = vpack.c.bf16 %v751_v27, %v750_v26  ;;  %v13966_v48 = vld [vmem:[#allocation7 + $0x100] sm:$0xff]   ;;  %v729_v52 = vmax.f32 %v697_v44, 0.0  ;;  %v644_v0 = vld [vmem:[%s14865_s18 + $0xd0] sm:$0xff]  ;;  %v659_v1 = vmul.f32 %v14892_v17, %v620_v62  ;;  %v660_v2 = vmul.f32 %v14892_v17, %v621_v63  ;;  %v645_v3 = vld [vmem:[%s14865_s18 + $0xd8] sm:$0xff] }
  0xee   : > { %v752_v53 = vmax.f32 %v720_v45, 0.0  ;;  %v753_v54 = vmax.f32 %v721_v46, 0.0  ;;  %761 = vst [vmem:[#allocation2 + $0x19] sm:$0xff] %v728_v49  ;;  %v683_v4 = vmul.f32 %v14892_v17, %v644_v0  ;;  %v13974_v5 = vld [vmem:[#allocation7 + $0x108] sm:$0xff]   ;;  %v684_v6 = vmul.f32 %v14892_v17, %v645_v3  ;;  %v13969_v7 = vld [vmem:[#allocation7 + $0xd0] sm:$0xff]   ;;  %v13971_v14 = vld [vmem:[#allocation7 + $0xd8] sm:$0xff]  }
  0xef   : > { %11522 = vmatpush3.bf16.msra.mxu0 %v13954_v8  ;;  %13678 = vmatpush3.bf16.msra.mxu1 %v13954_v8  ;;  %762 = vst [vmem:[#allocation2 + $0x21] sm:$0xff] %v729_v52  ;;  %v14915_v58 = vpack.c.bf16 %v729_v52, %v728_v49  ;;  %v698_v8 = vadd.f32 %v14897_v18, %v659_v1  ;;  %v622_v20 = vld [vmem:[%s14865_s18 + $0x20] sm:$0xff]  ;;  %v13973_v32 = vld [vmem:[#allocation7 + $0x98] sm:$0xff]   ;;  %v13980_v38 = vld [vmem:[#allocation7 + $0x150] sm:$0xff]  }
  0xf0   : > { %11523 = vmatprep.subr.bf16.mxu0 %v13955_v9  ;;  %13671 = vmatprep.subr.bf16.mxu1 %v13955_v9  ;;  %785 = vst [vmem:[#allocation2 + $0x139] sm:$0xff] %v752_v53  ;;  %786 = vst [vmem:[#allocation2 + $0x141] sm:$0xff] %v753_v54  ;;  %v1776_v61 = vpack.c.bf16 %v753_v54, %v752_v53  ;;  %v699_v9 = vadd.f32 %v14897_v18, %v660_v2  ;;  %v646_v30 = vld [vmem:[%s14865_s18 + $0xe0] sm:$0xff]  ;;  %v13982_v44 = vld [vmem:[#allocation7 + $0x110] sm:$0xff]  }
  0xf1   : > { %2506 = vmatprep.mubr.bf16.mxu1 %v1767_v29  ;;  %v723_v12 = vadd.f32 %v14897_v18, %v684_v6  ;;  %v730_v15 = vmax.f32 %v698_v8, 0.0  ;;  %v623_v29 = vld [vmem:[%s14865_s18 + $0x28] sm:$0xff]  ;;  %v685_v36 = vmul.f32 %v14892_v17, %v646_v30  ;;  %v13975_v39 = vld [vmem:[#allocation7 + $0xe0] sm:$0xff]   ;;  %v13985_v0 = vld [vmem:[#allocation7 + $0x158] sm:$0xff]  }
  0xf2   : > { %v731_v16 = vmax.f32 %v699_v9, 0.0  ;;  %v662_v34 = vmul.f32 %v14892_v17, %v623_v29  ;;  %v13976_v54 = vld [vmem:[#allocation7 + $0xa0] sm:$0xff]   ;;  %v13978_v62 = vld [vmem:[#allocation7 + $0xa8] sm:$0xff]   ;;  %v13986_v2 = vld [vmem:[#allocation7 + $0x118] sm:$0xff]  }
  0xf3   : > { %11524 = vmatpush3.bf16.msra.mxu0 %v13956_v10  ;;  %13679 = vmatpush3.bf16.msra.mxu1 %v13956_v10  ;;  %v817_v55 = vld [vmem:[#allocation2 + $0x120] sm:$0xff]  ;;  %v722_v10 = vadd.f32 %v14897_v18, %v683_v4  ;;  %v755_v24 = vmax.f32 %v723_v12, 0.0  ;;  %763 = vst [vmem:[#allocation2 + $0x31] sm:$0xff] %v730_v15  ;;  %v724_v42 = vadd.f32 %v14897_v18, %v685_v36  ;;  %v627_v6 = vld [vmem:[%s14865_s18 + $0x48] sm:$0xff]  ;;  %v13984_v36 = vld [vmem:[#allocation7 + $0xb8] sm:$0xff]  }
  0xf4   : > { %11525 = vmatprep.subr.bf16.mxu0 %v13957_v11  ;;  %13672 = vmatprep.subr.bf16.mxu1 %v13957_v11  ;;  %v818_v56 = vld [vmem:[#allocation2 + $0x128] sm:$0xff]  ;;  %v13970_v11 = vld [vmem:[#allocation7 + $0x90] sm:$0xff]   ;;  %764 = vst [vmem:[#allocation2 + $0x39] sm:$0xff] %v731_v16  ;;  %v701_v40 = vadd.f32 %v14897_v18, %v662_v34 }
  0xf5   : > { %v1766_v57 = vpack.c.bf16 %v818_v56, %v817_v55  ;;  %v795_v13 = vld [vmem:[#allocation2 + $0x18] sm:$0xff]  ;;  %v754_v19 = vmax.f32 %v722_v10, 0.0  ;;  %788 = vst [vmem:[#allocation2 + $0x159] sm:$0xff] %v755_v24  ;;  %v756_v46 = vmax.f32 %v724_v42, 0.0  ;;  %v624_v56 = vld [vmem:[%s14865_s18 + $0x30] sm:$0xff]  ;;  %v666_v10 = vmul.f32 %v14892_v17, %v627_v6  ;;  %v922_v42 = vld [vmem:[#allocation2 + $0xa] sm:$0xff] }
  0xf6   : > { %v733_v45 = vmax.f32 %v701_v40, 0.0  ;;  %v631_v40 = vld [vmem:[%s14865_s18 + $0x68] sm:$0xff] }
  0xf7   : > { %11526 = vmatpush3.bf16.msra.mxu0 %v13958_v21  ;;  %13680 = vmatpush3.bf16.msra.mxu1 %v13958_v21  ;;  %v796_v21 = vld [vmem:[#allocation2 + $0x20] sm:$0xff]  ;;  %787 = vst [vmem:[#allocation2 + $0x151] sm:$0xff] %v754_v19  ;;  %v1785_v33 = vpack.c.bf16 %v755_v24, %v754_v19  ;;  %789 = vst [vmem:[#allocation2 + $0x169] sm:$0xff] %v756_v46  ;;  %v705_v24 = vadd.f32 %v14897_v18, %v666_v10 }
  0xf8   : > { %11527 = vmatprep.subr.bf16.mxu0 %v13959_v22  ;;  %13673 = vmatprep.subr.bf16.mxu1 %v13959_v22  ;;  %v819_v22 = vld [vmem:[#allocation2 + $0x138] sm:$0xff]  ;;  %v820_v23 = vld [vmem:[#allocation2 + $0x140] sm:$0xff]  ;;  %v14932_v26 = vpack.c.bf16 %v796_v21, %v795_v13  ;;  %766 = vst [vmem:[#allocation2 + $0x51] sm:$0xff] %v733_v45 }
  0xf9   : > { %v14934_v27 = vpack.c.bf16 %v820_v23, %v819_v22  ;;  %v13981_v21 = vld [vmem:[#allocation7 + $0xb0] sm:$0xff]   ;;  %v13983_v22 = vld [vmem:[#allocation7 + $0xf8] sm:$0xff]   ;;  %v737_v34 = vmax.f32 %v705_v24, 0.0 }
  0xfb   : > { %11528 = vmatpush3.bf16.msra.mxu0 %v13960_v25  ;;  %13681 = vmatpush3.bf16.msra.mxu1 %v13960_v25  ;;  %v661_v25 = vmul.f32 %v14892_v17, %v622_v20  ;;  %v798_v49 = vld [vmem:[#allocation2 + $0x38] sm:$0xff]  ;;  %770 = vst [vmem:[#allocation2 + $0x81] sm:$0xff] %v737_v34 }
  0xfc   : > { %11529 = vmatprep.subr.bf16.mxu0 %v13961_v28  ;;  %13674 = vmatprep.subr.bf16.mxu1 %v13961_v28  ;;  %v14936_v28 = vpack.c.bf16 %v731_v16, %v730_v15  ;;  %v629_v15 = vld [vmem:[%s14865_s18 + $0x58] sm:$0xff] }
  0xfd   : > { %v700_v35 = vadd.f32 %v14897_v18, %v661_v25  ;;  %v668_v25 = vmul.f32 %v14892_v17, %v629_v15  ;;  %v13992_v15 = vld [vmem:[#allocation7 + $0x130] sm:$0xff]  }
  0xfe   : > { %v822_v53 = vld [vmem:[#allocation2 + $0x158] sm:$0xff]  ;;  %v823_v13 = vld [vmem:[#allocation2 + $0x168] sm:$0xff] }
  0xff   : > { %11530 = vmatpush3.bf16.msra.mxu0 %v13962_v31  ;;  %13682 = vmatpush3.bf16.msra.mxu1 %v13962_v31  ;;  %v647_v31 = vld [vmem:[%s14865_s18 + $0xe8] sm:$0xff] }
 0x100   : > { %11627 = vmatprep.subr.bf16.mxu1 %v13963_v41  ;;  %11739 = vmatprep.subr.bf16.mxu0 %v13964_v43  ;;  %v686_v37 = vmul.f32 %v14892_v17, %v647_v31  ;;  %v732_v41 = vmax.f32 %v700_v35, 0.0  ;;  %v14986_v35 = vadd.f32 %v14897_v18, %v668_v25  ;;  %v13993_v25 = vld [vmem:[#allocation7 + $0x178] sm:$0xff]  }
 0x102   : > { %2411 = vmatmul.mubr.bf16.vlgmr.msra.gmra.mrb[0].mxu0 %v1658_v50  ;;  %2507 = vmatmul.mubr.bf16.vlgmr.msra.gmra.mrb[0].mxu1 %v1766_v57  ;;  %v725_v43 = vadd.f32 %v14897_v18, %v686_v37  ;;  %765 = vst [vmem:[#allocation2 + $0x49] sm:$0xff] %v732_v41  ;;  %v821_v50 = vld [vmem:[#allocation2 + $0x150] sm:$0xff] }
 0x103   : > { %11628 = vmatpush3.bf16.msra.mxu1 %v13965_v47  ;;  %11740 = vmatpush3.bf16.msra.mxu0 %v13966_v48  ;;  %v797_v48 = vld [vmem:[#allocation2 + $0x30] sm:$0xff]  ;;  %v14956_v57 = vpack.c.bf16 %v822_v53, %v821_v50  ;;  %v632_v50 = vld [vmem:[%s14865_s18 + $0x70] sm:$0xff] }
 0x104   : > { %11629 = vmatprep.subr.bf16.mxu1 %v13967_v51  ;;  %2418 = vmatprep.mubr.bf16.mxu0 %v14915_v58  ;;  %v757_v47 = vmax.f32 %v725_v43, 0.0  ;;  %v14951_v51 = vpack.c.bf16 %v733_v45, %v732_v41  ;;  %v14953_v52 = vpack.c.bf16 %v798_v49, %v797_v48  ;;  %v921_v41 = vld [vmem:[#allocation2 + $0x2] sm:$0xff]  ;;  %v739_v43 = vmax.f32 %v14986_v35, 0.0  ;;  %v13990_v49 = vld [vmem:[#allocation7 + $0x128] sm:$0xff]  }
 0x105   : > { %2514 = vmatprep.mubr.bf16.mxu1 %v1776_v61  ;;  %11741 = vmatprep.subr.bf16.mxu0 %v13972_v59  ;;  %v13977_v59 = vld [vmem:[#allocation7 + $0xe8] sm:$0xff]   ;;  %v663_v61 = vmul.f32 %v14892_v17, %v624_v56  ;;  %v670_v45 = vmul.f32 %v14892_v17, %v631_v40  ;;  %v1660_v53 = vpack.c.bf16 %v922_v42, %v921_v41 }
 0x106   : > { %790 = vst [vmem:[#allocation2 + $0x171] sm:$0xff] %v757_v47  ;;  %v1794_v55 = vpack.c.bf16 %v757_v47, %v756_v46  ;;  %v13989_v46 = vld [vmem:[#allocation7 + $0x168] sm:$0xff]   ;;  %772 = vst [vmem:[#allocation2 + $0x99] sm:$0xff] %v739_v43  ;;  %v671_v56 = vmul.f32 %v14892_v17, %v632_v50 }
 0x107   : > { %11630 = vmatpush3.bf16.msra.mxu1 %v13968_v60  ;;  %11742 = vmatpush3.bf16.msra.mxu0 %v13974_v5  ;;  %v625_v60 = vld [vmem:[%s14865_s18 + $0x38] sm:$0xff]  ;;  %v702_v1 = vadd.f32 %v14897_v18, %v663_v61  ;;  %v626_v5 = vld [vmem:[%s14865_s18 + $0x40] sm:$0xff]  ;;  %v15006_v48 = vadd.f32 %v14897_v18, %v670_v45  ;;  %v639_v40 = vld [vmem:[%s14865_s18 + $0xa8] sm:$0xff] }
 0x108   : > { %11631 = vmatprep.subr.bf16.mxu1 %v13969_v7  ;;  %11743 = vmatprep.subr.bf16.mxu0 %v13980_v38  ;;  %v664_v63 = vmul.f32 %v14892_v17, %v625_v60  ;;  %v13979_v7 = vld [vmem:[#allocation7 + $0xf0] sm:$0xff]   ;;  %v665_v9 = vmul.f32 %v14892_v17, %v626_v5  ;;  %v13988_v38 = vld [vmem:[#allocation7 + $0x120] sm:$0xff]  }
 0x109   : > { %v799_v3 = vld [vmem:[#allocation2 + $0x48] sm:$0xff]  ;;  %v734_v8 = vmax.f32 %v702_v1, 0.0  ;;  %v800_v12 = vld [vmem:[#allocation2 + $0x50] sm:$0xff] }
 0x10a   : > { %2419 = vmatmul.mubr.bf16.gmra.mrb[4].mxu0 %v14932_v26  ;;  %2515 = vmatmul.mubr.bf16.gmra.mrb[4].mxu1 %v14934_v27  ;;  %v703_v4 = vadd.f32 %v14897_v18, %v664_v63  ;;  %v14973_v19 = vpack.c.bf16 %v800_v12, %v799_v3  ;;  %v704_v23 = vadd.f32 %v14897_v18, %v665_v9  ;;  %v635_v3 = vld [vmem:[%s14865_s18 + $0x88] sm:$0xff] }
 0x10b   : > { %11632 = vmatpush3.bf16.msra.mxu1 %v13970_v11  ;;  %2426 = vmatprep.mubr.bf16.mxu0 %v14936_v28  ;;  %v628_v11 = vld [vmem:[%s14865_s18 + $0x50] sm:$0xff]  ;;  %767 = vst [vmem:[#allocation2 + $0x61] sm:$0xff] %v734_v8  ;;  %v674_v5 = vmul.f32 %v14892_v17, %v635_v3  ;;  %v925_v50 = vld [vmem:[#allocation2 + $0x32] sm:$0xff] }
 0x10c   : > { %11633 = vmatprep.subr.bf16.mxu1 %v13971_v14  ;;  %2522 = vmatprep.mubr.bf16.mxu1 %v1785_v33  ;;  %v735_v14 = vmax.f32 %v703_v4, 0.0  ;;  %v667_v16 = vmul.f32 %v14892_v17, %v628_v11  ;;  %v736_v33 = vmax.f32 %v704_v23, 0.0 }
 0x10d   : > { %11744 = vmatpush3.bf16.msra.mxu0 %v13982_v44  ;;  %v824_v20 = vld [vmem:[#allocation2 + $0x170] sm:$0xff] }
 0x10e   : > { %11745 = vmatprep.subr.bf16.mxu0 %v13985_v0  ;;  %v14978_v29 = vpack.c.bf16 %v824_v20, %v823_v13  ;;  %768 = vst [vmem:[#allocation2 + $0x69] sm:$0xff] %v735_v14  ;;  %v14980_v30 = vpack.c.bf16 %v735_v14, %v734_v8  ;;  %v14983_v31 = vadd.f32 %v14897_v18, %v667_v16  ;;  %769 = vst [vmem:[#allocation2 + $0x79] sm:$0xff] %v736_v33  ;;  %v923_v8 = vld [vmem:[#allocation2 + $0x1a] sm:$0xff]  ;;  %v924_v16 = vld [vmem:[#allocation2 + $0x22] sm:$0xff] }
 0x10f   : > { %11634 = vmatpush3.bf16.msra.mxu1 %v13973_v32  ;;  %v13987_v32 = vld [vmem:[#allocation7 + $0x160] sm:$0xff]   ;;  %v15040_v13 = vadd.f32 %v14897_v18, %v674_v5  ;;  %v636_v20 = vld [vmem:[%s14865_s18 + $0x90] sm:$0xff] }
 0x110   : > { %11635 = vmatprep.subr.bf16.mxu1 %v13975_v39  ;;  %v738_v37 = vmax.f32 %v14983_v31, 0.0  ;;  %v630_v39 = vld [vmem:[%s14865_s18 + $0x60] sm:$0xff] }
 0x111   : > { %11746 = vmatpush3.bf16.msra.mxu0 %v13986_v2  ;;  %v669_v44 = vmul.f32 %v14892_v17, %v630_v39  ;;  %v15021_v2 = vadd.f32 %v14897_v18, %v671_v56  ;;  %v927_v5 = vld [vmem:[#allocation2 + $0x4a] sm:$0xff] }
 0x112   : > { %2427 = vmatmul.mubr.bf16.gmra.mrb[8].mxu0 %v14953_v52  ;;  %2523 = vmatmul.mubr.bf16.gmra.mrb[8].mxu1 %v14956_v57  ;;  %771 = vst [vmem:[#allocation2 + $0x91] sm:$0xff] %v738_v37 }
 0x113   : > { %2434 = vmatprep.mubr.bf16.mxu0 %v14951_v51  ;;  %11636 = vmatpush3.bf16.msra.mxu1 %v13976_v54  ;;  %v15003_v47 = vadd.f32 %v14897_v18, %v669_v44  ;;  %v15009_v54 = vpack.c.bf16 %v737_v34, %v736_v33  ;;  %v742_v9 = vmax.f32 %v15021_v2, 0.0  ;;  %v15063_v33 = vpack.c.bf16 %v739_v43, %v738_v37  ;;  %v13995_v44 = vld [vmem:[#allocation7 + $0x1c0] sm:$0xff]  }
 0x114   : > { %2530 = vmatprep.mubr.bf16.mxu1 %v1794_v55  ;;  %11637 = vmatprep.subr.bf16.mxu1 %v13977_v59  ;;  %v633_v55 = vld [vmem:[%s14865_s18 + $0x78] sm:$0xff]  ;;  %v634_v59 = vld [vmem:[%s14865_s18 + $0x80] sm:$0xff]  ;;  %v678_v37 = vmul.f32 %v14892_v17, %v639_v40 }
 0x115   : > { %11747 = vmatprep.subr.bf16.mxu0 %v13987_v32  ;;  %v802_v60 = vld [vmem:[#allocation2 + $0x68] sm:$0xff]  ;;  %v740_v61 = vmax.f32 %v15003_v47, 0.0  ;;  %v672_v63 = vmul.f32 %v14892_v17, %v633_v55  ;;  %v673_v0 = vmul.f32 %v14892_v17, %v634_v59  ;;  %v803_v10 = vld [vmem:[#allocation2 + $0x78] sm:$0xff]  ;;  %v804_v11 = vld [vmem:[#allocation2 + $0x80] sm:$0xff]  ;;  %775 = vst [vmem:[#allocation2 + $0xc1] sm:$0xff] %v742_v9  ;;  %v15057_v32 = vpack.c.bf16 %v924_v16, %v923_v8 }
 0x116   : > { %11748 = vmatpush3.bf16.msra.mxu0 %v13988_v38  ;;  %v15054_v23 = vpack.c.bf16 %v804_v11, %v803_v10  ;;  %v638_v38 = vld [vmem:[%s14865_s18 + $0xa0] sm:$0xff]  ;;  %v14002_v10 = vld [vmem:[#allocation7 + $0x190] sm:$0xff]   ;;  %v14004_v16 = vld [vmem:[#allocation7 + $0x1d8] sm:$0xff]  }
 0x117   : > { %11638 = vmatpush3.bf16.msra.mxu1 %v13978_v62  ;;  %11749 = vmatprep.subr.bf16.mxu0 %v13989_v46  ;;  %v741_v62 = vmax.f32 %v15006_v48, 0.0  ;;  %773 = vst [vmem:[#allocation2 + $0xa9] sm:$0xff] %v740_v61  ;;  %v15029_v4 = vadd.f32 %v14897_v18, %v672_v63  ;;  %v15033_v6 = vadd.f32 %v14897_v18, %v673_v0  ;;  %v15099_v59 = vld [vmem:[#allocation7 + $0x200] sm:$0xff]   ;;  %v13998_v63 = vld [vmem:[#allocation7 + $0x1c8] sm:$0xff]   ;;  %v929_v2 = vld [vmem:[#allocation2 + $0x62] sm:$0xff] }
 0x118   : > { %11639 = vmatprep.subr.bf16.mxu1 %v13979_v7  ;;  %v13991_v7 = vld [vmem:[#allocation7 + $0x170] sm:$0xff]   ;;  %v677_v41 = vmul.f32 %v14892_v17, %v638_v38  ;;  %v15088_v46 = vadd.f32 %v14897_v18, %v678_v37  ;;  %v13999_v0 = vld [vmem:[#allocation7 + $0x188] sm:$0xff]   ;;  %v649_v37 = vld [vmem:[%s14865_s18 + $0xf8] sm:$0xff] }
 0x119   : > { %774 = vst [vmem:[#allocation2 + $0xb1] sm:$0xff] %v741_v62  ;;  %v743_v12 = vmax.f32 %v15029_v4, 0.0  ;;  %v744_v14 = vmax.f32 %v15033_v6, 0.0  ;;  %v805_v31 = vld [vmem:[#allocation2 + $0x90] sm:$0xff]  ;;  %v806_v45 = vld [vmem:[#allocation2 + $0x98] sm:$0xff]  ;;  %v648_v38 = vld [vmem:[%s14865_s18 + $0xf0] sm:$0xff]  ;;  %v688_v6 = vmul.f32 %v14892_v17, %v649_v37 }
 0x11a   : > { %2435 = vmatmul.mubr.bf16.gmra.mrb[12].mxu0 %v14973_v19  ;;  %2531 = vmatmul.mubr.bf16.gmra.mrb[12].mxu1 %v14978_v29  ;;  %v15081_v43 = vadd.f32 %v14897_v18, %v677_v41  ;;  %v749_v55 = vmax.f32 %v15088_v46, 0.0  ;;  %v15095_v56 = vpack.c.bf16 %v806_v45, %v805_v31  ;;  %v928_v48 = vld [vmem:[#allocation2 + $0x52] sm:$0xff]  ;;  %v930_v4 = vld [vmem:[#allocation2 + $0x6a] sm:$0xff]  ;;  %v931_v31 = vld [vmem:[#allocation2 + $0x7a] sm:$0xff] }
 0x11b   : > { %2442 = vmatprep.mubr.bf16.mxu0 %v14980_v30  ;;  %11640 = vmatpush3.bf16.msra.mxu1 %v13981_v21  ;;  %v637_v21 = vld [vmem:[%s14865_s18 + $0x98] sm:$0xff]  ;;  %776 = vst [vmem:[#allocation2 + $0xc9] sm:$0xff] %v743_v12  ;;  %777 = vst [vmem:[#allocation2 + $0xd9] sm:$0xff] %v744_v14  ;;  %v15124_v8 = vpack.c.bf16 %v743_v12, %v742_v9  ;;  %v14006_v9 = vld [vmem:[#allocation7 + $0x1e0] sm:$0xff]   ;;  %v727_v45 = vadd.f32 %v14897_v18, %v688_v6  ;;  %s17462_s18 = sld [smem:[#allocation44_spill]] }
 0x11c   : > { %2571 = vmatprep.mubr.bf16.mxu1 %v14932_v26  ;;  %11641 = vmatprep.subr.bf16.mxu1 %v13983_v22  ;;  %v801_v26 = vld [vmem:[#allocation2 + $0x60] sm:$0xff]  ;;  %v745_v22 = vmax.f32 %v15040_v13, 0.0  ;;  %v676_v24 = vmul.f32 %v14892_v17, %v637_v21  ;;  %782 = vst [vmem:[#allocation2 + $0x111] sm:$0xff] %v749_v55  ;;  %v15132_v21 = vpack.c.bf16 %v930_v4, %v929_v2 }
 0x11d   : > { %v15018_v1 = vpack.c.bf16 %v802_v60, %v801_v26  ;;  %11750 = vmatpush3.bf16.msra.mxu0 %v13990_v49  ;;  %v13996_v49 = vld [vmem:[#allocation7 + $0x180] sm:$0xff]   ;;  %v926_v26 = vld [vmem:[#allocation2 + $0x3a] sm:$0xff]  ;;  %v945_v6 = vld [vmem:[#allocation2 + $0x122] sm:$0xff] }
 0x11e   : > { %11751 = vmatprep.subr.bf16.mxu0 %v13991_v7  ;;  %778 = vst [vmem:[#allocation2 + $0xe1] sm:$0xff] %v745_v22  ;;  %v15072_v39 = vadd.f32 %v14897_v18, %v676_v24  ;;  %v15101_v60 = vpack.c.bf16 %v926_v26, %v925_v50  ;;  %v807_v3 = vld [vmem:[#allocation2 + $0xa8] sm:$0xff]  ;;  %v15118_v7 = vpack.c.bf16 %v928_v48, %v927_v5  ;;  %v809_v11 = vld [vmem:[#allocation2 + $0xc0] sm:$0xff]  ;;  %v14008_v24 = vld [vmem:[#allocation7 + $0x1a0] sm:$0xff]  }
 0x11f   : > { %11642 = vmatpush3.bf16.msra.mxu1 %v13984_v36  ;;  %v13994_v36 = vld [vmem:[#allocation7 + $0x138] sm:$0xff]   ;;  %v14011_v13 = vld [vmem:[#allocation7 + $0x1f0] sm:$0xff]  }
 0x120   : > { %v747_v42 = vmax.f32 %v15072_v39, 0.0  ;;  %11851 = vmatprep.subr.bf16.mxu1 %v13995_v44  ;;  %v808_v47 = vld [vmem:[#allocation2 + $0xb0] sm:$0xff]  ;;  %v687_v44 = vmul.f32 %v14892_v17, %v648_v38  ;;  %v934_v39 = vld [vmem:[#allocation2 + $0x9a] sm:$0xff] }
 0x121   : > { %11752 = vmatpush3.bf16.msra.mxu0 %v13992_v15  ;;  %v14015_v38 = vld [vmem:[#allocation7 + $0x220] sm:$0xff]  }
 0x122   : > { %2443 = vmatmul.mubr.bf16.gmra.mrb[16].mxu0 %v15018_v1  ;;  %2572 = vmatmul.mubr.bf16.vlgmr.msra.gmra.mrb[16].mxu1 %v1660_v53  ;;  %780 = vst [vmem:[#allocation2 + $0xf9] sm:$0xff] %v747_v42  ;;  %v748_v53 = vmax.f32 %v15081_v43, 0.0  ;;  %v810_v15 = vld [vmem:[#allocation2 + $0xc8] sm:$0xff]  ;;  %v811_v40 = vld [vmem:[#allocation2 + $0xd8] sm:$0xff] }
 0x123   : > { %2450 = vmatprep.mubr.bf16.mxu0 %v15009_v54  ;;  %2579 = vmatprep.mubr.bf16.mxu1 %v14953_v52  ;;  %v675_v52 = vmul.f32 %v14892_v17, %v636_v20  ;;  %v14005_v20 = vld [vmem:[#allocation7 + $0x198] sm:$0xff]   ;;  %v15130_v12 = vpack.c.bf16 %v810_v15, %v809_v11  ;;  %v936_v11 = vld [vmem:[#allocation2 + $0xb2] sm:$0xff] }
 0x124   : > { %11753 = vmatprep.subr.bf16.mxu0 %v13993_v25  ;;  %11852 = vmatpush3.bf16.msra.mxu1 %v13996_v49  ;;  %781 = vst [vmem:[#allocation2 + $0x109] sm:$0xff] %v748_v53  ;;  %v14009_v25 = vld [vmem:[#allocation7 + $0x1e8] sm:$0xff]   ;;  %v14012_v49 = vld [vmem:[#allocation7 + $0x1b0] sm:$0xff]   ;;  %v15172_v48 = vpack.c.bf16 %v749_v55, %v748_v53  ;;  %v938_v46 = vld [vmem:[#allocation2 + $0xca] sm:$0xff] }
 0x125   : > { %v15068_v34 = vadd.f32 %v14897_v18, %v675_v52  ;;  %11754 = vmatpush3.bf16.msra.mxu0 %v13994_v36  ;;  %11853 = vmatprep.subr.bf16.mxu1 %v13998_v63  ;;  %v15138_v52 = vpack.c.bf16 %v745_v22, %v744_v14  ;;  %v14010_v36 = vld [vmem:[#allocation7 + $0x1a8] sm:$0xff]   ;;  %v812_v41 = vld [vmem:[#allocation2 + $0xe0] sm:$0xff]  ;;  %v726_v22 = vadd.f32 %v14897_v18, %v687_v44  ;;  %v14013_v63 = vld [vmem:[#allocation7 + $0x1f8] sm:$0xff]  }
 0x126   : > { %13427 = vmatprep.subr.bf16.mxu0 %v15099_v59  ;;  %v932_v14 = vld [vmem:[#allocation2 + $0x82] sm:$0xff]  ;;  %v15150_v50 = vpack.c.bf16 %v812_v41, %v811_v40  ;;  %v14000_v55 = vld [vmem:[#allocation7 + $0x208] sm:$0xff]  }
 0x127   : > { %v746_v35 = vmax.f32 %v15068_v34, 0.0  ;;  %v758_v26 = vmax.f32 %v726_v22, 0.0  ;;  %v933_v34 = vld [vmem:[#allocation2 + $0x92] sm:$0xff]  ;;  %v937_v43 = vld [vmem:[#allocation2 + $0xc2] sm:$0xff]  ;;  %v939_v2 = vld [vmem:[#allocation2 + $0xda] sm:$0xff] }
 0x128   : > { %11854 = vmatpush3.bf16.msra.mxu1 %v13999_v0  ;;  %v15152_v0 = vpack.c.bf16 %v932_v14, %v931_v31  ;;  %v15186_v53 = vpack.c.bf16 %v938_v46, %v937_v43  ;;  %v940_v4 = vld [vmem:[#allocation2 + $0xe2] sm:$0xff]  ;;  %v14016_v40 = vld [vmem:[#allocation7 + $0x228] sm:$0xff]  }
 0x129   : > { %779 = vst [vmem:[#allocation2 + $0xf1] sm:$0xff] %v746_v35  ;;  %v15158_v17 = vpack.c.bf16 %v747_v42, %v746_v35  ;;  %791 = vst [vmem:[#allocation2 + $0x181] sm:$0xff] %v758_v26  ;;  %v15166_v42 = vpack.c.bf16 %v934_v39, %v933_v34  ;;  %v944_v31 = vld [vmem:[#allocation2 + $0x112] sm:$0xff]  ;;  %v14018_v44 = vld [vmem:[#allocation7 + $0x238] sm:$0xff]  }
 0x12a   : > { %2451 = vmatmul.mubr.bf16.gmra.mrb[20].mxu0 %v15054_v23  ;;  %2580 = vmatmul.mubr.bf16.gmra.mrb[20].mxu1 %v15057_v32  ;;  %v948_v14 = vld [vmem:[#allocation2 + $0x142] sm:$0xff]  ;;  %v1243_v34 = vld [vmem:[#allocation2 + $0x39] sm:$0xff] }
 0x12b   : > { %2458 = vmatprep.mubr.bf16.mxu0 %v15063_v33  ;;  %2587 = vmatprep.mubr.bf16.mxu1 %v14973_v19  ;;  %v15107_v19 = vpack.c.bf16 %v741_v62, %v740_v61  ;;  %v14001_v61 = vld [vmem:[#allocation7 + $0x1d0] sm:$0xff]   ;;  %v15116_v62 = vpack.c.bf16 %v808_v47, %v807_v3  ;;  %v759_v3 = vmax.f32 %v727_v45, 0.0  ;;  %v14014_v47 = vld [vmem:[#allocation7 + $0x1b8] sm:$0xff]   ;;  %v816_v15 = vld [vmem:[#allocation2 + $0x110] sm:$0xff] }
 0x12c   : > { %11855 = vmatprep.subr.bf16.mxu1 %v14001_v61  ;;  %v815_v61 = vld [vmem:[#allocation2 + $0x108] sm:$0xff]  ;;  %v950_v45 = vld [vmem:[#allocation2 + $0x15a] sm:$0xff] }
 0x12d   : > { %11856 = vmatpush3.bf16.msra.mxu1 %v14002_v10  ;;  %792 = vst [vmem:[#allocation2 + $0x189] sm:$0xff] %v759_v3  ;;  %v935_v10 = vld [vmem:[#allocation2 + $0xaa] sm:$0xff]  ;;  %v14020_v46 = vld [vmem:[#allocation10 + $0x8] sm:$0xff]  }
 0x12e   : > { %11857 = vmatprep.subr.bf16.mxu1 %v14004_v16  ;;  %v15178_v16 = vpack.c.bf16 %v816_v15, %v815_v61  ;;  %v1178_v61 = vld [vmem:[#allocation2 + $0x30] sm:$0xff] }
 0x12f   : > { %v1245_v15 = vld [vmem:[#allocation2 + $0x51] sm:$0xff] }
 0x130   : > { %v813_v18 = vld [vmem:[#allocation2 + $0xf0] sm:$0xff]  ;;  %v814_v5 = vld [vmem:[#allocation2 + $0xf8] sm:$0xff] }
 0x131   : > { %11858 = vmatpush3.bf16.msra.mxu1 %v14005_v20  ;;  %v15164_v35 = vpack.c.bf16 %v814_v5, %v813_v18  ;;  %v15180_v20 = vpack.c.bf16 %v936_v11, %v935_v10  ;;  %v952_v18 = vld [vmem:[#allocation2 + $0x172] sm:$0xff]  ;;  %v1244_v11 = vld [vmem:[#allocation2 + $0x49] sm:$0xff] }
 0x132   : > { %2459 = vmatmul.mubr.bf16.gmra.mrb[24].mxu0 %v15095_v56  ;;  %2588 = vmatmul.mubr.bf16.gmra.mrb[24].mxu1 %v15101_v60  ;;  %v1242_v5 = vld [vmem:[#allocation2 + $0x31] sm:$0xff] }
 0x133   : > { %2466 = vmatprep.mubr.bf16.mxu0 %v15107_v19  ;;  %2595 = vmatprep.mubr.bf16.mxu1 %v15018_v1  ;;  %v1179_v10 = vld [vmem:[#allocation2 + $0x38] sm:$0xff] }
 0x134   : > { %11859 = vmatprep.subr.bf16.mxu1 %v14006_v9  ;;  %v14003_v9 = vld [vmem:[#allocation7 + $0x210] sm:$0xff]   ;;  %v1016_v26 = vld [vmem:[#allocation2 + $0x188] sm:$0xff]  ;;  %v1664_v43 = vpack.c.bf16 %v1179_v10, %v1178_v61  ;;  %v1309_v61 = vld [vmem:[#allocation2 + $0x52] sm:$0xff] }
 0x135   : > { %11860 = vmatpush3.bf16.msra.mxu1 %v14008_v24  ;;  %v14007_v24 = vld [vmem:[#allocation7 + $0x218] sm:$0xff]  }
 0x136   : > { %11861 = vmatprep.subr.bf16.mxu1 %v14009_v25  ;;  %v942_v25 = vld [vmem:[#allocation2 + $0xfa] sm:$0xff] }
 0x139   : > { %11862 = vmatpush3.bf16.msra.mxu1 %v14010_v36  ;;  %v1007_v36 = vld [vmem:[#allocation2 + $0x120] sm:$0xff] }
 0x13a   : > { %2467 = vmatmul.mubr.bf16.gmra.mrb[28].mxu0 %v15116_v62  ;;  %2596 = vmatmul.mubr.bf16.gmra.mrb[28].mxu1 %v15118_v7 }
 0x13b   : > { %2474 = vmatprep.mubr.bf16.mxu0 %v15124_v8  ;;  %2603 = vmatprep.mubr.bf16.mxu1 %v15054_v23 }
 0x13c   : > { %11863 = vmatprep.subr.bf16.mxu1 %v14011_v13  ;;  %v947_v13 = vld [vmem:[#allocation2 + $0x13a] sm:$0xff] }
 0x13d   : > { %11864 = vmatpush3.bf16.msra.mxu1 %v14012_v49  ;;  %v15219_v22 = vpack.c.bf16 %v948_v14, %v947_v13  ;;  %v1015_v49 = vld [vmem:[#allocation2 + $0x180] sm:$0xff] }
 0x13e   : > { %11865 = vmatprep.subr.bf16.mxu1 %v14013_v63  ;;  %v14019_v63 = vld [vmem:[#allocation10] sm:$0xff]   ;;  %v14243_v14 = vld [vmem:[#allocation2 + $0x181] sm:$0xff] }
 0x141   : > { %11866 = vmatpush3.bf16.msra.mxu1 %v14014_v47  ;;  %v15227_v47 = vpack.c.bf16 %v1016_v26, %v1015_v49 }
 0x142   : > { %2475 = vmatmul.mubr.bf16.gmra.mrb[32].mxu0 %v15130_v12  ;;  %2604 = vmatmul.mubr.bf16.gmra.mrb[32].mxu1 %v15132_v21 }
 0x143   : > { %2482 = vmatprep.mubr.bf16.mxu0 %v15138_v52  ;;  %2611 = vmatprep.mubr.bf16.mxu1 %v15095_v56 }
 0x144   : > { %13475 = vmatprep.subr.bf16.mxu1 %v14019_v63 }
 0x14a   : > { %2483 = vmatmul.mubr.bf16.gmra.mrb[36].mxu0 %v15150_v50  ;;  %2612 = vmatmul.mubr.bf16.gmra.mrb[36].mxu1 %v15152_v0 }
 0x14b   : > { %2490 = vmatprep.mubr.bf16.mxu0 %v15158_v17  ;;  %2619 = vmatprep.mubr.bf16.mxu1 %v15116_v62 }
 0x152   : > { %2491 = vmatmul.mubr.bf16.gmra.mrb[40].mxu0 %v15164_v35  ;;  %2620 = vmatmul.mubr.bf16.gmra.mrb[40].mxu1 %v15166_v42 }
 0x153   : > { %2498 = vmatprep.mubr.bf16.mxu0 %v15172_v48  ;;  %2627 = vmatprep.mubr.bf16.mxu1 %v15130_v12 }
 0x15a   : > { %2499 = vmatmul.mubr.bf16.gmra.mrb[44].mxu0 %v15178_v16  ;;  %2628 = vmatmul.mubr.bf16.gmra.mrb[44].mxu1 %v15180_v20 }
 0x15b   : > { %2732 = vmatprep.mubr.bf16.mxu0 %v15057_v32  ;;  %2635 = vmatprep.mubr.bf16.mxu1 %v15150_v50  ;;  %v15193_v32 = vpack.c.bf16 %v940_v4, %v939_v2  ;;  %v1180_v2 = vld [vmem:[#allocation2 + $0x48] sm:$0xff]  ;;  %v1181_v4 = vld [vmem:[#allocation2 + $0x50] sm:$0xff] }
 0x162   : > { %2733 = vmatmul.mubr.bf16.vlgmr.msra.gmra.mrb[48].mxu0 %v14915_v58  ;;  %2636 = vmatmul.mubr.bf16.gmra.mrb[48].mxu1 %v15186_v53  ;;  %v941_v58 = vld [vmem:[#allocation2 + $0xf2] sm:$0xff] }
 0x163   : > { %13428 = vmatpush3.bf16.msra.mxu0 %v15099_v59  ;;  %2643 = vmatprep.mubr.bf16.mxu1 %v15164_v35  ;;  %v1008_v59 = vld [vmem:[#allocation2 + $0x128] sm:$0xff] }
 0x164   : > { %2740 = vmatprep.mubr.bf16.mxu0 %v15101_v60  ;;  %13429 = vmatprep.subr.bf16.mxu0 %v14000_v55  ;;  %v15199_v60 = vpack.c.bf16 %v942_v25, %v941_v58  ;;  %v15201_v41 = vpack.c.bf16 %v1008_v59, %v1007_v36  ;;  %v1071_v58 = vld [vmem:[#allocation2 + $0x121] sm:$0xff]  ;;  %v1072_v25 = vld [vmem:[#allocation2 + $0x129] sm:$0xff]  ;;  %v1073_v59 = vld [vmem:[#allocation2 + $0x139] sm:$0xff] }
 0x165   : > { %v15247_v36 = vpack.c.bf16 %v1072_v25, %v1071_v58 }
 0x167   : > { %13430 = vmatpush3.bf16.msra.mxu0 %v14000_v55  ;;  %v1674_v55 = vpack.c.bf16 %v1245_v15, %v1244_v11  ;;  %v1310_v11 = vld [vmem:[#allocation2 + $0x62] sm:$0xff]  ;;  %v1311_v15 = vld [vmem:[#allocation2 + $0x6a] sm:$0xff] }
 0x168   : > { %13431 = vmatprep.subr.bf16.mxu0 %v14003_v9  ;;  %v1684_v25 = vpack.c.bf16 %v1311_v15, %v1310_v11 }
 0x16a   : > { %2741 = vmatmul.mubr.bf16.gmra.mrb[52].mxu0 %v14936_v28  ;;  %2644 = vmatmul.mubr.bf16.gmra.mrb[52].mxu1 %v15193_v32  ;;  %v943_v28 = vld [vmem:[#allocation2 + $0x10a] sm:$0xff] }
 0x16b   : > { %2748 = vmatprep.mubr.bf16.mxu0 %v15118_v7  ;;  %2651 = vmatprep.mubr.bf16.mxu1 %v15178_v16  ;;  %v14017_v7 = vld [vmem:[#allocation7 + $0x230] sm:$0xff]   ;;  %v15207_v37 = vpack.c.bf16 %v944_v31, %v943_v28  ;;  %v1078_v31 = vld [vmem:[#allocation2 + $0x171] sm:$0xff] }
 0x16c   : > { %13432 = vmatpush3.bf16.msra.mxu0 %v14003_v9  ;;  %v1673_v9 = vpack.c.bf16 %v1181_v4, %v1180_v2  ;;  %v1076_v28 = vld [vmem:[#allocation2 + $0x159] sm:$0xff] }
 0x16d   : > { %13433 = vmatprep.subr.bf16.mxu0 %v14007_v24 }
 0x170   : > { %13434 = vmatpush3.bf16.msra.mxu0 %v14007_v24  ;;  %v14021_v24 = vld [vmem:[#allocation10 + $0x10] sm:$0xff]  }
 0x171   : > { %13435 = vmatprep.subr.bf16.mxu0 %v14015_v38 }
 0x172   : > { %2749 = vmatmul.mubr.bf16.gmra.mrb[56].mxu0 %v14951_v51  ;;  %2652 = vmatmul.mubr.bf16.gmra.mrb[56].mxu1 %v15199_v60  ;;  %v946_v51 = vld [vmem:[#allocation2 + $0x12a] sm:$0xff] }
 0x173   : > { %2756 = vmatprep.mubr.bf16.mxu0 %v15132_v21  ;;  %2659 = vmatprep.mubr.bf16.mxu1 %v15201_v41  ;;  %v15213_v21 = vpack.c.bf16 %v946_v51, %v945_v6  ;;  %v1307_v51 = vld [vmem:[#allocation2 + $0x3a] sm:$0xff] }
 0x174   : > { %13436 = vmatpush3.bf16.msra.mxu0 %v14015_v38  ;;  %v1074_v38 = vld [vmem:[#allocation2 + $0x141] sm:$0xff] }
 0x175   : > { %13437 = vmatprep.subr.bf16.mxu0 %v14016_v40 }
 0x178   : > { %13438 = vmatpush3.bf16.msra.mxu0 %v14016_v40  ;;  %v15253_v40 = vpack.c.bf16 %v1074_v38, %v1073_v59 }
 0x179   : > { %13439 = vmatprep.subr.bf16.mxu0 %v14017_v7 }
 0x17a   : > { %2757 = vmatmul.mubr.bf16.gmra.mrb[60].mxu0 %v14980_v30  ;;  %2660 = vmatmul.mubr.bf16.gmra.mrb[60].mxu1 %v15207_v37 }
 0x17b   : > { %2764 = vmatprep.mubr.bf16.mxu0 %v15152_v0  ;;  %2667 = vmatprep.mubr.bf16.mxu1 %v14934_v27  ;;  %v949_v27 = vld [vmem:[#allocation2 + $0x152] sm:$0xff] }
 0x17c   : > { %13440 = vmatpush3.bf16.msra.mxu0 %v14017_v7  ;;  %v15225_v3 = vpack.c.bf16 %v950_v45, %v949_v27  ;;  %v1144_v7 = vld [vmem:[#allocation2 + $0x18a] sm:$0xff] }
 0x17d   : > { %13441 = vmatprep.subr.bf16.mxu0 %v14018_v44  ;;  %v14244_v27 = vld [vmem:[#allocation2 + $0x189] sm:$0xff] }
 0x17e   : > { %v15273_v45 = vpack.c.bf16 %v14244_v27, %v14243_v14 }
 0x180   : > { %13442 = vmatpush3.bf16.msra.mxu0 %v14018_v44  ;;  %v14023_v44 = vld [vmem:[#allocation10 + $0x20] sm:$0xff]  }
 0x182   : > { %2765 = vmatmul.mubr.bf16.gmra.mrb[64].mxu0 %v15009_v54  ;;  %2668 = vmatmul.mubr.bf16.gmra.mrb[64].mxu1 %v15213_v21 }
 0x183   : > { %2772 = vmatprep.mubr.bf16.mxu0 %v15166_v42  ;;  %2675 = vmatprep.mubr.bf16.mxu1 %v14956_v57  ;;  %v951_v57 = vld [vmem:[#allocation2 + $0x16a] sm:$0xff] }
 0x184   : > { %v15233_v39 = vpack.c.bf16 %v952_v18, %v951_v57 }
 0x18a   : > { %2773 = vmatmul.mubr.bf16.gmra.mrb[68].mxu0 %v15063_v33  ;;  %2676 = vmatmul.mubr.bf16.gmra.mrb[68].mxu1 %v15219_v22 }
 0x18b   : > { %2780 = vmatprep.mubr.bf16.mxu0 %v15180_v20  ;;  %2683 = vmatprep.mubr.bf16.mxu1 %v14978_v29  ;;  %v1665_v29 = vpack.c.bf16 %v1243_v34, %v1242_v5 }
 0x192   : > { %2781 = vmatmul.mubr.bf16.gmra.mrb[72].mxu0 %v15107_v19  ;;  %2684 = vmatmul.mubr.bf16.gmra.mrb[72].mxu1 %v15225_v3 }
 0x193   : > { %2788 = vmatprep.mubr.bf16.mxu0 %v15186_v53  ;;  %2691 = vmatprep.mubr.bf16.mxu1 %v15227_v47 }
 0x19a   : > { %2789 = vmatmul.mubr.bf16.gmra.mrb[76].mxu0 %v15124_v8  ;;  %2692 = vmatmul.mubr.bf16.gmra.mrb[76].mxu1 %v15233_v39 }
 0x19b   : > { %2796 = vmatprep.mubr.bf16.mxu0 %v15193_v32  ;;  %2893 = vmatprep.mubr.bf16.mxu1 %v1665_v29 }
 0x1a2   : > { %2797 = vmatmul.mubr.bf16.gmra.mrb[80].mxu0 %v15138_v52  ;;  %2894 = vmatmul.mubr.bf16.vlgmr.msra.gmra.mrb[80].mxu1 %v1664_v43  ;;  %v14024_v43 = vld [vmem:[#allocation10 + $0x28] sm:$0xff]  }
 0x1a3   : > { %2804 = vmatprep.mubr.bf16.mxu0 %v15199_v60  ;;  %2901 = vmatprep.mubr.bf16.mxu1 %v1674_v55 }
 0x1a4   : > { %13476 = vmatpush3.bf16.msra.mxu1 %v14019_v63 }
 0x1a5   : > { %13477 = vmatprep.subr.bf16.mxu1 %v14020_v46 }
 0x1a8   : > { %13478 = vmatpush3.bf16.msra.mxu1 %v14020_v46 }
 0x1a9   : > { %13479 = vmatprep.subr.bf16.mxu1 %v14021_v24 }
 0x1aa   : > { %2805 = vmatmul.mubr.bf16.gmra.mrb[84].mxu0 %v15158_v17  ;;  %2902 = vmatmul.mubr.bf16.gmra.mrb[84].mxu1 %v1673_v9 }
 0x1ab   : > { %2812 = vmatprep.mubr.bf16.mxu0 %v15207_v37  ;;  %2909 = vmatprep.mubr.bf16.mxu1 %v14980_v30  ;;  %v14022_v30 = vld [vmem:[#allocation10 + $0x18] sm:$0xff]  }
 0x1ac   : > { %13480 = vmatpush3.bf16.msra.mxu1 %v14021_v24 }
 0x1ad   : > { %13481 = vmatprep.subr.bf16.mxu1 %v14022_v30 }
 0x1b0   : > { %13482 = vmatpush3.bf16.msra.mxu1 %v14022_v30 }
 0x1b1   : > { %13483 = vmatprep.subr.bf16.mxu1 %v14023_v44 }
 0x1b2   : > { %2813 = vmatmul.mubr.bf16.gmra.mrb[88].mxu0 %v15172_v48  ;;  %2910 = vmatmul.mubr.bf16.gmra.mrb[88].mxu1 %v15018_v1  ;;  %v1075_v1 = vld [vmem:[#allocation2 + $0x151] sm:$0xff] }
 0x1b3   : > { %2820 = vmatprep.mubr.bf16.mxu0 %v15213_v21  ;;  %2917 = vmatprep.mubr.bf16.mxu1 %v15009_v54  ;;  %v15259_v54 = vpack.c.bf16 %v1076_v28, %v1075_v1 }
 0x1b4   : > { %13484 = vmatpush3.bf16.msra.mxu1 %v14023_v44 }
 0x1b5   : > { %13485 = vmatprep.subr.bf16.mxu1 %v14024_v43 }
 0x1b8   : > { %13486 = vmatpush3.bf16.msra.mxu1 %v14024_v43 }
 0x1ba   : > { %2821 = vmatmul.mubr.bf16.gmra.mrb[92].mxu0 %v15247_v36  ;;  %2918 = vmatmul.mubr.bf16.gmra.mrb[92].mxu1 %v15054_v23  ;;  %v1077_v23 = vld [vmem:[#allocation2 + $0x169] sm:$0xff] }
 0x1bb   : > { %2828 = vmatprep.mubr.bf16.mxu0 %v15219_v22  ;;  %2925 = vmatprep.mubr.bf16.mxu1 %v15063_v33  ;;  %v1143_v33 = vld [vmem:[#allocation2 + $0x182] sm:$0xff] }
 0x1bc   : > { %v15267_v6 = vpack.c.bf16 %v1144_v7, %v1143_v33 }
 0x1c2   : > { %2829 = vmatmul.mubr.bf16.gmra.mrb[96].mxu0 %v15253_v40  ;;  %2926 = vmatmul.mubr.bf16.gmra.mrb[96].mxu1 %v15095_v56  ;;  %v15265_v56 = vpack.c.bf16 %v1078_v31, %v1077_v23 }
 0x1c3   : > { %2836 = vmatprep.mubr.bf16.mxu0 %v15225_v3  ;;  %2933 = vmatprep.mubr.bf16.mxu1 %v15107_v19  ;;  %v1306_v19 = vld [vmem:[#allocation2 + $0x32] sm:$0xff] }
 0x1c4   : > { %v1666_v57 = vpack.c.bf16 %v1307_v51, %v1306_v19 }
 0x1ca   : > { %2837 = vmatmul.mubr.bf16.gmra.mrb[100].mxu0 %v15259_v54  ;;  %2934 = vmatmul.mubr.bf16.gmra.mrb[100].mxu1 %v15116_v62 }
 0x1cb   : > { %2844 = vmatprep.mubr.bf16.mxu0 %v15233_v39  ;;  %2941 = vmatprep.mubr.bf16.mxu1 %v15124_v8 }
 0x1d2   : > { %2845 = vmatmul.mubr.bf16.gmra.mrb[104].mxu0 %v15265_v56  ;;  %2942 = vmatmul.mubr.bf16.gmra.mrb[104].mxu1 %v15130_v12 }
 0x1d3   : > { %2852 = vmatprep.mubr.bf16.mxu0 %v15267_v6  ;;  %2949 = vmatprep.mubr.bf16.mxu1 %v15138_v52  ;;  %v1308_v52 = vld [vmem:[#allocation2 + $0x4a] sm:$0xff] }
 0x1d4   : > { %v1675_v4 = vpack.c.bf16 %v1309_v61, %v1308_v52  ;;  %v1201_v61 = vld [vmem:[#allocation2 + $0x140] sm:$0xff] }
 0x1d5   : > { %v11531_v62 = vpop.f32.mrb[0].mxu0  ;;  %v11603_v13 = vpop.f32.mrb[0].mxu1 }
 0x1d6   : > { %v11532_v8 = vpop.f32.mrb[1].mxu0  ;;  %v11604_v49 = vpop.f32.mrb[1].mxu1 }
 0x1d7   : > { %v15275_v26 = vadd.f32 %v11532_v8, %v11531_v62  ;;  %v11534_v63 = vpop.f32.mrb[2].mxu0  ;;  %v15277_v18 = vadd.f32 %v11604_v49, %v11603_v13  ;;  %v11606_v5 = vpop.f32.mrb[2].mxu1 }
 0x1d8   : > { %v11535_v12 = vpop.f32.mrb[3].mxu0  ;;  %v11607_v34 = vpop.f32.mrb[3].mxu1 }
 0x1d9   : > { %v15279_v29 = vadd.f32 %v11535_v12, %v11534_v63  ;;  %v15281_v10 = vadd.f32 %v11607_v34, %v11606_v5 }
 0x1da   : > { %2853 = vmatmul.mubr.bf16.gmra.mrb[108].mxu0 %v15273_v45  ;;  %2950 = vmatmul.mubr.bf16.gmra.mrb[108].mxu1 %v15150_v50 }
 0x1db   : > { %13443 = vmatprep.mubr.bf16.mxu0 %v1666_v57  ;;  %2957 = vmatprep.mubr.bf16.mxu1 %v15158_v17 }
 0x1dd   : > { %v11537_v46 = vpop.f32.mrb[4].mxu0  ;;  %v11609_v55 = vpop.f32.mrb[4].mxu1 }
 0x1de   : > { %v11538_v2 = vpop.f32.mrb[5].mxu0  ;;  %v11610_v9 = vpop.f32.mrb[5].mxu1 }
 0x1df   : > { %v15286_v24 = vadd.f32 %v11538_v2, %v11537_v46  ;;  %v11540_v58 = vpop.f32.mrb[6].mxu0  ;;  %v15288_v59 = vadd.f32 %v11610_v9, %v11609_v55  ;;  %v11612_v38 = vpop.f32.mrb[6].mxu1 }
 0x1e0   : > { %v11541_v30 = vpop.f32.mrb[7].mxu0  ;;  %v11613_v50 = vpop.f32.mrb[7].mxu1 }
 0x1e1   : > { %v15290_v1 = vadd.f32 %v11541_v30, %v11540_v58  ;;  %v15292_v17 = vadd.f32 %v11613_v50, %v11612_v38  ;;  %v1202_v50 = vld [vmem:[#allocation2 + $0x150] sm:$0xff] }
 0x1e2   : > { %13444 = vmatmul.mubr.bf16.vlgmr.msra.gmra.mrb[112].mxu0 %v1675_v4  ;;  %2958 = vmatmul.mubr.bf16.gmra.mrb[112].mxu1 %v15164_v35 }
 0x1e3   : > { %13447 = vmatprep.mubr.bf16.mxu0 %v1684_v25  ;;  %2965 = vmatprep.mubr.bf16.mxu1 %v15172_v48  ;;  %v14025_v48 = vld [vmem:[#allocation10 + $0x30] sm:$0xff]  }
 0x1e4   : > { %13487 = vmatprep.subr.bf16.mxu1 %v14025_v48 }
 0x1e5   : > { %v11543_v28 = vpop.f32.mrb[8].mxu0  ;;  %v11615_v31 = vpop.f32.mrb[8].mxu1  ;;  %13488 = vmatpush3.bf16.msra.mxu1 %v14025_v48 }
 0x1e6   : > { %v11544_v23 = vpop.f32.mrb[9].mxu0  ;;  %v11616_v44 = vpop.f32.mrb[9].mxu1 }
 0x1e7   : > { %v15296_v33 = vadd.f32 %v11544_v23, %v11543_v28  ;;  %v11546_v7 = vpop.f32.mrb[10].mxu0  ;;  %v15298_v51 = vadd.f32 %v11616_v44, %v11615_v31  ;;  %v11618_v62 = vpop.f32.mrb[10].mxu1  ;;  %v1203_v28 = vld [vmem:[#allocation2 + $0x158] sm:$0xff] }
 0x1e8   : > { %v11547_v19 = vpop.f32.mrb[11].mxu0  ;;  %v11619_v8 = vpop.f32.mrb[11].mxu1 }
 0x1e9   : > { %v15300_v13 = vadd.f32 %v11547_v19, %v11546_v7  ;;  %v15303_v35 = vadd.f32 %v11619_v8, %v11618_v62  ;;  %v1772_v19 = vpack.c.bf16 %v1203_v28, %v1202_v50 }
 0x1ea   : > { %13448 = vmatmul.mubr.bf16.gmra.mrb[116].mxu0 %v15152_v0  ;;  %2966 = vmatmul.mubr.bf16.gmra.mrb[116].mxu1 %v15178_v16 }
 0x1eb   : > { %13451 = vmatprep.mubr.bf16.mxu0 %v15166_v42  ;;  %2973 = vmatprep.mubr.bf16.mxu1 %v15247_v36  ;;  %v1200_v36 = vld [vmem:[#allocation2 + $0x138] sm:$0xff] }
 0x1ec   : > { %v1763_v4 = vpack.c.bf16 %v1201_v61, %v1200_v36 }
 0x1ed   : > { %v11549_v14 = vpop.f32.mrb[12].mxu0  ;;  %v11621_v49 = vpop.f32.mrb[12].mxu1 }
 0x1ee   : > { %v11550_v27 = vpop.f32.mrb[13].mxu0  ;;  %v11622_v5 = vpop.f32.mrb[13].mxu1 }
 0x1ef   : > { %v15308_v63 = vadd.f32 %v11550_v27, %v11549_v14  ;;  %v11552_v57 = vpop.f32.mrb[14].mxu0  ;;  %v15310_v0 = vadd.f32 %v11622_v5, %v11621_v49  ;;  %v11624_v34 = vpop.f32.mrb[14].mxu1  ;;  %v1204_v49 = vld [vmem:[#allocation2 + $0x168] sm:$0xff] }
 0x1f0   : > { %v11553_v12 = vpop.f32.mrb[15].mxu0  ;;  %v11625_v16 = vpop.f32.mrb[15].mxu1 }
 0x1f1   : > { %v15312_v52 = vadd.f32 %v11553_v12, %v11552_v57  ;;  %v15315_v42 = vadd.f32 %v11625_v16, %v11624_v34  ;;  %v1205_v57 = vld [vmem:[#allocation2 + $0x170] sm:$0xff] }
 0x1f2   : > { %13452 = vmatmul.mubr.bf16.gmra.mrb[120].mxu0 %v15180_v20  ;;  %2974 = vmatmul.mubr.bf16.gmra.mrb[120].mxu1 %v15201_v41  ;;  %v1781_v61 = vpack.c.bf16 %v1205_v57, %v1204_v49 }
 0x1f3   : > { %13455 = vmatprep.mubr.bf16.mxu0 %v15186_v53  ;;  %2981 = vmatprep.mubr.bf16.mxu1 %v15253_v40  ;;  %v14026_v40 = vld [vmem:[#allocation10 + $0x38] sm:$0xff]  }
 0x1f4   : > { %13489 = vmatprep.subr.bf16.mxu1 %v14026_v40 }
 0x1f5   : > { %v11555_v11 = vpop.f32.mrb[16].mxu0  ;;  %v11643_v15 = vpop.f32.mrb[16].mxu1  ;;  %13490 = vmatpush3.bf16.msra.mxu1 %v14026_v40 }
 0x1f6   : > { %v11556_v43 = vpop.f32.mrb[17].mxu0  ;;  %v11644_v55 = vpop.f32.mrb[17].mxu1 }
 0x1f7   : > { %v15320_v46 = vadd.f32 %v11556_v43, %v11555_v11  ;;  %v11558_v2 = vpop.f32.mrb[18].mxu0  ;;  %v11645_v9 = vadd.f32 %v11644_v55, %v11643_v15  ;;  %v11646_v20 = vpop.f32.mrb[18].mxu1  ;;  %v14027_v55 = vld [vmem:[#allocation9 + $0xc0] sm:$0xff]  }
 0x1f8   : > { %v11559_v58 = vpop.f32.mrb[19].mxu0  ;;  %v11647_v38 = vpop.f32.mrb[19].mxu1  ;;  %12123 = vmatprep.subr.bf16.mxu1 %v14027_v55 }
 0x1f9   : > { %v15322_v25 = vadd.f32 %v11559_v58, %v11558_v2  ;;  %v15325_v41 = vadd.f32 %v11645_v9, %v15275_v26  ;;  %v11648_v53 = vadd.f32 %v11647_v38, %v11646_v20  ;;  %v1272_v9 = vld [vmem:[#allocation2 + $0x199] sm:$0xff]  ;;  %v1273_v20 = vld [vmem:[#allocation2 + $0x1a1] sm:$0xff] }
 0x1fa   : > { %13456 = vmatmul.mubr.bf16.gmra.mrb[124].mxu0 %v15193_v32  ;;  %2982 = vmatmul.mubr.bf16.gmra.mrb[124].mxu1 %v1763_v4 }
 0x1fb   : > { %13459 = vmatprep.mubr.bf16.mxu0 %v15199_v60  ;;  %v15330_v30 = vadd.f32 %v11648_v53, %v15279_v29  ;;  %2989 = vmatprep.mubr.bf16.mxu1 %v15259_v54 }
 0x1fd   : > { %v11561_v23 = vpop.f32.mrb[20].mxu0  ;;  %v11649_v31 = vpop.f32.mrb[20].mxu1 }
 0x1fe   : > { %v11562_v7 = vpop.f32.mrb[21].mxu0  ;;  %v11650_v44 = vpop.f32.mrb[21].mxu1 }
 0x1ff   : > { %v15333_v26 = vadd.f32 %v11562_v7, %v11561_v23  ;;  %v11564_v32 = vpop.f32.mrb[22].mxu0  ;;  %v11651_v62 = vadd.f32 %v11650_v44, %v11649_v31  ;;  %v11652_v60 = vpop.f32.mrb[22].mxu1  ;;  %v1336_v44 = vld [vmem:[#allocation2 + $0x19a] sm:$0xff] }
 0x200   : > { %v11565_v8 = vpop.f32.mrb[23].mxu0  ;;  %v11653_v29 = vpop.f32.mrb[23].mxu1 }
 0x201   : > { %v15335_v48 = vadd.f32 %v11565_v8, %v11564_v32  ;;  %v15338_v54 = vadd.f32 %v11651_v62, %v15286_v24  ;;  %v11654_v14 = vadd.f32 %v11653_v29, %v11652_v60  ;;  %v1337_v32 = vld [vmem:[#allocation2 + $0x1a2] sm:$0xff]  ;;  %v1208_v62 = vld [vmem:[#allocation2 + $0x198] sm:$0xff] }
 0x202   : > { %13460 = vmatmul.mubr.bf16.gmra.mrb[128].mxu0 %v15207_v37  ;;  %2990 = vmatmul.mubr.bf16.gmra.mrb[128].mxu1 %v1772_v19  ;;  %v1209_v60 = vld [vmem:[#allocation2 + $0x1a0] sm:$0xff] }
 0x203   : > { %13463 = vmatprep.mubr.bf16.mxu0 %v15213_v21  ;;  %v15343_v27 = vadd.f32 %v11654_v14, %v15290_v1  ;;  %2997 = vmatprep.mubr.bf16.mxu1 %v15265_v56 }
 0x205   : > { %v11567_v5 = vpop.f32.mrb[24].mxu0  ;;  %v11655_v12 = vpop.f32.mrb[24].mxu1 }
 0x206   : > { %v11568_v34 = vpop.f32.mrb[25].mxu0  ;;  %v11656_v24 = vpop.f32.mrb[25].mxu1 }
 0x207   : > { %v15346_v16 = vadd.f32 %v11568_v34, %v11567_v5  ;;  %v11570_v36 = vpop.f32.mrb[26].mxu0  ;;  %v11657_v11 = vadd.f32 %v11656_v24, %v11655_v12  ;;  %v11658_v37 = vpop.f32.mrb[26].mxu1  ;;  %v1799_v5 = vpack.c.bf16 %v1209_v60, %v1208_v62  ;;  %v14245_v34 = vld [vmem:[#allocation2 + $0x19] sm:$0xff]  ;;  %v14246_v24 = vld [vmem:[#allocation2 + $0x21] sm:$0xff] }
 0x208   : > { %v11571_v15 = vpop.f32.mrb[27].mxu0  ;;  %v11659_v21 = vpop.f32.mrb[27].mxu1 }
 0x209   : > { %v15348_v43 = vadd.f32 %v11571_v15, %v11570_v36  ;;  %v15351_v1 = vadd.f32 %v11657_v11, %v15296_v33  ;;  %v11660_v56 = vadd.f32 %v11659_v21, %v11658_v37  ;;  %v4477_v36 = vpack.c.bf16 %v14246_v24, %v14245_v34  ;;  %v14251_v24 = vld [vmem:[#allocation2 + $0x61] sm:$0xff] }
 0x20a   : > { %13464 = vmatmul.mubr.bf16.gmra.mrb[132].mxu0 %v15219_v22  ;;  %2998 = vmatmul.mubr.bf16.gmra.mrb[132].mxu1 %v1781_v61 }
 0x20b   : > { %13467 = vmatprep.mubr.bf16.mxu0 %v15225_v3  ;;  %v15356_v2 = vadd.f32 %v11660_v56, %v15300_v13  ;;  %3005 = vmatprep.mubr.bf16.mxu1 %v15273_v45  ;;  %v1800_v3 = vpack.c.bf16 %v1273_v20, %v1272_v9 }
 0x20d   : > { %v11573_v4 = vpop.f32.mrb[28].mxu0  ;;  %v11661_v58 = vpop.f32.mrb[28].mxu1 }
 0x20e   : > { %v11574_v38 = vpop.f32.mrb[29].mxu0  ;;  %v11662_v53 = vpop.f32.mrb[29].mxu1 }
 0x20f   : > { %v15359_v33 = vadd.f32 %v11574_v38, %v11573_v4  ;;  %v11576_v40 = vpop.f32.mrb[30].mxu0  ;;  %v11663_v22 = vadd.f32 %v11662_v53, %v11661_v58  ;;  %v11664_v50 = vpop.f32.mrb[30].mxu1  ;;  %v14247_v58 = vld [vmem:[#allocation2 + $0x31] sm:$0xff]  ;;  %v14248_v38 = vld [vmem:[#allocation2 + $0x39] sm:$0xff] }
 0x210   : > { %v11577_v28 = vpop.f32.mrb[31].mxu0  ;;  %v11665_v13 = vpop.f32.mrb[31].mxu1  ;;  %v4478_v53 = vpack.c.bf16 %v14248_v38, %v14247_v58 }
 0x211   : > { %v15361_v23 = vadd.f32 %v11577_v28, %v11576_v40  ;;  %v15364_v31 = vadd.f32 %v11663_v22, %v15308_v63  ;;  %v11666_v7 = vadd.f32 %v11665_v13, %v11664_v50  ;;  %v1801_v63 = vpack.c.bf16 %v1337_v32, %v1336_v44  ;;  %v14028_v50 = vld [vmem:[#allocation9 + $0x80] sm:$0xff]   ;;  %v14029_v44 = vld [vmem:[#allocation9 + $0xc8] sm:$0xff]  }
 0x212   : > { %13468 = vmatmul.mubr.bf16.gmra.mrb[136].mxu0 %v15233_v39  ;;  %3006 = vmatmul.mubr.bf16.gmra.mrb[136].mxu1 %v15227_v47  ;;  %v14249_v28 = vld [vmem:[#allocation2 + $0x49] sm:$0xff] }
 0x213   : > { %13471 = vmatprep.mubr.bf16.mxu0 %v15267_v6  ;;  %v15370_v19 = vadd.f32 %v11666_v7, %v15312_v52  ;;  %3013 = vmatprep.mubr.bf16.mxu1 %v1800_v3  ;;  %v14250_v3 = vld [vmem:[#allocation2 + $0x51] sm:$0xff] }
 0x214   : > { %v4479_v13 = vpack.c.bf16 %v14250_v3, %v14249_v28  ;;  %v14033_v32 = vld [vmem:[#allocation9 + $0x40] sm:$0xff]   ;;  %v14036_v3 = vld [vmem:[#allocation9 + $0x98] sm:$0xff]  }
 0x215   : > { %v11579_v8 = vpop.f32.mrb[32].mxu0  ;;  %v11667_v29 = vpop.f32.mrb[32].mxu1  ;;  %12011 = vmatprep.subr.bf16.mxu0 %v14033_v32 }
 0x216   : > { %v11580_v14 = vpop.f32.mrb[33].mxu0  ;;  %v11668_v57 = vpop.f32.mrb[33].mxu1 }
 0x217   : > { %v15372_v49 = vadd.f32 %v11580_v14, %v11579_v8  ;;  %v11582_v39 = vpop.f32.mrb[34].mxu0  ;;  %v11669_v47 = vadd.f32 %v11668_v57, %v11667_v29  ;;  %v11670_v12 = vpop.f32.mrb[34].mxu1  ;;  %v14035_v8 = vld [vmem:[#allocation9] sm:$0xff]   ;;  %v14030_v14 = vld [vmem:[#allocation9 + $0x88] sm:$0xff]   ;;  %v14031_v57 = vld [vmem:[#allocation9 + $0xd0] sm:$0xff]  }
 0x218   : > { %v11583_v6 = vpop.f32.mrb[35].mxu0  ;;  %v11671_v61 = vpop.f32.mrb[35].mxu1  ;;  %12012 = vmatpush3.bf16.msra.mxu0 %v14035_v8  ;;  %v14044_v8 = vld [vmem:[#allocation9 + $0x18] sm:$0xff]  }
 0x219   : > { %v15374_v52 = vadd.f32 %v11583_v6, %v11582_v39  ;;  %v15377_v11 = vadd.f32 %v11669_v47, %v15320_v46  ;;  %v11672_v37 = vadd.f32 %v11671_v61, %v11670_v12  ;;  %v14037_v39 = vld [vmem:[#allocation9 + $0x48] sm:$0xff]  }
 0x21a   : > { %13472 = vmatmul.mubr.bf16.gmra.mrb[140].mxu0 %v1801_v63  ;;  %3014 = vmatmul.mubr.bf16.gmra.mrb[140].mxu1 %v1799_v5  ;;  %v14038_v12 = vld [vmem:[#allocation9 + $0x8] sm:$0xff]  }
 0x21b   : > { %v15380_v15 = vadd.f32 %v11672_v37, %v15322_v25  ;;  %13491 = vmatprep.mubr.bf16.mxu1 %v4477_v36  ;;  %v14252_v36 = vld [vmem:[#allocation2 + $0x69] sm:$0xff]  ;;  %12013 = vmatprep.subr.bf16.mxu0 %v14037_v39  ;;  %v14256_v39 = vld [vmem:[#allocation2 + $0x99] sm:$0xff] }
 0x21c   : > { %v4480_v61 = vpack.c.bf16 %v14252_v36, %v14251_v24  ;;  %12014 = vmatpush3.bf16.msra.mxu0 %v14038_v12  ;;  %v14042_v36 = vld [vmem:[#allocation9 + $0xa0] sm:$0xff]  }
 0x21d   : > { %v11585_v21 = vpop.f32.mrb[36].mxu0  ;;  %v11673_v56 = vpop.f32.mrb[36].mxu1 }
 0x21e   : > { %v11586_v55 = vpop.f32.mrb[37].mxu0  ;;  %v11674_v9 = vpop.f32.mrb[37].mxu1 }
 0x21f   : > { %v15382_v4 = vadd.f32 %v11586_v55, %v11585_v21  ;;  %v11588_v20 = vpop.f32.mrb[38].mxu0  ;;  %v11675_v40 = vadd.f32 %v11674_v9, %v11673_v56  ;;  %v11676_v46 = vpop.f32.mrb[38].mxu1  ;;  %v14253_v56 = vld [vmem:[#allocation2 + $0x79] sm:$0xff]  ;;  %v14254_v55 = vld [vmem:[#allocation2 + $0x81] sm:$0xff] }
 0x220   : > { %v11589_v22 = vpop.f32.mrb[39].mxu0  ;;  %v11677_v7 = vpop.f32.mrb[39].mxu1  ;;  %v4481_v9 = vpack.c.bf16 %v14254_v55, %v14253_v56  ;;  %v14047_v55 = vld [vmem:[#allocation9 + $0x20] sm:$0xff]  }
 0x221   : > { %v15384_v25 = vadd.f32 %v11589_v22, %v11588_v20  ;;  %v15387_v62 = vadd.f32 %v11675_v40, %v15333_v26  ;;  %v11678_v60 = vadd.f32 %v11677_v7, %v11676_v46  ;;  %v14032_v20 = vld [vmem:[#allocation9 + $0x90] sm:$0xff]   ;;  %v14040_v7 = vld [vmem:[#allocation9 + $0xe0] sm:$0xff]  }
 0x222   : > { %13492 = vmatmul.mubr.bf16.vlgmr.msra.gmra.mrb[144].mxu1 %v4478_v53  ;;  %v14034_v53 = vld [vmem:[#allocation9 + $0xd8] sm:$0xff]   ;;  %v14039_v40 = vld [vmem:[#allocation9 + $0x50] sm:$0xff]  }
 0x223   : > { %v15390_v29 = vadd.f32 %v11678_v60, %v15335_v48  ;;  %12124 = vmatpush3.bf16.msra.mxu1 %v14028_v50  ;;  %13495 = vmatprep.mubr.bf16.mxu1 %v4479_v13  ;;  %v14041_v50 = vld [vmem:[#allocation9 + $0x10] sm:$0xff]  }
 0x224   : > { %12125 = vmatprep.subr.bf16.mxu1 %v14029_v44  ;;  %12015 = vmatprep.subr.bf16.mxu0 %v14039_v40  ;;  %v14043_v44 = vld [vmem:[#allocation9 + $0x58] sm:$0xff]  }
 0x225   : > { %v11591_v63 = vpop.f32.mrb[40].mxu0  ;;  %v11679_v5 = vpop.f32.mrb[40].mxu1  ;;  %12016 = vmatpush3.bf16.msra.mxu0 %v14041_v50  ;;  %v14050_v50 = vld [vmem:[#allocation9 + $0x28] sm:$0xff]  }
 0x226   : > { %v11592_v47 = vpop.f32.mrb[41].mxu0  ;;  %v11680_v6 = vpop.f32.mrb[41].mxu1  ;;  %12017 = vmatprep.subr.bf16.mxu0 %v14043_v44  ;;  %v14260_v44 = vld [vmem:[#allocation2 + $0xc9] sm:$0xff] }
 0x227   : > { %v15392_v26 = vadd.f32 %v11592_v47, %v11591_v63  ;;  %v11594_v34 = vpop.f32.mrb[42].mxu0  ;;  %v11681_v48 = vadd.f32 %v11680_v6, %v11679_v5  ;;  %v11682_v37 = vpop.f32.mrb[42].mxu1  ;;  %12126 = vmatpush3.bf16.msra.mxu1 %v14030_v14  ;;  %v14257_v6 = vld [vmem:[#allocation2 + $0xa9] sm:$0xff] }
 0x228   : > { %v11595_v21 = vpop.f32.mrb[43].mxu0  ;;  %v11683_v38 = vpop.f32.mrb[43].mxu1  ;;  %12127 = vmatprep.subr.bf16.mxu1 %v14031_v57  ;;  %v14255_v57 = vld [vmem:[#allocation2 + $0x91] sm:$0xff] }
 0x229   : > { %v15394_v58 = vadd.f32 %v11595_v21, %v11594_v34  ;;  %v15397_v46 = vadd.f32 %v11681_v48, %v15346_v16  ;;  %v11684_v22 = vadd.f32 %v11683_v38, %v11682_v37  ;;  %v4482_v5 = vpack.c.bf16 %v14256_v39, %v14255_v57  ;;  %v14258_v34 = vld [vmem:[#allocation2 + $0xb1] sm:$0xff]  ;;  %12018 = vmatpush3.bf16.msra.mxu0 %v14044_v8 }
 0x22a   : > { %13496 = vmatmul.mubr.bf16.gmra.mrb[148].mxu1 %v4480_v61  ;;  %v4483_v24 = vpack.c.bf16 %v14258_v34, %v14257_v6  ;;  %v14045_v37 = vld [vmem:[#allocation9 + $0x60] sm:$0xff]   ;;  %v14053_v34 = vld [vmem:[#allocation9 + $0x30] sm:$0xff]  }
 0x22b   : > { %v15400_v28 = vadd.f32 %v11684_v22, %v15348_v43  ;;  %13499 = vmatprep.mubr.bf16.mxu1 %v4481_v9  ;;  %12128 = vmatpush3.bf16.msra.mxu1 %v14032_v20  ;;  %v14046_v9 = vld [vmem:[#allocation9 + $0xe8] sm:$0xff]  }
 0x22c   : > { %12129 = vmatprep.subr.bf16.mxu1 %v14034_v53  ;;  %12019 = vmatprep.subr.bf16.mxu0 %v14045_v37  ;;  %v14049_v53 = vld [vmem:[#allocation9 + $0x68] sm:$0xff]  }
 0x22d   : > { %v11597_v13 = vpop.f32.mrb[44].mxu0  ;;  %v11685_v32 = vpop.f32.mrb[44].mxu1  ;;  %12020 = vmatpush3.bf16.msra.mxu0 %v14047_v55  ;;  %v14048_v55 = vld [vmem:[#allocation9 + $0xa8] sm:$0xff]  }
 0x22e   : > { %v11598_v60 = vpop.f32.mrb[45].mxu0  ;;  %v11686_v14 = vpop.f32.mrb[45].mxu1  ;;  %12021 = vmatprep.subr.bf16.mxu0 %v14049_v53 }
 0x22f   : > { %v15402_v16 = vadd.f32 %v11598_v60, %v11597_v13  ;;  %v11600_v63 = vpop.f32.mrb[46].mxu0  ;;  %v11687_v43 = vadd.f32 %v11686_v14, %v11685_v32  ;;  %v11688_v47 = vpop.f32.mrb[46].mxu1  ;;  %12130 = vmatpush3.bf16.msra.mxu1 %v14036_v3  ;;  %v14261_v14 = vld [vmem:[#allocation2 + $0xd9] sm:$0xff] }
 0x230   : > { %v11601_v12 = vpop.f32.mrb[47].mxu0  ;;  %v11689_v48 = vpop.f32.mrb[47].mxu1  ;;  %12131 = vmatprep.subr.bf16.mxu1 %v14040_v7  ;;  %v14259_v7 = vld [vmem:[#allocation2 + $0xc1] sm:$0xff] }
 0x231   : > { %v15404_v61 = vadd.f32 %v11601_v12, %v11600_v63  ;;  %v15407_v21 = vadd.f32 %v11687_v43, %v15359_v33  ;;  %v11690_v56 = vadd.f32 %v11689_v48, %v11688_v47  ;;  %v4484_v32 = vpack.c.bf16 %v14260_v44, %v14259_v7  ;;  %v14262_v63 = vld [vmem:[#allocation2 + $0xe1] sm:$0xff]  ;;  %12022 = vmatpush3.bf16.msra.mxu0 %v14050_v50  ;;  %v14265_v7 = vld [vmem:[#allocation2 + $0x109] sm:$0xff]  ;;  %v14266_v44 = vld [vmem:[#allocation2 + $0x111] sm:$0xff] }
 0x232   : > { %13500 = vmatmul.mubr.bf16.gmra.mrb[152].mxu1 %v4482_v5  ;;  %v4485_v57 = vpack.c.bf16 %v14262_v63, %v14261_v14  ;;  %v14051_v47 = vld [vmem:[#allocation9 + $0x70] sm:$0xff]   ;;  %v14055_v48 = vld [vmem:[#allocation9 + $0x78] sm:$0xff]  }
 0x233   : > { %v15410_v20 = vadd.f32 %v11690_v56, %v15361_v23  ;;  %13503 = vmatprep.mubr.bf16.mxu1 %v4483_v24  ;;  %12132 = vmatpush3.bf16.msra.mxu1 %v14042_v36  ;;  %v3389_v50 = vld [vmem:[#allocation2 + $0x1] sm:$0xff] }
 0x234   : > { %12133 = vmatprep.subr.bf16.mxu1 %v14046_v9  ;;  %12023 = vmatprep.subr.bf16.mxu0 %v14051_v47  ;;  %v14056_v9 = vld [vmem:[#allocation9 + $0x38] sm:$0xff]  }
 0x235   : > { %v11755_v38 = vpop.f32.mrb[48].mxu0  ;;  %v11691_v40 = vpop.f32.mrb[48].mxu1  ;;  %12024 = vmatpush3.bf16.msra.mxu0 %v14053_v34 }
 0x236   : > { %v11756_v22 = vpop.f32.mrb[49].mxu0  ;;  %v11692_v3 = vpop.f32.mrb[49].mxu1  ;;  %12025 = vmatprep.subr.bf16.mxu0 %v14055_v48 }
 0x237   : > { %v11757_v33 = vadd.f32 %v11756_v22, %v11755_v38  ;;  %v11758_v13 = vpop.f32.mrb[50].mxu0  ;;  %v11693_v60 = vadd.f32 %v11692_v3, %v11691_v40  ;;  %v11694_v8 = vpop.f32.mrb[50].mxu1  ;;  %v14263_v40 = vld [vmem:[#allocation2 + $0xf1] sm:$0xff]  ;;  %v14264_v22 = vld [vmem:[#allocation2 + $0xf9] sm:$0xff]  ;;  %v3390_v3 = vld [vmem:[#allocation2 + $0x9] sm:$0xff]  ;;  %12134 = vmatpush3.bf16.msra.mxu1 %v14048_v55 }
 0x238   : > { %v11759_v23 = vpop.f32.mrb[51].mxu0  ;;  %v11695_v5 = vpop.f32.mrb[51].mxu1 }
 0x239   : > { %v15413_v39 = vadd.f32 %v11757_v33, %v15325_v41  ;;  %v11760_v43 = vadd.f32 %v11759_v23, %v11758_v13  ;;  %v15416_v12 = vadd.f32 %v11693_v60, %v15372_v49  ;;  %v11696_v6 = vadd.f32 %v11695_v5, %v11694_v8  ;;  %v3325_v8 = vld [vmem:[#allocation2] sm:$0xff]  ;;  %v3326_v23 = vld [vmem:[#allocation2 + $0x8] sm:$0xff]  ;;  %12026 = vmatpush3.bf16.msra.mxu0 %v14056_v9 }
 0x23a   : > { %13504 = vmatmul.mubr.bf16.gmra.mrb[156].mxu1 %v4484_v32  ;;  %v4487_v32 = vpack.c.bf16 %v14266_v44, %v14265_v7  ;;  %v4190_v60 = vpack.c.bf16 %v3390_v3, %v3389_v50  ;;  %v14052_v5 = vld [vmem:[#allocation9 + $0xf0] sm:$0xff]  }
 0x23b   : > { %v15419_v24 = vadd.f32 %v11760_v43, %v15330_v30  ;;  %v15422_v36 = vadd.f32 %v11696_v6, %v15374_v52  ;;  %13507 = vmatprep.mubr.bf16.mxu1 %v4485_v57  ;;  %v4486_v30 = vpack.c.bf16 %v14264_v22, %v14263_v40  ;;  %v4189_v43 = vpack.c.bf16 %v3326_v23, %v3325_v8  ;;  %v14269_v50 = vld [vmem:[#allocation2 + $0x139] sm:$0xff] }
 0x23c   : > { %5182 = vmatprep.mubr.bf16.mxu0 %v4190_v60  ;;  %12135 = vmatprep.subr.bf16.mxu1 %v14052_v5 }
 0x23d   : > { %v11761_v41 = vpop.f32.mrb[52].mxu0  ;;  %v11697_v37 = vpop.f32.mrb[52].mxu1  ;;  %5183 = vmatmul.mubr.bf16.vlgmr.msra.gmra.mrb[144].mxu0 %v4189_v43 }
 0x23e   : > { %v11762_v56 = vpop.f32.mrb[53].mxu0  ;;  %v11698_v49 = vpop.f32.mrb[53].mxu1 }
 0x23f   : > { %v11763_v38 = vadd.f32 %v11762_v56, %v11761_v41  ;;  %v11764_v53 = vpop.f32.mrb[54].mxu0  ;;  %v11699_v33 = vadd.f32 %v11698_v49, %v11697_v37  ;;  %v11700_v52 = vpop.f32.mrb[54].mxu1  ;;  %v14267_v49 = vld [vmem:[#allocation2 + $0x121] sm:$0xff] }
 0x240   : > { %v11765_v13 = vpop.f32.mrb[55].mxu0  ;;  %v11701_v63 = vpop.f32.mrb[55].mxu1 }
 0x241   : > { %v15425_v14 = vadd.f32 %v11763_v38, %v15338_v54  ;;  %v11766_v57 = vadd.f32 %v11765_v13, %v11764_v53  ;;  %v15428_v47 = vadd.f32 %v11699_v33, %v15382_v4  ;;  %v11702_v6 = vadd.f32 %v11701_v63, %v11700_v52  ;;  %v14054_v54 = vld [vmem:[#allocation9 + $0xb0] sm:$0xff]   ;;  %v14268_v38 = vld [vmem:[#allocation2 + $0x129] sm:$0xff] }
 0x242   : > { %13508 = vmatmul.mubr.bf16.gmra.mrb[160].mxu1 %v4486_v30  ;;  %v4488_v53 = vpack.c.bf16 %v14268_v38, %v14267_v49  ;;  %v14058_v33 = vld [vmem:[#allocation9 + $0xb8] sm:$0xff]   ;;  %v14059_v38 = vld [vmem:[#allocation9 + $0x1c0] sm:$0xff]  }
 0x243   : > { %v15431_v34 = vadd.f32 %v11766_v57, %v15343_v27  ;;  %v15434_v41 = vadd.f32 %v11702_v6, %v15384_v25  ;;  %13511 = vmatprep.mubr.bf16.mxu1 %v4487_v32  ;;  %12136 = vmatpush3.bf16.msra.mxu1 %v14054_v54  ;;  %v14057_v27 = vld [vmem:[#allocation9 + $0xf8] sm:$0xff]   ;;  %v14271_v6 = vld [vmem:[#allocation2 + $0x151] sm:$0xff]  ;;  %v14272_v54 = vld [vmem:[#allocation2 + $0x159] sm:$0xff] }
 0x244   : > { %v14270_v25 = vld [vmem:[#allocation2 + $0x141] sm:$0xff]  ;;  %12137 = vmatprep.subr.bf16.mxu1 %v14057_v27 }
 0x245   : > { %v11767_v48 = vpop.f32.mrb[56].mxu0  ;;  %v11703_v37 = vpop.f32.mrb[56].mxu1  ;;  %v4489_v3 = vpack.c.bf16 %v14270_v25, %v14269_v50 }
 0x246   : > { %v11768_v56 = vpop.f32.mrb[57].mxu0  ;;  %v11704_v55 = vpop.f32.mrb[57].mxu1 }
 0x247   : > { %v11769_v4 = vadd.f32 %v11768_v56, %v11767_v48  ;;  %v11770_v9 = vpop.f32.mrb[58].mxu0  ;;  %v11705_v40 = vadd.f32 %v11704_v55, %v11703_v37  ;;  %v11706_v22 = vpop.f32.mrb[58].mxu1  ;;  %12138 = vmatpush3.bf16.msra.mxu1 %v14058_v33  ;;  %v14273_v55 = vld [vmem:[#allocation2 + $0x169] sm:$0xff] }
 0x248   : > { %v11771_v30 = vpop.f32.mrb[59].mxu0  ;;  %v11707_v13 = vpop.f32.mrb[59].mxu1  ;;  %12347 = vmatprep.subr.bf16.mxu1 %v14059_v38 }
 0x249   : > { %v15437_v52 = vadd.f32 %v11769_v4, %v15351_v1  ;;  %v11772_v7 = vadd.f32 %v11771_v30, %v11770_v9  ;;  %v15440_v44 = vadd.f32 %v11705_v40, %v15392_v26  ;;  %v11708_v32 = vadd.f32 %v11707_v13, %v11706_v22 }
 0x24a   : > { %13512 = vmatmul.mubr.bf16.gmra.mrb[164].mxu1 %v4488_v53  ;;  %v4490_v26 = vpack.c.bf16 %v14272_v54, %v14271_v6 }
 0x24b   : > { %v15443_v60 = vadd.f32 %v11772_v7, %v15356_v2  ;;  %v15446_v8 = vadd.f32 %v11708_v32, %v15394_v58  ;;  %13515 = vmatprep.mubr.bf16.mxu1 %v4489_v3  ;;  %v14274_v2 = vld [vmem:[#allocation2 + $0x171] sm:$0xff] }
 0x24c   : > { %v4491_v4 = vpack.c.bf16 %v14274_v2, %v14273_v55 }
 0x24d   : > { %v11773_v23 = vpop.f32.mrb[60].mxu0  ;;  %v11709_v63 = vpop.f32.mrb[60].mxu1 }
 0x24e   : > { %v11774_v1 = vpop.f32.mrb[61].mxu0  ;;  %v11710_v57 = vpop.f32.mrb[61].mxu1 }
 0x24f   : > { %v11775_v5 = vadd.f32 %v11774_v1, %v11773_v23  ;;  %v11776_v43 = vpop.f32.mrb[62].mxu0  ;;  %v11711_v48 = vadd.f32 %v11710_v57, %v11709_v63  ;;  %v11712_v37 = vpop.f32.mrb[62].mxu1 }
 0x250   : > { %v11777_v56 = vpop.f32.mrb[63].mxu0  ;;  %v11713_v58 = vpop.f32.mrb[63].mxu1 }
 0x251   : > { %v15449_v9 = vadd.f32 %v11775_v5, %v15364_v31  ;;  %v11778_v49 = vadd.f32 %v11777_v56, %v11776_v43  ;;  %v15452_v53 = vadd.f32 %v11711_v48, %v15402_v16  ;;  %v11714_v27 = vadd.f32 %v11713_v58, %v11712_v37 }
 0x252   : > { %13516 = vmatmul.mubr.bf16.gmra.mrb[168].mxu1 %v4490_v26 }
 0x253   : > { %v15455_v40 = vadd.f32 %v11778_v49, %v15370_v19  ;;  %v15458_v22 = vadd.f32 %v11714_v27, %v15404_v61  ;;  %13519 = vmatprep.mubr.bf16.mxu1 %v4491_v4 }
 0x255   : > { %v11779_v30 = vpop.f32.mrb[64].mxu0  ;;  %v11715_v50 = vpop.f32.mrb[64].mxu1 }
 0x256   : > { %v11780_v31 = vpop.f32.mrb[65].mxu0  ;;  %v11716_v25 = vpop.f32.mrb[65].mxu1 }
 0x257   : > { %v11781_v3 = vadd.f32 %v11780_v31, %v11779_v30  ;;  %v11782_v33 = vpop.f32.mrb[66].mxu0  ;;  %v11717_v13 = vadd.f32 %v11716_v25, %v11715_v50  ;;  %v11718_v7 = vpop.f32.mrb[66].mxu1 }
 0x258   : > { %v11783_v16 = vpop.f32.mrb[67].mxu0  ;;  %v11719_v19 = vpop.f32.mrb[67].mxu1 }
 0x259   : > { %v15461_v32 = vadd.f32 %v11781_v3, %v15377_v11  ;;  %v11784_v23 = vadd.f32 %v11783_v16, %v11782_v33  ;;  %v15464_v63 = vadd.f32 %v11717_v13, %v15277_v18  ;;  %v11720_v61 = vadd.f32 %v11719_v19, %v11718_v7 }
 0x25a   : > { %13520 = vmatmul.mubr.bf16.gmra.mrb[172].mxu1 %v15273_v45 }
 0x25b   : > { %v15467_v1 = vadd.f32 %v11784_v23, %v15380_v15  ;;  %v15471_v57 = vadd.f32 %v11720_v61, %v15281_v10 }
 0x25d   : > { %v11785_v5 = vpop.f32.mrb[68].mxu0  ;;  %v11721_v43 = vpop.f32.mrb[68].mxu1 }
 0x25e   : > { %v11786_v6 = vpop.f32.mrb[69].mxu0  ;;  %v11722_v54 = vpop.f32.mrb[69].mxu1 }
 0x25f   : > { %v11787_v11 = vadd.f32 %v11786_v6, %v11785_v5  ;;  %v11788_v26 = vpop.f32.mrb[70].mxu0  ;;  %v11723_v48 = vadd.f32 %v11722_v54, %v11721_v43  ;;  %v11724_v37 = vpop.f32.mrb[70].mxu1 }
 0x260   : > { %v11789_v56 = vpop.f32.mrb[71].mxu0  ;;  %v11725_v55 = vpop.f32.mrb[71].mxu1 }
 0x261   : > { %v15474_v18 = vadd.f32 %v11787_v11, %v15387_v62  ;;  %v11790_v15 = vadd.f32 %v11789_v56, %v11788_v26  ;;  %v15477_v2 = vadd.f32 %v11723_v48, %v15288_v59  ;;  %v11726_v45 = vadd.f32 %v11725_v55, %v11724_v37 }
 0x263   : > { %v15480_v10 = vadd.f32 %v11790_v15, %v15390_v29  ;;  %v15483_v4 = vadd.f32 %v11726_v45, %v15292_v17 }
 0x265   : > { %v11791_v58 = vpop.f32.mrb[72].mxu0  ;;  %v11727_v49 = vpop.f32.mrb[72].mxu1 }
 0x266   : > { %v11792_v38 = vpop.f32.mrb[73].mxu0  ;;  %v11728_v27 = vpop.f32.mrb[73].mxu1 }
 0x267   : > { %v11793_v30 = vadd.f32 %v11792_v38, %v11791_v58  ;;  %v11794_v50 = vpop.f32.mrb[74].mxu0  ;;  %v11729_v62 = vadd.f32 %v11728_v27, %v11727_v49  ;;  %v11730_v31 = vpop.f32.mrb[74].mxu1 }
 0x268   : > { %v11795_v25 = vpop.f32.mrb[75].mxu0  ;;  %v11731_v59 = vpop.f32.mrb[75].mxu1 }
 0x269   : > { %v15486_v3 = vadd.f32 %v11793_v30, %v15397_v46  ;;  %v11796_v33 = vadd.f32 %v11795_v25, %v11794_v50  ;;  %v15489_v29 = vadd.f32 %v11729_v62, %v15298_v51  ;;  %v11732_v13 = vadd.f32 %v11731_v59, %v11730_v31 }
 0x26b   : > { %v15492_v17 = vadd.f32 %v11796_v33, %v15400_v28  ;;  %v15495_v7 = vadd.f32 %v11732_v13, %v15303_v35 }
 0x26d   : > { %v11797_v16 = vpop.f32.mrb[76].mxu0  ;;  %v11733_v19 = vpop.f32.mrb[76].mxu1 }
 0x26e   : > { %v11798_v23 = vpop.f32.mrb[77].mxu0  ;;  %v11734_v61 = vpop.f32.mrb[77].mxu1 }
 0x26f   : > { %v11799_v5 = vadd.f32 %v11798_v23, %v11797_v16  ;;  %v11800_v43 = vpop.f32.mrb[78].mxu0  ;;  %v11735_v46 = vadd.f32 %v11734_v61, %v11733_v19  ;;  %v11736_v6 = vpop.f32.mrb[78].mxu1 }
 0x270   : > { %v11801_v54 = vpop.f32.mrb[79].mxu0  ;;  %v11737_v51 = vpop.f32.mrb[79].mxu1 }
 0x271   : > { %v15498_v11 = vadd.f32 %v11799_v5, %v15407_v21  ;;  %v11802_v26 = vadd.f32 %v11801_v54, %v11800_v43  ;;  %v15501_v28 = vadd.f32 %v11735_v46, %v15310_v0  ;;  %v11738_v48 = vadd.f32 %v11737_v51, %v11736_v6 }
 0x273   : > { %v15504_v35 = vadd.f32 %v11802_v26, %v15410_v20  ;;  %v15507_v37 = vadd.f32 %v11738_v48, %v15315_v42 }
 0x275   : > { %v11803_v56 = vpop.f32.mrb[80].mxu0  ;;  %v11867_v55 = vpop.f32.mrb[80].mxu1 }
 0x276   : > { %v11804_v15 = vpop.f32.mrb[81].mxu0  ;;  %v11868_v58 = vpop.f32.mrb[81].mxu1 }
 0x277   : > { %v11805_v45 = vadd.f32 %v11804_v15, %v11803_v56  ;;  %v11806_v49 = vpop.f32.mrb[82].mxu0  ;;  %v11869_v21 = vadd.f32 %v11868_v58, %v11867_v55  ;;  %v11870_v38 = vpop.f32.mrb[82].mxu1 }
 0x278   : > { %v11807_v27 = vpop.f32.mrb[83].mxu0  ;;  %v11871_v50 = vpop.f32.mrb[83].mxu1 }
 0x279   : > { %v15510_v30 = vadd.f32 %v11805_v45, %v15416_v12  ;;  %v11808_v0 = vadd.f32 %v11807_v27, %v11806_v49  ;;  %v11872_v62 = vadd.f32 %v11871_v50, %v11870_v38  ;;  %v15513_v20 = vadd.f32 %v11869_v21, %v15413_v39 }
 0x27b   : > { %v15516_v42 = vadd.f32 %v11808_v0, %v15422_v36  ;;  %v15519_v31 = vadd.f32 %v11872_v62, %v15419_v24 }
 0x27d   : > { %v11809_v25 = vpop.f32.mrb[84].mxu0  ;;  %v11873_v59 = vpop.f32.mrb[84].mxu1 }
 0x27e   : > { %v11810_v33 = vpop.f32.mrb[85].mxu0  ;;  %v11874_v16 = vpop.f32.mrb[85].mxu1 }
 0x27f   : > { %v11811_v13 = vadd.f32 %v11810_v33, %v11809_v25  ;;  %v11812_v19 = vpop.f32.mrb[86].mxu0  ;;  %v11875_v12 = vadd.f32 %v11874_v16, %v11873_v59  ;;  %v11876_v23 = vpop.f32.mrb[86].mxu1 }
 0x280   : > { %v11813_v61 = vpop.f32.mrb[87].mxu0  ;;  %v11877_v43 = vpop.f32.mrb[87].mxu1 }
 0x281   : > { %v15522_v5 = vadd.f32 %v11811_v13, %v15428_v47  ;;  %v11814_v39 = vadd.f32 %v11813_v61, %v11812_v19  ;;  %v11878_v46 = vadd.f32 %v11877_v43, %v11876_v23  ;;  %v15525_v36 = vadd.f32 %v11875_v12, %v15425_v14 }
 0x283   : > { %v15528_v24 = vadd.f32 %v11814_v39, %v15434_v41  ;;  %v15531_v6 = vadd.f32 %v11878_v46, %v15431_v34 }
 0x285   : > { %v11815_v54 = vpop.f32.mrb[88].mxu0  ;;  %v11879_v51 = vpop.f32.mrb[88].mxu1 }
 0x286   : > { %v11816_v26 = vpop.f32.mrb[89].mxu0  ;;  %v11880_v56 = vpop.f32.mrb[89].mxu1 }
 0x287   : > { %v11817_v48 = vadd.f32 %v11816_v26, %v11815_v54  ;;  %v11818_v55 = vpop.f32.mrb[90].mxu0  ;;  %v11881_v47 = vadd.f32 %v11880_v56, %v11879_v51  ;;  %v11882_v15 = vpop.f32.mrb[90].mxu1 }
 0x288   : > { %v11819_v45 = vpop.f32.mrb[91].mxu0  ;;  %v11883_v49 = vpop.f32.mrb[91].mxu1 }
 0x289   : > { %v15534_v58 = vadd.f32 %v11817_v48, %v15440_v44  ;;  %v11820_v14 = vadd.f32 %v11819_v45, %v11818_v55  ;;  %v11884_v21 = vadd.f32 %v11883_v49, %v11882_v15  ;;  %v15537_v41 = vadd.f32 %v11881_v47, %v15437_v52 }
 0x28b   : > { %v15540_v34 = vadd.f32 %v11820_v14, %v15446_v8  ;;  %v15543_v38 = vadd.f32 %v11884_v21, %v15443_v60 }
 0x28d   : > { %v11821_v27 = vpop.f32.mrb[92].mxu0  ;;  %v11885_v0 = vpop.f32.mrb[92].mxu1 }
 0x28e   : > { %v11822_v50 = vpop.f32.mrb[93].mxu0  ;;  %v11886_v25 = vpop.f32.mrb[93].mxu1 }
 0x28f   : > { %v11823_v62 = vadd.f32 %v11822_v50, %v11821_v27  ;;  %v11824_v59 = vpop.f32.mrb[94].mxu0  ;;  %v11887_v44 = vadd.f32 %v11886_v25, %v11885_v0  ;;  %v11888_v33 = vpop.f32.mrb[94].mxu1 }
 0x290   : > { %v11825_v13 = vpop.f32.mrb[95].mxu0  ;;  %v11889_v19 = vpop.f32.mrb[95].mxu1 }
 0x291   : > { %v15546_v16 = vadd.f32 %v11823_v62, %v15452_v53  ;;  %v11826_v52 = vadd.f32 %v11825_v13, %v11824_v59  ;;  %v11890_v12 = vadd.f32 %v11889_v19, %v11888_v33  ;;  %v15549_v8 = vadd.f32 %v11887_v44, %v15449_v9  ;;  %v14071_v13 = vld [vmem:[#allocation9 + $0x140] sm:$0xff]  }
 0x292   : > { %v14072_v19 = vld [vmem:[#allocation9 + $0x100] sm:$0xff]   ;;  %12235 = vmatprep.subr.bf16.mxu0 %v14071_v13 }
 0x293   : > { %v15552_v60 = vadd.f32 %v11826_v52, %v15458_v22  ;;  %v15555_v23 = vadd.f32 %v11890_v12, %v15455_v40  ;;  %v14073_v12 = vld [vmem:[#allocation9 + $0x148] sm:$0xff]   ;;  %12236 = vmatpush3.bf16.msra.mxu0 %v14072_v19 }
 0x294   : > { %12237 = vmatprep.subr.bf16.mxu0 %v14073_v12 }
 0x295   : > { %v11827_v61 = vpop.f32.mrb[96].mxu0  ;;  %v11891_v39 = vpop.f32.mrb[96].mxu1 }
 0x296   : > { %v11828_v43 = vpop.f32.mrb[97].mxu0  ;;  %v11892_v54 = vpop.f32.mrb[97].mxu1 }
 0x297   : > { %v11829_v46 = vadd.f32 %v11828_v43, %v11827_v61  ;;  %v11830_v51 = vpop.f32.mrb[98].mxu0  ;;  %v11893_v53 = vadd.f32 %v11892_v54, %v11891_v39  ;;  %v11894_v26 = vpop.f32.mrb[98].mxu1  ;;  %v14074_v54 = vld [vmem:[#allocation9 + $0x108] sm:$0xff]  }
 0x298   : > { %v11831_v48 = vpop.f32.mrb[99].mxu0  ;;  %v11895_v55 = vpop.f32.mrb[99].mxu1  ;;  %12238 = vmatpush3.bf16.msra.mxu0 %v14074_v54 }
 0x299   : > { %v15558_v56 = vadd.f32 %v11829_v46, %v15464_v63  ;;  %v11832_v9 = vadd.f32 %v11831_v48, %v11830_v51  ;;  %v11896_v47 = vadd.f32 %v11895_v55, %v11894_v26  ;;  %v15561_v22 = vadd.f32 %v11893_v53, %v15461_v32 }
 0x29b   : > { %v15564_v40 = vadd.f32 %v11832_v9, %v15471_v57  ;;  %v15567_v15 = vadd.f32 %v11896_v47, %v15467_v1 }
 0x29d   : > { %v11833_v45 = vpop.f32.mrb[100].mxu0  ;;  %v11897_v14 = vpop.f32.mrb[100].mxu1 }
 0x29e   : > { %v11834_v49 = vpop.f32.mrb[101].mxu0  ;;  %v11898_v27 = vpop.f32.mrb[101].mxu1 }
 0x29f   : > { %v11835_v21 = vadd.f32 %v11834_v49, %v11833_v45  ;;  %v11836_v0 = vpop.f32.mrb[102].mxu0  ;;  %v11899_v63 = vadd.f32 %v11898_v27, %v11897_v14  ;;  %v11900_v50 = vpop.f32.mrb[102].mxu1  ;;  %v14075_v45 = vld [vmem:[#allocation9 + $0x150] sm:$0xff]  }
 0x2a0   : > { %v11837_v62 = vpop.f32.mrb[103].mxu0  ;;  %v11901_v59 = vpop.f32.mrb[103].mxu1  ;;  %v14077_v49 = vld [vmem:[#allocation9 + $0x110] sm:$0xff]   ;;  %12239 = vmatprep.subr.bf16.mxu0 %v14075_v45 }
 0x2a1   : > { %v15570_v25 = vadd.f32 %v11835_v21, %v15477_v2  ;;  %v11838_v32 = vadd.f32 %v11837_v62, %v11836_v0  ;;  %v11902_v44 = vadd.f32 %v11901_v59, %v11900_v50  ;;  %v15573_v57 = vadd.f32 %v11899_v63, %v15474_v18  ;;  %v14079_v21 = vld [vmem:[#allocation9 + $0x158] sm:$0xff]   ;;  %12240 = vmatpush3.bf16.msra.mxu0 %v14077_v49 }
 0x2a2   : > { %12241 = vmatprep.subr.bf16.mxu0 %v14079_v21 }
 0x2a3   : > { %v15576_v1 = vadd.f32 %v11838_v32, %v15483_v4  ;;  %v15579_v33 = vadd.f32 %v11902_v44, %v15480_v10 }
 0x2a5   : > { %v11839_v52 = vpop.f32.mrb[104].mxu0  ;;  %v11903_v61 = vpop.f32.mrb[104].mxu1 }
 0x2a6   : > { %v11840_v39 = vpop.f32.mrb[105].mxu0  ;;  %v11904_v43 = vpop.f32.mrb[105].mxu1 }
 0x2a7   : > { %v11841_v2 = vadd.f32 %v11840_v39, %v11839_v52  ;;  %v11842_v46 = vpop.f32.mrb[106].mxu0  ;;  %v11905_v18 = vadd.f32 %v11904_v43, %v11903_v61  ;;  %v11906_v51 = vpop.f32.mrb[106].mxu1  ;;  %v14081_v61 = vld [vmem:[#allocation9 + $0x160] sm:$0xff]   ;;  %v14083_v43 = vld [vmem:[#allocation9 + $0x168] sm:$0xff]  }
 0x2a8   : > { %v11843_v53 = vpop.f32.mrb[107].mxu0  ;;  %v11907_v26 = vpop.f32.mrb[107].mxu1 }
 0x2a9   : > { %v15582_v4 = vadd.f32 %v11841_v2, %v15489_v29  ;;  %v11844_v10 = vadd.f32 %v11843_v53, %v11842_v46  ;;  %v11908_v48 = vadd.f32 %v11907_v26, %v11906_v51  ;;  %v15585_v9 = vadd.f32 %v11905_v18, %v15486_v3  ;;  %v14080_v3 = vld [vmem:[#allocation9 + $0x118] sm:$0xff]   ;;  %v14082_v2 = vld [vmem:[#allocation9 + $0x120] sm:$0xff]   ;;  %v14084_v53 = vld [vmem:[#allocation9 + $0x128] sm:$0xff]  }
 0x2aa   : > { %12242 = vmatpush3.bf16.msra.mxu0 %v14080_v3 }
 0x2ab   : > { %v15588_v55 = vadd.f32 %v11844_v10, %v15495_v7  ;;  %v15591_v47 = vadd.f32 %v11908_v48, %v15492_v17  ;;  %12243 = vmatprep.subr.bf16.mxu0 %v14081_v61 }
 0x2ad   : > { %v11845_v14 = vpop.f32.mrb[108].mxu0  ;;  %v11909_v27 = vpop.f32.mrb[108].mxu1 }
 0x2ae   : > { %v11846_v29 = vpop.f32.mrb[109].mxu0  ;;  %v11910_v63 = vpop.f32.mrb[109].mxu1  ;;  %12244 = vmatpush3.bf16.msra.mxu0 %v14082_v2 }
 0x2af   : > { %v11847_v0 = vadd.f32 %v11846_v29, %v11845_v14  ;;  %v11848_v50 = vpop.f32.mrb[110].mxu0  ;;  %v11911_v62 = vadd.f32 %v11910_v63, %v11909_v27  ;;  %v11912_v32 = vpop.f32.mrb[110].mxu1  ;;  %12245 = vmatprep.subr.bf16.mxu0 %v14083_v43 }
 0x2b0   : > { %v11849_v7 = vpop.f32.mrb[111].mxu0  ;;  %v11913_v44 = vpop.f32.mrb[111].mxu1 }
 0x2b1   : > { %v15594_v59 = vadd.f32 %v11847_v0, %v15501_v28  ;;  %v11850_v17 = vadd.f32 %v11849_v7, %v11848_v50  ;;  %v11914_v13 = vadd.f32 %v11913_v44, %v11912_v32  ;;  %v15597_v52 = vadd.f32 %v11911_v62, %v15498_v11  ;;  %v15608_v28 = vld [vmem:[%s17379_s4] ss:$0 sm:$0xff] }
 0x2b2   : > { %12246 = vmatpush3.bf16.msra.mxu0 %v14084_v53  ;;  %v14087_v44 = vld [vmem:[#allocation9 + $0x130] sm:$0xff]  }
 0x2b3   : > { %v15600_v19 = vadd.f32 %v11850_v17, %v15507_v37  ;;  %v15603_v12 = vadd.f32 %v11914_v13, %v15504_v35  ;;  %v15614_v37 = vld [vmem:[%s17461_s17] ss:$0 sm:$0xff]  ;;  %v14089_v13 = vld [vmem:[#allocation9 + $0x178] sm:$0xff]   ;;  %s17508_s17 = sld [smem:[#allocation47_spill]] }
 0x2b5   : > { %v13445_v39 = vpop.f32.mrb[112].mxu0  ;;  %v11915_v46 = vpop.f32.mrb[112].mxu1 }
 0x2b6   : > { %v3065_v11 = vadd.f32 %v13445_v39, %v15525_v36  ;;  %v3056_v54 = vpop.f32.mrb[113].mxu0  ;;  %v11916_v35 = vpop.f32.mrb[113].mxu1 }
 0x2b7   : > { %v3057_v18 = vadd.f32 %v3056_v54, %v15513_v20  ;;  %v13446_v51 = vpop.f32.mrb[114].mxu0  ;;  %v11917_v26 = vadd.f32 %v11916_v35, %v11915_v46  ;;  %v11918_v48 = vpop.f32.mrb[114].mxu1  ;;  %v14090_v54 = vld [vmem:[#allocation9 + $0x138] sm:$0xff]  }
 0x2b8   : > { %v3192_v10 = vmul.f32 %v15608_v28, %v3065_v11  ;;  %v3068_v45 = vadd.f32 %v13446_v51, %v15531_v6  ;;  %v3059_v36 = vpop.f32.mrb[115].mxu0  ;;  %v11919_v49 = vpop.f32.mrb[115].mxu1 }
 0x2b9   : > { %v3190_v14 = vmul.f32 %v15608_v28, %v3057_v18  ;;  %v3060_v21 = vadd.f32 %v3059_v36, %v15519_v31  ;;  %v11920_v29 = vadd.f32 %v11919_v49, %v11918_v48  ;;  %v15624_v0 = vadd.f32 %v11917_v26, %v15510_v30  ;;  %v14085_v31 = vld [vmem:[#allocation9 + $0x170] sm:$0xff]  }
 0x2ba   : > { %v3231_v27 = vadd.f32 %v15614_v37, %v3192_v10  ;;  %v3193_v20 = vmul.f32 %v15608_v28, %v3068_v45  ;;  %12247 = vmatprep.subr.bf16.mxu0 %v14085_v31  ;;  %v3454_v31 = vld [vmem:[#allocation2 + $0xa] sm:$0xff] }
 0x2bb   : > { %v3229_v63 = vadd.f32 %v15614_v37, %v3190_v14  ;;  %v3191_v50 = vmul.f32 %v15608_v28, %v3060_v21  ;;  %v15630_v62 = vadd.f32 %v11920_v29, %v15516_v42  ;;  %12248 = vmatpush3.bf16.msra.mxu0 %v14087_v44 }
 0x2bc   : > { %v3263_v6 = vmax.f32 %v3231_v27, 0.0  ;;  %v3232_v3 = vadd.f32 %v15614_v37, %v3193_v20  ;;  %12249 = vmatprep.subr.bf16.mxu0 %v14089_v13 }
 0x2bd   : > { %v3261_v32 = vmax.f32 %v3229_v63, 0.0  ;;  %v3230_v7 = vadd.f32 %v15614_v37, %v3191_v50  ;;  %v13449_v17 = vpop.f32.mrb[116].mxu0  ;;  %v11921_v61 = vpop.f32.mrb[116].mxu1 }
 0x2be   : > { %3295 = vst [vmem:[#allocation2 + $0x31] sm:$0xff] %v3263_v6  ;;  %v3264_v30 = vmax.f32 %v3232_v3, 0.0  ;;  %v3081_v39 = vadd.f32 %v13449_v17, %v15549_v8  ;;  %v3072_v2 = vpop.f32.mrb[117].mxu0  ;;  %v11922_v46 = vpop.f32.mrb[117].mxu1  ;;  %v3453_v3 = vld [vmem:[#allocation2 + $0x2] sm:$0xff] }
 0x2bf   : > { %3293 = vst [vmem:[#allocation2 + $0x19] sm:$0xff] %v3261_v32  ;;  %v3262_v43 = vmax.f32 %v3230_v7, 0.0  ;;  %v3073_v42 = vadd.f32 %v3072_v2, %v15537_v41  ;;  %v13450_v11 = vpop.f32.mrb[118].mxu0  ;;  %v11923_v18 = vadd.f32 %v11922_v46, %v11921_v61  ;;  %v11924_v51 = vpop.f32.mrb[118].mxu1  ;;  %12250 = vmatpush3.bf16.msra.mxu0 %v14090_v54  ;;  %v4191_v54 = vpack.c.bf16 %v3454_v31, %v3453_v3  ;;  %v14062_v3 = vld [vmem:[#allocation9 + $0x188] sm:$0xff]  }
 0x2c0   : > { %3296 = vst [vmem:[#allocation2 + $0x39] sm:$0xff] %v3264_v30  ;;  %v3196_v35 = vmul.f32 %v15608_v28, %v3081_v39  ;;  %v3084_v53 = vadd.f32 %v13450_v11, %v15555_v23  ;;  %v3075_v10 = vpop.f32.mrb[119].mxu0  ;;  %v4208_v26 = vpack.c.bf16 %v3264_v30, %v3263_v6  ;;  %v11925_v48 = vpop.f32.mrb[119].mxu1 }
 0x2c1   : > { %3294 = vst [vmem:[#allocation2 + $0x21] sm:$0xff] %v3262_v43  ;;  %v3194_v8 = vmul.f32 %v15608_v28, %v3073_v42  ;;  %v3076_v45 = vadd.f32 %v3075_v10, %v15543_v38  ;;  %v4199_v41 = vpack.c.bf16 %v3262_v43, %v3261_v32  ;;  %v11926_v49 = vadd.f32 %v11925_v48, %v11924_v51 }
 0x2c2   : > { %v3235_v36 = vadd.f32 %v15614_v37, %v3196_v35  ;;  %v3197_v14 = vmul.f32 %v15608_v28, %v3084_v53  ;;  %v15642_v21 = vadd.f32 %v11923_v18, %v15522_v5  ;;  %v14060_v53 = vld [vmem:[#allocation9 + $0x180] sm:$0xff]  }
 0x2c3   : > { %v3233_v23 = vadd.f32 %v15614_v37, %v3194_v8  ;;  %v3195_v27 = vmul.f32 %v15608_v28, %v3076_v45  ;;  %5190 = vmatprep.mubr.bf16.mxu0 %v4199_v41  ;;  %v15648_v38 = vadd.f32 %v11926_v49, %v15528_v24  ;;  %v14061_v41 = vld [vmem:[#allocation9 + $0x1c8] sm:$0xff]  }
 0x2c4   : > { %v3267_v20 = vmax.f32 %v3235_v36, 0.0  ;;  %v3236_v29 = vadd.f32 %v15614_v37, %v3197_v14 }
 0x2c5   : > { %v3265_v63 = vmax.f32 %v3233_v23, 0.0  ;;  %v3234_v50 = vadd.f32 %v15614_v37, %v3195_v27  ;;  %v13453_v6 = vpop.f32.mrb[120].mxu0  ;;  %v11927_v32 = vpop.f32.mrb[120].mxu1 }
 0x2c6   : > { %3299 = vst [vmem:[#allocation2 + $0x61] sm:$0xff] %v3267_v20  ;;  %v3268_v5 = vmax.f32 %v3236_v29, 0.0  ;;  %v3097_v7 = vadd.f32 %v13453_v6, %v15573_v57  ;;  %v3088_v17 = vpop.f32.mrb[121].mxu0  ;;  %v11928_v13 = vpop.f32.mrb[121].mxu1  ;;  %v3517_v42 = vld [vmem:[#allocation2 + $0x18] sm:$0xff] }
 0x2c7   : > { %3297 = vst [vmem:[#allocation2 + $0x49] sm:$0xff] %v3265_v63  ;;  %v3266_v44 = vmax.f32 %v3234_v50, 0.0  ;;  %v3089_v30 = vadd.f32 %v3088_v17, %v15561_v22  ;;  %v13454_v61 = vpop.f32.mrb[122].mxu0  ;;  %v11929_v39 = vadd.f32 %v11928_v13, %v11927_v32  ;;  %v11930_v2 = vpop.f32.mrb[122].mxu1  ;;  %v3520_v35 = vld [vmem:[#allocation2 + $0x38] sm:$0xff] }
 0x2c8   : > { %3300 = vst [vmem:[#allocation2 + $0x69] sm:$0xff] %v3268_v5  ;;  %v3200_v24 = vmul.f32 %v15608_v28, %v3097_v7  ;;  %v3100_v43 = vadd.f32 %v13454_v61, %v15579_v33  ;;  %v3091_v46 = vpop.f32.mrb[123].mxu0  ;;  %v3518_v11 = vld [vmem:[#allocation2 + $0x20] sm:$0xff]  ;;  %v11931_v18 = vpop.f32.mrb[123].mxu1  ;;  %v3519_v33 = vld [vmem:[#allocation2 + $0x30] sm:$0xff]  ;;  %v15665_v27 = vpack.c.bf16 %v3268_v5, %v3267_v20 }
 0x2c9   : > { %3298 = vst [vmem:[#allocation2 + $0x51] sm:$0xff] %v3266_v44  ;;  %v3198_v57 = vmul.f32 %v15608_v28, %v3089_v30  ;;  %v3092_v51 = vadd.f32 %v3091_v46, %v15567_v15  ;;  %v4192_v22 = vpack.c.bf16 %v3518_v11, %v3517_v42  ;;  %v11932_v48 = vadd.f32 %v11931_v18, %v11930_v2  ;;  %v3455_v5 = vld [vmem:[#allocation2 + $0x1a] sm:$0xff]  ;;  %v3456_v17 = vld [vmem:[#allocation2 + $0x22] sm:$0xff] }
 0x2ca   : > { %v15658_v10 = vadd.f32 %v15614_v37, %v3200_v24  ;;  %v3201_v8 = vmul.f32 %v15608_v28, %v3100_v43  ;;  %v4217_v45 = vpack.c.bf16 %v3266_v44, %v3265_v63  ;;  %v4201_v49 = vpack.c.bf16 %v3520_v35, %v3519_v33 }
 0x2cb   : > { %v3237_v36 = vadd.f32 %v15614_v37, %v3198_v57  ;;  %v3199_v14 = vmul.f32 %v15608_v28, %v3092_v51  ;;  %5343 = vmatprep.mubr.bf16.mxu1 %v4192_v22  ;;  %5191 = vmatmul.mubr.bf16.gmra.mrb[148].mxu0 %v4192_v22  ;;  %v15668_v29 = vadd.f32 %v11929_v39, %v15534_v58  ;;  %v14063_v58 = vld [vmem:[#allocation9 + $0x1d0] sm:$0xff]   ;;  %v14065_v22 = vld [vmem:[#allocation9 + $0x1d8] sm:$0xff]  }
 0x2cc   : > { %v3271_v15 = vmax.f32 %v15658_v10, 0.0  ;;  %v3240_v23 = vadd.f32 %v15614_v37, %v3201_v8  ;;  %5344 = vmatmul.mubr.bf16.vlgmr.msra.gmra.mrb[176].mxu1 %v4191_v54  ;;  %5198 = vmatprep.mubr.bf16.mxu0 %v4208_v26  ;;  %v15672_v31 = vadd.f32 %v11932_v48, %v15540_v34  ;;  %v15680_v54 = vpack.c.bf16 %v3456_v17, %v3455_v5 }
 0x2cd   : > { %v3269_v63 = vmax.f32 %v3237_v36, 0.0  ;;  %v3238_v50 = vadd.f32 %v15614_v37, %v3199_v14  ;;  %v13457_v6 = vpop.f32.mrb[124].mxu0  ;;  %5351 = vmatprep.mubr.bf16.mxu1 %v4201_v49  ;;  %12348 = vmatpush3.bf16.msra.mxu1 %v14060_v53  ;;  %v11933_v7 = vpop.f32.mrb[124].mxu1 }
 0x2ce   : > { %3303 = vst [vmem:[#allocation2 + $0x91] sm:$0xff] %v3271_v15  ;;  %v3272_v32 = vmax.f32 %v3240_v23, 0.0  ;;  %v3113_v26 = vadd.f32 %v13457_v6, %v15597_v52  ;;  %v3104_v20 = vpop.f32.mrb[125].mxu0  ;;  %12349 = vmatprep.subr.bf16.mxu1 %v14061_v41  ;;  %v11934_v13 = vpop.f32.mrb[125].mxu1  ;;  %v3521_v51 = vld [vmem:[#allocation2 + $0x48] sm:$0xff] }
 0x2cf   : > { %3301 = vst [vmem:[#allocation2 + $0x79] sm:$0xff] %v3269_v63  ;;  %v3270_v44 = vmax.f32 %v3238_v50, 0.0  ;;  %v3105_v30 = vadd.f32 %v3104_v20, %v15585_v9  ;;  %v13458_v61 = vpop.f32.mrb[126].mxu0  ;;  %v11935_v24 = vadd.f32 %v11934_v13, %v11933_v7  ;;  %v11936_v39 = vpop.f32.mrb[126].mxu1  ;;  %v14064_v9 = vld [vmem:[#allocation9 + $0x190] sm:$0xff]   ;;  %v14066_v23 = vld [vmem:[#allocation9 + $0x198] sm:$0xff]  }
 0x2d0   : > { %3304 = vst [vmem:[#allocation2 + $0x99] sm:$0xff] %v3272_v32  ;;  %v3204_v34 = vmul.f32 %v15608_v28, %v3113_v26  ;;  %v3116_v2 = vadd.f32 %v13458_v61, %v15603_v12  ;;  %v3107_v43 = vpop.f32.mrb[127].mxu0  ;;  %v3522_v52 = vld [vmem:[#allocation2 + $0x50] sm:$0xff]  ;;  %v11937_v42 = vpop.f32.mrb[127].mxu1  ;;  %v15701_v41 = vpack.c.bf16 %v3272_v32, %v3271_v15  ;;  %v3458_v7 = vld [vmem:[#allocation2 + $0x3a] sm:$0xff] }
 0x2d1   : > { %3302 = vst [vmem:[#allocation2 + $0x81] sm:$0xff] %v3270_v44  ;;  %v3202_v46 = vmul.f32 %v15608_v28, %v3105_v30  ;;  %v3108_v11 = vadd.f32 %v3107_v43, %v15591_v47  ;;  %12350 = vmatpush3.bf16.msra.mxu1 %v14062_v3  ;;  %v11938_v18 = vadd.f32 %v11937_v42, %v11936_v39 }
 0x2d2   : > { %v15683_v35 = vadd.f32 %v15614_v37, %v3204_v34  ;;  %v3205_v57 = vmul.f32 %v15608_v28, %v3116_v2  ;;  %v15687_v12 = vadd.f32 %v11935_v24, %v15546_v16  ;;  %12351 = vmatprep.subr.bf16.mxu1 %v14063_v58  ;;  %v15691_v10 = vpack.c.bf16 %v3522_v52, %v3521_v51  ;;  %v3523_v52 = vld [vmem:[#allocation2 + $0x60] sm:$0xff] }
 0x2d3   : > { %v3241_v53 = vadd.f32 %v15614_v37, %v3202_v46  ;;  %v3203_v47 = vmul.f32 %v15608_v28, %v3108_v11  ;;  %5199 = vmatmul.mubr.bf16.gmra.mrb[152].mxu0 %v4201_v49  ;;  %v15693_v8 = vpack.c.bf16 %v3270_v44, %v3269_v63  ;;  %v15699_v16 = vadd.f32 %v11938_v18, %v15552_v60  ;;  %v14067_v60 = vld [vmem:[#allocation9 + $0x1e0] sm:$0xff]   ;;  %v14069_v46 = vld [vmem:[#allocation9 + $0x1e8] sm:$0xff]  }
 0x2d4   : > { %v3275_v48 = vmax.f32 %v15683_v35, 0.0  ;;  %v3244_v33 = vadd.f32 %v15614_v37, %v3205_v57  ;;  %5352 = vmatmul.mubr.bf16.gmra.mrb[180].mxu1 %v15680_v54  ;;  %5206 = vmatprep.mubr.bf16.mxu0 %v4217_v45  ;;  %v3457_v45 = vld [vmem:[#allocation2 + $0x32] sm:$0xff] }
 0x2d5   : > { %v3273_v36 = vmax.f32 %v3241_v53, 0.0  ;;  %v3242_v14 = vadd.f32 %v15614_v37, %v3203_v47  ;;  %v13461_v49 = vpop.f32.mrb[128].mxu0  ;;  %5359 = vmatprep.mubr.bf16.mxu1 %v15691_v10  ;;  %12352 = vmatpush3.bf16.msra.mxu1 %v14064_v9  ;;  %v11939_v50 = vpop.f32.mrb[128].mxu1  ;;  %v15711_v24 = vpack.c.bf16 %v3458_v7, %v3457_v45  ;;  %v14070_v47 = vld [vmem:[#allocation9 + $0x1a8] sm:$0xff]  }
 0x2d6   : > { %3307 = vst [vmem:[#allocation2 + $0xc1] sm:$0xff] %v3275_v48  ;;  %v3276_v63 = vmax.f32 %v3244_v33, 0.0  ;;  %v3129_v6 = vadd.f32 %v13461_v49, %v15642_v21  ;;  %v3120_v3 = vpop.f32.mrb[129].mxu0  ;;  %12353 = vmatprep.subr.bf16.mxu1 %v14065_v22  ;;  %v11940_v32 = vpop.f32.mrb[129].mxu1  ;;  %v3524_v21 = vld [vmem:[#allocation2 + $0x68] sm:$0xff] }
 0x2d7   : > { %3305 = vst [vmem:[#allocation2 + $0xa9] sm:$0xff] %v3273_v36  ;;  %v3274_v15 = vmax.f32 %v3242_v14, 0.0  ;;  %v3121_v26 = vadd.f32 %v3120_v3, %v15624_v0  ;;  %v13462_v20 = vpop.f32.mrb[130].mxu0  ;;  %v11941_v17 = vadd.f32 %v11940_v32, %v11939_v50  ;;  %v11942_v58 = vpop.f32.mrb[130].mxu1  ;;  %v14068_v0 = vld [vmem:[#allocation9 + $0x1a0] sm:$0xff]   ;;  %v15723_v11 = vpack.c.bf16 %v3524_v21, %v3523_v52  ;;  %v14086_v21 = vld [vmem:[#allocation9 + $0x1f8] sm:$0xff]  }
 0x2d8   : > { %3308 = vst [vmem:[#allocation2 + $0xc9] sm:$0xff] %v3276_v63  ;;  %v3208_v5 = vmul.f32 %v15608_v28, %v3129_v6  ;;  %v3132_v44 = vadd.f32 %v13462_v20, %v15648_v38  ;;  %v3123_v13 = vpop.f32.mrb[131].mxu0  ;;  %v11943_v61 = vpop.f32.mrb[131].mxu1  ;;  %v15734_v18 = vpack.c.bf16 %v3276_v63, %v3275_v48 }
 0x2d9   : > { %3306 = vst [vmem:[#allocation2 + $0xb1] sm:$0xff] %v3274_v15  ;;  %v3206_v30 = vmul.f32 %v15608_v28, %v3121_v26  ;;  %v3124_v34 = vadd.f32 %v3123_v13, %v15630_v62  ;;  %12354 = vmatpush3.bf16.msra.mxu1 %v14066_v23  ;;  %v11944_v43 = vadd.f32 %v11943_v61, %v11942_v58  ;;  %v3460_v23 = vld [vmem:[#allocation2 + $0x52] sm:$0xff] }
 0x2da   : > { %v15714_v39 = vadd.f32 %v15614_v37, %v3208_v5  ;;  %v3209_v2 = vmul.f32 %v15608_v28, %v3132_v44  ;;  %v15718_v38 = vadd.f32 %v11941_v17, %v15558_v56  ;;  %12355 = vmatprep.subr.bf16.mxu1 %v14067_v60  ;;  %v15725_v9 = vpack.c.bf16 %v3274_v15, %v3273_v36  ;;  %v3525_v13 = vld [vmem:[#allocation2 + $0x78] sm:$0xff] }
 0x2db   : > { %v3245_v42 = vadd.f32 %v15614_v37, %v3206_v30  ;;  %v3207_v62 = vmul.f32 %v15608_v28, %v3124_v34  ;;  %5207 = vmatmul.mubr.bf16.gmra.mrb[156].mxu0 %v15691_v10  ;;  %v15732_v56 = vadd.f32 %v11944_v43, %v15564_v40  ;;  %v14076_v40 = vld [vmem:[#allocation9 + $0x1f0] sm:$0xff]  }
 0x2dc   : > { %v3279_v35 = vmax.f32 %v15714_v39, 0.0  ;;  %v3248_v57 = vadd.f32 %v15614_v37, %v3209_v2  ;;  %5360 = vmatmul.mubr.bf16.gmra.mrb[184].mxu1 %v15711_v24  ;;  %5214 = vmatprep.mubr.bf16.mxu0 %v15665_v27  ;;  %v3459_v27 = vld [vmem:[#allocation2 + $0x4a] sm:$0xff] }
 0x2dd   : > { %v3277_v51 = vmax.f32 %v3245_v42, 0.0  ;;  %v3246_v22 = vadd.f32 %v15614_v37, %v3207_v62  ;;  %v13465_v53 = vpop.f32.mrb[132].mxu0  ;;  %5367 = vmatprep.mubr.bf16.mxu1 %v15723_v11  ;;  %12356 = vmatpush3.bf16.msra.mxu1 %v14068_v0  ;;  %v11945_v36 = vpop.f32.mrb[132].mxu1  ;;  %v15744_v5 = vpack.c.bf16 %v3460_v23, %v3459_v27  ;;  %v14088_v42 = vld [vmem:[#allocation9 + $0x1b8] sm:$0xff]  }
 0x2de   : > { %3311 = vst [vmem:[#allocation2 + $0xf1] sm:$0xff] %v3279_v35  ;;  %v3280_v33 = vmax.f32 %v3248_v57, 0.0  ;;  %v3145_v14 = vadd.f32 %v13465_v53, %v15687_v12  ;;  %v3136_v49 = vpop.f32.mrb[133].mxu0  ;;  %12357 = vmatprep.subr.bf16.mxu1 %v14069_v46  ;;  %v11946_v63 = vpop.f32.mrb[133].mxu1  ;;  %v3526_v12 = vld [vmem:[#allocation2 + $0x80] sm:$0xff] }
 0x2df   : > { %3309 = vst [vmem:[#allocation2 + $0xd9] sm:$0xff] %v3277_v51  ;;  %v3278_v48 = vmax.f32 %v3246_v22, 0.0  ;;  %v3137_v50 = vadd.f32 %v3136_v49, %v15668_v29  ;;  %v13466_v6 = vpop.f32.mrb[134].mxu0  ;;  %v11947_v45 = vadd.f32 %v11946_v63, %v11945_v36  ;;  %v11948_v7 = vpop.f32.mrb[134].mxu1  ;;  %v14078_v29 = vld [vmem:[#allocation9 + $0x1b0] sm:$0xff]  }
 0x2e0   : > { %3312 = vst [vmem:[#allocation2 + $0xf9] sm:$0xff] %v3280_v33  ;;  %v3212_v3 = vmul.f32 %v15608_v28, %v3145_v14  ;;  %v3148_v60 = vadd.f32 %v13466_v6, %v15699_v16  ;;  %v3139_v15 = vpop.f32.mrb[135].mxu0  ;;  %v11949_v26 = vpop.f32.mrb[135].mxu1  ;;  %v15763_v2 = vpack.c.bf16 %v3280_v33, %v3279_v35  ;;  %v3461_v53 = vld [vmem:[#allocation2 + $0x62] sm:$0xff] }
 0x2e1   : > { %3310 = vst [vmem:[#allocation2 + $0xe1] sm:$0xff] %v3278_v48  ;;  %v3210_v32 = vmul.f32 %v15608_v28, %v3137_v50  ;;  %v3140_v20 = vadd.f32 %v3139_v15, %v15672_v31  ;;  %12358 = vmatpush3.bf16.msra.mxu1 %v14070_v47  ;;  %v11950_v44 = vadd.f32 %v11949_v26, %v11948_v7  ;;  %v3462_v47 = vld [vmem:[#allocation2 + $0x6a] sm:$0xff] }
 0x2e2   : > { %v15747_v17 = vadd.f32 %v15614_v37, %v3212_v3  ;;  %v3213_v58 = vmul.f32 %v15608_v28, %v3148_v60  ;;  %v3000_v16 = vadd.f32 %v11947_v45, %v15570_v25  ;;  %12359 = vmatprep.subr.bf16.mxu1 %v14076_v40  ;;  %v15754_v31 = vpack.c.bf16 %v3526_v12, %v3525_v13  ;;  %v3527_v60 = vld [vmem:[#allocation2 + $0x90] sm:$0xff] }
 0x2e3   : > { %v3249_v30 = vadd.f32 %v15614_v37, %v3210_v32  ;;  %v3211_v61 = vmul.f32 %v15608_v28, %v3140_v20  ;;  %5215 = vmatmul.mubr.bf16.gmra.mrb[160].mxu0 %v15723_v11  ;;  %v15756_v34 = vpack.c.bf16 %v3278_v48, %v3277_v51  ;;  %v3003_v25 = vadd.f32 %v11950_v44, %v15576_v1  ;;  %v3528_v48 = vld [vmem:[#allocation2 + $0x98] sm:$0xff] }
 0x2e4   : > { %v3283_v0 = vmax.f32 %v15747_v17, 0.0  ;;  %v3252_v39 = vadd.f32 %v15614_v37, %v3213_v58  ;;  %5368 = vmatmul.mubr.bf16.gmra.mrb[188].mxu1 %v15744_v5  ;;  %5222 = vmatprep.mubr.bf16.mxu0 %v15693_v8  ;;  %v15767_v8 = vld [vmem:[#allocation9 + $0x200] sm:$0xff]   ;;  %v15773_v3 = vpack.c.bf16 %v3462_v47, %v3461_v53 }
 0x2e5   : > { %v3281_v43 = vmax.f32 %v3249_v30, 0.0  ;;  %v3250_v52 = vadd.f32 %v15614_v37, %v3211_v61  ;;  %v13469_v46 = vpop.f32.mrb[136].mxu0  ;;  %5375 = vmatprep.mubr.bf16.mxu1 %v15754_v31  ;;  %12360 = vmatpush3.bf16.msra.mxu1 %v14078_v29  ;;  %v11951_v57 = vpop.f32.mrb[136].mxu1 }
 0x2e6   : > { %3315 = vst [vmem:[#allocation2 + $0x121] sm:$0xff] %v3283_v0  ;;  %v3284_v62 = vmax.f32 %v3252_v39, 0.0  ;;  %v3161_v51 = vadd.f32 %v13469_v46, %v3000_v16  ;;  %v3152_v22 = vpop.f32.mrb[137].mxu0  ;;  %12361 = vmatprep.subr.bf16.mxu1 %v14086_v21  ;;  %v11952_v35 = vpop.f32.mrb[137].mxu1 }
 0x2e7   : > { %3313 = vst [vmem:[#allocation2 + $0x109] sm:$0xff] %v3281_v43  ;;  %v3282_v1 = vmax.f32 %v3250_v52, 0.0  ;;  %v3153_v33 = vadd.f32 %v3152_v22, %v15718_v38  ;;  %v13470_v36 = vpop.f32.mrb[138].mxu0  ;;  %v11953_v49 = vadd.f32 %v11952_v35, %v11951_v57  ;;  %v11954_v27 = vpop.f32.mrb[138].mxu1  ;;  %v3464_v52 = vld [vmem:[#allocation2 + $0x82] sm:$0xff] }
 0x2e8   : > { %3316 = vst [vmem:[#allocation2 + $0x129] sm:$0xff] %v3284_v62  ;;  %v3216_v14 = vmul.f32 %v15608_v28, %v3161_v51  ;;  %v3164_v23 = vadd.f32 %v13470_v36, %v3003_v25  ;;  %v3155_v40 = vpop.f32.mrb[139].mxu0  ;;  %v11955_v50 = vpop.f32.mrb[139].mxu1  ;;  %v15790_v17 = vpack.c.bf16 %v3284_v62, %v3283_v0  ;;  %v3529_v35 = vld [vmem:[#allocation2 + $0xa8] sm:$0xff] }
 0x2e9   : > { %3314 = vst [vmem:[#allocation2 + $0x111] sm:$0xff] %v3282_v1  ;;  %v3214_v63 = vmul.f32 %v15608_v28, %v3153_v33  ;;  %v3156_v6 = vadd.f32 %v3155_v40, %v15732_v56  ;;  %12362 = vmatpush3.bf16.msra.mxu1 %v14088_v42  ;;  %v11956_v7 = vadd.f32 %v11955_v50, %v11954_v27  ;;  %v3530_v42 = vld [vmem:[#allocation2 + $0xb0] sm:$0xff] }
 0x2ea   : > { %v3255_v38 = vadd.f32 %v15614_v37, %v3216_v14  ;;  %v3217_v45 = vmul.f32 %v15608_v28, %v3164_v23  ;;  %v3008_v15 = vadd.f32 %v11953_v49, %v15582_v4  ;;  %13523 = vmatprep.subr.bf16.mxu1 %v15767_v8  ;;  %v15782_v56 = vpack.c.bf16 %v3528_v48, %v3527_v60 }
 0x2eb   : > { %v3253_v12 = vadd.f32 %v15614_v37, %v3214_v63  ;;  %v3215_v32 = vmul.f32 %v15608_v28, %v3156_v6  ;;  %5223 = vmatmul.mubr.bf16.gmra.mrb[164].mxu0 %v15754_v31  ;;  %v15784_v26 = vpack.c.bf16 %v3282_v1, %v3281_v43  ;;  %v3011_v4 = vadd.f32 %v11956_v7, %v15588_v55  ;;  %v3465_v6 = vld [vmem:[#allocation2 + $0x92] sm:$0xff]  ;;  %v3532_v7 = vld [vmem:[#allocation2 + $0xc8] sm:$0xff] }
 0x2ec   : > { %v3287_v20 = vmax.f32 %v3255_v38, 0.0  ;;  %v3256_v29 = vadd.f32 %v15614_v37, %v3217_v45  ;;  %5376 = vmatmul.mubr.bf16.gmra.mrb[192].mxu1 %v15773_v3  ;;  %5230 = vmatprep.mubr.bf16.mxu0 %v15701_v41  ;;  %v3463_v41 = vld [vmem:[#allocation2 + $0x7a] sm:$0xff]  ;;  %v15805_v49 = vpack.c.bf16 %v3530_v42, %v3529_v35 }
 0x2ed   : > { %v3285_v58 = vmax.f32 %v3253_v12, 0.0  ;;  %v3254_v44 = vadd.f32 %v15614_v37, %v3215_v32  ;;  %v13473_v16 = vpop.f32.mrb[140].mxu0  ;;  %5383 = vmatprep.mubr.bf16.mxu1 %v15782_v56  ;;  %v11957_v21 = vpop.f32.mrb[140].mxu1  ;;  %v15798_v1 = vpack.c.bf16 %v3464_v52, %v3463_v41  ;;  %v3466_v38 = vld [vmem:[#allocation2 + $0x9a] sm:$0xff] }
 0x2ee   : > { %3319 = vst [vmem:[#allocation2 + $0x151] sm:$0xff] %v3287_v20  ;;  %v3288_v13 = vmax.f32 %v3256_v29, 0.0  ;;  %v3168_v30 = vpop.f32.mrb[141].mxu0  ;;  %v11958_v39 = vpop.f32.mrb[141].mxu1  ;;  %v15818_v12 = vpack.c.bf16 %v3466_v38, %v3465_v6  ;;  %v3531_v32 = vld [vmem:[#allocation2 + $0xc0] sm:$0xff]  ;;  %v3537_v52 = vld [vmem:[#allocation2 + $0x108] sm:$0xff] }
 0x2ef   : > { %3317 = vst [vmem:[#allocation2 + $0x139] sm:$0xff] %v3285_v58  ;;  %v3286_v61 = vmax.f32 %v3254_v44, 0.0  ;;  %v3169_v25 = vadd.f32 %v3168_v30, %v3008_v15  ;;  %v13474_v43 = vpop.f32.mrb[142].mxu0  ;;  %v11959_v55 = vadd.f32 %v11958_v39, %v11957_v21  ;;  %v11960_v0 = vpop.f32.mrb[142].mxu1  ;;  %v3533_v44 = vld [vmem:[#allocation2 + $0xd8] sm:$0xff]  ;;  %v3540_v42 = vld [vmem:[#allocation2 + $0x128] sm:$0xff] }
 0x2f0   : > { %3320 = vst [vmem:[#allocation2 + $0x159] sm:$0xff] %v3288_v13  ;;  %v3171_v46 = vpop.f32.mrb[143].mxu0  ;;  %v15794_v62 = vpack.c.bf16 %v3288_v13, %v3287_v20  ;;  %v11961_v51 = vpop.f32.mrb[143].mxu1  ;;  %v15821_v20 = vpack.c.bf16 %v3532_v7, %v3531_v32  ;;  %v3470_v13 = vld [vmem:[#allocation2 + $0xca] sm:$0xff]  ;;  %v3536_v21 = vld [vmem:[#allocation2 + $0xf8] sm:$0xff] }
 0x2f1   : > { %3318 = vst [vmem:[#allocation2 + $0x141] sm:$0xff] %v3286_v61  ;;  %v3218_v57 = vmul.f32 %v15608_v28, %v3169_v25  ;;  %v3172_v22 = vadd.f32 %v3171_v46, %v3011_v4  ;;  %v3016_v53 = vadd.f32 %v11959_v55, %v15594_v59  ;;  %v11962_v47 = vadd.f32 %v11961_v51, %v11960_v0  ;;  %v3468_v4 = vld [vmem:[#allocation2 + $0xb2] sm:$0xff]  ;;  %v3471_v25 = vld [vmem:[#allocation2 + $0xda] sm:$0xff] }
 0x2f2   : > { %v15800_v33 = vpack.c.bf16 %v3286_v61, %v3285_v58  ;;  %v3534_v58 = vld [vmem:[#allocation2 + $0xe0] sm:$0xff]  ;;  %v3535_v61 = vld [vmem:[#allocation2 + $0xf0] sm:$0xff] }
 0x2f3   : > { %v3257_v36 = vadd.f32 %v15614_v37, %v3218_v57  ;;  %v3219_v14 = vmul.f32 %v15608_v28, %v3172_v22  ;;  %5231 = vmatmul.mubr.bf16.gmra.mrb[168].mxu0 %v15782_v56  ;;  %v3177_v27 = vadd.f32 %v13473_v16, %v3016_v53  ;;  %v3019_v23 = vadd.f32 %v11962_v47, %v15600_v19  ;;  %v3473_v0 = vld [vmem:[#allocation2 + $0xf2] sm:$0xff]  ;;  %v3539_v53 = vld [vmem:[#allocation2 + $0x120] sm:$0xff] }
 0x2f4   : > { %5384 = vmatmul.mubr.bf16.gmra.mrb[196].mxu1 %v15798_v1  ;;  %5238 = vmatprep.mubr.bf16.mxu0 %v15725_v9  ;;  %v15829_v16 = vpack.c.bf16 %v3534_v58, %v3533_v44  ;;  %v15837_v39 = vpack.c.bf16 %v3536_v21, %v3535_v61  ;;  %v15855_v47 = vpack.c.bf16 %v3540_v42, %v3539_v53  ;;  %v3581_v21 = vld [vmem:[#allocation2 + $0x19] sm:$0xff]  ;;  %v3775_v42 = vld [vmem:[#allocation2 + $0x49] sm:$0xff] }
 0x2f5   : > { %v3289_v59 = vmax.f32 %v3257_v36, 0.0  ;;  %v3258_v40 = vadd.f32 %v15614_v37, %v3219_v14  ;;  %5391 = vmatprep.mubr.bf16.mxu1 %v15805_v49  ;;  %v3220_v48 = vmul.f32 %v15608_v28, %v3177_v27  ;;  %v3180_v63 = vadd.f32 %v13474_v43, %v3019_v23  ;;  %v3538_v43 = vld [vmem:[#allocation2 + $0x110] sm:$0xff]  ;;  %v3774_v61 = vld [vmem:[#allocation2 + $0x39] sm:$0xff] }
 0x2f6   : > { %v15845_v55 = vpack.c.bf16 %v3538_v43, %v3537_v52  ;;  %v3475_v14 = vld [vmem:[#allocation2 + $0x10a] sm:$0xff]  ;;  %v3476_v27 = vld [vmem:[#allocation2 + $0x112] sm:$0xff] }
 0x2f7   : > { %3321 = vst [vmem:[#allocation2 + $0x169] sm:$0xff] %v3289_v59  ;;  %v3290_v50 = vmax.f32 %v3258_v40, 0.0  ;;  %v3259_v45 = vadd.f32 %v15614_v37, %v3220_v48  ;;  %v3221_v19 = vmul.f32 %v15608_v28, %v3180_v63  ;;  %v3467_v28 = vld [vmem:[#allocation2 + $0xaa] sm:$0xff]  ;;  %v3541_v40 = vld [vmem:[#allocation2 + $0x138] sm:$0xff] }
 0x2f8   : > { %v3542_v23 = vld [vmem:[#allocation2 + $0x140] sm:$0xff]  ;;  %v3478_v63 = vld [vmem:[#allocation2 + $0x12a] sm:$0xff] }
 0x2f9   : > { %3322 = vst [vmem:[#allocation2 + $0x171] sm:$0xff] %v3290_v50  ;;  %v15815_v60 = vpack.c.bf16 %v3290_v50, %v3289_v59  ;;  %v3291_v9 = vmax.f32 %v3259_v45, 0.0  ;;  %v3260_v15 = vadd.f32 %v15614_v37, %v3221_v19  ;;  %v15826_v37 = vpack.c.bf16 %v3468_v4, %v3467_v28  ;;  %v3544_v50 = vld [vmem:[#allocation2 + $0x158] sm:$0xff]  ;;  %v3543_v38 = vld [vmem:[#allocation2 + $0x150] sm:$0xff] }
 0x2fa   : > { %v15862_v59 = vpack.c.bf16 %v3476_v27, %v3475_v14  ;;  %v15865_v48 = vpack.c.bf16 %v3542_v23, %v3541_v40  ;;  %v15873_v45 = vpack.c.bf16 %v3544_v50, %v3543_v38  ;;  %v3479_v19 = vld [vmem:[#allocation2 + $0x13a] sm:$0xff]  ;;  %v3773_v43 = vld [vmem:[#allocation2 + $0x31] sm:$0xff]  ;;  %v14094_v14 = vld [vmem:[#allocation9 + $0x218] sm:$0xff]  }
 0x2fb   : > { %5239 = vmatmul.mubr.bf16.gmra.mrb[172].mxu0 %v15805_v49  ;;  %3323 = vst [vmem:[#allocation2 + $0x181] sm:$0xff] %v3291_v9  ;;  %v3292_v29 = vmax.f32 %v3260_v15, 0.0  ;;  %v4196_v52 = vpack.c.bf16 %v3774_v61, %v3773_v43  ;;  %v3780_v23 = vld [vmem:[#allocation2 + $0x81] sm:$0xff]  ;;  %v14096_v40 = vld [vmem:[#allocation9 + $0x228] sm:$0xff]  }
 0x2fc   : > { %5392 = vmatmul.mubr.bf16.gmra.mrb[200].mxu1 %v15818_v12  ;;  %5246 = vmatprep.mubr.bf16.mxu0 %v15734_v18  ;;  %v3469_v18 = vld [vmem:[#allocation2 + $0xc2] sm:$0xff] }
 0x2fd   : > { %5399 = vmatprep.mubr.bf16.mxu1 %v15821_v20  ;;  %3324 = vst [vmem:[#allocation2 + $0x189] sm:$0xff] %v3292_v29  ;;  %v15834_v30 = vpack.c.bf16 %v3470_v13, %v3469_v18  ;;  %v3481_v29 = vld [vmem:[#allocation2 + $0x152] sm:$0xff]  ;;  %v3582_v18 = vld [vmem:[#allocation2 + $0x21] sm:$0xff] }
 0x2fe   : > { %v3545_v15 = vld [vmem:[#allocation2 + $0x168] sm:$0xff] }
 0x2ff   : > { %v14098_v50 = vld [vmem:[#allocation9 + $0x238] sm:$0xff]  }
 0x300   : > { %v3546_v7 = vld [vmem:[#allocation2 + $0x170] sm:$0xff] }
 0x301   : > { %v15881_v32 = vpack.c.bf16 %v3546_v7, %v3545_v15  ;;  %v3484_v13 = vld [vmem:[#allocation2 + $0x172] sm:$0xff]  ;;  %v3785_v7 = vld [vmem:[#allocation2 + $0xc1] sm:$0xff] }
 0x302   : > { %v3547_v58 = vld [vmem:[#allocation2 + $0x180] sm:$0xff] }
 0x303   : > { %5247 = vmatmul.mubr.bf16.gmra.mrb[176].mxu0 %v15821_v20 }
 0x304   : > { %5400 = vmatmul.mubr.bf16.gmra.mrb[204].mxu1 %v15826_v37  ;;  %5254 = vmatprep.mubr.bf16.mxu0 %v15756_v34  ;;  %v3472_v34 = vld [vmem:[#allocation2 + $0xe2] sm:$0xff] }
 0x305   : > { %5407 = vmatprep.mubr.bf16.mxu1 %v15829_v16  ;;  %v15842_v41 = vpack.c.bf16 %v3472_v34, %v3471_v25  ;;  %v3548_v28 = vld [vmem:[#allocation2 + $0x188] sm:$0xff]  ;;  %v4193_v25 = vpack.c.bf16 %v3582_v18, %v3581_v21 }
 0x306   : > { %v15889_v44 = vpack.c.bf16 %v3548_v28, %v3547_v58 }
 0x30b   : > { %5255 = vmatmul.mubr.bf16.gmra.mrb[180].mxu0 %v15829_v16 }
 0x30c   : > { %5408 = vmatmul.mubr.bf16.gmra.mrb[208].mxu1 %v15834_v30  ;;  %5262 = vmatprep.mubr.bf16.mxu0 %v15763_v2  ;;  %v3474_v2 = vld [vmem:[#allocation2 + $0xfa] sm:$0xff] }
 0x30d   : > { %5415 = vmatprep.mubr.bf16.mxu1 %v15837_v39  ;;  %v15852_v22 = vpack.c.bf16 %v3474_v2, %v3473_v0  ;;  %v3710_v0 = vld [vmem:[#allocation2 + $0x38] sm:$0xff]  ;;  %v3709_v2 = vld [vmem:[#allocation2 + $0x30] sm:$0xff] }
 0x310   : > { %v12027_v46 = vpop.f32.mrb[144].mxu0 }
 0x311   : > { %v12028_v57 = vpop.f32.mrb[145].mxu0 }
 0x312   : > { %v15850_v51 = vadd.f32 %v12028_v57, %v12027_v46  ;;  %v4195_v46 = vpack.c.bf16 %v3710_v0, %v3709_v2  ;;  %v14092_v57 = vld [vmem:[#allocation9 + $0x208] sm:$0xff]  }
 0x313   : > { %5263 = vmatmul.mubr.bf16.gmra.mrb[184].mxu0 %v15837_v39 }
 0x314   : > { %5416 = vmatmul.mubr.bf16.gmra.mrb[212].mxu1 %v15842_v41  ;;  %5270 = vmatprep.mubr.bf16.mxu0 %v15784_v26  ;;  %v12030_v26 = vpop.f32.mrb[146].mxu0 }
 0x315   : > { %5423 = vmatprep.mubr.bf16.mxu1 %v15845_v55  ;;  %v12031_v35 = vpop.f32.mrb[147].mxu0 }
 0x316   : > { %v15860_v36 = vadd.f32 %v12031_v35, %v12030_v26  ;;  %v14093_v26 = vld [vmem:[#allocation9 + $0x210] sm:$0xff]   ;;  %v3778_v35 = vld [vmem:[#allocation2 + $0x69] sm:$0xff] }
 0x31b   : > { %5271 = vmatmul.mubr.bf16.gmra.mrb[188].mxu0 %v15845_v55 }
 0x31c   : > { %5424 = vmatmul.mubr.bf16.gmra.mrb[216].mxu1 %v15852_v22  ;;  %5278 = vmatprep.mubr.bf16.mxu0 %v15790_v17  ;;  %v3477_v17 = vld [vmem:[#allocation2 + $0x122] sm:$0xff] }
 0x31d   : > { %5431 = vmatprep.mubr.bf16.mxu1 %v15855_v47  ;;  %v15870_v6 = vpack.c.bf16 %v3478_v63, %v3477_v17  ;;  %v3781_v63 = vld [vmem:[#allocation2 + $0x91] sm:$0xff] }
 0x323   : > { %5279 = vmatmul.mubr.bf16.gmra.mrb[192].mxu0 %v15855_v47 }
 0x324   : > { %5432 = vmatmul.mubr.bf16.gmra.mrb[220].mxu1 %v15862_v59  ;;  %5286 = vmatprep.mubr.bf16.mxu0 %v15800_v33  ;;  %v3480_v33 = vld [vmem:[#allocation2 + $0x142] sm:$0xff] }
 0x325   : > { %5439 = vmatprep.mubr.bf16.mxu1 %v15865_v48  ;;  %v15878_v9 = vpack.c.bf16 %v3480_v33, %v3479_v19  ;;  %v3786_v33 = vld [vmem:[#allocation2 + $0xc9] sm:$0xff] }
 0x326   : > { %v4250_v15 = vpack.c.bf16 %v3786_v33, %v3785_v7 }
 0x32b   : > { %5287 = vmatmul.mubr.bf16.gmra.mrb[196].mxu0 %v15865_v48 }
 0x32c   : > { %5440 = vmatmul.mubr.bf16.gmra.mrb[224].mxu1 %v15870_v6  ;;  %5294 = vmatprep.mubr.bf16.mxu0 %v15794_v62  ;;  %v3482_v62 = vld [vmem:[#allocation2 + $0x15a] sm:$0xff] }
 0x32d   : > { %5447 = vmatprep.mubr.bf16.mxu1 %v15873_v45  ;;  %v15886_v4 = vpack.c.bf16 %v3482_v62, %v3481_v29 }
 0x333   : > { %5295 = vmatmul.mubr.bf16.gmra.mrb[200].mxu0 %v15873_v45 }
 0x334   : > { %5448 = vmatmul.mubr.bf16.gmra.mrb[228].mxu1 %v15878_v9  ;;  %5302 = vmatprep.mubr.bf16.mxu0 %v15815_v60  ;;  %v3483_v60 = vld [vmem:[#allocation2 + $0x16a] sm:$0xff] }
 0x335   : > { %5455 = vmatprep.mubr.bf16.mxu1 %v15881_v32  ;;  %v15894_v34 = vpack.c.bf16 %v3484_v13, %v3483_v60 }
 0x33b   : > { %5303 = vmatmul.mubr.bf16.gmra.mrb[204].mxu0 %v15881_v32 }
 0x33c   : > { %5456 = vmatmul.mubr.bf16.gmra.mrb[232].mxu1 %v15886_v4  ;;  %5504 = vmatprep.mubr.bf16.mxu0 %v15680_v54  ;;  %v3776_v54 = vld [vmem:[#allocation2 + $0x51] sm:$0xff] }
 0x33d   : > { %5463 = vmatprep.mubr.bf16.mxu1 %v15889_v44  ;;  %v4205_v53 = vpack.c.bf16 %v3776_v54, %v3775_v42  ;;  %v3797_v54 = vld [vmem:[#allocation2 + $0x151] sm:$0xff] }
 0x343   : > { %5505 = vmatmul.mubr.bf16.vlgmr.msra.gmra.mrb[208].mxu0 %v4193_v25  ;;  %v3798_v25 = vld [vmem:[#allocation2 + $0x159] sm:$0xff] }
 0x344   : > { %5464 = vmatmul.mubr.bf16.gmra.mrb[236].mxu1 %v15894_v34  ;;  %5512 = vmatprep.mubr.bf16.mxu0 %v15711_v24  ;;  %v3777_v24 = vld [vmem:[#allocation2 + $0x61] sm:$0xff] }
 0x345   : > { %5665 = vmatprep.mubr.bf16.mxu1 %v4196_v52  ;;  %v4214_v27 = vpack.c.bf16 %v3778_v35, %v3777_v24 }
 0x34b   : > { %5513 = vmatmul.mubr.bf16.gmra.mrb[212].mxu0 %v4196_v52 }
 0x34c   : > { %5666 = vmatmul.mubr.bf16.vlgmr.msra.gmra.mrb[240].mxu1 %v4195_v46  ;;  %5520 = vmatprep.mubr.bf16.mxu0 %v15744_v5  ;;  %v14095_v5 = vld [vmem:[#allocation9 + $0x220] sm:$0xff]  }
 0x34d   : > { %5673 = vmatprep.mubr.bf16.mxu1 %v4205_v53  ;;  %13524 = vmatpush3.bf16.msra.mxu1 %v15767_v8  ;;  %v3779_v8 = vld [vmem:[#allocation2 + $0x79] sm:$0xff] }
 0x34e   : > { %13525 = vmatprep.subr.bf16.mxu1 %v14092_v57  ;;  %v4223_v17 = vpack.c.bf16 %v3780_v23, %v3779_v8 }
 0x351   : > { %13526 = vmatpush3.bf16.msra.mxu1 %v14092_v57 }
 0x352   : > { %13527 = vmatprep.subr.bf16.mxu1 %v14093_v26 }
 0x353   : > { %5521 = vmatmul.mubr.bf16.gmra.mrb[216].mxu0 %v4205_v53 }
 0x354   : > { %5674 = vmatmul.mubr.bf16.gmra.mrb[244].mxu1 %v15691_v10  ;;  %5528 = vmatprep.mubr.bf16.mxu0 %v15773_v3  ;;  %v14097_v10 = vld [vmem:[#allocation9 + $0x230] sm:$0xff]  }
 0x355   : > { %5681 = vmatprep.mubr.bf16.mxu1 %v4214_v27  ;;  %13528 = vmatpush3.bf16.msra.mxu1 %v14093_v26  ;;  %v3782_v3 = vld [vmem:[#allocation2 + $0x99] sm:$0xff] }
 0x356   : > { %13529 = vmatprep.subr.bf16.mxu1 %v14094_v14  ;;  %v4232_v38 = vpack.c.bf16 %v3782_v3, %v3781_v63 }
 0x359   : > { %13530 = vmatpush3.bf16.msra.mxu1 %v14094_v14  ;;  %v3800_v14 = vld [vmem:[#allocation2 + $0x171] sm:$0xff] }
 0x35a   : > { %13531 = vmatprep.subr.bf16.mxu1 %v14095_v5 }
 0x35b   : > { %5529 = vmatmul.mubr.bf16.gmra.mrb[220].mxu0 %v4214_v27 }
 0x35c   : > { %5682 = vmatmul.mubr.bf16.gmra.mrb[248].mxu1 %v15723_v11  ;;  %5536 = vmatprep.mubr.bf16.mxu0 %v15798_v1  ;;  %v3784_v11 = vld [vmem:[#allocation2 + $0xb1] sm:$0xff]  ;;  %v3783_v1 = vld [vmem:[#allocation2 + $0xa9] sm:$0xff] }
 0x35d   : > { %5689 = vmatprep.mubr.bf16.mxu1 %v4223_v17  ;;  %13532 = vmatpush3.bf16.msra.mxu1 %v14095_v5  ;;  %v4241_v19 = vpack.c.bf16 %v3784_v11, %v3783_v1  ;;  %v3676_v11 = vld [vmem:[#allocation2 + $0x18a] sm:$0xff] }
 0x35e   : > { %13533 = vmatprep.subr.bf16.mxu1 %v14096_v40  ;;  %v14100_v1 = vld [vmem:[#allocation12] sm:$0xff]  }
 0x361   : > { %13534 = vmatpush3.bf16.msra.mxu1 %v14096_v40  ;;  %v3799_v40 = vld [vmem:[#allocation2 + $0x169] sm:$0xff] }
 0x362   : > { %13535 = vmatprep.subr.bf16.mxu1 %v14097_v10 }
 0x363   : > { %5537 = vmatmul.mubr.bf16.gmra.mrb[224].mxu0 %v4223_v17  ;;  %v14099_v17 = vld [vmem:[#allocation12 + $0x40] sm:$0xff]  }
 0x364   : > { %5690 = vmatmul.mubr.bf16.gmra.mrb[252].mxu1 %v15754_v31  ;;  %5544 = vmatprep.mubr.bf16.mxu0 %v15818_v12  ;;  %v3788_v31 = vld [vmem:[#allocation2 + $0xe1] sm:$0xff]  ;;  %v3787_v12 = vld [vmem:[#allocation2 + $0xd9] sm:$0xff] }
 0x365   : > { %5697 = vmatprep.mubr.bf16.mxu1 %v4232_v38  ;;  %13536 = vmatpush3.bf16.msra.mxu1 %v14097_v10  ;;  %v4259_v29 = vpack.c.bf16 %v3788_v31, %v3787_v12 }
 0x366   : > { %13537 = vmatprep.subr.bf16.mxu1 %v14098_v50  ;;  %12483 = vmatprep.subr.bf16.mxu0 %v14099_v17 }
 0x367   : > { %12484 = vmatpush3.bf16.msra.mxu0 %v14100_v1 }
 0x369   : > { %13538 = vmatpush3.bf16.msra.mxu1 %v14098_v50 }
 0x36b   : > { %5545 = vmatmul.mubr.bf16.gmra.mrb[228].mxu0 %v4232_v38  ;;  %v3675_v38 = vld [vmem:[#allocation2 + $0x182] sm:$0xff] }
 0x36c   : > { %5698 = vmatmul.mubr.bf16.gmra.mrb[0].mxu1 %v15782_v56  ;;  %5552 = vmatprep.mubr.bf16.mxu0 %v15826_v37  ;;  %v3790_v56 = vld [vmem:[#allocation2 + $0xf9] sm:$0xff]  ;;  %v3789_v37 = vld [vmem:[#allocation2 + $0xf1] sm:$0xff] }
 0x36d   : > { %5705 = vmatprep.mubr.bf16.mxu1 %v4241_v19  ;;  %v4268_v62 = vpack.c.bf16 %v3790_v56, %v3789_v37  ;;  %v15934_v56 = vpack.c.bf16 %v3676_v11, %v3675_v38  ;;  %v3801_v37 = vld [vmem:[#allocation2 + $0x181] sm:$0xff]  ;;  %v3839_v38 = vld [vmem:[#allocation2 + $0x4a] sm:$0xff]  ;;  %v3840_v11 = vld [vmem:[#allocation2 + $0x52] sm:$0xff] }
 0x373   : > { %5553 = vmatmul.mubr.bf16.gmra.mrb[232].mxu0 %v4241_v19 }
 0x374   : > { %5706 = vmatmul.mubr.bf16.gmra.mrb[4].mxu1 %v15805_v49  ;;  %5560 = vmatprep.mubr.bf16.mxu0 %v15834_v30  ;;  %v3792_v49 = vld [vmem:[#allocation2 + $0x111] sm:$0xff]  ;;  %v3791_v30 = vld [vmem:[#allocation2 + $0x109] sm:$0xff] }
 0x375   : > { %5713 = vmatprep.mubr.bf16.mxu1 %v4250_v15  ;;  %v4277_v28 = vpack.c.bf16 %v3792_v49, %v3791_v30 }
 0x37b   : > { %5561 = vmatmul.mubr.bf16.gmra.mrb[236].mxu0 %v4250_v15  ;;  %v3802_v15 = vld [vmem:[#allocation2 + $0x189] sm:$0xff] }
 0x37c   : > { %5714 = vmatmul.mubr.bf16.gmra.mrb[8].mxu1 %v15821_v20  ;;  %5568 = vmatprep.mubr.bf16.mxu0 %v15842_v41  ;;  %v3794_v20 = vld [vmem:[#allocation2 + $0x129] sm:$0xff]  ;;  %v3793_v41 = vld [vmem:[#allocation2 + $0x121] sm:$0xff]  ;;  %v4322_v30 = vpack.c.bf16 %v3802_v15, %v3801_v37  ;;  %v4206_v37 = vpack.c.bf16 %v3840_v11, %v3839_v38 }
 0x37d   : > { %5721 = vmatprep.mubr.bf16.mxu1 %v4259_v29  ;;  %v4286_v58 = vpack.c.bf16 %v3794_v20, %v3793_v41  ;;  %v3803_v41 = vld [vmem:[#allocation2 + $0x199] sm:$0xff]  ;;  %v3842_v15 = vld [vmem:[#allocation2 + $0x6a] sm:$0xff] }
 0x383   : > { %5569 = vmatmul.mubr.bf16.gmra.mrb[240].mxu0 %v4259_v29 }
 0x384   : > { %5722 = vmatmul.mubr.bf16.gmra.mrb[12].mxu1 %v15829_v16  ;;  %5576 = vmatprep.mubr.bf16.mxu0 %v15852_v22  ;;  %v3796_v16 = vld [vmem:[#allocation2 + $0x141] sm:$0xff]  ;;  %v3795_v22 = vld [vmem:[#allocation2 + $0x139] sm:$0xff] }
 0x385   : > { %5729 = vmatprep.mubr.bf16.mxu1 %v4268_v62  ;;  %v4295_v18 = vpack.c.bf16 %v3796_v16, %v3795_v22 }
 0x38b   : > { %5577 = vmatmul.mubr.bf16.gmra.mrb[244].mxu0 %v4268_v62 }
 0x38c   : > { %5730 = vmatmul.mubr.bf16.gmra.mrb[16].mxu1 %v15837_v39  ;;  %5584 = vmatprep.mubr.bf16.mxu0 %v15862_v59 }
 0x38d   : > { %5737 = vmatprep.mubr.bf16.mxu1 %v4277_v28 }
 0x393   : > { %5585 = vmatmul.mubr.bf16.gmra.mrb[248].mxu0 %v4277_v28 }
 0x394   : > { %5738 = vmatmul.mubr.bf16.gmra.mrb[20].mxu1 %v15845_v55  ;;  %5592 = vmatprep.mubr.bf16.mxu0 %v15870_v6 }
 0x395   : > { %5745 = vmatprep.mubr.bf16.mxu1 %v4286_v58 }
 0x39b   : > { %5593 = vmatmul.mubr.bf16.gmra.mrb[252].mxu0 %v4286_v58  ;;  %v3804_v58 = vld [vmem:[#allocation2 + $0x1a1] sm:$0xff] }
 0x39c   : > { %5746 = vmatmul.mubr.bf16.gmra.mrb[24].mxu1 %v15855_v47  ;;  %5600 = vmatprep.mubr.bf16.mxu0 %v15878_v9  ;;  %v4304_v9 = vpack.c.bf16 %v3798_v25, %v3797_v54  ;;  %v3740_v54 = vld [vmem:[#allocation2 + $0x1a0] sm:$0xff] }
 0x39d   : > { %5753 = vmatprep.mubr.bf16.mxu1 %v4295_v18 }
 0x39e   : > { %v12033_v39 = vpop.f32.mrb[148].mxu0 }
 0x39f   : > { %v12139_v59 = vpop.f32.mrb[176].mxu1  ;;  %v12034_v60 = vpop.f32.mrb[149].mxu0 }
 0x3a0   : > { %v12035_v13 = vadd.f32 %v12034_v60, %v12033_v39  ;;  %v12140_v21 = vpop.f32.mrb[177].mxu1  ;;  %v12036_v61 = vpop.f32.mrb[150].mxu0 }
 0x3a1   : > { %v12141_v55 = vadd.f32 %v12140_v21, %v12139_v59  ;;  %v12142_v43 = vpop.f32.mrb[178].mxu1  ;;  %v12037_v6 = vpop.f32.mrb[151].mxu0 }
 0x3a2   : > { %v12038_v52 = vadd.f32 %v12037_v6, %v12036_v61  ;;  %v12143_v0 = vpop.f32.mrb[179].mxu1  ;;  %v4331_v61 = vpack.c.bf16 %v3804_v58, %v3803_v41  ;;  %v14101_v6 = vld [vmem:[#allocation12 + $0x48] sm:$0xff]   ;;  %v14103_v41 = vld [vmem:[#allocation12 + $0x50] sm:$0xff]  }
 0x3a3   : > { %v15921_v2 = vadd.f32 %v12141_v55, %v15850_v51  ;;  %v12144_v47 = vadd.f32 %v12143_v0, %v12142_v43  ;;  %5601 = vmatmul.mubr.bf16.gmra.mrb[0].mxu0 %v4295_v18  ;;  %v3739_v0 = vld [vmem:[#allocation2 + $0x198] sm:$0xff]  ;;  %12485 = vmatprep.subr.bf16.mxu0 %v14101_v6 }
 0x3a4   : > { %5754 = vmatmul.mubr.bf16.gmra.mrb[28].mxu1 %v15865_v48  ;;  %5608 = vmatprep.mubr.bf16.mxu0 %v15886_v4 }
 0x3a5   : > { %v15926_v46 = vadd.f32 %v12144_v47, %v15860_v36  ;;  %5761 = vmatprep.mubr.bf16.mxu1 %v4304_v9  ;;  %v4313_v36 = vpack.c.bf16 %v3800_v14, %v3799_v40  ;;  %v3837_v14 = vld [vmem:[#allocation2 + $0x32] sm:$0xff] }
 0x3a6   : > { %v12039_v42 = vpop.f32.mrb[152].mxu0 }
 0x3a7   : > { %v12145_v57 = vpop.f32.mrb[180].mxu1  ;;  %v12040_v53 = vpop.f32.mrb[153].mxu0 }
 0x3a8   : > { %v12041_v26 = vadd.f32 %v12040_v53, %v12039_v42  ;;  %v12146_v35 = vpop.f32.mrb[181].mxu1  ;;  %v12042_v24 = vpop.f32.mrb[154].mxu0 }
 0x3a9   : > { %v12147_v51 = vadd.f32 %v12146_v35, %v12145_v57  ;;  %v12148_v27 = vpop.f32.mrb[182].mxu1  ;;  %v12043_v5 = vpop.f32.mrb[155].mxu0  ;;  %v14102_v57 = vld [vmem:[#allocation12 + $0x8] sm:$0xff]  }
 0x3aa   : > { %v12044_v23 = vadd.f32 %v12043_v5, %v12042_v24  ;;  %v12149_v8 = vpop.f32.mrb[183].mxu1  ;;  %v4330_v24 = vpack.c.bf16 %v3740_v54, %v3739_v0  ;;  %12486 = vmatpush3.bf16.msra.mxu0 %v14102_v57 }
 0x3ab   : > { %v15928_v48 = vadd.f32 %v12147_v51, %v12035_v13  ;;  %v12150_v4 = vadd.f32 %v12149_v8, %v12148_v27  ;;  %5609 = vmatmul.mubr.bf16.gmra.mrb[4].mxu0 %v4304_v9  ;;  %v3838_v51 = vld [vmem:[#allocation2 + $0x3a] sm:$0xff]  ;;  %12487 = vmatprep.subr.bf16.mxu0 %v14103_v41 }
 0x3ac   : > { %5762 = vmatmul.mubr.bf16.gmra.mrb[32].mxu1 %v15873_v45  ;;  %5616 = vmatprep.mubr.bf16.mxu0 %v15894_v34 }
 0x3ad   : > { %v15932_v10 = vadd.f32 %v12150_v4, %v12038_v52  ;;  %5769 = vmatprep.mubr.bf16.mxu1 %v4313_v36 }
 0x3ae   : > { %v12045_v3 = vpop.f32.mrb[156].mxu0 }
 0x3af   : > { %v12151_v63 = vpop.f32.mrb[184].mxu1  ;;  %v12046_v50 = vpop.f32.mrb[157].mxu0 }
 0x3b0   : > { %v12047_v19 = vadd.f32 %v12046_v50, %v12045_v3  ;;  %v12152_v33 = vpop.f32.mrb[185].mxu1  ;;  %v12048_v7 = vpop.f32.mrb[158].mxu0 }
 0x3b1   : > { %v12153_v31 = vadd.f32 %v12152_v33, %v12151_v63  ;;  %v12154_v12 = vpop.f32.mrb[186].mxu1  ;;  %v12049_v45 = vpop.f32.mrb[159].mxu0 }
 0x3b2   : > { %v12050_v34 = vadd.f32 %v12049_v45, %v12048_v7  ;;  %v12155_v29 = vpop.f32.mrb[187].mxu1  ;;  %v3841_v7 = vld [vmem:[#allocation2 + $0x62] sm:$0xff] }
 0x3b3   : > { %v15936_v62 = vadd.f32 %v12153_v31, %v12041_v26  ;;  %v12156_v49 = vadd.f32 %v12155_v29, %v12154_v12  ;;  %5617 = vmatmul.mubr.bf16.gmra.mrb[8].mxu0 %v4313_v36  ;;  %v4197_v36 = vpack.c.bf16 %v3838_v51, %v3837_v14  ;;  %v3847_v51 = vld [vmem:[#allocation2 + $0xaa] sm:$0xff] }
 0x3b4   : > { %5770 = vmatmul.mubr.bf16.gmra.mrb[36].mxu1 %v15881_v32  ;;  %5624 = vmatprep.mubr.bf16.mxu0 %v15934_v56 }
 0x3b5   : > { %v15940_v28 = vadd.f32 %v12156_v49, %v12044_v23  ;;  %5777 = vmatprep.mubr.bf16.mxu1 %v4322_v30 }
 0x3b6   : > { %v12051_v20 = vpop.f32.mrb[160].mxu0 }
 0x3b7   : > { %v12157_v16 = vpop.f32.mrb[188].mxu1  ;;  %v12052_v22 = vpop.f32.mrb[161].mxu0 }
 0x3b8   : > { %v12053_v18 = vadd.f32 %v12052_v22, %v12051_v20  ;;  %v12158_v39 = vpop.f32.mrb[189].mxu1  ;;  %v12054_v59 = vpop.f32.mrb[162].mxu0  ;;  %v4215_v20 = vpack.c.bf16 %v3842_v15, %v3841_v7  ;;  %v14105_v7 = vld [vmem:[#allocation12 + $0x58] sm:$0xff]  }
 0x3b9   : > { %v12159_v60 = vadd.f32 %v12158_v39, %v12157_v16  ;;  %v12160_v13 = vpop.f32.mrb[190].mxu1  ;;  %v12055_v21 = vpop.f32.mrb[163].mxu0  ;;  %v3843_v39 = vld [vmem:[#allocation2 + $0x7a] sm:$0xff] }
 0x3ba   : > { %v12056_v25 = vadd.f32 %v12055_v21, %v12054_v59  ;;  %v12161_v55 = vpop.f32.mrb[191].mxu1  ;;  %v3844_v59 = vld [vmem:[#allocation2 + $0x82] sm:$0xff] }
 0x3bb   : > { %v15942_v32 = vadd.f32 %v12159_v60, %v12047_v19  ;;  %v12162_v43 = vadd.f32 %v12161_v55, %v12160_v13  ;;  %5625 = vmatmul.mubr.bf16.gmra.mrb[12].mxu0 %v4322_v30  ;;  %v14104_v60 = vld [vmem:[#allocation12 + $0x10] sm:$0xff]  }
 0x3bc   : > { %5778 = vmatmul.mubr.bf16.gmra.mrb[40].mxu1 %v15889_v44  ;;  %v3846_v55 = vld [vmem:[#allocation2 + $0x9a] sm:$0xff]  ;;  %12488 = vmatpush3.bf16.msra.mxu0 %v14104_v60 }
 0x3bd   : > { %v15945_v52 = vadd.f32 %v12162_v43, %v12050_v34  ;;  %5785 = vmatprep.mubr.bf16.mxu1 %v4331_v61  ;;  %12489 = vmatprep.subr.bf16.mxu0 %v14105_v7  ;;  %v3860_v7 = vld [vmem:[#allocation2 + $0x142] sm:$0xff] }
 0x3be   : > { %v12057_v47 = vpop.f32.mrb[164].mxu0 }
 0x3bf   : > { %v12163_v9 = vpop.f32.mrb[192].mxu1  ;;  %v12058_v42 = vpop.f32.mrb[165].mxu0 }
 0x3c0   : > { %v12059_v53 = vadd.f32 %v12058_v42, %v12057_v47  ;;  %v12164_v26 = vpop.f32.mrb[193].mxu1  ;;  %v12060_v35 = vpop.f32.mrb[166].mxu0 }
 0x3c1   : > { %v12165_v27 = vadd.f32 %v12164_v26, %v12163_v9  ;;  %v12166_v5 = vpop.f32.mrb[194].mxu1  ;;  %v12061_v44 = vpop.f32.mrb[167].mxu0  ;;  %v4224_v9 = vpack.c.bf16 %v3844_v59, %v3843_v39 }
 0x3c2   : > { %v12062_v23 = vadd.f32 %v12061_v44, %v12060_v35  ;;  %v12167_v8 = vpop.f32.mrb[195].mxu1 }
 0x3c3   : > { %v15947_v40 = vadd.f32 %v12165_v27, %v12053_v18  ;;  %v12168_v4 = vadd.f32 %v12167_v8, %v12166_v5  ;;  %v3848_v27 = vld [vmem:[#allocation2 + $0xb2] sm:$0xff]  ;;  %v3849_v8 = vld [vmem:[#allocation2 + $0xc2] sm:$0xff] }
 0x3c4   : > { %5786 = vmatmul.mubr.bf16.gmra.mrb[44].mxu1 %v4330_v24  ;;  %v4242_v11 = vpack.c.bf16 %v3848_v27, %v3847_v51 }
 0x3c5   : > { %v15949_v17 = vadd.f32 %v12168_v4, %v12056_v25  ;;  %13539 = vmatprep.mubr.bf16.mxu1 %v4197_v36  ;;  %v3845_v25 = vld [vmem:[#allocation2 + $0x92] sm:$0xff]  ;;  %v3850_v4 = vld [vmem:[#allocation2 + $0xca] sm:$0xff] }
 0x3c6   : > { %v12063_v3 = vpop.f32.mrb[168].mxu0 }
 0x3c7   : > { %v12169_v63 = vpop.f32.mrb[196].mxu1  ;;  %v12064_v50 = vpop.f32.mrb[169].mxu0 }
 0x3c8   : > { %v12065_v1 = vadd.f32 %v12064_v50, %v12063_v3  ;;  %v12170_v19 = vpop.f32.mrb[197].mxu1  ;;  %v12066_v33 = vpop.f32.mrb[170].mxu0 }
 0x3c9   : > { %v12171_v31 = vadd.f32 %v12170_v19, %v12169_v63  ;;  %v12172_v12 = vpop.f32.mrb[198].mxu1  ;;  %v12067_v45 = vpop.f32.mrb[171].mxu0 }
 0x3ca   : > { %v12068_v34 = vadd.f32 %v12067_v45, %v12066_v33  ;;  %v12173_v29 = vpop.f32.mrb[199].mxu1  ;;  %v4251_v33 = vpack.c.bf16 %v3850_v4, %v3849_v8 }
 0x3cb   : > { %v15951_v49 = vadd.f32 %v12171_v31, %v12059_v53  ;;  %v12174_v30 = vadd.f32 %v12173_v29, %v12172_v12  ;;  %v4233_v53 = vpack.c.bf16 %v3846_v55, %v3845_v25  ;;  %v3852_v29 = vld [vmem:[#allocation2 + $0xe2] sm:$0xff] }
 0x3cc   : > { %13540 = vmatmul.mubr.bf16.vlgmr.msra.gmra.mrb[144].mxu1 %v4206_v37  ;;  %v14106_v37 = vld [vmem:[#allocation12 + $0x18] sm:$0xff]  }
 0x3cd   : > { %v15953_v58 = vadd.f32 %v12174_v30, %v12062_v23  ;;  %13543 = vmatprep.mubr.bf16.mxu1 %v4215_v20  ;;  %12490 = vmatpush3.bf16.msra.mxu0 %v14106_v37  ;;  %v3862_v37 = vld [vmem:[#allocation2 + $0x15a] sm:$0xff] }
 0x3ce   : > { %v12069_v16 = vpop.f32.mrb[172].mxu0 }
 0x3cf   : > { %v12175_v22 = vpop.f32.mrb[200].mxu1  ;;  %v12070_v18 = vpop.f32.mrb[173].mxu0 }
 0x3d0   : > { %v12071_v13 = vadd.f32 %v12070_v18, %v12069_v16  ;;  %v12176_v21 = vpop.f32.mrb[201].mxu1  ;;  %v12072_v61 = vpop.f32.mrb[174].mxu0  ;;  %v3853_v16 = vld [vmem:[#allocation2 + $0xf2] sm:$0xff] }
 0x3d1   : > { %v12177_v43 = vadd.f32 %v12176_v21, %v12175_v22  ;;  %v12178_v6 = vpop.f32.mrb[202].mxu1  ;;  %v12073_v0 = vpop.f32.mrb[175].mxu0  ;;  %v3854_v22 = vld [vmem:[#allocation2 + $0xfa] sm:$0xff] }
 0x3d2   : > { %v12074_v54 = vadd.f32 %v12073_v0, %v12072_v61  ;;  %v12179_v47 = vpop.f32.mrb[203].mxu1  ;;  %v4269_v55 = vpack.c.bf16 %v3854_v22, %v3853_v16 }
 0x3d3   : > { %v15955_v42 = vadd.f32 %v12177_v43, %v12065_v1  ;;  %v12180_v57 = vadd.f32 %v12179_v47, %v12178_v6  ;;  %v3855_v47 = vld [vmem:[#allocation2 + $0x10a] sm:$0xff] }
 0x3d4   : > { %13544 = vmatmul.mubr.bf16.gmra.mrb[148].mxu1 %v4224_v9  ;;  %v3856_v9 = vld [vmem:[#allocation2 + $0x112] sm:$0xff] }
 0x3d5   : > { %v15957_v26 = vadd.f32 %v12180_v57, %v12068_v34  ;;  %13547 = vmatprep.mubr.bf16.mxu1 %v4233_v53  ;;  %v3851_v34 = vld [vmem:[#allocation2 + $0xda] sm:$0xff]  ;;  %v4278_v8 = vpack.c.bf16 %v3856_v9, %v3855_v47 }
 0x3d6   : > { %v12075_v35 = vpop.f32.mrb[176].mxu0  ;;  %v4260_v21 = vpack.c.bf16 %v3852_v29, %v3851_v34  ;;  %v3861_v29 = vld [vmem:[#allocation2 + $0x152] sm:$0xff] }
 0x3d7   : > { %v12181_v24 = vpop.f32.mrb[204].mxu1  ;;  %v12076_v14 = vpop.f32.mrb[177].mxu0 }
 0x3d8   : > { %v12077_v5 = vadd.f32 %v12076_v14, %v12075_v35  ;;  %v12182_v44 = vpop.f32.mrb[205].mxu1  ;;  %v12078_v23 = vpop.f32.mrb[178].mxu0  ;;  %v3858_v14 = vld [vmem:[#allocation2 + $0x12a] sm:$0xff] }
 0x3d9   : > { %v12183_v36 = vadd.f32 %v12182_v44, %v12181_v24  ;;  %v12184_v3 = vpop.f32.mrb[206].mxu1  ;;  %v12079_v63 = vpop.f32.mrb[179].mxu0  ;;  %v3857_v24 = vld [vmem:[#allocation2 + $0x122] sm:$0xff] }
 0x3da   : > { %v12080_v50 = vadd.f32 %v12079_v63, %v12078_v23  ;;  %v12185_v38 = vpop.f32.mrb[207].mxu1  ;;  %v14107_v63 = vld [vmem:[#allocation12 + $0x60] sm:$0xff]  }
 0x3db   : > { %v15959_v1 = vadd.f32 %v12183_v36, %v12071_v13  ;;  %v12186_v19 = vadd.f32 %v12185_v38, %v12184_v3  ;;  %v4287_v3 = vpack.c.bf16 %v3858_v14, %v3857_v24  ;;  %12491 = vmatprep.subr.bf16.mxu0 %v14107_v63 }
 0x3dc   : > { %13548 = vmatmul.mubr.bf16.gmra.mrb[152].mxu1 %v4242_v11 }
 0x3dd   : > { %v15961_v15 = vadd.f32 %v12186_v19, %v12074_v54  ;;  %13551 = vmatprep.mubr.bf16.mxu1 %v4251_v33  ;;  %v3859_v33 = vld [vmem:[#allocation2 + $0x13a] sm:$0xff] }
 0x3de   : > { %v12081_v31 = vpop.f32.mrb[180].mxu0 }
 0x3df   : > { %v12187_v12 = vpop.f32.mrb[208].mxu1  ;;  %v12082_v45 = vpop.f32.mrb[181].mxu0 }
 0x3e0   : > { %v12083_v30 = vadd.f32 %v12082_v45, %v12081_v31  ;;  %v12188_v20 = vpop.f32.mrb[209].mxu1  ;;  %v12084_v41 = vpop.f32.mrb[182].mxu0  ;;  %v14108_v31 = vld [vmem:[#allocation12 + $0x20] sm:$0xff]  }
 0x3e1   : > { %v12189_v18 = vadd.f32 %v12188_v20, %v12187_v12  ;;  %v12190_v39 = vpop.f32.mrb[210].mxu1  ;;  %v12085_v59 = vpop.f32.mrb[183].mxu0  ;;  %12492 = vmatpush3.bf16.msra.mxu0 %v14108_v31 }
 0x3e2   : > { %v12086_v60 = vadd.f32 %v12085_v59, %v12084_v41  ;;  %v12191_v13 = vpop.f32.mrb[211].mxu1 }
 0x3e3   : > { %v15963_v61 = vadd.f32 %v12189_v18, %v12077_v5  ;;  %v12192_v25 = vadd.f32 %v12191_v13, %v12190_v39  ;;  %v4296_v18 = vpack.c.bf16 %v3860_v7, %v3859_v33 }
 0x3e4   : > { %13552 = vmatmul.mubr.bf16.gmra.mrb[156].mxu1 %v4260_v21 }
 0x3e5   : > { %v15965_v43 = vadd.f32 %v12192_v25, %v12080_v50  ;;  %13555 = vmatprep.mubr.bf16.mxu1 %v4269_v55 }
 0x3e6   : > { %v12087_v6 = vpop.f32.mrb[184].mxu0 }
 0x3e7   : > { %v12193_v0 = vpop.f32.mrb[212].mxu1  ;;  %v12088_v54 = vpop.f32.mrb[185].mxu0 }
 0x3e8   : > { %v12089_v57 = vadd.f32 %v12088_v54, %v12087_v6  ;;  %v12194_v53 = vpop.f32.mrb[213].mxu1  ;;  %v12090_v35 = vpop.f32.mrb[186].mxu0  ;;  %v3863_v6 = vld [vmem:[#allocation2 + $0x16a] sm:$0xff] }
 0x3e9   : > { %v12195_v51 = vadd.f32 %v12194_v53, %v12193_v0  ;;  %v12196_v27 = vpop.f32.mrb[214].mxu1  ;;  %v12091_v5 = vpop.f32.mrb[187].mxu0  ;;  %v3864_v0 = vld [vmem:[#allocation2 + $0x172] sm:$0xff] }
 0x3ea   : > { %v12092_v44 = vadd.f32 %v12091_v5, %v12090_v35  ;;  %v12197_v23 = vpop.f32.mrb[215].mxu1 }
 0x3eb   : > { %v15967_v4 = vadd.f32 %v12195_v51, %v12083_v30  ;;  %v12198_v36 = vadd.f32 %v12197_v23, %v12196_v27  ;;  %v4314_v51 = vpack.c.bf16 %v3864_v0, %v3863_v6 }
 0x3ec   : > { %13556 = vmatmul.mubr.bf16.gmra.mrb[160].mxu1 %v4278_v8  ;;  %v3867_v8 = vld [vmem:[#allocation2 + $0x19a] sm:$0xff] }
 0x3ed   : > { %v15969_v50 = vadd.f32 %v12198_v36, %v12086_v60  ;;  %13559 = vmatprep.mubr.bf16.mxu1 %v4287_v3  ;;  %v4305_v60 = vpack.c.bf16 %v3862_v37, %v3861_v29  ;;  %v3868_v36 = vld [vmem:[#allocation2 + $0x1a2] sm:$0xff] }
 0x3ee   : > { %v12093_v38 = vpop.f32.mrb[188].mxu0  ;;  %v4332_v31 = vpack.c.bf16 %v3868_v36, %v3867_v8 }
 0x3ef   : > { %v12199_v11 = vpop.f32.mrb[216].mxu1  ;;  %v12094_v19 = vpop.f32.mrb[189].mxu0 }
 0x3f0   : > { %v12095_v12 = vadd.f32 %v12094_v19, %v12093_v38  ;;  %v12200_v45 = vpop.f32.mrb[217].mxu1  ;;  %v12096_v34 = vpop.f32.mrb[190].mxu0 }
 0x3f1   : > { %v12201_v30 = vadd.f32 %v12200_v45, %v12199_v11  ;;  %v12202_v20 = vpop.f32.mrb[218].mxu1  ;;  %v12097_v41 = vpop.f32.mrb[191].mxu0  ;;  %v14110_v11 = vld [vmem:[#allocation12 + $0x28] sm:$0xff]  }
 0x3f2   : > { %v12098_v16 = vadd.f32 %v12097_v41, %v12096_v34  ;;  %v12203_v22 = vpop.f32.mrb[219].mxu1 }
 0x3f3   : > { %v15971_v39 = vadd.f32 %v12201_v30, %v12089_v57  ;;  %v12204_v59 = vadd.f32 %v12203_v22, %v12202_v20 }
 0x3f4   : > { %13560 = vmatmul.mubr.bf16.gmra.mrb[164].mxu1 %v4296_v18 }
 0x3f5   : > { %v15973_v13 = vadd.f32 %v12204_v59, %v12092_v44  ;;  %13563 = vmatprep.mubr.bf16.mxu1 %v4305_v60  ;;  %v14109_v44 = vld [vmem:[#allocation12 + $0x68] sm:$0xff]  }
 0x3f6   : > { %v12099_v21 = vpop.f32.mrb[192].mxu0  ;;  %12493 = vmatprep.subr.bf16.mxu0 %v14109_v44 }
 0x3f7   : > { %v12205_v25 = vpop.f32.mrb[220].mxu1  ;;  %v12100_v55 = vpop.f32.mrb[193].mxu0  ;;  %12494 = vmatpush3.bf16.msra.mxu0 %v14110_v11 }
 0x3f8   : > { %v12101_v54 = vadd.f32 %v12100_v55, %v12099_v21  ;;  %v12206_v47 = vpop.f32.mrb[221].mxu1  ;;  %v12102_v9 = vpop.f32.mrb[194].mxu0 }
 0x3f9   : > { %v12207_v53 = vadd.f32 %v12206_v47, %v12205_v25  ;;  %v12208_v35 = vpop.f32.mrb[222].mxu1  ;;  %v12103_v24 = vpop.f32.mrb[195].mxu0 }
 0x3fa   : > { %v12104_v14 = vadd.f32 %v12103_v24, %v12102_v9  ;;  %v12209_v57 = vpop.f32.mrb[223].mxu1 }
 0x3fb   : > { %v15975_v27 = vadd.f32 %v12207_v53, %v12095_v12  ;;  %v12210_v5 = vadd.f32 %v12209_v57, %v12208_v35  ;;  %v14112_v57 = vld [vmem:[#allocation12 + $0x30] sm:$0xff]  }
 0x3fc   : > { %13564 = vmatmul.mubr.bf16.gmra.mrb[168].mxu1 %v4314_v51 }
 0x3fd   : > { %v15977_v23 = vadd.f32 %v12210_v5, %v12098_v16  ;;  %13567 = vmatprep.mubr.bf16.mxu1 %v15934_v56 }
 0x3fe   : > { %v12105_v3 = vpop.f32.mrb[196].mxu0 }
 0x3ff   : > { %v12211_v63 = vpop.f32.mrb[224].mxu1  ;;  %v12106_v38 = vpop.f32.mrb[197].mxu0 }
 0x400   : > { %v12107_v19 = vadd.f32 %v12106_v38, %v12105_v3  ;;  %v12212_v33 = vpop.f32.mrb[225].mxu1  ;;  %v12108_v7 = vpop.f32.mrb[198].mxu0 }
 0x401   : > { %v12213_v12 = vadd.f32 %v12212_v33, %v12211_v63  ;;  %v12214_v45 = vpop.f32.mrb[226].mxu1  ;;  %v12109_v34 = vpop.f32.mrb[199].mxu0  ;;  %v14113_v33 = vld [vmem:[#allocation12 + $0xc0] sm:$0xff]  }
 0x402   : > { %v12110_v29 = vadd.f32 %v12109_v34, %v12108_v7  ;;  %v12215_v37 = vpop.f32.mrb[227].mxu1  ;;  %12595 = vmatprep.subr.bf16.mxu1 %v14113_v33  ;;  %v14114_v34 = vld [vmem:[#allocation12 + $0x80] sm:$0xff]  }
 0x403   : > { %v15980_v30 = vadd.f32 %v12213_v12, %v12101_v54  ;;  %v12216_v56 = vadd.f32 %v12215_v37, %v12214_v45  ;;  %v14111_v54 = vld [vmem:[#allocation12 + $0x70] sm:$0xff]   ;;  %12596 = vmatpush3.bf16.msra.mxu1 %v14114_v34 }
 0x404   : > { %13568 = vmatmul.mubr.bf16.gmra.mrb[172].mxu1 %v4332_v31  ;;  %12495 = vmatprep.subr.bf16.mxu0 %v14111_v54  ;;  %v14118_v54 = vld [vmem:[#allocation12 + $0xd0] sm:$0xff]  }
 0x405   : > { %v15982_v20 = vadd.f32 %v12216_v56, %v12104_v14  ;;  %12496 = vmatpush3.bf16.msra.mxu0 %v14112_v57 }
 0x406   : > { %v12111_v41 = vpop.f32.mrb[200].mxu0 }
 0x407   : > { %v12217_v16 = vpop.f32.mrb[228].mxu1  ;;  %v12112_v22 = vpop.f32.mrb[201].mxu0 }
 0x408   : > { %v12113_v18 = vadd.f32 %v12112_v22, %v12111_v41  ;;  %v12218_v59 = vpop.f32.mrb[229].mxu1  ;;  %v12114_v60 = vpop.f32.mrb[202].mxu0 }
 0x409   : > { %v12219_v21 = vadd.f32 %v12218_v59, %v12217_v16  ;;  %v12220_v25 = vpop.f32.mrb[230].mxu1  ;;  %v12115_v55 = vpop.f32.mrb[203].mxu0 }
 0x40a   : > { %v12116_v6 = vadd.f32 %v12115_v55, %v12114_v60  ;;  %v12221_v0 = vpop.f32.mrb[231].mxu1  ;;  %v14115_v55 = vld [vmem:[#allocation12 + $0xc8] sm:$0xff]  }
 0x40b   : > { %v15984_v47 = vadd.f32 %v12219_v21, %v12107_v19  ;;  %v12222_v9 = vadd.f32 %v12221_v0, %v12220_v25  ;;  %v14117_v0 = vld [vmem:[#allocation12 + $0x78] sm:$0xff]   ;;  %12597 = vmatprep.subr.bf16.mxu1 %v14115_v55 }
 0x40c   : > { %12497 = vmatprep.subr.bf16.mxu0 %v14117_v0 }
 0x40d   : > { %v15986_v53 = vadd.f32 %v12222_v9, %v12110_v29 }
 0x40e   : > { %v12117_v35 = vpop.f32.mrb[204].mxu0 }
 0x40f   : > { %v12223_v24 = vpop.f32.mrb[232].mxu1  ;;  %v12118_v14 = vpop.f32.mrb[205].mxu0 }
 0x410   : > { %v12119_v51 = vadd.f32 %v12118_v14, %v12117_v35  ;;  %v12224_v5 = vpop.f32.mrb[233].mxu1  ;;  %v12120_v44 = vpop.f32.mrb[206].mxu0 }
 0x411   : > { %v12225_v8 = vadd.f32 %v12224_v5, %v12223_v24  ;;  %v12226_v36 = vpop.f32.mrb[234].mxu1  ;;  %v12121_v3 = vpop.f32.mrb[207].mxu0 }
 0x412   : > { %v12122_v63 = vadd.f32 %v12121_v3, %v12120_v44  ;;  %v12227_v38 = vpop.f32.mrb[235].mxu1 }
 0x413   : > { %v15988_v11 = vadd.f32 %v12225_v8, %v12113_v18  ;;  %v12228_v19 = vadd.f32 %v12227_v38, %v12226_v36 }
 0x415   : > { %v15990_v7 = vadd.f32 %v12228_v19, %v12116_v6  ;;  %v14116_v6 = vld [vmem:[#allocation12 + $0x88] sm:$0xff]  }
 0x416   : > { %v12251_v31 = vpop.f32.mrb[208].mxu0  ;;  %12598 = vmatpush3.bf16.msra.mxu1 %v14116_v6 }
 0x417   : > { %v12229_v12 = vpop.f32.mrb[236].mxu1  ;;  %v12252_v45 = vpop.f32.mrb[209].mxu0  ;;  %12599 = vmatprep.subr.bf16.mxu1 %v14118_v54 }
 0x418   : > { %v12230_v29 = vpop.f32.mrb[237].mxu1  ;;  %v12253_v37 = vadd.f32 %v12252_v45, %v12251_v31  ;;  %v12254_v56 = vpop.f32.mrb[210].mxu0  ;;  %v14120_v31 = vld [vmem:[#allocation12 + $0x90] sm:$0xff]  }
 0x419   : > { %v12231_v41 = vadd.f32 %v12230_v29, %v12229_v12  ;;  %v12232_v16 = vpop.f32.mrb[238].mxu1  ;;  %v12255_v22 = vpop.f32.mrb[211].mxu0 }
 0x41a   : > { %v13688_v59 = vadd.f32 %v15921_v2, %v12253_v37  ;;  %v12233_v18 = vpop.f32.mrb[239].mxu1  ;;  %v12256_v60 = vadd.f32 %v12255_v22, %v12254_v56  ;;  %12600 = vmatpush3.bf16.msra.mxu1 %v14120_v31  ;;  %v14121_v37 = vld [vmem:[#allocation12 + $0xd8] sm:$0xff]  }
 0x41b   : > { %v15993_v21 = vadd.f32 %v12231_v41, %v12119_v51  ;;  %v12234_v25 = vadd.f32 %v12233_v18, %v12232_v16  ;;  %v14119_v22 = vld [vmem:[#allocation12 + $0x38] sm:$0xff]   ;;  %12601 = vmatprep.subr.bf16.mxu1 %v14121_v37 }
 0x41c   : > { %v13696_v9 = vadd.f32 %v15926_v46, %v12256_v60  ;;  %12498 = vmatpush3.bf16.msra.mxu0 %v14119_v22  ;;  %v14127_v22 = vld [vmem:[#allocation12 + $0xf0] sm:$0xff]  }
 0x41d   : > { %v15996_v35 = vadd.f32 %v12234_v25, %v12122_v63 }
 0x41e   : > { %v12257_v24 = vpop.f32.mrb[212].mxu0 }
 0x41f   : > { %v12363_v14 = vpop.f32.mrb[240].mxu1  ;;  %v12258_v57 = vpop.f32.mrb[213].mxu0 }
 0x420   : > { %v12259_v2 = vadd.f32 %v12258_v57, %v12257_v24  ;;  %v12364_v5 = vpop.f32.mrb[241].mxu1  ;;  %v12260_v51 = vpop.f32.mrb[214].mxu0  ;;  %v14124_v24 = vld [vmem:[#allocation12 + $0xa0] sm:$0xff]   ;;  %v6161_v57 = vld [vmem:[#allocation2 + $0x1] sm:$0xff] }
 0x421   : > { %v12365_v44 = vadd.f32 %v12364_v5, %v12363_v14  ;;  %v12366_v8 = vpop.f32.mrb[242].mxu1  ;;  %v12261_v36 = vpop.f32.mrb[215].mxu0 }
 0x422   : > { %v13684_v3 = vadd.f32 %v15928_v48, %v12259_v2  ;;  %v12262_v38 = vadd.f32 %v12261_v36, %v12260_v51  ;;  %v12367_v46 = vpop.f32.mrb[243].mxu1  ;;  %v14122_v48 = vld [vmem:[#allocation12 + $0x98] sm:$0xff]  }
 0x423   : > { %v12368_v19 = vadd.f32 %v12367_v46, %v12366_v8  ;;  %v15999_v63 = vadd.f32 %v13688_v59, %v12365_v44  ;;  %12602 = vmatpush3.bf16.msra.mxu1 %v14122_v48  ;;  %v6162_v2 = vld [vmem:[#allocation2 + $0x9] sm:$0xff] }
 0x424   : > { %v13692_v33 = vadd.f32 %v15932_v10, %v12262_v38  ;;  %v6962_v51 = vpack.c.bf16 %v6162_v2, %v6161_v57  ;;  %v6098_v44 = vld [vmem:[#allocation2 + $0x8] sm:$0xff]  ;;  %v14125_v38 = vld [vmem:[#allocation12 + $0xe8] sm:$0xff]   ;;  %v14128_v48 = vld [vmem:[#allocation12 + $0x140] sm:$0xff]  }
 0x425   : > { %v16002_v12 = vadd.f32 %v13696_v9, %v12368_v19  ;;  %v14123_v9 = vld [vmem:[#allocation12 + $0xe0] sm:$0xff]   ;;  %12707 = vmatprep.subr.bf16.mxu0 %v14128_v48 }
 0x426   : > { %v12263_v45 = vpop.f32.mrb[216].mxu0  ;;  %12603 = vmatprep.subr.bf16.mxu1 %v14123_v9  ;;  %7713 = vmatprep.mubr.bf16.mxu0 %v6962_v51  ;;  %v14130_v2 = vld [vmem:[#allocation12 + $0x100] sm:$0xff]  }
 0x427   : > { %v12369_v34 = vpop.f32.mrb[244].mxu1  ;;  %v12264_v29 = vpop.f32.mrb[217].mxu0  ;;  %12604 = vmatpush3.bf16.msra.mxu1 %v14124_v24 }
 0x428   : > { %v12265_v56 = vadd.f32 %v12264_v29, %v12263_v45  ;;  %v12370_v41 = vpop.f32.mrb[245].mxu1  ;;  %v12266_v16 = vpop.f32.mrb[218].mxu0  ;;  %12605 = vmatprep.subr.bf16.mxu1 %v14125_v38 }
 0x429   : > { %v12371_v18 = vadd.f32 %v12370_v41, %v12369_v34  ;;  %v12372_v60 = vpop.f32.mrb[246].mxu1  ;;  %v12267_v25 = vpop.f32.mrb[219].mxu0 }
 0x42a   : > { %v13704_v59 = vadd.f32 %v15936_v62, %v12265_v56  ;;  %v12268_v10 = vadd.f32 %v12267_v25, %v12266_v16  ;;  %v12373_v55 = vpop.f32.mrb[247].mxu1  ;;  %v6097_v62 = vld [vmem:[#allocation2] sm:$0xff] }
 0x42b   : > { %v12374_v6 = vadd.f32 %v12373_v55, %v12372_v60  ;;  %v16005_v0 = vadd.f32 %v13684_v3, %v12371_v18  ;;  %v6961_v46 = vpack.c.bf16 %v6098_v44, %v6097_v62  ;;  %v14129_v60 = vld [vmem:[#allocation12 + $0xb0] sm:$0xff]  }
 0x42c   : > { %v13712_v54 = vadd.f32 %v15940_v28, %v12268_v10  ;;  %v14126_v28 = vld [vmem:[#allocation12 + $0xa8] sm:$0xff]  }
 0x42d   : > { %v16008_v14 = vadd.f32 %v13692_v33, %v12374_v6  ;;  %7714 = vmatmul.mubr.bf16.vlgmr.msra.gmra.mrb[16].mxu0 %v6961_v46  ;;  %12606 = vmatpush3.bf16.msra.mxu1 %v14126_v28 }
 0x42e   : > { %v12269_v5 = vpop.f32.mrb[220].mxu0  ;;  %12607 = vmatprep.subr.bf16.mxu1 %v14127_v22  ;;  %12708 = vmatpush3.bf16.msra.mxu0 %v14130_v2 }
 0x42f   : > { %v12375_v8 = vpop.f32.mrb[248].mxu1  ;;  %v12270_v36 = vpop.f32.mrb[221].mxu0 }
 0x430   : > { %v12271_v3 = vadd.f32 %v12270_v36, %v12269_v5  ;;  %v12376_v19 = vpop.f32.mrb[249].mxu1  ;;  %v12272_v31 = vpop.f32.mrb[222].mxu0 }
 0x431   : > { %v12377_v45 = vadd.f32 %v12376_v19, %v12375_v8  ;;  %v12378_v33 = vpop.f32.mrb[250].mxu1  ;;  %v12273_v34 = vpop.f32.mrb[223].mxu0  ;;  %12608 = vmatpush3.bf16.msra.mxu1 %v14129_v60  ;;  %v14133_v60 = vld [vmem:[#allocation12 + $0x148] sm:$0xff]  }
 0x432   : > { %v13700_v29 = vadd.f32 %v15942_v32, %v12271_v3  ;;  %v12274_v37 = vadd.f32 %v12273_v34, %v12272_v31  ;;  %v12379_v56 = vpop.f32.mrb[251].mxu1  ;;  %v14131_v32 = vld [vmem:[#allocation12 + $0xf8] sm:$0xff]   ;;  %12709 = vmatprep.subr.bf16.mxu0 %v14133_v60 }
 0x433   : > { %v12380_v41 = vadd.f32 %v12379_v56, %v12378_v33  ;;  %v16011_v16 = vadd.f32 %v13704_v59, %v12377_v45  ;;  %v14132_v59 = vld [vmem:[#allocation12 + $0xb8] sm:$0xff]   ;;  %12609 = vmatprep.subr.bf16.mxu1 %v14131_v32 }
 0x434   : > { %v13708_v18 = vadd.f32 %v15945_v52, %v12274_v37 }
 0x435   : > { %v16014_v25 = vadd.f32 %v13712_v54, %v12380_v41  ;;  %12610 = vmatpush3.bf16.msra.mxu1 %v14132_v59 }
 0x436   : > { %v12275_v10 = vpop.f32.mrb[224].mxu0 }
 0x437   : > { %v12381_v55 = vpop.f32.mrb[252].mxu1  ;;  %v12276_v6 = vpop.f32.mrb[225].mxu0 }
 0x438   : > { %v12277_v9 = vadd.f32 %v12276_v6, %v12275_v10  ;;  %v12382_v24 = vpop.f32.mrb[253].mxu1  ;;  %v12278_v57 = vpop.f32.mrb[226].mxu0 }
 0x439   : > { %v12383_v5 = vadd.f32 %v12382_v24, %v12381_v55  ;;  %v12384_v51 = vpop.f32.mrb[254].mxu1  ;;  %v12279_v62 = vpop.f32.mrb[227].mxu0 }
 0x43a   : > { %v13720_v52 = vadd.f32 %v15947_v40, %v12277_v9  ;;  %v12280_v54 = vadd.f32 %v12279_v62, %v12278_v57  ;;  %v12385_v44 = vpop.f32.mrb[255].mxu1  ;;  %v14134_v57 = vld [vmem:[#allocation12 + $0x108] sm:$0xff]  }
 0x43b   : > { %v12386_v8 = vadd.f32 %v12385_v44, %v12384_v51  ;;  %v16017_v36 = vadd.f32 %v13700_v29, %v12383_v5  ;;  %12710 = vmatpush3.bf16.msra.mxu0 %v14134_v57 }
 0x43c   : > { %v13728_v38 = vadd.f32 %v15949_v17, %v12280_v54 }
 0x43d   : > { %v16020_v46 = vadd.f32 %v13708_v18, %v12386_v8 }
 0x43e   : > { %v12281_v3 = vpop.f32.mrb[228].mxu0 }
 0x43f   : > { %v12387_v19 = vpop.f32.mrb[0].mxu1  ;;  %v12282_v31 = vpop.f32.mrb[229].mxu0 }
 0x440   : > { %v12283_v28 = vadd.f32 %v12282_v31, %v12281_v3  ;;  %v12388_v45 = vpop.f32.mrb[1].mxu1  ;;  %v12284_v33 = vpop.f32.mrb[230].mxu0 }
 0x441   : > { %v12389_v34 = vadd.f32 %v12388_v45, %v12387_v19  ;;  %v12390_v37 = vpop.f32.mrb[2].mxu1  ;;  %v12285_v40 = vpop.f32.mrb[231].mxu0 }
 0x442   : > { %v13716_v56 = vadd.f32 %v15951_v49, %v12283_v28  ;;  %v12286_v41 = vadd.f32 %v12285_v40, %v12284_v33  ;;  %v12391_v22 = vpop.f32.mrb[3].mxu1 }
 0x443   : > { %v12392_v48 = vadd.f32 %v12391_v22, %v12390_v37  ;;  %v16023_v29 = vadd.f32 %v13720_v52, %v12389_v34  ;;  %v14135_v22 = vld [vmem:[#allocation12 + $0x150] sm:$0xff]  }
 0x444   : > { %v13724_v17 = vadd.f32 %v15953_v58, %v12286_v41  ;;  %12711 = vmatprep.subr.bf16.mxu0 %v14135_v22 }
 0x445   : > { %v16026_v18 = vadd.f32 %v13728_v38, %v12392_v48 }
 0x446   : > { %v12287_v10 = vpop.f32.mrb[232].mxu0 }
 0x447   : > { %v12393_v55 = vpop.f32.mrb[4].mxu1  ;;  %v12288_v6 = vpop.f32.mrb[233].mxu0 }
 0x448   : > { %v12289_v32 = vadd.f32 %v12288_v6, %v12287_v10  ;;  %v12394_v9 = vpop.f32.mrb[5].mxu1  ;;  %v12290_v24 = vpop.f32.mrb[234].mxu0 }
 0x449   : > { %v12395_v2 = vadd.f32 %v12394_v9, %v12393_v55  ;;  %v12396_v49 = vpop.f32.mrb[6].mxu1  ;;  %v12291_v59 = vpop.f32.mrb[235].mxu0  ;;  %v14136_v9 = vld [vmem:[#allocation12 + $0x110] sm:$0xff]  }
 0x44a   : > { %v13736_v5 = vadd.f32 %v15955_v42, %v12289_v32  ;;  %v12292_v51 = vadd.f32 %v12291_v59, %v12290_v24  ;;  %v12397_v62 = vpop.f32.mrb[7].mxu1  ;;  %12712 = vmatpush3.bf16.msra.mxu0 %v14136_v9 }
 0x44b   : > { %v12398_v52 = vadd.f32 %v12397_v62, %v12396_v49  ;;  %v16029_v58 = vadd.f32 %v13716_v56, %v12395_v2 }
 0x44c   : > { %v13744_v54 = vadd.f32 %v15957_v26, %v12292_v51 }
 0x44d   : > { %v16032_v44 = vadd.f32 %v13724_v17, %v12398_v52 }
 0x44e   : > { %v12293_v8 = vpop.f32.mrb[236].mxu0 }
 0x44f   : > { %v12399_v38 = vpop.f32.mrb[8].mxu1  ;;  %v12294_v3 = vpop.f32.mrb[237].mxu0 }
 0x450   : > { %v12295_v19 = vadd.f32 %v12294_v3, %v12293_v8  ;;  %v12400_v31 = vpop.f32.mrb[9].mxu1  ;;  %v12296_v28 = vpop.f32.mrb[238].mxu0 }
 0x451   : > { %v12401_v45 = vadd.f32 %v12400_v31, %v12399_v38  ;;  %v12402_v33 = vpop.f32.mrb[10].mxu1  ;;  %v12297_v34 = vpop.f32.mrb[239].mxu0 }
 0x452   : > { %v13732_v42 = vadd.f32 %v15959_v1, %v12295_v19  ;;  %v12298_v37 = vadd.f32 %v12297_v34, %v12296_v28  ;;  %v12403_v40 = vpop.f32.mrb[11].mxu1 }
 0x453   : > { %v12404_v41 = vadd.f32 %v12403_v40, %v12402_v33  ;;  %v16035_v56 = vadd.f32 %v13736_v5, %v12401_v45  ;;  %v14137_v40 = vld [vmem:[#allocation12 + $0x158] sm:$0xff]  }
 0x454   : > { %v13740_v26 = vadd.f32 %v15961_v15, %v12298_v37  ;;  %12713 = vmatprep.subr.bf16.mxu0 %v14137_v40 }
 0x455   : > { %v16038_v48 = vadd.f32 %v13744_v54, %v12404_v41 }
 0x456   : > { %v12299_v60 = vpop.f32.mrb[240].mxu0 }
 0x457   : > { %v12405_v17 = vpop.f32.mrb[12].mxu1  ;;  %v12300_v10 = vpop.f32.mrb[241].mxu0 }
 0x458   : > { %v12301_v55 = vadd.f32 %v12300_v10, %v12299_v60  ;;  %v12406_v6 = vpop.f32.mrb[13].mxu1  ;;  %v12302_v32 = vpop.f32.mrb[242].mxu0 }
 0x459   : > { %v12407_v24 = vadd.f32 %v12406_v6, %v12405_v17  ;;  %v12408_v1 = vpop.f32.mrb[14].mxu1  ;;  %v12303_v57 = vpop.f32.mrb[243].mxu0 }
 0x45a   : > { %v13752_v2 = vadd.f32 %v15963_v61, %v12301_v55  ;;  %v12304_v49 = vadd.f32 %v12303_v57, %v12302_v32  ;;  %v12409_v59 = vpop.f32.mrb[15].mxu1 }
 0x45b   : > { %v12410_v5 = vadd.f32 %v12409_v59, %v12408_v1  ;;  %v16041_v15 = vadd.f32 %v13732_v42, %v12407_v24 }
 0x45c   : > { %v13760_v51 = vadd.f32 %v15965_v43, %v12304_v49  ;;  %v14138_v43 = vld [vmem:[#allocation12 + $0x118] sm:$0xff]  }
 0x45d   : > { %v16044_v62 = vadd.f32 %v13740_v26, %v12410_v5  ;;  %12714 = vmatpush3.bf16.msra.mxu0 %v14138_v43 }
 0x45e   : > { %v12305_v52 = vpop.f32.mrb[244].mxu0 }
 0x45f   : > { %v12411_v54 = vpop.f32.mrb[16].mxu1  ;;  %v12306_v8 = vpop.f32.mrb[245].mxu0 }
 0x460   : > { %v12307_v38 = vadd.f32 %v12306_v8, %v12305_v52  ;;  %v12412_v3 = vpop.f32.mrb[17].mxu1  ;;  %v12308_v19 = vpop.f32.mrb[246].mxu0  ;;  %v14140_v8 = vld [vmem:[#allocation12 + $0x120] sm:$0xff]  }
 0x461   : > { %v12413_v31 = vadd.f32 %v12412_v3, %v12411_v54  ;;  %v12414_v28 = vpop.f32.mrb[18].mxu1  ;;  %v12309_v45 = vpop.f32.mrb[247].mxu0 }
 0x462   : > { %v13748_v61 = vadd.f32 %v15967_v4, %v12307_v38  ;;  %v12310_v33 = vadd.f32 %v12309_v45, %v12308_v19  ;;  %v12415_v34 = vpop.f32.mrb[19].mxu1 }
 0x463   : > { %v12416_v37 = vadd.f32 %v12415_v34, %v12414_v28  ;;  %v16047_v42 = vadd.f32 %v13752_v2, %v12413_v31 }
 0x464   : > { %v13756_v41 = vadd.f32 %v15969_v50, %v12310_v33 }
 0x465   : > { %v16050_v22 = vadd.f32 %v13760_v51, %v12416_v37  ;;  %v14139_v51 = vld [vmem:[#allocation12 + $0x160] sm:$0xff]  }
 0x466   : > { %v12311_v26 = vpop.f32.mrb[248].mxu0  ;;  %12715 = vmatprep.subr.bf16.mxu0 %v14139_v51 }
 0x467   : > { %v12417_v60 = vpop.f32.mrb[20].mxu1  ;;  %v12312_v17 = vpop.f32.mrb[249].mxu0  ;;  %12716 = vmatpush3.bf16.msra.mxu0 %v14140_v8 }
 0x468   : > { %v12313_v10 = vadd.f32 %v12312_v17, %v12311_v26  ;;  %v12418_v55 = vpop.f32.mrb[21].mxu1  ;;  %v12314_v6 = vpop.f32.mrb[250].mxu0 }
 0x469   : > { %v12419_v4 = vadd.f32 %v12418_v55, %v12417_v60  ;;  %v12420_v32 = vpop.f32.mrb[22].mxu1  ;;  %v12315_v9 = vpop.f32.mrb[251].mxu0 }
 0x46a   : > { %v13768_v24 = vadd.f32 %v15971_v39, %v12313_v10  ;;  %v12316_v1 = vadd.f32 %v12315_v9, %v12314_v6  ;;  %v12421_v57 = vpop.f32.mrb[23].mxu1 }
 0x46b   : > { %v12422_v2 = vadd.f32 %v12421_v57, %v12420_v32  ;;  %v16053_v49 = vadd.f32 %v13748_v61, %v12419_v4 }
 0x46c   : > { %v13776_v50 = vadd.f32 %v15973_v13, %v12316_v1 }
 0x46d   : > { %v16056_v59 = vadd.f32 %v13756_v41, %v12422_v2 }
 0x46e   : > { %v12317_v5 = vpop.f32.mrb[252].mxu0 }
 0x46f   : > { %v12423_v52 = vpop.f32.mrb[24].mxu1  ;;  %v12318_v54 = vpop.f32.mrb[253].mxu0 }
 0x470   : > { %v12319_v38 = vadd.f32 %v12318_v54, %v12317_v5  ;;  %v12424_v3 = vpop.f32.mrb[25].mxu1  ;;  %v12320_v19 = vpop.f32.mrb[254].mxu0 }
 0x471   : > { %v12425_v31 = vadd.f32 %v12424_v3, %v12423_v52  ;;  %v12426_v39 = vpop.f32.mrb[26].mxu1  ;;  %v12321_v28 = vpop.f32.mrb[255].mxu0  ;;  %v14142_v52 = vld [vmem:[#allocation12 + $0x128] sm:$0xff]  }
 0x472   : > { %v13764_v45 = vadd.f32 %v15975_v27, %v12319_v38  ;;  %v12322_v61 = vadd.f32 %v12321_v28, %v12320_v19  ;;  %v12427_v33 = vpop.f32.mrb[27].mxu1 }
 0x473   : > { %v12428_v13 = vadd.f32 %v12427_v33, %v12426_v39  ;;  %v16059_v34 = vadd.f32 %v13768_v24, %v12425_v31 }
 0x474   : > { %v13772_v37 = vadd.f32 %v15977_v23, %v12322_v61 }
 0x475   : > { %v16062_v40 = vadd.f32 %v13776_v50, %v12428_v13  ;;  %v14141_v50 = vld [vmem:[#allocation12 + $0x168] sm:$0xff]  }
 0x476   : > { %v12323_v43 = vpop.f32.mrb[0].mxu0  ;;  %12717 = vmatprep.subr.bf16.mxu0 %v14141_v50 }
 0x477   : > { %v12429_v41 = vpop.f32.mrb[28].mxu1  ;;  %v12324_v26 = vpop.f32.mrb[1].mxu0  ;;  %12718 = vmatpush3.bf16.msra.mxu0 %v14142_v52 }
 0x478   : > { %v12325_v60 = vadd.f32 %v12324_v26, %v12323_v43  ;;  %v12430_v17 = vpop.f32.mrb[29].mxu1  ;;  %v12326_v10 = vpop.f32.mrb[2].mxu0 }
 0x479   : > { %v12431_v55 = vadd.f32 %v12430_v17, %v12429_v41  ;;  %v12432_v6 = vpop.f32.mrb[30].mxu1  ;;  %v12327_v4 = vpop.f32.mrb[3].mxu0 }
 0x47a   : > { %v13784_v27 = vadd.f32 %v15980_v30, %v12325_v60  ;;  %v12328_v32 = vadd.f32 %v12327_v4, %v12326_v10  ;;  %v12433_v9 = vpop.f32.mrb[31].mxu1 }
 0x47b   : > { %v12434_v1 = vadd.f32 %v12433_v9, %v12432_v6  ;;  %v16065_v24 = vadd.f32 %v13764_v45, %v12431_v55 }
 0x47c   : > { %v13792_v23 = vadd.f32 %v15982_v20, %v12328_v32 }
 0x47d   : > { %v16068_v57 = vadd.f32 %v13772_v37, %v12434_v1 }
 0x47e   : > { %v12329_v2 = vpop.f32.mrb[4].mxu0 }
 0x47f   : > { %v12435_v5 = vpop.f32.mrb[32].mxu1  ;;  %v12330_v51 = vpop.f32.mrb[5].mxu0 }
 0x480   : > { %v12331_v54 = vadd.f32 %v12330_v51, %v12329_v2  ;;  %v12436_v8 = vpop.f32.mrb[33].mxu1  ;;  %v12332_v38 = vpop.f32.mrb[6].mxu0 }
 0x481   : > { %v12437_v3 = vadd.f32 %v12436_v8, %v12435_v5  ;;  %v12438_v30 = vpop.f32.mrb[34].mxu1  ;;  %v12333_v19 = vpop.f32.mrb[7].mxu0  ;;  %v14144_v5 = vld [vmem:[#allocation12 + $0x130] sm:$0xff]  }
 0x482   : > { %v13780_v31 = vadd.f32 %v15984_v47, %v12331_v54  ;;  %v12334_v39 = vadd.f32 %v12333_v19, %v12332_v38  ;;  %v12439_v28 = vpop.f32.mrb[35].mxu1 }
 0x483   : > { %v12440_v20 = vadd.f32 %v12439_v28, %v12438_v30  ;;  %v16071_v45 = vadd.f32 %v13784_v27, %v12437_v3 }
 0x484   : > { %v13788_v61 = vadd.f32 %v15986_v53, %v12334_v39 }
 0x485   : > { %v16074_v33 = vadd.f32 %v13792_v23, %v12440_v20  ;;  %v14143_v23 = vld [vmem:[#allocation12 + $0x170] sm:$0xff]   ;;  %v14145_v20 = vld [vmem:[#allocation12 + $0x1c0] sm:$0xff]  }
 0x486   : > { %v12335_v13 = vpop.f32.mrb[8].mxu0  ;;  %12719 = vmatprep.subr.bf16.mxu0 %v14143_v23  ;;  %12819 = vmatprep.subr.bf16.mxu1 %v14145_v20 }
 0x487   : > { %v12441_v37 = vpop.f32.mrb[36].mxu1  ;;  %v12336_v43 = vpop.f32.mrb[9].mxu0  ;;  %12720 = vmatpush3.bf16.msra.mxu0 %v14144_v5 }
 0x488   : > { %v12337_v41 = vadd.f32 %v12336_v43, %v12335_v13  ;;  %v12442_v26 = vpop.f32.mrb[37].mxu1  ;;  %v12338_v60 = vpop.f32.mrb[10].mxu0 }
 0x489   : > { %v12443_v17 = vadd.f32 %v12442_v26, %v12441_v37  ;;  %v12444_v10 = vpop.f32.mrb[38].mxu1  ;;  %v12339_v55 = vpop.f32.mrb[11].mxu0 }
 0x48a   : > { %v13800_v47 = vadd.f32 %v15988_v11, %v12337_v41  ;;  %v12340_v6 = vadd.f32 %v12339_v55, %v12338_v60  ;;  %v12445_v4 = vpop.f32.mrb[39].mxu1  ;;  %v14151_v55 = vld [vmem:[#allocation12 + $0x138] sm:$0xff]  }
 0x48b   : > { %v12446_v32 = vadd.f32 %v12445_v4, %v12444_v10  ;;  %v16077_v27 = vadd.f32 %v13780_v31, %v12443_v17  ;;  %v14149_v17 = vld [vmem:[#allocation12 + $0x178] sm:$0xff]   ;;  %v16103_v4 = vld [vmem:[%s17463_s9] ss:$0 sm:$0xff]  ;;  %s17325_s9 = scalar_lea.hbm %s17530_s22, %s11514_s14 }
 0x48c   : > { %v13808_v53 = vadd.f32 %v15990_v7, %v12340_v6  ;;  %12721 = vmatprep.subr.bf16.mxu0 %v14149_v17 }
 0x48d   : > { %v16080_v9 = vadd.f32 %v13788_v61, %v12446_v32  ;;  %12722 = vmatpush3.bf16.msra.mxu0 %v14151_v55 }
 0x48e   : > { %v12341_v1 = vpop.f32.mrb[12].mxu0 }
 0x48f   : > { %v12447_v2 = vpop.f32.mrb[40].mxu1  ;;  %v12342_v50 = vpop.f32.mrb[13].mxu0 }
 0x490   : > { %v12343_v51 = vadd.f32 %v12342_v50, %v12341_v1  ;;  %v12448_v52 = vpop.f32.mrb[41].mxu1  ;;  %v12344_v54 = vpop.f32.mrb[14].mxu0 }
 0x491   : > { %v12449_v8 = vadd.f32 %v12448_v52, %v12447_v2  ;;  %v12450_v11 = vpop.f32.mrb[42].mxu1  ;;  %v12345_v38 = vpop.f32.mrb[15].mxu0 }
 0x492   : > { %v13796_v3 = vadd.f32 %v15993_v21, %v12343_v51  ;;  %v12346_v30 = vadd.f32 %v12345_v38, %v12344_v54  ;;  %v12451_v19 = vpop.f32.mrb[43].mxu1 }
 0x493   : > { %v12452_v7 = vadd.f32 %v12451_v19, %v12450_v11  ;;  %v16083_v31 = vadd.f32 %v13800_v47, %v12449_v8 }
 0x494   : > { %v13804_v39 = vadd.f32 %v15996_v35, %v12346_v30  ;;  %v16095_v35 = vld [vmem:[%s17462_s18] ss:$0 sm:$0xff] }
 0x495   : > { %v16086_v28 = vadd.f32 %v13808_v53, %v12452_v7 }
 0x497   : > { %v12453_v61 = vpop.f32.mrb[44].mxu1 }
 0x498   : > { %v12454_v13 = vpop.f32.mrb[45].mxu1 }
 0x499   : > { %v12455_v37 = vadd.f32 %v12454_v13, %v12453_v61  ;;  %v12456_v43 = vpop.f32.mrb[46].mxu1 }
 0x49a   : > { %v12457_v41 = vpop.f32.mrb[47].mxu1 }
 0x49b   : > { %v12458_v26 = vadd.f32 %v12457_v41, %v12456_v43  ;;  %v16088_v60 = vadd.f32 %v13796_v3, %v12455_v37 }
 0x49d   : > { %v16090_v21 = vadd.f32 %v13804_v39, %v12458_v26 }
 0x49f   : > { %v13541_v10 = vpop.f32.mrb[144].mxu1 }
 0x4a0   : > { %v16098_v47 = vadd.f32 %v16005_v0, %v13541_v10  ;;  %v5828_v6 = vpop.f32.mrb[145].mxu1 }
 0x4a1   : > { %v16106_v32 = vadd.f32 %v15999_v63, %v5828_v6  ;;  %v13542_v53 = vpop.f32.mrb[146].mxu1 }
 0x4a2   : > { %v5964_v1 = vmul.f32 %v16098_v47, %v16095_v35  ;;  %v16111_v23 = vadd.f32 %v16008_v14, %v13542_v53  ;;  %v5831_v0 = vpop.f32.mrb[147].mxu1 }
 0x4a3   : > { %v5962_v2 = vmul.f32 %v16106_v32, %v16095_v35  ;;  %v16116_v50 = vadd.f32 %v16002_v12, %v5831_v0  ;;  %v6226_v0 = vld [vmem:[#allocation2 + $0xa] sm:$0xff] }
 0x4a4   : > { %v16119_v5 = vadd.f32 %v16103_v4, %v5964_v1  ;;  %v5965_v63 = vmul.f32 %v16111_v23, %v16095_v35  ;;  %v6225_v1 = vld [vmem:[#allocation2 + $0x2] sm:$0xff] }
 0x4a5   : > { %v6001_v51 = vadd.f32 %v16103_v4, %v5962_v2  ;;  %v5963_v52 = vmul.f32 %v16116_v50, %v16095_v35 }
 0x4a6   : > { %v6035_v14 = vmax.f32 %v16119_v5, 0.0  ;;  %v6004_v54 = vadd.f32 %v16103_v4, %v5965_v63 }
 0x4a7   : > { %v6033_v8 = vmax.f32 %v6001_v51, 0.0  ;;  %v6002_v11 = vadd.f32 %v16103_v4, %v5963_v52  ;;  %v13545_v12 = vpop.f32.mrb[148].mxu1 }
 0x4a8   : > { %6067 = vst [vmem:[#allocation2 + $0x31] sm:$0xff] %v6035_v14  ;;  %v6036_v38 = vmax.f32 %v6004_v54, 0.0  ;;  %v16130_v3 = vadd.f32 %v16017_v36, %v13545_v12  ;;  %v5844_v30 = vpop.f32.mrb[149].mxu1 }
 0x4a9   : > { %6065 = vst [vmem:[#allocation2 + $0x19] sm:$0xff] %v6033_v8  ;;  %v6034_v19 = vmax.f32 %v6002_v11, 0.0  ;;  %v16133_v7 = vadd.f32 %v16011_v16, %v5844_v30  ;;  %v13546_v39 = vpop.f32.mrb[150].mxu1 }
 0x4aa   : > { %6068 = vst [vmem:[#allocation2 + $0x39] sm:$0xff] %v6036_v38  ;;  %v5968_v20 = vmul.f32 %v16130_v3, %v16095_v35  ;;  %v16138_v61 = vadd.f32 %v16020_v46, %v13546_v39  ;;  %v5847_v13 = vpop.f32.mrb[151].mxu1 }
 0x4ab   : > { %6066 = vst [vmem:[#allocation2 + $0x21] sm:$0xff] %v6034_v19  ;;  %v5966_v36 = vmul.f32 %v16133_v7, %v16095_v35  ;;  %v16143_v37 = vadd.f32 %v16014_v25, %v5847_v13  ;;  %v6971_v43 = vpack.c.bf16 %v6034_v19, %v6033_v8  ;;  %v16159_v25 = vld [vmem:[#allocation12 + $0x200] sm:$0xff]   ;;  %v6963_v19 = vpack.c.bf16 %v6226_v0, %v6225_v1 }
 0x4ac   : > { %v16146_v16 = vadd.f32 %v16103_v4, %v5968_v20  ;;  %v5969_v41 = vmul.f32 %v16138_v61, %v16095_v35  ;;  %13571 = vmatprep.subr.bf16.mxu0 %v16159_v25 }
 0x4ad   : > { %v16151_v26 = vadd.f32 %v16103_v4, %v5966_v36  ;;  %v5967_v46 = vmul.f32 %v16143_v37, %v16095_v35  ;;  %7721 = vmatprep.mubr.bf16.mxu0 %v6971_v43  ;;  %v14146_v36 = vld [vmem:[#allocation12 + $0x180] sm:$0xff]  }
 0x4ae   : > { %v6039_v17 = vmax.f32 %v16146_v16, 0.0  ;;  %v16157_v10 = vadd.f32 %v16103_v4, %v5969_v41  ;;  %v6980_v41 = vpack.c.bf16 %v6036_v38, %v6035_v14 }
 0x4af   : > { %v6037_v55 = vmax.f32 %v16151_v26, 0.0  ;;  %v16163_v6 = vadd.f32 %v16103_v4, %v5967_v46  ;;  %v13549_v53 = vpop.f32.mrb[152].mxu1  ;;  %v6291_v46 = vld [vmem:[#allocation2 + $0x30] sm:$0xff] }
 0x4b0   : > { %6071 = vst [vmem:[#allocation2 + $0x61] sm:$0xff] %v6039_v17  ;;  %v6040_v2 = vmax.f32 %v16157_v10, 0.0  ;;  %v16169_v5 = vadd.f32 %v16029_v58, %v13549_v53  ;;  %v5860_v63 = vpop.f32.mrb[153].mxu1  ;;  %v6289_v12 = vld [vmem:[#allocation2 + $0x18] sm:$0xff] }
 0x4b1   : > { %6069 = vst [vmem:[#allocation2 + $0x49] sm:$0xff] %v6037_v55  ;;  %v6038_v51 = vmax.f32 %v16163_v6, 0.0  ;;  %v16176_v52 = vadd.f32 %v16023_v29, %v5860_v63  ;;  %v13550_v54 = vpop.f32.mrb[154].mxu1  ;;  %v6292_v39 = vld [vmem:[#allocation2 + $0x38] sm:$0xff] }
 0x4b2   : > { %6072 = vst [vmem:[#allocation2 + $0x69] sm:$0xff] %v6040_v2  ;;  %v5972_v8 = vmul.f32 %v16169_v5, %v16095_v35  ;;  %v16183_v58 = vadd.f32 %v16032_v44, %v13550_v54  ;;  %v5863_v11 = vpop.f32.mrb[155].mxu1  ;;  %v6290_v30 = vld [vmem:[#allocation2 + $0x20] sm:$0xff]  ;;  %v14147_v6 = vld [vmem:[#allocation12 + $0x1c8] sm:$0xff]  }
 0x4b3   : > { %6070 = vst [vmem:[#allocation2 + $0x51] sm:$0xff] %v6038_v51  ;;  %v5970_v29 = vmul.f32 %v16176_v52, %v16095_v35  ;;  %v16188_v20 = vadd.f32 %v16026_v18, %v5863_v11  ;;  %v6964_v13 = vpack.c.bf16 %v6290_v30, %v6289_v12  ;;  %v16200_v18 = vpack.c.bf16 %v6292_v39, %v6291_v46 }
 0x4b4   : > { %17464 = vst [vmem:[#allocation21_spill] sm:$0xff] %v16183_v58  ;;  %v16191_v43 = vadd.f32 %v16103_v4, %v5972_v8  ;;  %v5973_v44 = vmul.f32 %v16183_v58, %v16095_v35  ;;  %v14148_v8 = vld [vmem:[#allocation12 + $0x188] sm:$0xff]  }
 0x4b5   : > { %v16196_v53 = vadd.f32 %v16103_v4, %v5970_v29  ;;  %v5971_v1 = vmul.f32 %v16188_v20, %v16095_v35  ;;  %7874 = vmatprep.mubr.bf16.mxu1 %v6964_v13  ;;  %7722 = vmatmul.mubr.bf16.gmra.mrb[20].mxu0 %v6964_v13 }
 0x4b6   : > { %v17395_v0 = vmax.f32 %v16191_v43, 0.0  ;;  %v16204_v63 = vadd.f32 %v16103_v4, %v5973_v44  ;;  %7875 = vmatmul.mubr.bf16.vlgmr.msra.gmra.mrb[48].mxu1 %v6963_v19  ;;  %7729 = vmatprep.mubr.bf16.mxu0 %v6980_v41  ;;  %v14150_v19 = vld [vmem:[#allocation12 + $0x1d0] sm:$0xff]  }
 0x4b7   : > { %v17397_v14 = vmax.f32 %v16196_v53, 0.0  ;;  %v16208_v38 = vadd.f32 %v16103_v4, %v5971_v1  ;;  %v13553_v54 = vpop.f32.mrb[156].mxu1  ;;  %7882 = vmatprep.mubr.bf16.mxu1 %v16200_v18  ;;  %12820 = vmatpush3.bf16.msra.mxu1 %v14146_v36  ;;  %v6227_v36 = vld [vmem:[#allocation2 + $0x1a] sm:$0xff]  ;;  %v6228_v44 = vld [vmem:[#allocation2 + $0x22] sm:$0xff] }
 0x4b8   : > { %6075 = vst [vmem:[#allocation2 + $0x91] sm:$0xff] %v17395_v0  ;;  %v17394_v11 = vmax.f32 %v16204_v63, 0.0  ;;  %v16215_v12 = vadd.f32 %v16041_v15, %v13553_v54  ;;  %v5876_v30 = vpop.f32.mrb[157].mxu1  ;;  %12821 = vmatprep.subr.bf16.mxu1 %v14147_v6  ;;  %v14152_v54 = vld [vmem:[#allocation12 + $0x190] sm:$0xff]   ;;  %v6293_v0 = vld [vmem:[#allocation2 + $0x48] sm:$0xff] }
 0x4b9   : > { %6073 = vst [vmem:[#allocation2 + $0x79] sm:$0xff] %v17397_v14  ;;  %v17396_v39 = vmax.f32 %v16208_v38, 0.0  ;;  %v16221_v29 = vadd.f32 %v16035_v56, %v5876_v30  ;;  %v13554_v13 = vpop.f32.mrb[158].mxu1 }
 0x4ba   : > { %17465 = vst [vmem:[#allocation22_spill] sm:$0xff] %v16215_v12  ;;  %6076 = vst [vmem:[#allocation2 + $0x99] sm:$0xff] %v17394_v11  ;;  %v5976_v15 = vmul.f32 %v16215_v12, %v16095_v35  ;;  %v16228_v41 = vadd.f32 %v16044_v62, %v13554_v13  ;;  %v5879_v46 = vpop.f32.mrb[159].mxu1  ;;  %v6294_v6 = vld [vmem:[#allocation2 + $0x50] sm:$0xff]  ;;  %v16242_v13 = vpack.c.bf16 %v6228_v44, %v6227_v36 }
 0x4bb   : > { %17466 = vst [vmem:[#allocation23_spill] sm:$0xff] %v16221_v29  ;;  %6074 = vst [vmem:[#allocation2 + $0x81] sm:$0xff] %v17396_v39  ;;  %v5974_v56 = vmul.f32 %v16221_v29, %v16095_v35  ;;  %v16235_v1 = vadd.f32 %v16038_v48, %v5879_v46  ;;  %12822 = vmatpush3.bf16.msra.mxu1 %v14148_v8  ;;  %v6989_v11 = vpack.c.bf16 %v6038_v51, %v6037_v55  ;;  %v14153_v39 = vld [vmem:[#allocation12 + $0x1d8] sm:$0xff]  }
 0x4bc   : > { %17467 = vst [vmem:[#allocation24_spill] sm:$0xff] %v16228_v41  ;;  %v16238_v30 = vadd.f32 %v16103_v4, %v5976_v15  ;;  %v5977_v62 = vmul.f32 %v16228_v41, %v16095_v35  ;;  %12823 = vmatprep.subr.bf16.mxu1 %v14150_v19  ;;  %v16252_v8 = vpack.c.bf16 %v6294_v6, %v6293_v0  ;;  %v14154_v19 = vld [vmem:[#allocation12 + $0x198] sm:$0xff]  }
 0x4bd   : > { %17468 = vst [vmem:[#allocation25_spill] sm:$0xff] %v16235_v1  ;;  %v16247_v14 = vadd.f32 %v16103_v4, %v5974_v56  ;;  %v5975_v48 = vmul.f32 %v16235_v1, %v16095_v35  ;;  %7730 = vmatmul.mubr.bf16.gmra.mrb[24].mxu0 %v16200_v18 }
 0x4be   : > { %v17398_v15 = vmax.f32 %v16238_v30, 0.0  ;;  %v16256_v36 = vadd.f32 %v16103_v4, %v5977_v62  ;;  %7883 = vmatmul.mubr.bf16.gmra.mrb[52].mxu1 %v16242_v13  ;;  %7737 = vmatprep.mubr.bf16.mxu0 %v6989_v11  ;;  %v14155_v11 = vld [vmem:[#allocation12 + $0x1e0] sm:$0xff]  }
 0x4bf   : > { %v17399_v26 = vmax.f32 %v16247_v14, 0.0  ;;  %v16261_v55 = vadd.f32 %v16103_v4, %v5975_v48  ;;  %v13557_v51 = vpop.f32.mrb[160].mxu1  ;;  %7890 = vmatprep.mubr.bf16.mxu1 %v16252_v8  ;;  %12824 = vmatpush3.bf16.msra.mxu1 %v14152_v54  ;;  %v6229_v62 = vld [vmem:[#allocation2 + $0x32] sm:$0xff]  ;;  %v6230_v48 = vld [vmem:[#allocation2 + $0x3a] sm:$0xff] }
 0x4c0   : > { %6079 = vst [vmem:[#allocation2 + $0xc1] sm:$0xff] %v17398_v15  ;;  %v17400_v0 = vmax.f32 %v16256_v36, 0.0  ;;  %v16268_v44 = vadd.f32 %v16053_v49, %v13557_v51  ;;  %v5892_v46 = vpop.f32.mrb[161].mxu1  ;;  %12825 = vmatprep.subr.bf16.mxu1 %v14153_v39  ;;  %v6296_v15 = vld [vmem:[#allocation2 + $0x68] sm:$0xff] }
 0x4c1   : > { %6077 = vst [vmem:[#allocation2 + $0xa9] sm:$0xff] %v17399_v26  ;;  %v17401_v6 = vmax.f32 %v16261_v55, 0.0  ;;  %v16274_v56 = vadd.f32 %v16047_v42, %v5892_v46  ;;  %v13558_v54 = vpop.f32.mrb[162].mxu1  ;;  %v14156_v26 = vld [vmem:[#allocation12 + $0x1a0] sm:$0xff]  }
 0x4c2   : > { %17469 = vst [vmem:[#allocation26_spill] sm:$0xff] %v16268_v44  ;;  %6080 = vst [vmem:[#allocation2 + $0xc9] sm:$0xff] %v17400_v0  ;;  %v5980_v49 = vmul.f32 %v16268_v44, %v16095_v35  ;;  %v16281_v39 = vadd.f32 %v16056_v59, %v13558_v54  ;;  %v5895_v51 = vpop.f32.mrb[163].mxu1  ;;  %v16295_v54 = vpack.c.bf16 %v6230_v48, %v6229_v62  ;;  %v6295_v44 = vld [vmem:[#allocation2 + $0x60] sm:$0xff] }
 0x4c3   : > { %17470 = vst [vmem:[#allocation27_spill] sm:$0xff] %v16274_v56  ;;  %6078 = vst [vmem:[#allocation2 + $0xb1] sm:$0xff] %v17401_v6  ;;  %v5978_v42 = vmul.f32 %v16274_v56, %v16095_v35  ;;  %v16288_v46 = vadd.f32 %v16050_v22, %v5895_v51  ;;  %12826 = vmatpush3.bf16.msra.mxu1 %v14154_v19  ;;  %v6998_v6 = vpack.c.bf16 %v6040_v2, %v6039_v17  ;;  %v14157_v56 = vld [vmem:[#allocation12 + $0x1e8] sm:$0xff]  }
 0x4c4   : > { %17471 = vst [vmem:[#allocation28_spill] sm:$0xff] %v16281_v39  ;;  %v16291_v0 = vadd.f32 %v16103_v4, %v5980_v49  ;;  %v5981_v59 = vmul.f32 %v16281_v39, %v16095_v35  ;;  %12827 = vmatprep.subr.bf16.mxu1 %v14155_v11  ;;  %v16307_v49 = vpack.c.bf16 %v6296_v15, %v6295_v44  ;;  %v14158_v11 = vld [vmem:[#allocation12 + $0x1a8] sm:$0xff]  }
 0x4c5   : > { %17472 = vst [vmem:[#allocation29_spill] sm:$0xff] %v16288_v46  ;;  %v16302_v22 = vadd.f32 %v16103_v4, %v5978_v42  ;;  %v5979_v19 = vmul.f32 %v16288_v46, %v16095_v35  ;;  %7738 = vmatmul.mubr.bf16.gmra.mrb[28].mxu0 %v16252_v8  ;;  %v6297_v46 = vld [vmem:[#allocation2 + $0x78] sm:$0xff] }
 0x4c6   : > { %v17404_v62 = vmax.f32 %v16291_v0, 0.0  ;;  %v16311_v16 = vadd.f32 %v16103_v4, %v5981_v59  ;;  %7891 = vmatmul.mubr.bf16.gmra.mrb[56].mxu1 %v16295_v54  ;;  %7745 = vmatprep.mubr.bf16.mxu0 %v6998_v6  ;;  %v14159_v6 = vld [vmem:[#allocation12 + $0x1f0] sm:$0xff]   ;;  %v6231_v59 = vld [vmem:[#allocation2 + $0x4a] sm:$0xff] }
 0x4c7   : > { %v17405_v17 = vmax.f32 %v16302_v22, 0.0  ;;  %v16316_v10 = vadd.f32 %v16103_v4, %v5979_v19  ;;  %v13561_v2 = vpop.f32.mrb[164].mxu1  ;;  %7898 = vmatprep.mubr.bf16.mxu1 %v16307_v49  ;;  %12828 = vmatpush3.bf16.msra.mxu1 %v14156_v26  ;;  %v6232_v19 = vld [vmem:[#allocation2 + $0x52] sm:$0xff] }
 0x4c8   : > { %6083 = vst [vmem:[#allocation2 + $0xf1] sm:$0xff] %v17404_v62  ;;  %v17406_v15 = vmax.f32 %v16311_v16, 0.0  ;;  %v16323_v44 = vadd.f32 %v16065_v24, %v13561_v2  ;;  %v5908_v48 = vpop.f32.mrb[165].mxu1  ;;  %12829 = vmatprep.subr.bf16.mxu1 %v14157_v56  ;;  %v6298_v62 = vld [vmem:[#allocation2 + $0x80] sm:$0xff] }
 0x4c9   : > { %6081 = vst [vmem:[#allocation2 + $0xd9] sm:$0xff] %v17405_v17  ;;  %v17408_v51 = vmax.f32 %v16316_v10, 0.0  ;;  %v16329_v42 = vadd.f32 %v16059_v34, %v5908_v48  ;;  %v13562_v26 = vpop.f32.mrb[166].mxu1  ;;  %v14161_v17 = vld [vmem:[#allocation12 + $0x1b0] sm:$0xff]  }
 0x4ca   : > { %17473 = vst [vmem:[#allocation30_spill] sm:$0xff] %v16323_v44  ;;  %6084 = vst [vmem:[#allocation2 + $0xf9] sm:$0xff] %v17406_v15  ;;  %v5984_v24 = vmul.f32 %v16323_v44, %v16095_v35  ;;  %v16336_v56 = vadd.f32 %v16068_v57, %v13562_v26  ;;  %v5911_v2 = vpop.f32.mrb[167].mxu1  ;;  %v16350_v26 = vpack.c.bf16 %v6232_v19, %v6231_v59  ;;  %v17477_v44 = vmax.f32 %v16196_v53, 0.0 }
 0x4cb   : > { %17474 = vst [vmem:[#allocation31_spill] sm:$0xff] %v16329_v42  ;;  %6082 = vst [vmem:[#allocation2 + $0xe1] sm:$0xff] %v17408_v51  ;;  %v5982_v34 = vmul.f32 %v16329_v42, %v16095_v35  ;;  %v16343_v48 = vadd.f32 %v16062_v40, %v5911_v2  ;;  %12830 = vmatpush3.bf16.msra.mxu1 %v14158_v11  ;;  %v17478_v51 = vmax.f32 %v16208_v38, 0.0  ;;  %v14162_v42 = vld [vmem:[#allocation12 + $0x1f8] sm:$0xff]  }
 0x4cc   : > { %17475 = vst [vmem:[#allocation32_spill] sm:$0xff] %v16336_v56  ;;  %v16346_v15 = vadd.f32 %v16103_v4, %v5984_v24  ;;  %v5985_v57 = vmul.f32 %v16336_v56, %v16095_v35  ;;  %12831 = vmatprep.subr.bf16.mxu1 %v14159_v6  ;;  %v16362_v24 = vpack.c.bf16 %v6298_v62, %v6297_v46 }
 0x4cd   : > { %17476 = vst [vmem:[#allocation33_spill] sm:$0xff] %v16343_v48  ;;  %v7007_v39 = vpack.c.bf16 %v17478_v51, %v17477_v44  ;;  %v16357_v40 = vadd.f32 %v16103_v4, %v5982_v34  ;;  %v5983_v11 = vmul.f32 %v16343_v48, %v16095_v35  ;;  %7746 = vmatmul.mubr.bf16.gmra.mrb[32].mxu0 %v16307_v49  ;;  %v14163_v51 = vld [vmem:[#allocation12 + $0x1b8] sm:$0xff]  }
 0x4ce   : > { %v17413_v59 = vmax.f32 %v16346_v15, 0.0  ;;  %v16366_v53 = vadd.f32 %v16103_v4, %v5985_v57  ;;  %7899 = vmatmul.mubr.bf16.gmra.mrb[60].mxu1 %v16350_v26  ;;  %v6233_v34 = vld [vmem:[#allocation2 + $0x62] sm:$0xff]  ;;  %v6234_v57 = vld [vmem:[#allocation2 + $0x6a] sm:$0xff] }
 0x4cf   : > { %7753 = vmatprep.mubr.bf16.mxu0 %v7007_v39  ;;  %v17414_v38 = vmax.f32 %v16357_v40, 0.0  ;;  %v16371_v44 = vadd.f32 %v16103_v4, %v5983_v11  ;;  %v13565_v6 = vpop.f32.mrb[168].mxu1  ;;  %7906 = vmatprep.mubr.bf16.mxu1 %v16362_v24 }
 0x4d0   : > { %12832 = vmatpush3.bf16.msra.mxu1 %v14161_v17  ;;  %6087 = vst [vmem:[#allocation2 + $0x121] sm:$0xff] %v17413_v59  ;;  %v17412_v46 = vmax.f32 %v16366_v53, 0.0  ;;  %v16378_v62 = vadd.f32 %v16077_v27, %v13565_v6  ;;  %v5924_v19 = vpop.f32.mrb[169].mxu1  ;;  %v6300_v6 = vld [vmem:[#allocation2 + $0x98] sm:$0xff] }
 0x4d1   : > { %12833 = vmatprep.subr.bf16.mxu1 %v14162_v42  ;;  %6085 = vst [vmem:[#allocation2 + $0x109] sm:$0xff] %v17414_v38  ;;  %v17415_v39 = vmax.f32 %v16371_v44, 0.0  ;;  %v16384_v2 = vadd.f32 %v16071_v45, %v5924_v19  ;;  %v13566_v17 = vpop.f32.mrb[170].mxu1  ;;  %v17484_v38 = vmax.f32 %v16204_v63, 0.0 }
 0x4d2   : > { %17479 = vst [vmem:[#allocation34_spill] sm:$0xff] %v16378_v62  ;;  %6088 = vst [vmem:[#allocation2 + $0x129] sm:$0xff] %v17412_v46  ;;  %v5988_v27 = vmul.f32 %v16378_v62, %v16095_v35  ;;  %v16391_v11 = vadd.f32 %v16080_v9, %v13566_v17  ;;  %v5927_v42 = vpop.f32.mrb[171].mxu1  ;;  %v16405_v9 = vpack.c.bf16 %v6234_v57, %v6233_v34  ;;  %v17483_v17 = vmax.f32 %v16191_v43, 0.0  ;;  %v6299_v62 = vld [vmem:[#allocation2 + $0x90] sm:$0xff] }
 0x4d3   : > { %17480 = vst [vmem:[#allocation35_spill] sm:$0xff] %v16384_v2  ;;  %6086 = vst [vmem:[#allocation2 + $0x111] sm:$0xff] %v17415_v39  ;;  %v5986_v45 = vmul.f32 %v16384_v2, %v16095_v35  ;;  %v16398_v19 = vadd.f32 %v16074_v33, %v5927_v42 }
 0x4d4   : > { %17481 = vst [vmem:[#allocation36_spill] sm:$0xff] %v16391_v11  ;;  %12834 = vmatpush3.bf16.msra.mxu1 %v14163_v51  ;;  %v16401_v46 = vadd.f32 %v16103_v4, %v5988_v27  ;;  %v5989_v59 = vmul.f32 %v16391_v11, %v16095_v35  ;;  %v7016_v39 = vpack.c.bf16 %v17484_v38, %v17483_v17  ;;  %v6236_v17 = vld [vmem:[#allocation2 + $0x82] sm:$0xff] }
 0x4d5   : > { %17482 = vst [vmem:[#allocation37_spill] sm:$0xff] %v16398_v19  ;;  %v16412_v2 = vadd.f32 %v16103_v4, %v5986_v45  ;;  %v5987_v33 = vmul.f32 %v16398_v19, %v16095_v35  ;;  %7754 = vmatmul.mubr.bf16.gmra.mrb[36].mxu0 %v16362_v24  ;;  %v16417_v51 = vpack.c.bf16 %v6300_v6, %v6299_v62  ;;  %v6235_v45 = vld [vmem:[#allocation2 + $0x7a] sm:$0xff]  ;;  %v6301_v19 = vld [vmem:[#allocation2 + $0xa8] sm:$0xff] }
 0x4d6   : > { %v17418_v27 = vmax.f32 %v16401_v46, 0.0  ;;  %v16421_v34 = vadd.f32 %v16103_v4, %v5989_v59  ;;  %7907 = vmatmul.mubr.bf16.gmra.mrb[64].mxu1 %v16405_v9  ;;  %7761 = vmatprep.mubr.bf16.mxu0 %v7016_v39 }
 0x4d7   : > { %v17419_v43 = vmax.f32 %v16412_v2, 0.0  ;;  %v16426_v63 = vadd.f32 %v16103_v4, %v5987_v33  ;;  %v13569_v38 = vpop.f32.mrb[172].mxu1  ;;  %7914 = vmatprep.mubr.bf16.mxu1 %v16417_v51 }
 0x4d8   : > { %6091 = vst [vmem:[#allocation2 + $0x151] sm:$0xff] %v17418_v27  ;;  %v17420_v62 = vmax.f32 %v16421_v34, 0.0  ;;  %v16433_v57 = vadd.f32 %v16088_v60, %v13569_v38  ;;  %v5940_v59 = vpop.f32.mrb[173].mxu1  ;;  %v6302_v27 = vld [vmem:[#allocation2 + $0xb0] sm:$0xff] }
 0x4d9   : > { %6089 = vst [vmem:[#allocation2 + $0x139] sm:$0xff] %v17419_v43  ;;  %v17424_v39 = vmax.f32 %v16426_v63, 0.0  ;;  %v16439_v42 = vadd.f32 %v16083_v31, %v5940_v59  ;;  %v13570_v6 = vpop.f32.mrb[174].mxu1 }
 0x4da   : > { %17485 = vst [vmem:[#allocation38_spill] sm:$0xff] %v16433_v57  ;;  %6092 = vst [vmem:[#allocation2 + $0x159] sm:$0xff] %v17420_v62  ;;  %v5992_v33 = vmul.f32 %v16433_v57, %v16095_v35  ;;  %v16446_v60 = vadd.f32 %v16090_v21, %v13570_v6  ;;  %v5943_v38 = vpop.f32.mrb[175].mxu1  ;;  %v16458_v57 = vpack.c.bf16 %v6236_v17, %v6235_v45  ;;  %v17489_v21 = vmax.f32 %v16247_v14, 0.0 }
 0x4db   : > { %17486 = vst [vmem:[#allocation39_spill] sm:$0xff] %v16439_v42  ;;  %6090 = vst [vmem:[#allocation2 + $0x141] sm:$0xff] %v17424_v39  ;;  %v5990_v31 = vmul.f32 %v16439_v42, %v16095_v35  ;;  %v16453_v59 = vadd.f32 %v16086_v28, %v5943_v38  ;;  %v17490_v6 = vmax.f32 %v16261_v55, 0.0 }
 0x4dc   : > { %17487 = vst [vmem:[#allocation40_spill] sm:$0xff] %v16446_v60  ;;  %v6031_v43 = vadd.f32 %v16103_v4, %v5992_v33  ;;  %v5993_v62 = vmul.f32 %v16446_v60, %v16095_v35  ;;  %v16470_v33 = vpack.c.bf16 %v6302_v27, %v6301_v19  ;;  %v6237_v19 = vld [vmem:[#allocation2 + $0x92] sm:$0xff]  ;;  %v6238_v27 = vld [vmem:[#allocation2 + $0x9a] sm:$0xff] }
 0x4dd   : > { %17488 = vst [vmem:[#allocation41_spill] sm:$0xff] %v16453_v59  ;;  %v7025_v11 = vpack.c.bf16 %v17490_v6, %v17489_v21  ;;  %v16465_v39 = vadd.f32 %v16103_v4, %v5990_v31  ;;  %v5991_v28 = vmul.f32 %v16453_v59, %v16095_v35  ;;  %7762 = vmatmul.mubr.bf16.gmra.mrb[40].mxu0 %v16417_v51  ;;  %v6303_v21 = vld [vmem:[#allocation2 + $0xc0] sm:$0xff] }
 0x4de   : > { %v6063_v38 = vmax.f32 %v6031_v43, 0.0  ;;  %v6032_v45 = vadd.f32 %v16103_v4, %v5993_v62  ;;  %7915 = vmatmul.mubr.bf16.gmra.mrb[68].mxu1 %v16458_v57  ;;  %v6304_v43 = vld [vmem:[#allocation2 + $0xc8] sm:$0xff]  ;;  %v17492_v62 = vmax.f32 %v16256_v36, 0.0  ;;  %v17494_v36 = vmax.f32 %v16316_v10, 0.0 }
 0x4df   : > { %7769 = vmatprep.mubr.bf16.mxu0 %v7025_v11  ;;  %v17426_v14 = vmax.f32 %v16465_v39, 0.0  ;;  %v16476_v55 = vadd.f32 %v16103_v4, %v5991_v28  ;;  %7922 = vmatprep.mubr.bf16.mxu1 %v16470_v33  ;;  %v16484_v11 = vpack.c.bf16 %v6238_v27, %v6237_v19  ;;  %v17491_v4 = vmax.f32 %v16238_v30, 0.0  ;;  %v6239_v28 = vld [vmem:[#allocation2 + $0xaa] sm:$0xff]  ;;  %v6305_v27 = vld [vmem:[#allocation2 + $0xd8] sm:$0xff] }
 0x4e0   : > { %6095 = vst [vmem:[#allocation2 + $0x181] sm:$0xff] %v6063_v38  ;;  %v6064_v17 = vmax.f32 %v6032_v45, 0.0  ;;  %v16491_v6 = vpack.c.bf16 %v6304_v43, %v6303_v21  ;;  %v6240_v38 = vld [vmem:[#allocation2 + $0xb2] sm:$0xff]  ;;  %v6306_v45 = vld [vmem:[#allocation2 + $0xe0] sm:$0xff]  ;;  %v17493_v30 = vmax.f32 %v16302_v22, 0.0  ;;  %v17495_v22 = vmax.f32 %v16291_v0, 0.0 }
 0x4e1   : > { %6093 = vst [vmem:[#allocation2 + $0x169] sm:$0xff] %v17426_v14  ;;  %v17425_v35 = vmax.f32 %v16476_v55, 0.0  ;;  %v7034_v31 = vpack.c.bf16 %v17492_v62, %v17491_v4  ;;  %v16502_v43 = vpack.c.bf16 %v6306_v45, %v6305_v27  ;;  %v6241_v4 = vld [vmem:[#allocation2 + $0xc2] sm:$0xff]  ;;  %v6242_v62 = vld [vmem:[#allocation2 + $0xca] sm:$0xff]  ;;  %v17496_v10 = vmax.f32 %v16311_v16, 0.0  ;;  %v6313_v14 = vld [vmem:[#allocation2 + $0x138] sm:$0xff] }
 0x4e2   : > { %6096 = vst [vmem:[#allocation2 + $0x189] sm:$0xff] %v6064_v17  ;;  %v16495_v17 = vpack.c.bf16 %v6240_v38, %v6239_v28  ;;  %v7043_v19 = vpack.c.bf16 %v17494_v36, %v17493_v30  ;;  %v16506_v21 = vpack.c.bf16 %v6242_v62, %v6241_v4  ;;  %v6307_v38 = vld [vmem:[#allocation2 + $0xf0] sm:$0xff]  ;;  %v6243_v30 = vld [vmem:[#allocation2 + $0xda] sm:$0xff]  ;;  %v6244_v36 = vld [vmem:[#allocation2 + $0xe2] sm:$0xff]  ;;  %v17497_v0 = vmax.f32 %v16357_v40, 0.0 }
 0x4e3   : > { %6094 = vst [vmem:[#allocation2 + $0x171] sm:$0xff] %v17425_v35  ;;  %v7052_v28 = vpack.c.bf16 %v17496_v10, %v17495_v22  ;;  %v16517_v27 = vpack.c.bf16 %v6244_v36, %v6243_v30  ;;  %v17498_v16 = vmax.f32 %v16371_v44, 0.0  ;;  %v6309_v62 = vld [vmem:[#allocation2 + $0x108] sm:$0xff]  ;;  %v6245_v22 = vld [vmem:[#allocation2 + $0xf2] sm:$0xff]  ;;  %v6246_v10 = vld [vmem:[#allocation2 + $0xfa] sm:$0xff]  ;;  %v17499_v40 = vmax.f32 %v16346_v15, 0.0 }
 0x4e4   : > { %v17500_v44 = vmax.f32 %v16366_v53, 0.0  ;;  %v6311_v36 = vld [vmem:[#allocation2 + $0x120] sm:$0xff]  ;;  %v6247_v53 = vld [vmem:[#allocation2 + $0x10a] sm:$0xff] }
 0x4e5   : > { %7770 = vmatmul.mubr.bf16.gmra.mrb[44].mxu0 %v16470_v33  ;;  %v7061_v4 = vpack.c.bf16 %v17498_v16, %v17497_v0 }
 0x4e6   : > { %7923 = vmatmul.mubr.bf16.gmra.mrb[72].mxu1 %v16484_v11  ;;  %7777 = vmatprep.mubr.bf16.mxu0 %v7034_v31  ;;  %v6308_v31 = vld [vmem:[#allocation2 + $0xf8] sm:$0xff]  ;;  %v7070_v30 = vpack.c.bf16 %v17500_v44, %v17499_v40  ;;  %v6314_v40 = vld [vmem:[#allocation2 + $0x140] sm:$0xff] }
 0x4e7   : > { %7930 = vmatprep.mubr.bf16.mxu1 %v16491_v6  ;;  %v16513_v45 = vpack.c.bf16 %v6308_v31, %v6307_v38  ;;  %v16528_v38 = vpack.c.bf16 %v6246_v10, %v6245_v22  ;;  %v6248_v10 = vld [vmem:[#allocation2 + $0x112] sm:$0xff] }
 0x4e8   : > { %v16543_v44 = vpack.c.bf16 %v6248_v10, %v6247_v53  ;;  %v6315_v10 = vld [vmem:[#allocation2 + $0x150] sm:$0xff] }
 0x4ed   : > { %7778 = vmatmul.mubr.bf16.gmra.mrb[48].mxu0 %v16491_v6 }
 0x4ee   : > { %7931 = vmatmul.mubr.bf16.gmra.mrb[76].mxu1 %v16495_v17  ;;  %7785 = vmatprep.mubr.bf16.mxu0 %v7043_v19  ;;  %v6310_v19 = vld [vmem:[#allocation2 + $0x110] sm:$0xff] }
 0x4ef   : > { %7938 = vmatprep.mubr.bf16.mxu1 %v16502_v43  ;;  %v16524_v31 = vpack.c.bf16 %v6310_v19, %v6309_v62 }
 0x4f5   : > { %7786 = vmatmul.mubr.bf16.gmra.mrb[52].mxu0 %v16502_v43 }
 0x4f6   : > { %7939 = vmatmul.mubr.bf16.gmra.mrb[80].mxu1 %v16506_v21  ;;  %7793 = vmatprep.mubr.bf16.mxu0 %v7052_v28  ;;  %v6312_v28 = vld [vmem:[#allocation2 + $0x128] sm:$0xff] }
 0x4f7   : > { %7946 = vmatprep.mubr.bf16.mxu1 %v16513_v45  ;;  %v16535_v19 = vpack.c.bf16 %v6312_v28, %v6311_v36  ;;  %v17501_v28 = vmax.f32 %v16412_v2, 0.0  ;;  %v17502_v36 = vmax.f32 %v16426_v63, 0.0  ;;  %v17503_v2 = vmax.f32 %v16401_v46, 0.0 }
 0x4f8   : > { %v17504_v63 = vmax.f32 %v16421_v34, 0.0  ;;  %v17505_v46 = vmax.f32 %v16465_v39, 0.0  ;;  %v17506_v34 = vmax.f32 %v16476_v55, 0.0  ;;  %v6354_v55 = vld [vmem:[#allocation2 + $0x21] sm:$0xff] }
 0x4f9   : > { %v7079_v35 = vpack.c.bf16 %v17502_v36, %v17501_v28  ;;  %v6318_v28 = vld [vmem:[#allocation2 + $0x170] sm:$0xff] }
 0x4fa   : > { %v7088_v53 = vpack.c.bf16 %v17504_v63, %v17503_v2  ;;  %v6253_v2 = vld [vmem:[#allocation2 + $0x152] sm:$0xff]  ;;  %v6254_v63 = vld [vmem:[#allocation2 + $0x15a] sm:$0xff] }
 0x4fd   : > { %7794 = vmatmul.mubr.bf16.gmra.mrb[56].mxu0 %v16513_v45 }
 0x4fe   : > { %7947 = vmatmul.mubr.bf16.gmra.mrb[84].mxu1 %v16517_v27  ;;  %7801 = vmatprep.mubr.bf16.mxu0 %v7061_v4 }
 0x4ff   : > { %7954 = vmatprep.mubr.bf16.mxu1 %v16524_v31 }
 0x500   : > { %v12499_v0 = vpop.f32.mrb[16].mxu0 }
 0x501   : > { %v12500_v16 = vpop.f32.mrb[17].mxu0 }
 0x502   : > { %v16538_v4 = vadd.f32 %v12500_v16, %v12499_v0  ;;  %v12502_v62 = vpop.f32.mrb[18].mxu0  ;;  %v6249_v0 = vld [vmem:[#allocation2 + $0x122] sm:$0xff]  ;;  %v6250_v16 = vld [vmem:[#allocation2 + $0x12a] sm:$0xff] }
 0x503   : > { %v12503_v22 = vpop.f32.mrb[19].mxu0 }
 0x504   : > { %v16541_v15 = vadd.f32 %v12503_v22, %v12502_v62  ;;  %v6316_v62 = vld [vmem:[#allocation2 + $0x158] sm:$0xff]  ;;  %v16554_v22 = vpack.c.bf16 %v6250_v16, %v6249_v0  ;;  %v7097_v0 = vpack.c.bf16 %v17506_v34, %v17505_v46  ;;  %v6317_v16 = vld [vmem:[#allocation2 + $0x168] sm:$0xff] }
 0x505   : > { %7802 = vmatmul.mubr.bf16.gmra.mrb[60].mxu0 %v16524_v31  ;;  %v6353_v46 = vld [vmem:[#allocation2 + $0x19] sm:$0xff] }
 0x506   : > { %7955 = vmatmul.mubr.bf16.gmra.mrb[88].mxu1 %v16528_v38  ;;  %7809 = vmatprep.mubr.bf16.mxu0 %v7070_v30  ;;  %v16550_v30 = vpack.c.bf16 %v6314_v40, %v6313_v14  ;;  %v16561_v14 = vpack.c.bf16 %v6316_v62, %v6315_v10  ;;  %v6252_v40 = vld [vmem:[#allocation2 + $0x142] sm:$0xff]  ;;  %v16572_v62 = vpack.c.bf16 %v6318_v28, %v6317_v16  ;;  %v6256_v28 = vld [vmem:[#allocation2 + $0x172] sm:$0xff] }
 0x507   : > { %7962 = vmatprep.mubr.bf16.mxu1 %v16535_v19  ;;  %v16576_v10 = vpack.c.bf16 %v6254_v63, %v6253_v2  ;;  %v6546_v34 = vld [vmem:[#allocation2 + $0x39] sm:$0xff]  ;;  %v6545_v2 = vld [vmem:[#allocation2 + $0x31] sm:$0xff] }
 0x508   : > { %v14164_v63 = vld [vmem:[#allocation12 + $0x208] sm:$0xff]   ;;  %v6968_v60 = vpack.c.bf16 %v6546_v34, %v6545_v2 }
 0x50d   : > { %7810 = vmatmul.mubr.bf16.gmra.mrb[64].mxu0 %v16535_v19 }
 0x50e   : > { %7963 = vmatmul.mubr.bf16.gmra.mrb[92].mxu1 %v16543_v44  ;;  %7817 = vmatprep.mubr.bf16.mxu0 %v7079_v35  ;;  %v6251_v35 = vld [vmem:[#allocation2 + $0x13a] sm:$0xff] }
 0x50f   : > { %7970 = vmatprep.mubr.bf16.mxu1 %v16550_v30  ;;  %v16565_v36 = vpack.c.bf16 %v6252_v40, %v6251_v35  ;;  %v6319_v35 = vld [vmem:[#allocation2 + $0x180] sm:$0xff]  ;;  %v6255_v40 = vld [vmem:[#allocation2 + $0x16a] sm:$0xff] }
 0x510   : > { %v16584_v16 = vpack.c.bf16 %v6256_v28, %v6255_v40  ;;  %v6550_v28 = vld [vmem:[#allocation2 + $0x69] sm:$0xff] }
 0x515   : > { %7818 = vmatmul.mubr.bf16.gmra.mrb[68].mxu0 %v16550_v30 }
 0x516   : > { %7971 = vmatmul.mubr.bf16.gmra.mrb[96].mxu1 %v16554_v22  ;;  %7825 = vmatprep.mubr.bf16.mxu0 %v7088_v53  ;;  %v6320_v53 = vld [vmem:[#allocation2 + $0x188] sm:$0xff] }
 0x517   : > { %7978 = vmatprep.mubr.bf16.mxu1 %v16561_v14  ;;  %v16579_v39 = vpack.c.bf16 %v6320_v53, %v6319_v35  ;;  %v6548_v53 = vld [vmem:[#allocation2 + $0x51] sm:$0xff]  ;;  %v6547_v35 = vld [vmem:[#allocation2 + $0x49] sm:$0xff] }
 0x518   : > { %v6977_v40 = vpack.c.bf16 %v6548_v53, %v6547_v35  ;;  %v6556_v53 = vld [vmem:[#allocation2 + $0xb1] sm:$0xff]  ;;  %v6555_v35 = vld [vmem:[#allocation2 + $0xa9] sm:$0xff] }
 0x51d   : > { %7826 = vmatmul.mubr.bf16.gmra.mrb[72].mxu0 %v16561_v14 }
 0x51e   : > { %7979 = vmatmul.mubr.bf16.gmra.mrb[100].mxu1 %v16565_v36  ;;  %7833 = vmatprep.mubr.bf16.mxu0 %v7097_v0  ;;  %v6965_v0 = vpack.c.bf16 %v6354_v55, %v6353_v46  ;;  %v14166_v55 = vld [vmem:[#allocation12 + $0x218] sm:$0xff]   ;;  %v14168_v46 = vld [vmem:[#allocation12 + $0x228] sm:$0xff]  }
 0x51f   : > { %7986 = vmatprep.mubr.bf16.mxu1 %v16572_v62 }
 0x525   : > { %7834 = vmatmul.mubr.bf16.gmra.mrb[76].mxu0 %v16572_v62 }
 0x526   : > { %7987 = vmatmul.mubr.bf16.gmra.mrb[104].mxu1 %v16576_v10  ;;  %8035 = vmatprep.mubr.bf16.mxu0 %v16242_v13  ;;  %v14165_v13 = vld [vmem:[#allocation12 + $0x210] sm:$0xff]  }
 0x527   : > { %7994 = vmatprep.mubr.bf16.mxu1 %v16579_v39 }
 0x52d   : > { %8036 = vmatmul.mubr.bf16.vlgmr.msra.gmra.mrb[80].mxu0 %v6965_v0  ;;  %v14170_v0 = vld [vmem:[#allocation12 + $0x238] sm:$0xff]  }
 0x52e   : > { %7995 = vmatmul.mubr.bf16.gmra.mrb[108].mxu1 %v16584_v16  ;;  %8043 = vmatprep.mubr.bf16.mxu0 %v16295_v54  ;;  %v14167_v54 = vld [vmem:[#allocation12 + $0x220] sm:$0xff]  }
 0x52f   : > { %8196 = vmatprep.mubr.bf16.mxu1 %v6968_v60  ;;  %13572 = vmatpush3.bf16.msra.mxu0 %v16159_v25  ;;  %v6549_v25 = vld [vmem:[#allocation2 + $0x61] sm:$0xff] }
 0x530   : > { %13573 = vmatprep.subr.bf16.mxu0 %v14164_v63  ;;  %v6986_v34 = vpack.c.bf16 %v6550_v28, %v6549_v25 }
 0x533   : > { %13574 = vmatpush3.bf16.msra.mxu0 %v14164_v63 }
 0x534   : > { %13575 = vmatprep.subr.bf16.mxu0 %v14165_v13 }
 0x535   : > { %8044 = vmatmul.mubr.bf16.gmra.mrb[84].mxu0 %v6968_v60  ;;  %v6551_v60 = vld [vmem:[#allocation2 + $0x79] sm:$0xff] }
 0x536   : > { %8197 = vmatmul.mubr.bf16.vlgmr.msra.gmra.mrb[112].mxu1 %v16200_v18  ;;  %8051 = vmatprep.mubr.bf16.mxu0 %v16350_v26  ;;  %v14169_v18 = vld [vmem:[#allocation12 + $0x230] sm:$0xff]  }
 0x537   : > { %8204 = vmatprep.mubr.bf16.mxu1 %v6977_v40  ;;  %13576 = vmatpush3.bf16.msra.mxu0 %v14165_v13  ;;  %v6552_v26 = vld [vmem:[#allocation2 + $0x81] sm:$0xff]  ;;  %v14171_v13 = vld [vmem:[#allocation13 + $0x40] sm:$0xff]  }
 0x538   : > { %13577 = vmatprep.subr.bf16.mxu0 %v14166_v55  ;;  %v6995_v2 = vpack.c.bf16 %v6552_v26, %v6551_v60 }
 0x53b   : > { %13578 = vmatpush3.bf16.msra.mxu0 %v14166_v55  ;;  %v6557_v55 = vld [vmem:[#allocation2 + $0xc1] sm:$0xff] }
 0x53c   : > { %13579 = vmatprep.subr.bf16.mxu0 %v14167_v54 }
 0x53d   : > { %8052 = vmatmul.mubr.bf16.gmra.mrb[88].mxu0 %v6977_v40 }
 0x53e   : > { %8205 = vmatmul.mubr.bf16.gmra.mrb[116].mxu1 %v16252_v8  ;;  %8059 = vmatprep.mubr.bf16.mxu0 %v16405_v9  ;;  %v6554_v8 = vld [vmem:[#allocation2 + $0x99] sm:$0xff]  ;;  %v6553_v9 = vld [vmem:[#allocation2 + $0x91] sm:$0xff] }
 0x53f   : > { %8212 = vmatprep.mubr.bf16.mxu1 %v6986_v34  ;;  %13580 = vmatpush3.bf16.msra.mxu0 %v14167_v54  ;;  %v7004_v63 = vpack.c.bf16 %v6554_v8, %v6553_v9 }
 0x540   : > { %13581 = vmatprep.subr.bf16.mxu0 %v14168_v46 }
 0x543   : > { %13582 = vmatpush3.bf16.msra.mxu0 %v14168_v46 }
 0x544   : > { %13583 = vmatprep.subr.bf16.mxu0 %v14169_v18 }
 0x545   : > { %8060 = vmatmul.mubr.bf16.gmra.mrb[92].mxu0 %v6986_v34 }
 0x546   : > { %8213 = vmatmul.mubr.bf16.gmra.mrb[120].mxu1 %v16307_v49  ;;  %8067 = vmatprep.mubr.bf16.mxu0 %v16458_v57  ;;  %v7013_v49 = vpack.c.bf16 %v6556_v53, %v6555_v35  ;;  %v6558_v57 = vld [vmem:[#allocation2 + $0xc9] sm:$0xff] }
 0x547   : > { %8220 = vmatprep.mubr.bf16.mxu1 %v6995_v2  ;;  %13584 = vmatpush3.bf16.msra.mxu0 %v14169_v18  ;;  %v7022_v40 = vpack.c.bf16 %v6558_v57, %v6557_v55 }
 0x548   : > { %13585 = vmatprep.subr.bf16.mxu0 %v14170_v0 }
 0x54b   : > { %13586 = vmatpush3.bf16.msra.mxu0 %v14170_v0 }
 0x54c   : > { %12955 = vmatprep.subr.bf16.mxu0 %v14171_v13  ;;  %v6569_v13 = vld [vmem:[#allocation2 + $0x151] sm:$0xff] }
 0x54d   : > { %8068 = vmatmul.mubr.bf16.gmra.mrb[96].mxu0 %v6995_v2  ;;  %v6570_v2 = vld [vmem:[#allocation2 + $0x159] sm:$0xff] }
 0x54e   : > { %8221 = vmatmul.mubr.bf16.gmra.mrb[124].mxu1 %v16362_v24  ;;  %8075 = vmatprep.mubr.bf16.mxu0 %v16484_v11  ;;  %v6560_v24 = vld [vmem:[#allocation2 + $0xe1] sm:$0xff]  ;;  %v6559_v11 = vld [vmem:[#allocation2 + $0xd9] sm:$0xff] }
 0x54f   : > { %8228 = vmatprep.mubr.bf16.mxu1 %v7004_v63  ;;  %v7031_v54 = vpack.c.bf16 %v6560_v24, %v6559_v11 }
 0x555   : > { %8076 = vmatmul.mubr.bf16.gmra.mrb[100].mxu0 %v7004_v63 }
 0x556   : > { %8229 = vmatmul.mubr.bf16.gmra.mrb[128].mxu1 %v16417_v51  ;;  %8083 = vmatprep.mubr.bf16.mxu0 %v16495_v17  ;;  %v6562_v51 = vld [vmem:[#allocation2 + $0xf9] sm:$0xff]  ;;  %v6561_v17 = vld [vmem:[#allocation2 + $0xf1] sm:$0xff] }
 0x557   : > { %8236 = vmatprep.mubr.bf16.mxu1 %v7013_v49  ;;  %v7040_v28 = vpack.c.bf16 %v6562_v51, %v6561_v17 }
 0x55d   : > { %8084 = vmatmul.mubr.bf16.gmra.mrb[104].mxu0 %v7013_v49 }
 0x55e   : > { %8237 = vmatmul.mubr.bf16.gmra.mrb[132].mxu1 %v16470_v33  ;;  %8091 = vmatprep.mubr.bf16.mxu0 %v16506_v21  ;;  %v6564_v33 = vld [vmem:[#allocation2 + $0x111] sm:$0xff]  ;;  %v6563_v21 = vld [vmem:[#allocation2 + $0x109] sm:$0xff] }
 0x55f   : > { %8244 = vmatprep.mubr.bf16.mxu1 %v7022_v40  ;;  %v7049_v25 = vpack.c.bf16 %v6564_v33, %v6563_v21  ;;  %v6571_v21 = vld [vmem:[#allocation2 + $0x169] sm:$0xff] }
 0x565   : > { %8092 = vmatmul.mubr.bf16.gmra.mrb[108].mxu0 %v7022_v40 }
 0x566   : > { %8245 = vmatmul.mubr.bf16.gmra.mrb[136].mxu1 %v16491_v6  ;;  %8099 = vmatprep.mubr.bf16.mxu0 %v16517_v27  ;;  %v6566_v6 = vld [vmem:[#allocation2 + $0x129] sm:$0xff]  ;;  %v6565_v27 = vld [vmem:[#allocation2 + $0x121] sm:$0xff] }
 0x567   : > { %8252 = vmatprep.mubr.bf16.mxu1 %v7031_v54  ;;  %v7058_v46 = vpack.c.bf16 %v6566_v6, %v6565_v27 }
 0x56d   : > { %8100 = vmatmul.mubr.bf16.gmra.mrb[112].mxu0 %v7031_v54  ;;  %v6572_v54 = vld [vmem:[#allocation2 + $0x171] sm:$0xff] }
 0x56e   : > { %8253 = vmatmul.mubr.bf16.gmra.mrb[140].mxu1 %v16502_v43  ;;  %8107 = vmatprep.mubr.bf16.mxu0 %v16528_v38  ;;  %v6568_v43 = vld [vmem:[#allocation2 + $0x141] sm:$0xff]  ;;  %v6567_v38 = vld [vmem:[#allocation2 + $0x139] sm:$0xff] }
 0x56f   : > { %8260 = vmatprep.mubr.bf16.mxu1 %v7040_v28  ;;  %v7067_v34 = vpack.c.bf16 %v6568_v43, %v6567_v38  ;;  %v6447_v43 = vld [vmem:[#allocation2 + $0x182] sm:$0xff]  ;;  %v6448_v38 = vld [vmem:[#allocation2 + $0x18a] sm:$0xff] }
 0x575   : > { %8108 = vmatmul.mubr.bf16.gmra.mrb[116].mxu0 %v7040_v28 }
 0x576   : > { %8261 = vmatmul.mubr.bf16.gmra.mrb[176].mxu1 %v16513_v45  ;;  %8115 = vmatprep.mubr.bf16.mxu0 %v16543_v44 }
 0x577   : > { %8268 = vmatprep.mubr.bf16.mxu1 %v7049_v25 }
 0x57d   : > { %8116 = vmatmul.mubr.bf16.gmra.mrb[120].mxu0 %v7049_v25 }
 0x57e   : > { %8269 = vmatmul.mubr.bf16.gmra.mrb[180].mxu1 %v16524_v31  ;;  %8123 = vmatprep.mubr.bf16.mxu0 %v16554_v22 }
 0x57f   : > { %8276 = vmatprep.mubr.bf16.mxu1 %v7058_v46 }
 0x585   : > { %8124 = vmatmul.mubr.bf16.gmra.mrb[124].mxu0 %v7058_v46 }
 0x586   : > { %8277 = vmatmul.mubr.bf16.gmra.mrb[184].mxu1 %v16535_v19  ;;  %8131 = vmatprep.mubr.bf16.mxu0 %v16565_v36  ;;  %v7076_v36 = vpack.c.bf16 %v6570_v2, %v6569_v13 }
 0x587   : > { %8284 = vmatprep.mubr.bf16.mxu1 %v7067_v34 }
 0x588   : > { %v12505_v45 = vpop.f32.mrb[20].mxu0 }
 0x589   : > { %v12611_v44 = vpop.f32.mrb[48].mxu1  ;;  %v12506_v18 = vpop.f32.mrb[21].mxu0 }
 0x58a   : > { %v12507_v26 = vadd.f32 %v12506_v18, %v12505_v45  ;;  %v12612_v60 = vpop.f32.mrb[49].mxu1  ;;  %v12508_v0 = vpop.f32.mrb[22].mxu0  ;;  %v6574_v18 = vld [vmem:[#allocation2 + $0x189] sm:$0xff] }
 0x58b   : > { %v12613_v31 = vadd.f32 %v12612_v60, %v12611_v44  ;;  %v12614_v8 = vpop.f32.mrb[50].mxu1  ;;  %v12509_v22 = vpop.f32.mrb[23].mxu0 }
 0x58c   : > { %v12510_v9 = vadd.f32 %v12509_v22, %v12508_v0  ;;  %v12615_v63 = vpop.f32.mrb[51].mxu1 }
 0x58d   : > { %v16612_v53 = vadd.f32 %v12613_v31, %v16538_v4  ;;  %v12616_v19 = vadd.f32 %v12615_v63, %v12614_v8  ;;  %8132 = vmatmul.mubr.bf16.gmra.mrb[128].mxu0 %v7067_v34 }
 0x58e   : > { %8285 = vmatmul.mubr.bf16.gmra.mrb[188].mxu1 %v16550_v30  ;;  %8139 = vmatprep.mubr.bf16.mxu0 %v16576_v10 }
 0x58f   : > { %v16617_v35 = vadd.f32 %v12616_v19, %v16541_v15  ;;  %8292 = vmatprep.mubr.bf16.mxu1 %v7076_v36  ;;  %v7085_v15 = vpack.c.bf16 %v6572_v54, %v6571_v21  ;;  %v6575_v19 = vld [vmem:[#allocation2 + $0x199] sm:$0xff] }
 0x590   : > { %v12511_v49 = vpop.f32.mrb[24].mxu0 }
 0x591   : > { %v12617_v57 = vpop.f32.mrb[52].mxu1  ;;  %v12512_v55 = vpop.f32.mrb[25].mxu0 }
 0x592   : > { %v12513_v40 = vadd.f32 %v12512_v55, %v12511_v49  ;;  %v12618_v24 = vpop.f32.mrb[53].mxu1  ;;  %v12514_v11 = vpop.f32.mrb[26].mxu0  ;;  %v6609_v55 = vld [vmem:[#allocation2 + $0x32] sm:$0xff] }
 0x593   : > { %v12619_v4 = vadd.f32 %v12618_v24, %v12617_v57  ;;  %v12620_v51 = vpop.f32.mrb[54].mxu1  ;;  %v12515_v17 = vpop.f32.mrb[27].mxu0  ;;  %v6610_v24 = vld [vmem:[#allocation2 + $0x3a] sm:$0xff] }
 0x594   : > { %v12516_v28 = vadd.f32 %v12515_v17, %v12514_v11  ;;  %v12621_v33 = vpop.f32.mrb[55].mxu1 }
 0x595   : > { %v16619_v30 = vadd.f32 %v12619_v4, %v12507_v26  ;;  %v12622_v10 = vadd.f32 %v12621_v33, %v12620_v51  ;;  %8140 = vmatmul.mubr.bf16.gmra.mrb[132].mxu0 %v7076_v36  ;;  %v6576_v36 = vld [vmem:[#allocation2 + $0x1a1] sm:$0xff] }
 0x596   : > { %8293 = vmatmul.mubr.bf16.gmra.mrb[192].mxu1 %v16561_v14  ;;  %8147 = vmatprep.mubr.bf16.mxu0 %v16584_v16  ;;  %v16625_v14 = vpack.c.bf16 %v6448_v38, %v6447_v43  ;;  %v6573_v16 = vld [vmem:[#allocation2 + $0x181] sm:$0xff]  ;;  %v7103_v33 = vpack.c.bf16 %v6576_v36, %v6575_v19  ;;  %v6611_v38 = vld [vmem:[#allocation2 + $0x4a] sm:$0xff] }
 0x597   : > { %v16623_v25 = vadd.f32 %v12622_v10, %v12510_v9  ;;  %8300 = vmatprep.mubr.bf16.mxu1 %v7085_v15  ;;  %v7094_v9 = vpack.c.bf16 %v6574_v18, %v6573_v16  ;;  %v6969_v10 = vpack.c.bf16 %v6610_v24, %v6609_v55 }
 0x598   : > { %v12517_v6 = vpop.f32.mrb[28].mxu0 }
 0x599   : > { %v12623_v27 = vpop.f32.mrb[56].mxu1  ;;  %v12518_v46 = vpop.f32.mrb[29].mxu0 }
 0x59a   : > { %v12519_v34 = vadd.f32 %v12518_v46, %v12517_v6  ;;  %v12624_v45 = vpop.f32.mrb[57].mxu1  ;;  %v12520_v44 = vpop.f32.mrb[30].mxu0  ;;  %v6512_v46 = vld [vmem:[#allocation2 + $0x1a0] sm:$0xff] }
 0x59b   : > { %v12625_v26 = vadd.f32 %v12624_v45, %v12623_v27  ;;  %v12626_v60 = vpop.f32.mrb[58].mxu1  ;;  %v12521_v0 = vpop.f32.mrb[31].mxu0  ;;  %v6511_v27 = vld [vmem:[#allocation2 + $0x198] sm:$0xff] }
 0x59c   : > { %v12522_v2 = vadd.f32 %v12521_v0, %v12520_v44  ;;  %v12627_v31 = vpop.f32.mrb[59].mxu1  ;;  %v6612_v45 = vld [vmem:[#allocation2 + $0x52] sm:$0xff]  ;;  %v7102_v16 = vpack.c.bf16 %v6512_v46, %v6511_v27  ;;  %v6618_v27 = vld [vmem:[#allocation2 + $0x9a] sm:$0xff] }
 0x59d   : > { %v16627_v8 = vadd.f32 %v12625_v26, %v12513_v40  ;;  %v12628_v22 = vadd.f32 %v12627_v31, %v12626_v60  ;;  %8148 = vmatmul.mubr.bf16.gmra.mrb[136].mxu0 %v7085_v15  ;;  %v6613_v26 = vld [vmem:[#allocation2 + $0x62] sm:$0xff]  ;;  %v6614_v60 = vld [vmem:[#allocation2 + $0x6a] sm:$0xff] }
 0x59e   : > { %8301 = vmatmul.mubr.bf16.gmra.mrb[196].mxu1 %v16572_v62  ;;  %8155 = vmatprep.mubr.bf16.mxu0 %v16625_v14 }
 0x59f   : > { %v16631_v63 = vadd.f32 %v12628_v22, %v12516_v28  ;;  %8308 = vmatprep.mubr.bf16.mxu1 %v7094_v9 }
 0x5a0   : > { %v12523_v13 = vpop.f32.mrb[32].mxu0 }
 0x5a1   : > { %v12629_v49 = vpop.f32.mrb[60].mxu1  ;;  %v12524_v57 = vpop.f32.mrb[33].mxu0 }
 0x5a2   : > { %v12525_v11 = vadd.f32 %v12524_v57, %v12523_v13  ;;  %v12630_v40 = vpop.f32.mrb[61].mxu1  ;;  %v12526_v54 = vpop.f32.mrb[34].mxu0  ;;  %v6978_v13 = vpack.c.bf16 %v6612_v45, %v6611_v38  ;;  %v14173_v57 = vld [vmem:[#allocation13 + $0x48] sm:$0xff]  }
 0x5a3   : > { %v12631_v4 = vadd.f32 %v12630_v40, %v12629_v49  ;;  %v12632_v51 = vpop.f32.mrb[62].mxu1  ;;  %v12527_v17 = vpop.f32.mrb[35].mxu0  ;;  %v6987_v49 = vpack.c.bf16 %v6614_v60, %v6613_v26 }
 0x5a4   : > { %v12528_v62 = vadd.f32 %v12527_v17, %v12526_v54  ;;  %v12633_v21 = vpop.f32.mrb[63].mxu1  ;;  %v14174_v54 = vld [vmem:[#allocation13 + $0x8] sm:$0xff]   ;;  %v6616_v17 = vld [vmem:[#allocation2 + $0x82] sm:$0xff] }
 0x5a5   : > { %v16633_v28 = vadd.f32 %v12631_v4, %v12519_v34  ;;  %v12634_v15 = vadd.f32 %v12633_v21, %v12632_v51  ;;  %8156 = vmatmul.mubr.bf16.gmra.mrb[140].mxu0 %v7094_v9  ;;  %v6615_v51 = vld [vmem:[#allocation2 + $0x7a] sm:$0xff] }
 0x5a6   : > { %8309 = vmatmul.mubr.bf16.gmra.mrb[200].mxu1 %v16579_v39  ;;  %13587 = vmatprep.mubr.bf16.mxu0 %v6969_v10 }
 0x5a7   : > { %v16636_v6 = vadd.f32 %v12634_v15, %v12522_v2  ;;  %8316 = vmatprep.mubr.bf16.mxu1 %v7103_v33  ;;  %v14172_v2 = vld [vmem:[#allocation13] sm:$0xff]   ;;  %v14175_v33 = vld [vmem:[#allocation13 + $0x50] sm:$0xff]  }
 0x5a8   : > { %v12529_v43 = vpop.f32.mrb[36].mxu0  ;;  %v6617_v15 = vld [vmem:[#allocation2 + $0x92] sm:$0xff] }
 0x5a9   : > { %v12635_v44 = vpop.f32.mrb[64].mxu1  ;;  %v12530_v18 = vpop.f32.mrb[37].mxu0 }
 0x5aa   : > { %v12531_v0 = vadd.f32 %v12530_v18, %v12529_v43  ;;  %v12636_v34 = vpop.f32.mrb[65].mxu1  ;;  %v12532_v31 = vpop.f32.mrb[38].mxu0  ;;  %v6996_v18 = vpack.c.bf16 %v6616_v17, %v6615_v51 }
 0x5ab   : > { %v12637_v22 = vadd.f32 %v12636_v34, %v12635_v44  ;;  %v12638_v9 = vpop.f32.mrb[66].mxu1  ;;  %v12533_v39 = vpop.f32.mrb[39].mxu0  ;;  %v7005_v34 = vpack.c.bf16 %v6618_v27, %v6617_v15 }
 0x5ac   : > { %v12534_v19 = vadd.f32 %v12533_v39, %v12532_v31  ;;  %v12639_v36 = vpop.f32.mrb[67].mxu1  ;;  %v14177_v31 = vld [vmem:[#allocation13 + $0x58] sm:$0xff]  }
 0x5ad   : > { %v16638_v55 = vadd.f32 %v12637_v22, %v12525_v11  ;;  %v12640_v24 = vadd.f32 %v12639_v36, %v12638_v9  ;;  %13588 = vmatmul.mubr.bf16.vlgmr.msra.gmra.mrb[144].mxu0 %v6978_v13  ;;  %v14178_v39 = vld [vmem:[#allocation13 + $0x18] sm:$0xff]   ;;  %v6620_v36 = vld [vmem:[#allocation2 + $0xb2] sm:$0xff] }
 0x5ae   : > { %8317 = vmatmul.mubr.bf16.gmra.mrb[204].mxu1 %v7102_v16  ;;  %13591 = vmatprep.mubr.bf16.mxu0 %v6987_v49  ;;  %v14179_v49 = vld [vmem:[#allocation13 + $0x60] sm:$0xff]  }
 0x5af   : > { %v16640_v40 = vadd.f32 %v12640_v24, %v12528_v62  ;;  %12956 = vmatpush3.bf16.msra.mxu0 %v14172_v2  ;;  %v14176_v62 = vld [vmem:[#allocation13 + $0x10] sm:$0xff]   ;;  %v6619_v2 = vld [vmem:[#allocation2 + $0xaa] sm:$0xff] }
 0x5b0   : > { %v12535_v4 = vpop.f32.mrb[40].mxu0  ;;  %12957 = vmatprep.subr.bf16.mxu0 %v14173_v57  ;;  %v7014_v15 = vpack.c.bf16 %v6620_v36, %v6619_v2  ;;  %v6625_v2 = vld [vmem:[#allocation2 + $0xf2] sm:$0xff]  ;;  %v6626_v36 = vld [vmem:[#allocation2 + $0xfa] sm:$0xff] }
 0x5b1   : > { %v12641_v21 = vpop.f32.mrb[68].mxu1  ;;  %v12536_v10 = vpop.f32.mrb[41].mxu0 }
 0x5b2   : > { %v12537_v46 = vadd.f32 %v12536_v10, %v12535_v4  ;;  %v12642_v11 = vpop.f32.mrb[69].mxu1  ;;  %v12538_v43 = vpop.f32.mrb[42].mxu0  ;;  %v6622_v4 = vld [vmem:[#allocation2 + $0xca] sm:$0xff] }
 0x5b3   : > { %v12643_v38 = vadd.f32 %v12642_v11, %v12641_v21  ;;  %v12644_v45 = vpop.f32.mrb[70].mxu1  ;;  %v12539_v44 = vpop.f32.mrb[43].mxu0  ;;  %12958 = vmatpush3.bf16.msra.mxu0 %v14174_v54  ;;  %v6621_v54 = vld [vmem:[#allocation2 + $0xc2] sm:$0xff] }
 0x5b4   : > { %v12540_v26 = vadd.f32 %v12539_v44, %v12538_v43  ;;  %v12645_v60 = vpop.f32.mrb[71].mxu1  ;;  %12959 = vmatprep.subr.bf16.mxu0 %v14175_v33  ;;  %v7023_v43 = vpack.c.bf16 %v6622_v4, %v6621_v54 }
 0x5b5   : > { %v16642_v16 = vadd.f32 %v12643_v38, %v12531_v0  ;;  %v12646_v22 = vadd.f32 %v12645_v60, %v12644_v45  ;;  %13592 = vmatmul.mubr.bf16.gmra.mrb[148].mxu0 %v6996_v18  ;;  %v14181_v38 = vld [vmem:[#allocation13 + $0x68] sm:$0xff]  }
 0x5b6   : > { %13595 = vmatprep.mubr.bf16.mxu0 %v7005_v34  ;;  %v6623_v34 = vld [vmem:[#allocation2 + $0xda] sm:$0xff] }
 0x5b7   : > { %v16644_v9 = vadd.f32 %v12646_v22, %v12534_v19  ;;  %12960 = vmatpush3.bf16.msra.mxu0 %v14176_v62  ;;  %v14180_v19 = vld [vmem:[#allocation13 + $0x20] sm:$0xff]   ;;  %v14182_v62 = vld [vmem:[#allocation13 + $0x28] sm:$0xff]   ;;  %v14183_v22 = vld [vmem:[#allocation13 + $0x70] sm:$0xff]  }
 0x5b8   : > { %v12541_v13 = vpop.f32.mrb[44].mxu0  ;;  %12961 = vmatprep.subr.bf16.mxu0 %v14177_v31  ;;  %v6624_v31 = vld [vmem:[#allocation2 + $0xe2] sm:$0xff] }
 0x5b9   : > { %v12647_v57 = vpop.f32.mrb[72].mxu1  ;;  %v12542_v24 = vpop.f32.mrb[45].mxu0 }
 0x5ba   : > { %v12543_v51 = vadd.f32 %v12542_v24, %v12541_v13  ;;  %v12648_v17 = vpop.f32.mrb[73].mxu1  ;;  %v12544_v0 = vpop.f32.mrb[46].mxu0 }
 0x5bb   : > { %v12649_v33 = vadd.f32 %v12648_v17, %v12647_v57  ;;  %v12650_v21 = vpop.f32.mrb[74].mxu1  ;;  %v12545_v10 = vpop.f32.mrb[47].mxu0  ;;  %12962 = vmatpush3.bf16.msra.mxu0 %v14178_v39  ;;  %v7032_v17 = vpack.c.bf16 %v6624_v31, %v6623_v34  ;;  %v6629_v31 = vld [vmem:[#allocation2 + $0x122] sm:$0xff] }
 0x5bc   : > { %v12546_v27 = vadd.f32 %v12545_v10, %v12544_v0  ;;  %v12651_v11 = vpop.f32.mrb[75].mxu1  ;;  %12963 = vmatprep.subr.bf16.mxu0 %v14179_v49  ;;  %v14185_v10 = vld [vmem:[#allocation13 + $0x78] sm:$0xff]  }
 0x5bd   : > { %v16646_v45 = vadd.f32 %v12649_v33, %v12537_v46  ;;  %v12652_v44 = vadd.f32 %v12651_v11, %v12650_v21  ;;  %13596 = vmatmul.mubr.bf16.gmra.mrb[152].mxu0 %v7014_v15  ;;  %v7041_v21 = vpack.c.bf16 %v6626_v36, %v6625_v2 }
 0x5be   : > { %13599 = vmatprep.mubr.bf16.mxu0 %v7023_v43  ;;  %v14186_v43 = vld [vmem:[#allocation13 + $0x38] sm:$0xff]  }
 0x5bf   : > { %v16648_v18 = vadd.f32 %v12652_v44, %v12540_v26  ;;  %12964 = vmatpush3.bf16.msra.mxu0 %v14180_v19  ;;  %v14184_v26 = vld [vmem:[#allocation13 + $0x30] sm:$0xff]   ;;  %v6627_v44 = vld [vmem:[#allocation2 + $0x10a] sm:$0xff] }
 0x5c0   : > { %v12547_v60 = vpop.f32.mrb[48].mxu0  ;;  %12965 = vmatprep.subr.bf16.mxu0 %v14181_v38 }
 0x5c1   : > { %v12653_v39 = vpop.f32.mrb[76].mxu1  ;;  %v12548_v13 = vpop.f32.mrb[49].mxu0 }
 0x5c2   : > { %v12549_v49 = vadd.f32 %v12548_v13, %v12547_v60  ;;  %v12654_v57 = vpop.f32.mrb[77].mxu1  ;;  %v12550_v46 = vpop.f32.mrb[50].mxu0  ;;  %v6628_v60 = vld [vmem:[#allocation2 + $0x112] sm:$0xff] }
 0x5c3   : > { %v12655_v24 = vadd.f32 %v12654_v57, %v12653_v39  ;;  %v12656_v54 = vpop.f32.mrb[78].mxu1  ;;  %v12551_v4 = vpop.f32.mrb[51].mxu0  ;;  %12966 = vmatpush3.bf16.msra.mxu0 %v14182_v62  ;;  %v6630_v39 = vld [vmem:[#allocation2 + $0x12a] sm:$0xff] }
 0x5c4   : > { %v12552_v0 = vadd.f32 %v12551_v4, %v12550_v46  ;;  %v12657_v33 = vpop.f32.mrb[79].mxu1  ;;  %12967 = vmatprep.subr.bf16.mxu0 %v14183_v22  ;;  %v7050_v46 = vpack.c.bf16 %v6628_v60, %v6627_v44  ;;  %v6633_v44 = vld [vmem:[#allocation2 + $0x152] sm:$0xff] }
 0x5c5   : > { %v16650_v15 = vadd.f32 %v12655_v24, %v12543_v51  ;;  %v12658_v19 = vadd.f32 %v12657_v33, %v12656_v54  ;;  %13600 = vmatmul.mubr.bf16.gmra.mrb[156].mxu0 %v7032_v17  ;;  %v7059_v54 = vpack.c.bf16 %v6630_v39, %v6629_v31  ;;  %v14188_v33 = vld [vmem:[#allocation13 + $0x80] sm:$0xff]  }
 0x5c6   : > { %13603 = vmatprep.mubr.bf16.mxu0 %v7041_v21 }
 0x5c7   : > { %v16652_v11 = vadd.f32 %v12658_v19, %v12546_v27  ;;  %12968 = vmatpush3.bf16.msra.mxu0 %v14184_v26  ;;  %v14187_v26 = vld [vmem:[#allocation13 + $0xc0] sm:$0xff]   ;;  %v6631_v19 = vld [vmem:[#allocation2 + $0x13a] sm:$0xff] }
 0x5c8   : > { %v12553_v38 = vpop.f32.mrb[52].mxu0  ;;  %12969 = vmatprep.subr.bf16.mxu0 %v14185_v10  ;;  %13067 = vmatprep.subr.bf16.mxu1 %v14187_v26  ;;  %v6635_v26 = vld [vmem:[#allocation2 + $0x16a] sm:$0xff] }
 0x5c9   : > { %v12659_v62 = vpop.f32.mrb[80].mxu1  ;;  %v12554_v34 = vpop.f32.mrb[53].mxu0  ;;  %13068 = vmatpush3.bf16.msra.mxu1 %v14188_v33  ;;  %v6636_v33 = vld [vmem:[#allocation2 + $0x172] sm:$0xff] }
 0x5ca   : > { %v12555_v13 = vadd.f32 %v12554_v34, %v12553_v38  ;;  %v12660_v22 = vpop.f32.mrb[81].mxu1  ;;  %v12556_v2 = vpop.f32.mrb[54].mxu0  ;;  %v6632_v38 = vld [vmem:[#allocation2 + $0x142] sm:$0xff] }
 0x5cb   : > { %v12661_v51 = vadd.f32 %v12660_v22, %v12659_v62  ;;  %v12662_v36 = vpop.f32.mrb[82].mxu1  ;;  %v12557_v57 = vpop.f32.mrb[55].mxu0  ;;  %12970 = vmatpush3.bf16.msra.mxu0 %v14186_v43  ;;  %v6634_v43 = vld [vmem:[#allocation2 + $0x15a] sm:$0xff] }
 0x5cc   : > { %v12558_v27 = vadd.f32 %v12557_v57, %v12556_v2  ;;  %v12663_v24 = vpop.f32.mrb[83].mxu1 }
 0x5cd   : > { %v16654_v4 = vadd.f32 %v12661_v51, %v12549_v49  ;;  %v12664_v17 = vadd.f32 %v12663_v24, %v12662_v36  ;;  %13604 = vmatmul.mubr.bf16.gmra.mrb[160].mxu0 %v7050_v46  ;;  %v7068_v51 = vpack.c.bf16 %v6632_v38, %v6631_v19 }
 0x5ce   : > { %13607 = vmatprep.mubr.bf16.mxu0 %v7059_v54 }
 0x5cf   : > { %v16656_v21 = vadd.f32 %v12664_v17, %v12552_v0  ;;  %v7077_v0 = vpack.c.bf16 %v6634_v43, %v6633_v44 }
 0x5d0   : > { %v12559_v10 = vpop.f32.mrb[56].mxu0 }
 0x5d1   : > { %v12665_v62 = vpop.f32.mrb[84].mxu1  ;;  %v12560_v34 = vpop.f32.mrb[57].mxu0 }
 0x5d2   : > { %v12561_v60 = vadd.f32 %v12560_v34, %v12559_v10  ;;  %v12666_v31 = vpop.f32.mrb[85].mxu1  ;;  %v12562_v49 = vpop.f32.mrb[58].mxu0 }
 0x5d3   : > { %v12667_v39 = vadd.f32 %v12666_v31, %v12665_v62  ;;  %v12668_v22 = vpop.f32.mrb[86].mxu1  ;;  %v12563_v2 = vpop.f32.mrb[59].mxu0 }
 0x5d4   : > { %v12564_v36 = vadd.f32 %v12563_v2, %v12562_v49  ;;  %v12669_v57 = vpop.f32.mrb[87].mxu1  ;;  %v7086_v49 = vpack.c.bf16 %v6636_v33, %v6635_v26  ;;  %v14189_v2 = vld [vmem:[#allocation13 + $0xc8] sm:$0xff]  }
 0x5d5   : > { %v16658_v46 = vadd.f32 %v12667_v39, %v12555_v13  ;;  %v12670_v24 = vadd.f32 %v12669_v57, %v12668_v22  ;;  %13608 = vmatmul.mubr.bf16.gmra.mrb[164].mxu0 %v7068_v51  ;;  %v6640_v22 = vld [vmem:[#allocation2 + $0x1a2] sm:$0xff]  ;;  %v14190_v51 = vld [vmem:[#allocation13 + $0x88] sm:$0xff]   ;;  %13069 = vmatprep.subr.bf16.mxu1 %v14189_v2 }
 0x5d6   : > { %13611 = vmatprep.mubr.bf16.mxu0 %v7077_v0  ;;  %v8692_v0 = vld [vmem:[#allocation2 + $0x1] sm:$0xff]  ;;  %13070 = vmatpush3.bf16.msra.mxu1 %v14190_v51 }
 0x5d7   : > { %v16660_v54 = vadd.f32 %v12670_v24, %v12558_v27  ;;  %v6639_v27 = vld [vmem:[#allocation2 + $0x19a] sm:$0xff]  ;;  %v8693_v24 = vld [vmem:[#allocation2 + $0x9] sm:$0xff] }
 0x5d8   : > { %v12565_v17 = vpop.f32.mrb[60].mxu0  ;;  %v7104_v33 = vpack.c.bf16 %v6640_v22, %v6639_v27  ;;  %v8629_v2 = vld [vmem:[#allocation2 + $0x8] sm:$0xff] }
 0x5d9   : > { %v12671_v10 = vpop.f32.mrb[88].mxu1  ;;  %v12566_v34 = vpop.f32.mrb[61].mxu0 }
 0x5da   : > { %v12567_v59 = vadd.f32 %v12566_v34, %v12565_v17  ;;  %v12672_v62 = vpop.f32.mrb[89].mxu1  ;;  %v12568_v31 = vpop.f32.mrb[62].mxu0 }
 0x5db   : > { %v12673_v42 = vadd.f32 %v12672_v62, %v12671_v10  ;;  %v12674_v19 = vpop.f32.mrb[90].mxu1  ;;  %v12569_v38 = vpop.f32.mrb[63].mxu0  ;;  %v9493_v62 = vpack.c.bf16 %v8693_v24, %v8692_v0 }
 0x5dc   : > { %v12570_v44 = vadd.f32 %v12569_v38, %v12568_v31  ;;  %v12675_v13 = vpop.f32.mrb[91].mxu1 }
 0x5dd   : > { %v16662_v43 = vadd.f32 %v12673_v42, %v12561_v60  ;;  %v12676_v39 = vadd.f32 %v12675_v13, %v12674_v19  ;;  %13612 = vmatmul.mubr.bf16.gmra.mrb[168].mxu0 %v7086_v49 }
 0x5de   : > { %13615 = vmatprep.mubr.bf16.mxu0 %v16625_v14 }
 0x5df   : > { %v16665_v57 = vadd.f32 %v12676_v39, %v12564_v36  ;;  %v8628_v39 = vld [vmem:[#allocation2] sm:$0xff] }
 0x5e0   : > { %v12571_v17 = vpop.f32.mrb[64].mxu0 }
 0x5e1   : > { %v12677_v10 = vpop.f32.mrb[92].mxu1  ;;  %v12572_v26 = vpop.f32.mrb[65].mxu0 }
 0x5e2   : > { %v12573_v42 = vadd.f32 %v12572_v26, %v12571_v17  ;;  %v12678_v60 = vpop.f32.mrb[93].mxu1  ;;  %v12574_v34 = vpop.f32.mrb[66].mxu0  ;;  %v9492_v17 = vpack.c.bf16 %v8629_v2, %v8628_v39 }
 0x5e3   : > { %v12679_v31 = vadd.f32 %v12678_v60, %v12677_v10  ;;  %v12680_v19 = vpop.f32.mrb[94].mxu1  ;;  %v12575_v14 = vpop.f32.mrb[67].mxu0 }
 0x5e4   : > { %v12576_v38 = vadd.f32 %v12575_v14, %v12574_v34  ;;  %v12681_v49 = vpop.f32.mrb[95].mxu1 }
 0x5e5   : > { %v16667_v13 = vadd.f32 %v12679_v31, %v12567_v59  ;;  %v12682_v36 = vadd.f32 %v12681_v49, %v12680_v19  ;;  %13616 = vmatmul.mubr.bf16.gmra.mrb[172].mxu0 %v7104_v33  ;;  %v14192_v19 = vld [vmem:[#allocation13 + $0x90] sm:$0xff]  }
 0x5e6   : > { %10244 = vmatprep.mubr.bf16.mxu0 %v9493_v62  ;;  %v14191_v62 = vld [vmem:[#allocation13 + $0xd0] sm:$0xff]  }
 0x5e7   : > { %v16669_v56 = vadd.f32 %v12682_v36, %v12570_v44  ;;  %13071 = vmatprep.subr.bf16.mxu1 %v14191_v62 }
 0x5e8   : > { %v12577_v27 = vpop.f32.mrb[68].mxu0  ;;  %13072 = vmatpush3.bf16.msra.mxu1 %v14192_v19 }
 0x5e9   : > { %v12683_v22 = vpop.f32.mrb[96].mxu1  ;;  %v12578_v51 = vpop.f32.mrb[69].mxu0 }
 0x5ea   : > { %v12579_v26 = vadd.f32 %v12578_v51, %v12577_v27  ;;  %v12684_v0 = vpop.f32.mrb[97].mxu1  ;;  %v12580_v24 = vpop.f32.mrb[70].mxu0 }
 0x5eb   : > { %v12685_v10 = vadd.f32 %v12684_v0, %v12683_v22  ;;  %v12686_v60 = vpop.f32.mrb[98].mxu1  ;;  %v12581_v34 = vpop.f32.mrb[71].mxu0 }
 0x5ec   : > { %v12582_v14 = vadd.f32 %v12581_v34, %v12580_v24  ;;  %v12687_v59 = vpop.f32.mrb[99].mxu1 }
 0x5ed   : > { %v16671_v31 = vadd.f32 %v12685_v10, %v12573_v42  ;;  %v12688_v33 = vadd.f32 %v12687_v59, %v12686_v60  ;;  %10245 = vmatmul.mubr.bf16.vlgmr.msra.gmra.mrb[176].mxu0 %v9492_v17 }
 0x5ef   : > { %v16673_v44 = vadd.f32 %v12688_v33, %v12576_v38 }
 0x5f0   : > { %v12583_v49 = vpop.f32.mrb[72].mxu0 }
 0x5f1   : > { %v12689_v36 = vpop.f32.mrb[100].mxu1  ;;  %v12584_v39 = vpop.f32.mrb[73].mxu0 }
 0x5f2   : > { %v12585_v2 = vadd.f32 %v12584_v39, %v12583_v49  ;;  %v12690_v27 = vpop.f32.mrb[101].mxu1  ;;  %v12586_v22 = vpop.f32.mrb[74].mxu0 }
 0x5f3   : > { %v12691_v51 = vadd.f32 %v12690_v27, %v12689_v36  ;;  %v12692_v0 = vpop.f32.mrb[102].mxu1  ;;  %v12587_v24 = vpop.f32.mrb[75].mxu0 }
 0x5f4   : > { %v12588_v34 = vadd.f32 %v12587_v24, %v12586_v22  ;;  %v12693_v42 = vpop.f32.mrb[103].mxu1  ;;  %v14193_v24 = vld [vmem:[#allocation13 + $0xd8] sm:$0xff]  }
 0x5f5   : > { %v16675_v10 = vadd.f32 %v12691_v51, %v12579_v26  ;;  %v12694_v17 = vadd.f32 %v12693_v42, %v12692_v0  ;;  %v14194_v26 = vld [vmem:[#allocation13 + $0x98] sm:$0xff]   ;;  %13073 = vmatprep.subr.bf16.mxu1 %v14193_v24 }
 0x5f6   : > { %13074 = vmatpush3.bf16.msra.mxu1 %v14194_v26 }
 0x5f7   : > { %v16677_v60 = vadd.f32 %v12694_v17, %v12582_v14 }
 0x5f8   : > { %v12589_v38 = vpop.f32.mrb[76].mxu0 }
 0x5f9   : > { %v12695_v59 = vpop.f32.mrb[104].mxu1  ;;  %v12590_v33 = vpop.f32.mrb[77].mxu0 }
 0x5fa   : > { %v12591_v62 = vadd.f32 %v12590_v33, %v12589_v38  ;;  %v12696_v48 = vpop.f32.mrb[105].mxu1  ;;  %v12592_v41 = vpop.f32.mrb[78].mxu0 }
 0x5fb   : > { %v12697_v19 = vadd.f32 %v12696_v48, %v12695_v59  ;;  %v12698_v49 = vpop.f32.mrb[106].mxu1  ;;  %v12593_v39 = vpop.f32.mrb[79].mxu0 }
 0x5fc   : > { %v12594_v12 = vadd.f32 %v12593_v39, %v12592_v41  ;;  %v12699_v36 = vpop.f32.mrb[107].mxu1 }
 0x5fd   : > { %v16679_v27 = vadd.f32 %v12697_v19, %v12585_v2  ;;  %v12700_v22 = vadd.f32 %v12699_v36, %v12698_v49 }
 0x5ff   : > { %v16681_v51 = vadd.f32 %v12700_v22, %v12588_v34 }
 0x600   : > { %v12723_v14 = vpop.f32.mrb[80].mxu0 }
 0x601   : > { %v12701_v0 = vpop.f32.mrb[108].mxu1  ;;  %v12724_v42 = vpop.f32.mrb[81].mxu0 }
 0x602   : > { %v12702_v17 = vpop.f32.mrb[109].mxu1  ;;  %v12725_v38 = vadd.f32 %v12724_v42, %v12723_v14  ;;  %v12726_v33 = vpop.f32.mrb[82].mxu0 }
 0x603   : > { %v12703_v48 = vadd.f32 %v12702_v17, %v12701_v0  ;;  %v12704_v59 = vpop.f32.mrb[110].mxu1  ;;  %v12727_v1 = vpop.f32.mrb[83].mxu0 }
 0x604   : > { %v8038_v41 = vadd.f32 %v12725_v38, %v16612_v53  ;;  %v12705_v2 = vpop.f32.mrb[111].mxu1  ;;  %v12728_v19 = vadd.f32 %v12727_v1, %v12726_v33 }
 0x605   : > { %v16684_v49 = vadd.f32 %v12703_v48, %v12591_v62  ;;  %v12706_v39 = vadd.f32 %v12705_v2, %v12704_v59  ;;  %v14195_v62 = vld [vmem:[#allocation13 + $0xe0] sm:$0xff]  }
 0x606   : > { %v8041_v34 = vadd.f32 %v12728_v19, %v16617_v35  ;;  %v14196_v35 = vld [vmem:[#allocation13 + $0xa0] sm:$0xff]   ;;  %13075 = vmatprep.subr.bf16.mxu1 %v14195_v62  ;;  %v14197_v19 = vld [vmem:[#allocation13 + $0xe8] sm:$0xff]   ;;  %v14201_v62 = vld [vmem:[#allocation13 + $0xb0] sm:$0xff]  }
 0x607   : > { %v16687_v36 = vadd.f32 %v12706_v39, %v12594_v12  ;;  %13076 = vmatpush3.bf16.msra.mxu1 %v14196_v35 }
 0x608   : > { %v12729_v22 = vpop.f32.mrb[84].mxu0  ;;  %13077 = vmatprep.subr.bf16.mxu1 %v14197_v19  ;;  %v14203_v19 = vld [vmem:[#allocation13 + $0xf8] sm:$0xff]  }
 0x609   : > { %v12835_v24 = vpop.f32.mrb[112].mxu1  ;;  %v12730_v26 = vpop.f32.mrb[85].mxu0 }
 0x60a   : > { %v12731_v29 = vadd.f32 %v12730_v26, %v12729_v22  ;;  %v12836_v14 = vpop.f32.mrb[113].mxu1  ;;  %v12732_v42 = vpop.f32.mrb[86].mxu0 }
 0x60b   : > { %v12837_v0 = vadd.f32 %v12836_v14, %v12835_v24  ;;  %v12838_v17 = vpop.f32.mrb[114].mxu1  ;;  %v12733_v58 = vpop.f32.mrb[87].mxu0  ;;  %v14198_v24 = vld [vmem:[#allocation13 + $0xa8] sm:$0xff]  }
 0x60c   : > { %v8046_v53 = vadd.f32 %v12731_v29, %v16619_v30  ;;  %v12734_v38 = vadd.f32 %v12733_v58, %v12732_v42  ;;  %v12839_v1 = vpop.f32.mrb[115].mxu1  ;;  %13078 = vmatpush3.bf16.msra.mxu1 %v14198_v24  ;;  %v14204_v24 = vld [vmem:[#allocation13 + $0xb8] sm:$0xff]  }
 0x60d   : > { %v12840_v33 = vadd.f32 %v12839_v1, %v12838_v17  ;;  %v16690_v48 = vadd.f32 %v12837_v0, %v8038_v41  ;;  %v14200_v17 = vld [vmem:[#allocation13 + $0x140] sm:$0xff]  }
 0x60e   : > { %v8049_v12 = vadd.f32 %v12734_v38, %v16623_v25  ;;  %13179 = vmatprep.subr.bf16.mxu0 %v14200_v17 }
 0x60f   : > { %v16693_v59 = vadd.f32 %v12840_v33, %v8041_v34  ;;  %v14199_v34 = vld [vmem:[#allocation13 + $0xf0] sm:$0xff]  }
 0x610   : > { %v12735_v2 = vpop.f32.mrb[88].mxu0  ;;  %13079 = vmatprep.subr.bf16.mxu1 %v14199_v34 }
 0x611   : > { %v12841_v39 = vpop.f32.mrb[116].mxu1  ;;  %v12736_v22 = vpop.f32.mrb[89].mxu0  ;;  %13080 = vmatpush3.bf16.msra.mxu1 %v14201_v62 }
 0x612   : > { %v12737_v26 = vadd.f32 %v12736_v22, %v12735_v2  ;;  %v12842_v29 = vpop.f32.mrb[117].mxu1  ;;  %v12738_v58 = vpop.f32.mrb[90].mxu0  ;;  %13081 = vmatprep.subr.bf16.mxu1 %v14203_v19 }
 0x613   : > { %v12843_v30 = vadd.f32 %v12842_v29, %v12841_v39  ;;  %v12844_v14 = vpop.f32.mrb[118].mxu1  ;;  %v12739_v41 = vpop.f32.mrb[91].mxu0 }
 0x614   : > { %v8054_v42 = vadd.f32 %v12737_v26, %v16627_v8  ;;  %v12740_v25 = vadd.f32 %v12739_v41, %v12738_v58  ;;  %v12845_v0 = vpop.f32.mrb[119].mxu1  ;;  %v14202_v8 = vld [vmem:[#allocation13 + $0x100] sm:$0xff]  }
 0x615   : > { %v12846_v38 = vadd.f32 %v12845_v0, %v12844_v14  ;;  %v16696_v1 = vadd.f32 %v12843_v30, %v8046_v53  ;;  %13180 = vmatpush3.bf16.msra.mxu0 %v14202_v8  ;;  %13082 = vmatpush3.bf16.msra.mxu1 %v14204_v24 }
 0x616   : > { %v8057_v33 = vadd.f32 %v12740_v25, %v16631_v63 }
 0x617   : > { %v16699_v35 = vadd.f32 %v12846_v38, %v8049_v12 }
 0x618   : > { %v12741_v2 = vpop.f32.mrb[92].mxu0 }
 0x619   : > { %v12847_v39 = vpop.f32.mrb[120].mxu1  ;;  %v12742_v22 = vpop.f32.mrb[93].mxu0 }
 0x61a   : > { %v12743_v26 = vadd.f32 %v12742_v22, %v12741_v2  ;;  %v12848_v29 = vpop.f32.mrb[121].mxu1  ;;  %v12744_v58 = vpop.f32.mrb[94].mxu0 }
 0x61b   : > { %v12849_v53 = vadd.f32 %v12848_v29, %v12847_v39  ;;  %v12850_v30 = vpop.f32.mrb[122].mxu1  ;;  %v12745_v14 = vpop.f32.mrb[95].mxu0 }
 0x61c   : > { %v8062_v63 = vadd.f32 %v12743_v26, %v16633_v28  ;;  %v12746_v12 = vadd.f32 %v12745_v14, %v12744_v58  ;;  %v12851_v41 = vpop.f32.mrb[123].mxu1 }
 0x61d   : > { %v12852_v25 = vadd.f32 %v12851_v41, %v12850_v30  ;;  %v16702_v0 = vadd.f32 %v12849_v53, %v8054_v42  ;;  %v14205_v30 = vld [vmem:[#allocation13 + $0x148] sm:$0xff]  }
 0x61e   : > { %v8065_v34 = vadd.f32 %v12746_v12, %v16636_v6  ;;  %13181 = vmatprep.subr.bf16.mxu0 %v14205_v30 }
 0x61f   : > { %v16705_v17 = vadd.f32 %v12852_v25, %v8057_v33  ;;  %v14206_v25 = vld [vmem:[#allocation13 + $0x108] sm:$0xff]  }
 0x620   : > { %v12747_v38 = vpop.f32.mrb[96].mxu0  ;;  %13182 = vmatpush3.bf16.msra.mxu0 %v14206_v25 }
 0x621   : > { %v12853_v62 = vpop.f32.mrb[124].mxu1  ;;  %v12748_v2 = vpop.f32.mrb[97].mxu0 }
 0x622   : > { %v12749_v19 = vadd.f32 %v12748_v2, %v12747_v38  ;;  %v12854_v39 = vpop.f32.mrb[125].mxu1  ;;  %v12750_v22 = vpop.f32.mrb[98].mxu0 }
 0x623   : > { %v12855_v29 = vadd.f32 %v12854_v39, %v12853_v62  ;;  %v12856_v8 = vpop.f32.mrb[126].mxu1  ;;  %v12751_v24 = vpop.f32.mrb[99].mxu0 }
 0x624   : > { %v8070_v28 = vadd.f32 %v12749_v19, %v16638_v55  ;;  %v12752_v26 = vadd.f32 %v12751_v24, %v12750_v22  ;;  %v12857_v58 = vpop.f32.mrb[127].mxu1 }
 0x625   : > { %v12858_v42 = vadd.f32 %v12857_v58, %v12856_v8  ;;  %v16708_v53 = vadd.f32 %v12855_v29, %v8062_v63 }
 0x626   : > { %v8073_v6 = vadd.f32 %v12752_v26, %v16640_v40 }
 0x627   : > { %v16711_v33 = vadd.f32 %v12858_v42, %v8065_v34 }
 0x628   : > { %v12753_v14 = vpop.f32.mrb[100].mxu0 }
 0x629   : > { %v12859_v12 = vpop.f32.mrb[128].mxu1  ;;  %v12754_v41 = vpop.f32.mrb[101].mxu0 }
 0x62a   : > { %v12755_v38 = vadd.f32 %v12754_v41, %v12753_v14  ;;  %v12860_v62 = vpop.f32.mrb[129].mxu1  ;;  %v12756_v2 = vpop.f32.mrb[102].mxu0 }
 0x62b   : > { %v12861_v39 = vadd.f32 %v12860_v62, %v12859_v12  ;;  %v12862_v55 = vpop.f32.mrb[130].mxu1  ;;  %v12757_v19 = vpop.f32.mrb[103].mxu0 }
 0x62c   : > { %v8078_v22 = vadd.f32 %v12755_v38, %v16642_v16  ;;  %v12758_v63 = vadd.f32 %v12757_v19, %v12756_v2  ;;  %v12863_v29 = vpop.f32.mrb[131].mxu1 }
 0x62d   : > { %v12864_v8 = vadd.f32 %v12863_v29, %v12862_v55  ;;  %v16714_v40 = vadd.f32 %v12861_v39, %v8070_v28  ;;  %v14207_v55 = vld [vmem:[#allocation13 + $0x150] sm:$0xff]  }
 0x62e   : > { %v8081_v34 = vadd.f32 %v12758_v63, %v16644_v9  ;;  %13183 = vmatprep.subr.bf16.mxu0 %v14207_v55 }
 0x62f   : > { %v16717_v24 = vadd.f32 %v12864_v8, %v8073_v6  ;;  %v14208_v8 = vld [vmem:[#allocation13 + $0x110] sm:$0xff]  }
 0x630   : > { %v12759_v26 = vpop.f32.mrb[104].mxu0  ;;  %13184 = vmatpush3.bf16.msra.mxu0 %v14208_v8 }
 0x631   : > { %v12865_v58 = vpop.f32.mrb[132].mxu1  ;;  %v12760_v30 = vpop.f32.mrb[105].mxu0 }
 0x632   : > { %v12761_v42 = vadd.f32 %v12760_v30, %v12759_v26  ;;  %v12866_v14 = vpop.f32.mrb[133].mxu1  ;;  %v12762_v12 = vpop.f32.mrb[106].mxu0 }
 0x633   : > { %v12867_v41 = vadd.f32 %v12866_v14, %v12865_v58  ;;  %v12868_v62 = vpop.f32.mrb[134].mxu1  ;;  %v12763_v25 = vpop.f32.mrb[107].mxu0 }
 0x634   : > { %v8086_v16 = vadd.f32 %v12761_v42, %v16646_v45  ;;  %v12764_v38 = vadd.f32 %v12763_v25, %v12762_v12  ;;  %v12869_v2 = vpop.f32.mrb[135].mxu1 }
 0x635   : > { %v12870_v28 = vadd.f32 %v12869_v2, %v12868_v62  ;;  %v16720_v39 = vadd.f32 %v12867_v41, %v8078_v22 }
 0x636   : > { %v8089_v9 = vadd.f32 %v12764_v38, %v16648_v18 }
 0x637   : > { %v16723_v6 = vadd.f32 %v12870_v28, %v8081_v34 }
 0x638   : > { %v12765_v19 = vpop.f32.mrb[108].mxu0 }
 0x639   : > { %v12871_v63 = vpop.f32.mrb[136].mxu1  ;;  %v12766_v29 = vpop.f32.mrb[109].mxu0 }
 0x63a   : > { %v12767_v26 = vadd.f32 %v12766_v29, %v12765_v19  ;;  %v12872_v58 = vpop.f32.mrb[137].mxu1  ;;  %v12768_v30 = vpop.f32.mrb[110].mxu0 }
 0x63b   : > { %v12873_v14 = vadd.f32 %v12872_v58, %v12871_v63  ;;  %v12874_v45 = vpop.f32.mrb[138].mxu1  ;;  %v12769_v42 = vpop.f32.mrb[111].mxu0 }
 0x63c   : > { %v8094_v12 = vadd.f32 %v12767_v26, %v16650_v15  ;;  %v12770_v22 = vadd.f32 %v12769_v42, %v12768_v30  ;;  %v12875_v41 = vpop.f32.mrb[139].mxu1 }
 0x63d   : > { %v12876_v62 = vadd.f32 %v12875_v41, %v12874_v45  ;;  %v16726_v18 = vadd.f32 %v12873_v14, %v8086_v16  ;;  %v14209_v45 = vld [vmem:[#allocation13 + $0x158] sm:$0xff]   ;;  %v14211_v41 = vld [vmem:[#allocation13 + $0x1c0] sm:$0xff]  }
 0x63e   : > { %v8097_v34 = vadd.f32 %v12770_v22, %v16652_v11  ;;  %v14210_v16 = vld [vmem:[#allocation13 + $0x118] sm:$0xff]   ;;  %13185 = vmatprep.subr.bf16.mxu0 %v14209_v45  ;;  %13291 = vmatprep.subr.bf16.mxu1 %v14211_v41 }
 0x63f   : > { %v16729_v25 = vadd.f32 %v12876_v62, %v8089_v9  ;;  %13186 = vmatpush3.bf16.msra.mxu0 %v14210_v16  ;;  %v14214_v16 = vld [vmem:[#allocation13 + $0x120] sm:$0xff]  }
 0x640   : > { %v12771_v38 = vpop.f32.mrb[112].mxu0 }
 0x641   : > { %v12877_v2 = vpop.f32.mrb[140].mxu1  ;;  %v12772_v55 = vpop.f32.mrb[113].mxu0 }
 0x642   : > { %v12773_v28 = vadd.f32 %v12772_v55, %v12771_v38  ;;  %v12878_v19 = vpop.f32.mrb[141].mxu1  ;;  %v12774_v63 = vpop.f32.mrb[114].mxu0 }
 0x643   : > { %v12879_v29 = vadd.f32 %v12878_v19, %v12877_v2  ;;  %v12880_v58 = vpop.f32.mrb[142].mxu1  ;;  %v12775_v8 = vpop.f32.mrb[115].mxu0 }
 0x644   : > { %v8102_v15 = vadd.f32 %v12773_v28, %v16654_v4  ;;  %v12776_v26 = vadd.f32 %v12775_v8, %v12774_v63  ;;  %v12881_v30 = vpop.f32.mrb[143].mxu1 }
 0x645   : > { %v12882_v14 = vadd.f32 %v12881_v30, %v12880_v58  ;;  %v16732_v42 = vadd.f32 %v12879_v29, %v8094_v12  ;;  %v14213_v30 = vld [vmem:[#allocation13 + $0x160] sm:$0xff]  }
 0x646   : > { %v8105_v11 = vadd.f32 %v12776_v26, %v16656_v21  ;;  %13187 = vmatprep.subr.bf16.mxu0 %v14213_v30 }
 0x647   : > { %v16735_v9 = vadd.f32 %v12882_v14, %v8097_v34  ;;  %13188 = vmatpush3.bf16.msra.mxu0 %v14214_v16 }
 0x648   : > { %v12777_v22 = vpop.f32.mrb[116].mxu0 }
 0x649   : > { %v12883_v62 = vpop.f32.mrb[176].mxu1  ;;  %v12778_v38 = vpop.f32.mrb[117].mxu0 }
 0x64a   : > { %v12779_v2 = vadd.f32 %v12778_v38, %v12777_v22  ;;  %v12884_v55 = vpop.f32.mrb[177].mxu1  ;;  %v12780_v4 = vpop.f32.mrb[118].mxu0 }
 0x64b   : > { %v12885_v28 = vadd.f32 %v12884_v55, %v12883_v62  ;;  %v12886_v19 = vpop.f32.mrb[178].mxu1  ;;  %v12781_v63 = vpop.f32.mrb[119].mxu0 }
 0x64c   : > { %v8110_v12 = vadd.f32 %v12779_v2, %v16658_v46  ;;  %v12782_v29 = vadd.f32 %v12781_v63, %v12780_v4  ;;  %v12887_v58 = vpop.f32.mrb[179].mxu1 }
 0x64d   : > { %v12888_v21 = vadd.f32 %v12887_v58, %v12886_v19  ;;  %v16738_v8 = vadd.f32 %v12885_v28, %v8102_v15 }
 0x64e   : > { %v8113_v34 = vadd.f32 %v12782_v29, %v16660_v54 }
 0x64f   : > { %v16741_v26 = vadd.f32 %v12888_v21, %v8105_v11 }
 0x650   : > { %v12783_v45 = vpop.f32.mrb[120].mxu0 }
 0x651   : > { %v12889_v14 = vpop.f32.mrb[180].mxu1  ;;  %v12784_v22 = vpop.f32.mrb[121].mxu0 }
 0x652   : > { %v12785_v41 = vadd.f32 %v12784_v22, %v12783_v45  ;;  %v12890_v62 = vpop.f32.mrb[181].mxu1  ;;  %v12786_v38 = vpop.f32.mrb[122].mxu0 }
 0x653   : > { %v12891_v46 = vadd.f32 %v12890_v62, %v12889_v14  ;;  %v12892_v2 = vpop.f32.mrb[182].mxu1  ;;  %v12787_v55 = vpop.f32.mrb[123].mxu0 }
 0x654   : > { %v8118_v15 = vadd.f32 %v12785_v41, %v16662_v43  ;;  %v12788_v4 = vadd.f32 %v12787_v55, %v12786_v38  ;;  %v12893_v28 = vpop.f32.mrb[183].mxu1 }
 0x655   : > { %v12894_v54 = vadd.f32 %v12893_v28, %v12892_v2  ;;  %v16744_v11 = vadd.f32 %v12891_v46, %v8110_v12  ;;  %v14217_v46 = vld [vmem:[#allocation13 + $0x168] sm:$0xff]  }
 0x656   : > { %v8121_v19 = vadd.f32 %v12788_v4, %v16665_v57  ;;  %v14218_v4 = vld [vmem:[#allocation13 + $0x128] sm:$0xff]   ;;  %13189 = vmatprep.subr.bf16.mxu0 %v14217_v46 }
 0x657   : > { %v16747_v63 = vadd.f32 %v12894_v54, %v8113_v34  ;;  %13190 = vmatpush3.bf16.msra.mxu0 %v14218_v4 }
 0x658   : > { %v12789_v29 = vpop.f32.mrb[124].mxu0 }
 0x659   : > { %v12895_v58 = vpop.f32.mrb[184].mxu1  ;;  %v12790_v21 = vpop.f32.mrb[125].mxu0 }
 0x65a   : > { %v12791_v30 = vadd.f32 %v12790_v21, %v12789_v29  ;;  %v12896_v45 = vpop.f32.mrb[185].mxu1  ;;  %v12792_v16 = vpop.f32.mrb[126].mxu0 }
 0x65b   : > { %v12897_v14 = vadd.f32 %v12896_v45, %v12895_v58  ;;  %v12898_v22 = vpop.f32.mrb[186].mxu1  ;;  %v12793_v62 = vpop.f32.mrb[127].mxu0 }
 0x65c   : > { %v8126_v43 = vadd.f32 %v12791_v30, %v16667_v13  ;;  %v12794_v41 = vadd.f32 %v12793_v62, %v12792_v16  ;;  %v12899_v38 = vpop.f32.mrb[187].mxu1 }
 0x65d   : > { %v12900_v2 = vadd.f32 %v12899_v38, %v12898_v22  ;;  %v16750_v12 = vadd.f32 %v12897_v14, %v8118_v15 }
 0x65e   : > { %v8129_v57 = vadd.f32 %v12794_v41, %v16669_v56 }
 0x65f   : > { %v16753_v34 = vadd.f32 %v12900_v2, %v8121_v19 }
 0x660   : > { %v12795_v55 = vpop.f32.mrb[128].mxu0 }
 0x661   : > { %v12901_v28 = vpop.f32.mrb[188].mxu1  ;;  %v12796_v54 = vpop.f32.mrb[129].mxu0 }
 0x662   : > { %v12797_v29 = vadd.f32 %v12796_v54, %v12795_v55  ;;  %v12902_v58 = vpop.f32.mrb[189].mxu1  ;;  %v12798_v21 = vpop.f32.mrb[130].mxu0 }
 0x663   : > { %v12903_v13 = vadd.f32 %v12902_v58, %v12901_v28  ;;  %v12904_v30 = vpop.f32.mrb[190].mxu1  ;;  %v12799_v45 = vpop.f32.mrb[131].mxu0 }
 0x664   : > { %v8134_v15 = vadd.f32 %v12797_v29, %v16671_v31  ;;  %v12800_v16 = vadd.f32 %v12799_v45, %v12798_v21  ;;  %v12905_v14 = vpop.f32.mrb[191].mxu1 }
 0x665   : > { %v12906_v56 = vadd.f32 %v12905_v14, %v12904_v30  ;;  %v16756_v19 = vadd.f32 %v12903_v13, %v8126_v43  ;;  %v14221_v13 = vld [vmem:[#allocation13 + $0x170] sm:$0xff]  }
 0x666   : > { %v8137_v22 = vadd.f32 %v12800_v16, %v16673_v44  ;;  %v14222_v16 = vld [vmem:[#allocation13 + $0x130] sm:$0xff]   ;;  %13191 = vmatprep.subr.bf16.mxu0 %v14221_v13 }
 0x667   : > { %v16759_v62 = vadd.f32 %v12906_v56, %v8129_v57  ;;  %13192 = vmatpush3.bf16.msra.mxu0 %v14222_v16 }
 0x668   : > { %v12801_v41 = vpop.f32.mrb[132].mxu0 }
 0x669   : > { %v12907_v38 = vpop.f32.mrb[192].mxu1  ;;  %v12802_v2 = vpop.f32.mrb[133].mxu0 }
 0x66a   : > { %v12803_v46 = vadd.f32 %v12802_v2, %v12801_v41  ;;  %v12908_v55 = vpop.f32.mrb[193].mxu1  ;;  %v12804_v4 = vpop.f32.mrb[134].mxu0 }
 0x66b   : > { %v12909_v28 = vadd.f32 %v12908_v55, %v12907_v38  ;;  %v12910_v54 = vpop.f32.mrb[194].mxu1  ;;  %v12805_v58 = vpop.f32.mrb[135].mxu0 }
 0x66c   : > { %v8142_v31 = vadd.f32 %v12803_v46, %v16675_v10  ;;  %v12806_v29 = vadd.f32 %v12805_v58, %v12804_v4  ;;  %v12911_v21 = vpop.f32.mrb[195].mxu1 }
 0x66d   : > { %v12912_v30 = vadd.f32 %v12911_v21, %v12910_v54  ;;  %v16762_v43 = vadd.f32 %v12909_v28, %v8134_v15 }
 0x66e   : > { %v8145_v44 = vadd.f32 %v12806_v29, %v16677_v60 }
 0x66f   : > { %v16765_v57 = vadd.f32 %v12912_v30, %v8137_v22 }
 0x670   : > { %v12807_v45 = vpop.f32.mrb[136].mxu0 }
 0x671   : > { %v12913_v14 = vpop.f32.mrb[196].mxu1  ;;  %v12808_v56 = vpop.f32.mrb[137].mxu0 }
 0x672   : > { %v12809_v41 = vadd.f32 %v12808_v56, %v12807_v45  ;;  %v12914_v38 = vpop.f32.mrb[197].mxu1  ;;  %v12810_v2 = vpop.f32.mrb[138].mxu0 }
 0x673   : > { %v12915_v10 = vadd.f32 %v12914_v38, %v12913_v14  ;;  %v12916_v46 = vpop.f32.mrb[198].mxu1  ;;  %v12811_v55 = vpop.f32.mrb[139].mxu0 }
 0x674   : > { %v8150_v15 = vadd.f32 %v12809_v41, %v16679_v27  ;;  %v12812_v4 = vadd.f32 %v12811_v55, %v12810_v2  ;;  %v12917_v28 = vpop.f32.mrb[199].mxu1 }
 0x675   : > { %v12918_v60 = vadd.f32 %v12917_v28, %v12916_v46  ;;  %v16768_v22 = vadd.f32 %v12915_v10, %v8142_v31  ;;  %v14225_v10 = vld [vmem:[#allocation13 + $0x178] sm:$0xff]  }
 0x676   : > { %v8153_v54 = vadd.f32 %v12812_v4, %v16681_v51  ;;  %v16782_v4 = vld [vmem:[%s17507_s5] ss:$0 sm:$0xff]  ;;  %v14226_v28 = vld [vmem:[#allocation13 + $0x138] sm:$0xff]   ;;  %13193 = vmatprep.subr.bf16.mxu0 %v14225_v10  ;;  %s14449_s5 = sshll.u32 %s14536_s23, 4  ;;  %s14450_s5 = int_to_ptr.vmem [resolvable:$false] %s14449_s5 }
 0x677   : > { %v16771_v58 = vadd.f32 %v12918_v60, %v8145_v44  ;;  %13194 = vmatpush3.bf16.msra.mxu0 %v14226_v28  ;;  %s14451_s28 = scalar_lea.vmem %s14450_s5, 8192  ;;  %p14452_p0 = scmp.lt.s32.totalorder %s17327_s12, %s14450_s5 }
 0x678   : > { %v12813_v29 = vpop.f32.mrb[140].mxu0  ;;  %p14453_p2 = scmp.lt.s32.totalorder %s14451_s28, %s14445_s25 }
 0x679   : > { %v12919_v21 = vpop.f32.mrb[200].mxu1  ;;  %v12814_v30 = vpop.f32.mrb[141].mxu0 }
 0x67a   : > { %v12815_v13 = vadd.f32 %v12814_v30, %v12813_v29  ;;  %v12920_v45 = vpop.f32.mrb[201].mxu1  ;;  %v12816_v16 = vpop.f32.mrb[142].mxu0  ;;  %p14454_p9 = por %p14453_p2, %p14452_p0 }
 0x67b   : > { %v12921_v14 = vadd.f32 %v12920_v45, %v12919_v21  ;;  %v12922_v56 = vpop.f32.mrb[202].mxu1  ;;  %v12817_v38 = vpop.f32.mrb[143].mxu0 }
 0x67c   : > { %v8158_v27 = vadd.f32 %v12815_v13, %v16684_v49  ;;  %v12818_v41 = vadd.f32 %v12817_v38, %v12816_v16  ;;  %v12923_v2 = vpop.f32.mrb[203].mxu1  ;;  %p14455_p7 = pnand %p14454_p9, %p14448_p13 }
 0x67d   : > { %v12924_v46 = vadd.f32 %v12923_v2, %v12922_v56  ;;  %v16774_v31 = vadd.f32 %v12921_v14, %v8150_v15  ;;  %v16788_v15 = vld [vmem:[%s17508_s17] ss:$0 sm:$0xff] }
 0x67e   : > { %v8161_v51 = vadd.f32 %v12818_v41, %v16687_v36 }
 0x67f   : > { %v16777_v44 = vadd.f32 %v12924_v46, %v8153_v54 }
 0x680   : > { %v13589_v55 = vpop.f32.mrb[144].mxu0 }
 0x681   : > { %v12925_v60 = vpop.f32.mrb[204].mxu1  ;;  %v8368_v49 = vadd.f32 %v13589_v55, %v16696_v1  ;;  %v8359_v29 = vpop.f32.mrb[145].mxu0 }
 0x682   : > { %v12926_v36 = vpop.f32.mrb[205].mxu1  ;;  %v8360_v54 = vadd.f32 %v8359_v29, %v16690_v48  ;;  %v13590_v21 = vpop.f32.mrb[146].mxu0 }
 0x683   : > { %v8495_v30 = vmul.f32 %v16782_v4, %v8368_v49  ;;  %v12927_v13 = vadd.f32 %v12926_v36, %v12925_v60  ;;  %v12928_v45 = vpop.f32.mrb[206].mxu1  ;;  %v8371_v16 = vadd.f32 %v13590_v21, %v16699_v35  ;;  %v8362_v14 = vpop.f32.mrb[147].mxu0 }
 0x684   : > { %v8493_v1 = vmul.f32 %v16782_v4, %v8360_v54  ;;  %v12929_v56 = vpop.f32.mrb[207].mxu1  ;;  %v8363_v38 = vadd.f32 %v8362_v14, %v16693_v59 }
 0x685   : > { %v8534_v41 = vadd.f32 %v16788_v15, %v8495_v30  ;;  %v8496_v2 = vmul.f32 %v16782_v4, %v8371_v16  ;;  %v12930_v46 = vadd.f32 %v12929_v56, %v12928_v45  ;;  %v16797_v48 = vadd.f32 %v12927_v13, %v8158_v27 }
 0x686   : > { %v8532_v10 = vadd.f32 %v16788_v15, %v8493_v1  ;;  %v8494_v55 = vmul.f32 %v16782_v4, %v8363_v38 }
 0x687   : > { %v8566_v28 = vmax.f32 %v8534_v41, 0.0  ;;  %v8535_v35 = vadd.f32 %v16788_v15, %v8496_v2  ;;  %v16802_v60 = vadd.f32 %v12930_v46, %v8161_v51 }
 0x688   : > { %v8564_v49 = vmax.f32 %v8532_v10, 0.0  ;;  %v8533_v29 = vadd.f32 %v16788_v15, %v8494_v55  ;;  %v13593_v59 = vpop.f32.mrb[148].mxu0  ;;  %v16816_v10 = vld [vmem:[#allocation13 + $0x200] sm:$0xff]  }
 0x689   : > { %8598 = vst [vmem:[#allocation2 + $0x31] sm:$0xff] %v8566_v28  ;;  %v8567_v36 = vmax.f32 %v8535_v35, 0.0  ;;  %v8384_v54 = vadd.f32 %v13593_v59, %v16708_v53  ;;  %v8375_v21 = vpop.f32.mrb[149].mxu0  ;;  %13619 = vmatprep.subr.bf16.mxu0 %v16816_v10 }
 0x68a   : > { %8596 = vst [vmem:[#allocation2 + $0x19] sm:$0xff] %v8564_v49  ;;  %v8565_v27 = vmax.f32 %v8533_v29, 0.0  ;;  %v8376_v30 = vadd.f32 %v8375_v21, %v16702_v0  ;;  %v13594_v13 = vpop.f32.mrb[150].mxu0 }
 0x68b   : > { %8599 = vst [vmem:[#allocation2 + $0x39] sm:$0xff] %v8567_v36  ;;  %v8499_v45 = vmul.f32 %v16782_v4, %v8384_v54  ;;  %v8387_v51 = vadd.f32 %v13594_v13, %v16711_v33  ;;  %v8378_v16 = vpop.f32.mrb[151].mxu0  ;;  %v9511_v14 = vpack.c.bf16 %v8567_v36, %v8566_v28 }
 0x68c   : > { %8597 = vst [vmem:[#allocation2 + $0x21] sm:$0xff] %v8565_v27  ;;  %v8497_v1 = vmul.f32 %v16782_v4, %v8376_v30  ;;  %v8379_v56 = vadd.f32 %v8378_v16, %v16705_v17  ;;  %v9502_v38 = vpack.c.bf16 %v8565_v27, %v8564_v49  ;;  %v8756_v17 = vld [vmem:[#allocation2 + $0x2] sm:$0xff]  ;;  %v8757_v49 = vld [vmem:[#allocation2 + $0xa] sm:$0xff] }
 0x68d   : > { %v8538_v53 = vadd.f32 %v16788_v15, %v8499_v45  ;;  %v8500_v41 = vmul.f32 %v16782_v4, %v8387_v51 }
 0x68e   : > { %v8536_v0 = vadd.f32 %v16788_v15, %v8497_v1  ;;  %v8498_v2 = vmul.f32 %v16782_v4, %v8379_v56  ;;  %10252 = vmatprep.mubr.bf16.mxu0 %v9502_v38  ;;  %v9494_v1 = vpack.c.bf16 %v8757_v49, %v8756_v17 }
 0x68f   : > { %v8570_v46 = vmax.f32 %v8538_v53, 0.0  ;;  %v8539_v33 = vadd.f32 %v16788_v15, %v8500_v41  ;;  %v14212_v41 = vld [vmem:[#allocation13 + $0x180] sm:$0xff]  }
 0x690   : > { %v8568_v55 = vmax.f32 %v8536_v0, 0.0  ;;  %v8537_v28 = vadd.f32 %v16788_v15, %v8498_v2  ;;  %v13597_v35 = vpop.f32.mrb[152].mxu0  ;;  %v8822_v2 = vld [vmem:[#allocation2 + $0x30] sm:$0xff] }
 0x691   : > { %8602 = vst [vmem:[#allocation2 + $0x61] sm:$0xff] %v8570_v46  ;;  %v8571_v29 = vmax.f32 %v8539_v33, 0.0  ;;  %v8400_v59 = vadd.f32 %v13597_v35, %v16720_v39  ;;  %v8391_v36 = vpop.f32.mrb[153].mxu0  ;;  %v8820_v51 = vld [vmem:[#allocation2 + $0x18] sm:$0xff] }
 0x692   : > { %8600 = vst [vmem:[#allocation2 + $0x49] sm:$0xff] %v8568_v55  ;;  %v8569_v54 = vmax.f32 %v8537_v28, 0.0  ;;  %v8392_v21 = vadd.f32 %v8391_v36, %v16714_v40  ;;  %v13598_v27 = vpop.f32.mrb[154].mxu0  ;;  %v8823_v56 = vld [vmem:[#allocation2 + $0x38] sm:$0xff] }
 0x693   : > { %8603 = vst [vmem:[#allocation2 + $0x69] sm:$0xff] %v8571_v29  ;;  %v8503_v30 = vmul.f32 %v16782_v4, %v8400_v59  ;;  %v8403_v13 = vadd.f32 %v13598_v27, %v16723_v6  ;;  %v8394_v45 = vpop.f32.mrb[155].mxu0  ;;  %v8821_v16 = vld [vmem:[#allocation2 + $0x20] sm:$0xff]  ;;  %v16828_v28 = vpack.c.bf16 %v8571_v29, %v8570_v46  ;;  %v14215_v6 = vld [vmem:[#allocation13 + $0x1c8] sm:$0xff]   ;;  %v9504_v49 = vpack.c.bf16 %v8823_v56, %v8822_v2 }
 0x694   : > { %8601 = vst [vmem:[#allocation2 + $0x51] sm:$0xff] %v8569_v54  ;;  %v8501_v39 = vmul.f32 %v16782_v4, %v8392_v21  ;;  %v8395_v38 = vadd.f32 %v8394_v45, %v16717_v24  ;;  %v9495_v53 = vpack.c.bf16 %v8821_v16, %v8820_v51  ;;  %v9520_v33 = vpack.c.bf16 %v8569_v54, %v8568_v55  ;;  %v14216_v46 = vld [vmem:[#allocation13 + $0x188] sm:$0xff]   ;;  %v14219_v45 = vld [vmem:[#allocation13 + $0x1d0] sm:$0xff]  }
 0x695   : > { %v8542_v40 = vadd.f32 %v16788_v15, %v8503_v30  ;;  %v8504_v0 = vmul.f32 %v16782_v4, %v8403_v13  ;;  %v8758_v30 = vld [vmem:[#allocation2 + $0x1a] sm:$0xff]  ;;  %v8759_v13 = vld [vmem:[#allocation2 + $0x22] sm:$0xff] }
 0x696   : > { %v8540_v35 = vadd.f32 %v16788_v15, %v8501_v39  ;;  %v8502_v17 = vmul.f32 %v16782_v4, %v8395_v38  ;;  %10405 = vmatprep.mubr.bf16.mxu1 %v9495_v53  ;;  %10253 = vmatmul.mubr.bf16.gmra.mrb[180].mxu0 %v9495_v53 }
 0x697   : > { %v8574_v59 = vmax.f32 %v8542_v40, 0.0  ;;  %v8543_v24 = vadd.f32 %v16788_v15, %v8504_v0  ;;  %10406 = vmatmul.mubr.bf16.vlgmr.msra.gmra.mrb[208].mxu1 %v9494_v1  ;;  %10260 = vmatprep.mubr.bf16.mxu0 %v9511_v14  ;;  %v14220_v40 = vld [vmem:[#allocation13 + $0x190] sm:$0xff]  }
 0x698   : > { %v8572_v36 = vmax.f32 %v8540_v35, 0.0  ;;  %v8541_v21 = vadd.f32 %v16788_v15, %v8502_v17  ;;  %v13601_v27 = vpop.f32.mrb[156].mxu0  ;;  %10413 = vmatprep.mubr.bf16.mxu1 %v9504_v49  ;;  %13292 = vmatpush3.bf16.msra.mxu1 %v14212_v41  ;;  %v16840_v41 = vpack.c.bf16 %v8759_v13, %v8758_v30  ;;  %v8760_v30 = vld [vmem:[#allocation2 + $0x32] sm:$0xff]  ;;  %v8761_v13 = vld [vmem:[#allocation2 + $0x3a] sm:$0xff] }
 0x699   : > { %8606 = vst [vmem:[#allocation2 + $0x91] sm:$0xff] %v8574_v59  ;;  %v8575_v55 = vmax.f32 %v8543_v24, 0.0  ;;  %v8416_v29 = vadd.f32 %v13601_v27, %v16732_v42  ;;  %v8407_v54 = vpop.f32.mrb[157].mxu0  ;;  %13293 = vmatprep.subr.bf16.mxu1 %v14215_v6  ;;  %v8824_v2 = vld [vmem:[#allocation2 + $0x48] sm:$0xff] }
 0x69a   : > { %8604 = vst [vmem:[#allocation2 + $0x79] sm:$0xff] %v8572_v36  ;;  %v8573_v51 = vmax.f32 %v8541_v21, 0.0  ;;  %v8408_v14 = vadd.f32 %v8407_v54, %v16726_v18  ;;  %v13602_v16 = vpop.f32.mrb[158].mxu0 }
 0x69b   : > { %8607 = vst [vmem:[#allocation2 + $0x99] sm:$0xff] %v8575_v55  ;;  %v8507_v1 = vmul.f32 %v16782_v4, %v8416_v29  ;;  %v8419_v56 = vadd.f32 %v13602_v16, %v16735_v9  ;;  %v8410_v39 = vpop.f32.mrb[159].mxu0  ;;  %v8825_v38 = vld [vmem:[#allocation2 + $0x50] sm:$0xff]  ;;  %v16846_v35 = vpack.c.bf16 %v8575_v55, %v8574_v59  ;;  %v14223_v9 = vld [vmem:[#allocation13 + $0x1d8] sm:$0xff]  }
 0x69c   : > { %8605 = vst [vmem:[#allocation2 + $0x81] sm:$0xff] %v8573_v51  ;;  %v8505_v42 = vmul.f32 %v16782_v4, %v8408_v14  ;;  %v8411_v53 = vadd.f32 %v8410_v39, %v16729_v25  ;;  %13294 = vmatpush3.bf16.msra.mxu1 %v14216_v46  ;;  %v16844_v6 = vpack.c.bf16 %v8573_v51, %v8572_v36  ;;  %v14224_v55 = vld [vmem:[#allocation13 + $0x198] sm:$0xff]  }
 0x69d   : > { %v8546_v0 = vadd.f32 %v16788_v15, %v8507_v1  ;;  %v8508_v18 = vmul.f32 %v16782_v4, %v8419_v56  ;;  %13295 = vmatprep.subr.bf16.mxu1 %v14219_v45  ;;  %v16850_v25 = vpack.c.bf16 %v8825_v38, %v8824_v2  ;;  %v14227_v45 = vld [vmem:[#allocation13 + $0x1e0] sm:$0xff]   ;;  %v8827_v39 = vld [vmem:[#allocation2 + $0x68] sm:$0xff] }
 0x69e   : > { %v8544_v17 = vadd.f32 %v16788_v15, %v8505_v42  ;;  %v8506_v24 = vmul.f32 %v16782_v4, %v8411_v53  ;;  %10261 = vmatmul.mubr.bf16.gmra.mrb[184].mxu0 %v9504_v49  ;;  %v16862_v42 = vpack.c.bf16 %v8761_v13, %v8760_v30  ;;  %v14228_v53 = vld [vmem:[#allocation13 + $0x1a0] sm:$0xff]   ;;  %v14231_v13 = vld [vmem:[#allocation13 + $0x1f0] sm:$0xff]  }
 0x69f   : > { %v8578_v21 = vmax.f32 %v8546_v0, 0.0  ;;  %v8547_v27 = vadd.f32 %v16788_v15, %v8508_v18  ;;  %10414 = vmatmul.mubr.bf16.gmra.mrb[212].mxu1 %v16840_v41  ;;  %10268 = vmatprep.mubr.bf16.mxu0 %v9520_v33  ;;  %v8826_v0 = vld [vmem:[#allocation2 + $0x60] sm:$0xff]  ;;  %v8763_v30 = vld [vmem:[#allocation2 + $0x52] sm:$0xff] }
 0x6a0   : > { %v8576_v46 = vmax.f32 %v8544_v17, 0.0  ;;  %v8545_v36 = vadd.f32 %v16788_v15, %v8506_v24  ;;  %v13605_v59 = vpop.f32.mrb[160].mxu0  ;;  %10421 = vmatprep.mubr.bf16.mxu1 %v16850_v25  ;;  %13296 = vmatpush3.bf16.msra.mxu1 %v14220_v40 }
 0x6a1   : > { %8610 = vst [vmem:[#allocation2 + $0xc1] sm:$0xff] %v8578_v21  ;;  %v8579_v29 = vmax.f32 %v8547_v27, 0.0  ;;  %v8432_v49 = vadd.f32 %v13605_v59, %v16744_v11  ;;  %v8423_v54 = vpop.f32.mrb[161].mxu0  ;;  %13297 = vmatprep.subr.bf16.mxu1 %v14223_v9  ;;  %v14230_v59 = vld [vmem:[#allocation13 + $0x1a8] sm:$0xff]  }
 0x6a2   : > { %8608 = vst [vmem:[#allocation2 + $0xa9] sm:$0xff] %v8576_v46  ;;  %v8577_v51 = vmax.f32 %v8545_v36, 0.0  ;;  %v8424_v33 = vadd.f32 %v8423_v54, %v16738_v8  ;;  %v13606_v14 = vpop.f32.mrb[162].mxu0  ;;  %v8762_v54 = vld [vmem:[#allocation2 + $0x4a] sm:$0xff] }
 0x6a3   : > { %8611 = vst [vmem:[#allocation2 + $0xc9] sm:$0xff] %v8579_v29  ;;  %v8511_v16 = vmul.f32 %v16782_v4, %v8432_v49  ;;  %v8435_v1 = vadd.f32 %v13606_v14, %v16747_v63  ;;  %v8426_v56 = vpop.f32.mrb[163].mxu0  ;;  %v16868_v2 = vpack.c.bf16 %v8579_v29, %v8578_v21  ;;  %v14229_v63 = vld [vmem:[#allocation13 + $0x1e8] sm:$0xff]  }
 0x6a4   : > { %8609 = vst [vmem:[#allocation2 + $0xb1] sm:$0xff] %v8577_v51  ;;  %v8509_v11 = vmul.f32 %v16782_v4, %v8424_v33  ;;  %v8427_v38 = vadd.f32 %v8426_v56, %v16741_v26  ;;  %13298 = vmatpush3.bf16.msra.mxu1 %v14224_v55  ;;  %v16866_v18 = vpack.c.bf16 %v8577_v51, %v8576_v46 }
 0x6a5   : > { %v8550_v40 = vadd.f32 %v16788_v15, %v8511_v16  ;;  %v8512_v8 = vmul.f32 %v16782_v4, %v8435_v1  ;;  %13299 = vmatprep.subr.bf16.mxu1 %v14227_v45  ;;  %v16873_v26 = vpack.c.bf16 %v8827_v39, %v8826_v0  ;;  %v8829_v1 = vld [vmem:[#allocation2 + $0x80] sm:$0xff]  ;;  %v16886_v39 = vpack.c.bf16 %v8763_v30, %v8762_v54 }
 0x6a6   : > { %v8548_v9 = vadd.f32 %v16788_v15, %v8509_v11  ;;  %v8510_v17 = vmul.f32 %v16782_v4, %v8427_v38  ;;  %10269 = vmatmul.mubr.bf16.gmra.mrb[188].mxu0 %v16850_v25  ;;  %v14233_v11 = vld [vmem:[#allocation13 + $0x1b0] sm:$0xff]  }
 0x6a7   : > { %v8582_v24 = vmax.f32 %v8550_v40, 0.0  ;;  %v8551_v27 = vadd.f32 %v16788_v15, %v8512_v8  ;;  %10422 = vmatmul.mubr.bf16.gmra.mrb[216].mxu1 %v16862_v42  ;;  %10276 = vmatprep.mubr.bf16.mxu0 %v16828_v28 }
 0x6a8   : > { %v8580_v46 = vmax.f32 %v8548_v9, 0.0  ;;  %v8549_v21 = vadd.f32 %v16788_v15, %v8510_v17  ;;  %v13609_v36 = vpop.f32.mrb[164].mxu0  ;;  %10429 = vmatprep.mubr.bf16.mxu1 %v16873_v26  ;;  %13300 = vmatpush3.bf16.msra.mxu1 %v14228_v53  ;;  %v8828_v53 = vld [vmem:[#allocation2 + $0x78] sm:$0xff] }
 0x6a9   : > { %8614 = vst [vmem:[#allocation2 + $0xf1] sm:$0xff] %v8582_v24  ;;  %v8583_v55 = vmax.f32 %v8551_v27, 0.0  ;;  %v8448_v29 = vadd.f32 %v13609_v36, %v16756_v19  ;;  %v8439_v49 = vpop.f32.mrb[165].mxu0  ;;  %13301 = vmatprep.subr.bf16.mxu1 %v14229_v63 }
 0x6aa   : > { %8612 = vst [vmem:[#allocation2 + $0xd9] sm:$0xff] %v8580_v46  ;;  %v8581_v45 = vmax.f32 %v8549_v21, 0.0  ;;  %v8440_v28 = vadd.f32 %v8439_v49, %v16750_v12  ;;  %v13610_v51 = vpop.f32.mrb[166].mxu0  ;;  %v14235_v21 = vld [vmem:[#allocation13 + $0x1b8] sm:$0xff]  }
 0x6ab   : > { %8615 = vst [vmem:[#allocation2 + $0xf9] sm:$0xff] %v8583_v55  ;;  %v8515_v33 = vmul.f32 %v16782_v4, %v8448_v29  ;;  %v8451_v14 = vadd.f32 %v13610_v51, %v16759_v62  ;;  %v8442_v16 = vpop.f32.mrb[167].mxu0  ;;  %v16892_v8 = vpack.c.bf16 %v8583_v55, %v8582_v24  ;;  %v14234_v62 = vld [vmem:[#allocation13 + $0x1f8] sm:$0xff]   ;;  %v8831_v51 = vld [vmem:[#allocation2 + $0x98] sm:$0xff] }
 0x6ac   : > { %8613 = vst [vmem:[#allocation2 + $0xe1] sm:$0xff] %v8581_v45  ;;  %v8513_v19 = vmul.f32 %v16782_v4, %v8440_v28  ;;  %v8443_v56 = vadd.f32 %v8442_v16, %v16753_v34  ;;  %13302 = vmatpush3.bf16.msra.mxu1 %v14230_v59  ;;  %v16890_v40 = vpack.c.bf16 %v8581_v45, %v8580_v46  ;;  %v8764_v29 = vld [vmem:[#allocation2 + $0x62] sm:$0xff]  ;;  %v8765_v49 = vld [vmem:[#allocation2 + $0x6a] sm:$0xff] }
 0x6ad   : > { %v8554_v38 = vadd.f32 %v16788_v15, %v8515_v33  ;;  %v8516_v12 = vmul.f32 %v16782_v4, %v8451_v14  ;;  %13303 = vmatprep.subr.bf16.mxu1 %v14231_v13  ;;  %v16897_v34 = vpack.c.bf16 %v8829_v1, %v8828_v53  ;;  %v16910_v14 = vpack.c.bf16 %v8765_v49, %v8764_v29  ;;  %v8830_v1 = vld [vmem:[#allocation2 + $0x90] sm:$0xff] }
 0x6ae   : > { %v8552_v0 = vadd.f32 %v16788_v15, %v8513_v19  ;;  %v8514_v63 = vmul.f32 %v16782_v4, %v8443_v56  ;;  %10277 = vmatmul.mubr.bf16.gmra.mrb[192].mxu0 %v16873_v26  ;;  %v8833_v29 = vld [vmem:[#allocation2 + $0xb0] sm:$0xff] }
 0x6af   : > { %v8586_v9 = vmax.f32 %v8554_v38, 0.0  ;;  %v8555_v17 = vadd.f32 %v16788_v15, %v8516_v12  ;;  %10430 = vmatmul.mubr.bf16.gmra.mrb[220].mxu1 %v16886_v39  ;;  %10284 = vmatprep.mubr.bf16.mxu0 %v16844_v6  ;;  %v16921_v38 = vpack.c.bf16 %v8831_v51, %v8830_v1 }
 0x6b0   : > { %v8584_v27 = vmax.f32 %v8552_v0, 0.0  ;;  %v8553_v24 = vadd.f32 %v16788_v15, %v8514_v63  ;;  %v13613_v46 = vpop.f32.mrb[168].mxu0  ;;  %10437 = vmatprep.mubr.bf16.mxu1 %v16897_v34  ;;  %13304 = vmatpush3.bf16.msra.mxu1 %v14233_v11 }
 0x6b1   : > { %8618 = vst [vmem:[#allocation2 + $0x121] sm:$0xff] %v8586_v9  ;;  %v8587_v36 = vmax.f32 %v8555_v17, 0.0  ;;  %v8464_v59 = vadd.f32 %v13613_v46, %v16768_v22  ;;  %v8455_v55 = vpop.f32.mrb[169].mxu0  ;;  %13305 = vmatprep.subr.bf16.mxu1 %v14234_v62 }
 0x6b2   : > { %8616 = vst [vmem:[#allocation2 + $0x109] sm:$0xff] %v8584_v27  ;;  %v8585_v54 = vmax.f32 %v8553_v24, 0.0  ;;  %v8456_v6 = vadd.f32 %v8455_v55, %v16762_v43  ;;  %v13614_v30 = vpop.f32.mrb[170].mxu0  ;;  %v8767_v24 = vld [vmem:[#allocation2 + $0x82] sm:$0xff] }
 0x6b3   : > { %8619 = vst [vmem:[#allocation2 + $0x129] sm:$0xff] %v8587_v36  ;;  %v8519_v13 = vmul.f32 %v16782_v4, %v8464_v59  ;;  %v8467_v45 = vadd.f32 %v13614_v30, %v16771_v58  ;;  %v8458_v28 = vpop.f32.mrb[171].mxu0  ;;  %v16916_v56 = vpack.c.bf16 %v8587_v36, %v8586_v9 }
 0x6b4   : > { %8617 = vst [vmem:[#allocation2 + $0x111] sm:$0xff] %v8585_v54  ;;  %v8517_v33 = vmul.f32 %v16782_v4, %v8456_v6  ;;  %v8459_v22 = vadd.f32 %v8458_v28, %v16765_v57  ;;  %13306 = vmatpush3.bf16.msra.mxu1 %v14235_v21  ;;  %v16914_v19 = vpack.c.bf16 %v8585_v54, %v8584_v27  ;;  %v8766_v27 = vld [vmem:[#allocation2 + $0x7a] sm:$0xff] }
 0x6b5   : > { %v8558_v16 = vadd.f32 %v16788_v15, %v8519_v13  ;;  %v8520_v43 = vmul.f32 %v16782_v4, %v8467_v45  ;;  %v16934_v54 = vpack.c.bf16 %v8767_v24, %v8766_v27  ;;  %v8770_v27 = vld [vmem:[#allocation2 + $0xaa] sm:$0xff]  ;;  %v8771_v24 = vld [vmem:[#allocation2 + $0xb2] sm:$0xff] }
 0x6b6   : > { %v8556_v58 = vadd.f32 %v16788_v15, %v8517_v33  ;;  %v8518_v11 = vmul.f32 %v16782_v4, %v8459_v22  ;;  %10285 = vmatmul.mubr.bf16.gmra.mrb[196].mxu0 %v16897_v34 }
 0x6b7   : > { %v8590_v57 = vmax.f32 %v8558_v16, 0.0  ;;  %v8559_v12 = vadd.f32 %v16788_v15, %v8520_v43  ;;  %10438 = vmatmul.mubr.bf16.gmra.mrb[224].mxu1 %v16910_v14  ;;  %10292 = vmatprep.mubr.bf16.mxu0 %v16846_v35 }
 0x6b8   : > { %v8588_v53 = vmax.f32 %v8556_v58, 0.0  ;;  %v8557_v62 = vadd.f32 %v16788_v15, %v8518_v11  ;;  %v13617_v0 = vpop.f32.mrb[172].mxu0  ;;  %10445 = vmatprep.mubr.bf16.mxu1 %v16921_v38 }
 0x6b9   : > { %8622 = vst [vmem:[#allocation2 + $0x151] sm:$0xff] %v8590_v57  ;;  %v8591_v63 = vmax.f32 %v8559_v12, 0.0  ;;  %v8480_v9 = vadd.f32 %v13617_v0, %v16797_v48  ;;  %v8471_v17 = vpop.f32.mrb[173].mxu0  ;;  %v8768_v12 = vld [vmem:[#allocation2 + $0x92] sm:$0xff]  ;;  %v8835_v0 = vld [vmem:[#allocation2 + $0xc8] sm:$0xff] }
 0x6ba   : > { %8620 = vst [vmem:[#allocation2 + $0x139] sm:$0xff] %v8588_v53  ;;  %v8589_v46 = vmax.f32 %v8557_v62, 0.0  ;;  %v8472_v21 = vadd.f32 %v8471_v17, %v16774_v31  ;;  %v13618_v36 = vpop.f32.mrb[174].mxu0  ;;  %v8832_v31 = vld [vmem:[#allocation2 + $0xa8] sm:$0xff] }
 0x6bb   : > { %8623 = vst [vmem:[#allocation2 + $0x159] sm:$0xff] %v8591_v63  ;;  %v8523_v35 = vmul.f32 %v16782_v4, %v8480_v9  ;;  %v8483_v59 = vadd.f32 %v13618_v36, %v16802_v60  ;;  %v8474_v55 = vpop.f32.mrb[175].mxu0  ;;  %v16940_v45 = vpack.c.bf16 %v8591_v63, %v8590_v57  ;;  %v16945_v51 = vpack.c.bf16 %v8833_v29, %v8832_v31  ;;  %v8834_v63 = vld [vmem:[#allocation2 + $0xc0] sm:$0xff]  ;;  %v8836_v36 = vld [vmem:[#allocation2 + $0xd8] sm:$0xff] }
 0x6bc   : > { %8621 = vst [vmem:[#allocation2 + $0x141] sm:$0xff] %v8589_v46  ;;  %v8521_v49 = vmul.f32 %v16782_v4, %v8472_v21  ;;  %v8475_v48 = vadd.f32 %v8474_v55, %v16777_v44  ;;  %v16938_v13 = vpack.c.bf16 %v8589_v46, %v8588_v53  ;;  %v8769_v53 = vld [vmem:[#allocation2 + $0x9a] sm:$0xff]  ;;  %v16961_v17 = vpack.c.bf16 %v8835_v0, %v8834_v63 }
 0x6bd   : > { %v8562_v6 = vadd.f32 %v16788_v15, %v8523_v35  ;;  %v8524_v30 = vmul.f32 %v16782_v4, %v8483_v59  ;;  %v8837_v46 = vld [vmem:[#allocation2 + $0xe0] sm:$0xff]  ;;  %v16966_v21 = vpack.c.bf16 %v8771_v24, %v8770_v27  ;;  %v8839_v55 = vld [vmem:[#allocation2 + $0xf8] sm:$0xff] }
 0x6be   : > { %v8560_v60 = vadd.f32 %v16788_v15, %v8521_v49  ;;  %v8522_v28 = vmul.f32 %v16782_v4, %v8475_v48  ;;  %10293 = vmatmul.mubr.bf16.gmra.mrb[200].mxu0 %v16921_v38  ;;  %v16969_v35 = vpack.c.bf16 %v8837_v46, %v8836_v36  ;;  %v8772_v59 = vld [vmem:[#allocation2 + $0xc2] sm:$0xff]  ;;  %v8838_v49 = vld [vmem:[#allocation2 + $0xf0] sm:$0xff] }
 0x6bf   : > { %v8594_v44 = vmax.f32 %v8562_v6, 0.0  ;;  %v8563_v33 = vadd.f32 %v16788_v15, %v8524_v30  ;;  %10446 = vmatmul.mubr.bf16.gmra.mrb[228].mxu1 %v16934_v54  ;;  %10300 = vmatprep.mubr.bf16.mxu0 %v16866_v18  ;;  %v16977_v48 = vpack.c.bf16 %v8839_v55, %v8838_v49  ;;  %v8774_v6 = vld [vmem:[#allocation2 + $0xda] sm:$0xff]  ;;  %v8841_v30 = vld [vmem:[#allocation2 + $0x110] sm:$0xff] }
 0x6c0   : > { %v8592_v22 = vmax.f32 %v8560_v60, 0.0  ;;  %v8561_v16 = vadd.f32 %v16788_v15, %v8522_v28  ;;  %v12971_v43 = vpop.f32.mrb[176].mxu0  ;;  %10453 = vmatprep.mubr.bf16.mxu1 %v16945_v51  ;;  %v16956_v15 = vpack.c.bf16 %v8769_v53, %v8768_v12  ;;  %v8840_v60 = vld [vmem:[#allocation2 + $0x108] sm:$0xff]  ;;  %v8846_v63 = vld [vmem:[#allocation2 + $0x150] sm:$0xff] }
 0x6c1   : > { %8626 = vst [vmem:[#allocation2 + $0x181] sm:$0xff] %v8594_v44  ;;  %v8595_v1 = vmax.f32 %v8563_v33, 0.0  ;;  %v12972_v4 = vpop.f32.mrb[177].mxu0  ;;  %v16985_v28 = vpack.c.bf16 %v8841_v30, %v8840_v60  ;;  %v8776_v44 = vld [vmem:[#allocation2 + $0xf2] sm:$0xff]  ;;  %v8843_v33 = vld [vmem:[#allocation2 + $0x128] sm:$0xff] }
 0x6c2   : > { %8624 = vst [vmem:[#allocation2 + $0x169] sm:$0xff] %v8592_v22  ;;  %v8593_v58 = vmax.f32 %v8561_v16, 0.0  ;;  %v16952_v11 = vadd.f32 %v12972_v4, %v12971_v43  ;;  %v12974_v57 = vpop.f32.mrb[178].mxu0  ;;  %v8842_v16 = vld [vmem:[#allocation2 + $0x120] sm:$0xff]  ;;  %v8784_v55 = vld [vmem:[#allocation2 + $0x152] sm:$0xff] }
 0x6c3   : > { %8627 = vst [vmem:[#allocation2 + $0x189] sm:$0xff] %v8595_v1  ;;  %v12975_v62 = vpop.f32.mrb[179].mxu0  ;;  %v16993_v43 = vpack.c.bf16 %v8843_v33, %v8842_v16  ;;  %v8778_v1 = vld [vmem:[#allocation2 + $0x10a] sm:$0xff]  ;;  %v8845_v4 = vld [vmem:[#allocation2 + $0x140] sm:$0xff] }
 0x6c4   : > { %8625 = vst [vmem:[#allocation2 + $0x171] sm:$0xff] %v8593_v58  ;;  %v16954_v18 = vadd.f32 %v12975_v62, %v12974_v57  ;;  %v16958_v9 = vpack.c.bf16 %v8593_v58, %v8592_v22  ;;  %v8844_v57 = vld [vmem:[#allocation2 + $0x138] sm:$0xff]  ;;  %v8780_v53 = vld [vmem:[#allocation2 + $0x122] sm:$0xff] }
 0x6c5   : > { %v17001_v12 = vpack.c.bf16 %v8845_v4, %v8844_v57  ;;  %v8847_v62 = vld [vmem:[#allocation2 + $0x158] sm:$0xff]  ;;  %v8885_v60 = vld [vmem:[#allocation2 + $0x21] sm:$0xff] }
 0x6c6   : > { %10301 = vmatmul.mubr.bf16.gmra.mrb[204].mxu0 %v16945_v51  ;;  %v17009_v27 = vpack.c.bf16 %v8847_v62, %v8846_v63  ;;  %v8782_v24 = vld [vmem:[#allocation2 + $0x13a] sm:$0xff]  ;;  %v9012_v62 = vld [vmem:[#allocation2 + $0x30] sm:$0xff] }
 0x6c7   : > { %10454 = vmatmul.mubr.bf16.gmra.mrb[232].mxu1 %v16956_v15  ;;  %10308 = vmatprep.mubr.bf16.mxu0 %v16868_v2  ;;  %v8773_v2 = vld [vmem:[#allocation2 + $0xca] sm:$0xff]  ;;  %v9077_v33 = vld [vmem:[#allocation2 + $0x39] sm:$0xff] }
 0x6c8   : > { %10461 = vmatprep.mubr.bf16.mxu1 %v16961_v17  ;;  %v16974_v29 = vpack.c.bf16 %v8773_v2, %v8772_v59  ;;  %v14236_v4 = vld [vmem:[#allocation13 + $0x208] sm:$0xff]  }
 0x6c9   : > { %v8848_v59 = vld [vmem:[#allocation2 + $0x168] sm:$0xff] }
 0x6ca   : > { %v8851_v49 = vld [vmem:[#allocation2 + $0x188] sm:$0xff] }
 0x6cb   : > { %v8849_v46 = vld [vmem:[#allocation2 + $0x170] sm:$0xff] }
 0x6cc   : > { %v17017_v2 = vpack.c.bf16 %v8849_v46, %v8848_v59  ;;  %v9080_v59 = vld [vmem:[#allocation2 + $0x61] sm:$0xff] }
 0x6ce   : > { %10309 = vmatmul.mubr.bf16.gmra.mrb[208].mxu0 %v16961_v17 }
 0x6cf   : > { %10462 = vmatmul.mubr.bf16.gmra.mrb[236].mxu1 %v16966_v21  ;;  %10316 = vmatprep.mubr.bf16.mxu0 %v16890_v40  ;;  %v8775_v40 = vld [vmem:[#allocation2 + $0xe2] sm:$0xff] }
 0x6d0   : > { %10469 = vmatprep.mubr.bf16.mxu1 %v16969_v35  ;;  %v16982_v31 = vpack.c.bf16 %v8775_v40, %v8774_v6  ;;  %v8850_v40 = vld [vmem:[#allocation2 + $0x180] sm:$0xff] }
 0x6d1   : > { %v17025_v30 = vpack.c.bf16 %v8851_v49, %v8850_v40  ;;  %v14241_v49 = vld [vmem:[#allocation13 + $0x230] sm:$0xff]  }
 0x6d2   : > { %v9082_v40 = vld [vmem:[#allocation2 + $0x79] sm:$0xff] }
 0x6d6   : > { %10317 = vmatmul.mubr.bf16.gmra.mrb[212].mxu0 %v16969_v35 }
 0x6d7   : > { %10470 = vmatmul.mubr.bf16.gmra.mrb[240].mxu1 %v16974_v29  ;;  %10324 = vmatprep.mubr.bf16.mxu0 %v16892_v8  ;;  %v8777_v8 = vld [vmem:[#allocation2 + $0xfa] sm:$0xff] }
 0x6d8   : > { %10477 = vmatprep.mubr.bf16.mxu1 %v16977_v48  ;;  %v16990_v22 = vpack.c.bf16 %v8777_v8, %v8776_v44  ;;  %v8787_v44 = vld [vmem:[#allocation2 + $0x172] sm:$0xff] }
 0x6d9   : > { %v8884_v8 = vld [vmem:[#allocation2 + $0x19] sm:$0xff] }
 0x6da   : > { %v9496_v16 = vpack.c.bf16 %v8885_v60, %v8884_v8  ;;  %v14242_v60 = vld [vmem:[#allocation13 + $0x238] sm:$0xff]   ;;  %v9087_v8 = vld [vmem:[#allocation2 + $0xb1] sm:$0xff] }
 0x6de   : > { %10325 = vmatmul.mubr.bf16.gmra.mrb[216].mxu0 %v16977_v48 }
 0x6df   : > { %10478 = vmatmul.mubr.bf16.gmra.mrb[244].mxu1 %v16982_v31  ;;  %10332 = vmatprep.mubr.bf16.mxu0 %v16914_v19  ;;  %v8779_v19 = vld [vmem:[#allocation2 + $0x112] sm:$0xff] }
 0x6e0   : > { %10485 = vmatprep.mubr.bf16.mxu1 %v16985_v28  ;;  %v16998_v58 = vpack.c.bf16 %v8779_v19, %v8778_v1  ;;  %v9076_v19 = vld [vmem:[#allocation2 + $0x31] sm:$0xff] }
 0x6e1   : > { %v9499_v57 = vpack.c.bf16 %v9077_v33, %v9076_v19  ;;  %v9086_v33 = vld [vmem:[#allocation2 + $0xa9] sm:$0xff] }
 0x6e6   : > { %10333 = vmatmul.mubr.bf16.gmra.mrb[220].mxu0 %v16985_v28 }
 0x6e7   : > { %10486 = vmatmul.mubr.bf16.gmra.mrb[248].mxu1 %v16990_v22  ;;  %10340 = vmatprep.mubr.bf16.mxu0 %v16916_v56  ;;  %v8781_v56 = vld [vmem:[#allocation2 + $0x12a] sm:$0xff] }
 0x6e8   : > { %10493 = vmatprep.mubr.bf16.mxu1 %v16993_v43  ;;  %v17006_v0 = vpack.c.bf16 %v8781_v56, %v8780_v53  ;;  %v9013_v53 = vld [vmem:[#allocation2 + $0x38] sm:$0xff] }
 0x6e9   : > { %v9079_v56 = vld [vmem:[#allocation2 + $0x51] sm:$0xff]  ;;  %v9498_v63 = vpack.c.bf16 %v9013_v53, %v9012_v62 }
 0x6ee   : > { %10341 = vmatmul.mubr.bf16.gmra.mrb[224].mxu0 %v16993_v43 }
 0x6ef   : > { %10494 = vmatmul.mubr.bf16.gmra.mrb[252].mxu1 %v16998_v58  ;;  %10348 = vmatprep.mubr.bf16.mxu0 %v16938_v13  ;;  %v8783_v13 = vld [vmem:[#allocation2 + $0x142] sm:$0xff] }
 0x6f0   : > { %10501 = vmatprep.mubr.bf16.mxu1 %v17001_v12  ;;  %v17014_v36 = vpack.c.bf16 %v8783_v13, %v8782_v24  ;;  %v9078_v24 = vld [vmem:[#allocation2 + $0x49] sm:$0xff] }
 0x6f1   : > { %v14238_v13 = vld [vmem:[#allocation13 + $0x218] sm:$0xff]   ;;  %v9508_v46 = vpack.c.bf16 %v9079_v56, %v9078_v24 }
 0x6f6   : > { %10349 = vmatmul.mubr.bf16.gmra.mrb[228].mxu0 %v17001_v12 }
 0x6f7   : > { %10502 = vmatmul.mubr.bf16.gmra.mrb[0].mxu1 %v17006_v0  ;;  %10356 = vmatprep.mubr.bf16.mxu0 %v16940_v45  ;;  %v8785_v45 = vld [vmem:[#allocation2 + $0x15a] sm:$0xff] }
 0x6f8   : > { %10509 = vmatprep.mubr.bf16.mxu1 %v17009_v27  ;;  %v17022_v6 = vpack.c.bf16 %v8785_v45, %v8784_v55  ;;  %v14240_v55 = vld [vmem:[#allocation13 + $0x228] sm:$0xff]  }
 0x6fe   : > { %10357 = vmatmul.mubr.bf16.gmra.mrb[232].mxu0 %v17009_v27 }
 0x6ff   : > { %10510 = vmatmul.mubr.bf16.gmra.mrb[4].mxu1 %v17014_v36  ;;  %10364 = vmatprep.mubr.bf16.mxu0 %v16958_v9  ;;  %v8786_v9 = vld [vmem:[#allocation2 + $0x16a] sm:$0xff] }
 0x700   : > { %10517 = vmatprep.mubr.bf16.mxu1 %v17017_v2  ;;  %v17030_v1 = vpack.c.bf16 %v8787_v44, %v8786_v9 }
 0x706   : > { %10365 = vmatmul.mubr.bf16.gmra.mrb[236].mxu0 %v17017_v2 }
 0x707   : > { %10518 = vmatmul.mubr.bf16.gmra.mrb[8].mxu1 %v17022_v6  ;;  %10566 = vmatprep.mubr.bf16.mxu0 %v16840_v41  ;;  %v14237_v41 = vld [vmem:[#allocation13 + $0x210] sm:$0xff]  }
 0x708   : > { %10525 = vmatprep.mubr.bf16.mxu1 %v17025_v30 }
 0x70e   : > { %10567 = vmatmul.mubr.bf16.vlgmr.msra.gmra.mrb[240].mxu0 %v9496_v16  ;;  %v9544_v16 = vpack.c.bf16 %v9087_v8, %v9086_v33 }
 0x70f   : > { %10526 = vmatmul.mubr.bf16.gmra.mrb[12].mxu1 %v17030_v1  ;;  %10574 = vmatprep.mubr.bf16.mxu0 %v16862_v42  ;;  %v14239_v42 = vld [vmem:[#allocation13 + $0x220] sm:$0xff]  }
 0x710   : > { %10727 = vmatprep.mubr.bf16.mxu1 %v9499_v57  ;;  %13620 = vmatpush3.bf16.msra.mxu0 %v16816_v10  ;;  %v9081_v10 = vld [vmem:[#allocation2 + $0x69] sm:$0xff] }
 0x711   : > { %13621 = vmatprep.subr.bf16.mxu0 %v14236_v4  ;;  %v9517_v45 = vpack.c.bf16 %v9081_v10, %v9080_v59 }
 0x714   : > { %13622 = vmatpush3.bf16.msra.mxu0 %v14236_v4 }
 0x715   : > { %13623 = vmatprep.subr.bf16.mxu0 %v14237_v41 }
 0x716   : > { %10575 = vmatmul.mubr.bf16.gmra.mrb[244].mxu0 %v9499_v57 }
 0x717   : > { %10728 = vmatmul.mubr.bf16.vlgmr.msra.gmra.mrb[16].mxu1 %v9498_v63  ;;  %10582 = vmatprep.mubr.bf16.mxu0 %v16886_v39  ;;  %v9083_v39 = vld [vmem:[#allocation2 + $0x81] sm:$0xff] }
 0x718   : > { %10735 = vmatprep.mubr.bf16.mxu1 %v9508_v46  ;;  %13624 = vmatpush3.bf16.msra.mxu0 %v14237_v41  ;;  %v9526_v9 = vpack.c.bf16 %v9083_v39, %v9082_v40 }
 0x719   : > { %13625 = vmatprep.subr.bf16.mxu0 %v14238_v13 }
 0x71c   : > { %13626 = vmatpush3.bf16.msra.mxu0 %v14238_v13 }
 0x71d   : > { %13627 = vmatprep.subr.bf16.mxu0 %v14239_v42 }
 0x71e   : > { %10583 = vmatmul.mubr.bf16.gmra.mrb[248].mxu0 %v9508_v46  ;;  %v9101_v46 = vld [vmem:[#allocation2 + $0x159] sm:$0xff] }
 0x71f   : > { %10736 = vmatmul.mubr.bf16.gmra.mrb[20].mxu1 %v16850_v25  ;;  %10590 = vmatprep.mubr.bf16.mxu0 %v16910_v14  ;;  %v9085_v25 = vld [vmem:[#allocation2 + $0x99] sm:$0xff]  ;;  %v9084_v14 = vld [vmem:[#allocation2 + $0x91] sm:$0xff] }
 0x720   : > { %10743 = vmatprep.mubr.bf16.mxu1 %v9517_v45  ;;  %13628 = vmatpush3.bf16.msra.mxu0 %v14239_v42  ;;  %v9535_v44 = vpack.c.bf16 %v9085_v25, %v9084_v14 }
 0x721   : > { %13629 = vmatprep.subr.bf16.mxu0 %v14240_v55 }
 0x724   : > { %13630 = vmatpush3.bf16.msra.mxu0 %v14240_v55 }
 0x725   : > { %13631 = vmatprep.subr.bf16.mxu0 %v14241_v49 }
 0x726   : > { %10591 = vmatmul.mubr.bf16.gmra.mrb[252].mxu0 %v9517_v45  ;;  %v9100_v45 = vld [vmem:[#allocation2 + $0x151] sm:$0xff] }
 0x727   : > { %10744 = vmatmul.mubr.bf16.gmra.mrb[24].mxu1 %v16873_v26  ;;  %10598 = vmatprep.mubr.bf16.mxu0 %v16934_v54  ;;  %v9089_v26 = vld [vmem:[#allocation2 + $0xc9] sm:$0xff]  ;;  %v9088_v54 = vld [vmem:[#allocation2 + $0xc1] sm:$0xff]  ;;  %v9607_v39 = vpack.c.bf16 %v9101_v46, %v9100_v45 }
 0x728   : > { %10751 = vmatprep.mubr.bf16.mxu1 %v9526_v9  ;;  %13632 = vmatpush3.bf16.msra.mxu0 %v14241_v49  ;;  %v9553_v19 = vpack.c.bf16 %v9089_v26, %v9088_v54  ;;  %v9107_v46 = vld [vmem:[#allocation2 + $0x1a1] sm:$0xff] }
 0x729   : > { %13633 = vmatprep.subr.bf16.mxu0 %v14242_v60 }
 0x72c   : > { %13634 = vmatpush3.bf16.msra.mxu0 %v14242_v60 }
 0x72e   : > { %10599 = vmatmul.mubr.bf16.gmra.mrb[0].mxu0 %v9526_v9 }
 0x72f   : > { %10752 = vmatmul.mubr.bf16.gmra.mrb[28].mxu1 %v16897_v34  ;;  %10606 = vmatprep.mubr.bf16.mxu0 %v16956_v15  ;;  %v9091_v34 = vld [vmem:[#allocation2 + $0xe1] sm:$0xff]  ;;  %v9090_v15 = vld [vmem:[#allocation2 + $0xd9] sm:$0xff] }
 0x730   : > { %10759 = vmatprep.mubr.bf16.mxu1 %v9535_v44  ;;  %v9562_v4 = vpack.c.bf16 %v9091_v34, %v9090_v15 }
 0x736   : > { %10607 = vmatmul.mubr.bf16.gmra.mrb[4].mxu0 %v9535_v44  ;;  %v9103_v44 = vld [vmem:[#allocation2 + $0x171] sm:$0xff] }
 0x737   : > { %10760 = vmatmul.mubr.bf16.gmra.mrb[32].mxu1 %v16921_v38  ;;  %10614 = vmatprep.mubr.bf16.mxu0 %v16966_v21  ;;  %v9093_v38 = vld [vmem:[#allocation2 + $0xf9] sm:$0xff]  ;;  %v9092_v21 = vld [vmem:[#allocation2 + $0xf1] sm:$0xff] }
 0x738   : > { %10767 = vmatprep.mubr.bf16.mxu1 %v9544_v16  ;;  %v9571_v57 = vpack.c.bf16 %v9093_v38, %v9092_v21  ;;  %v8978_v21 = vld [vmem:[#allocation2 + $0x182] sm:$0xff] }
 0x73e   : > { %10615 = vmatmul.mubr.bf16.gmra.mrb[8].mxu0 %v9544_v16 }
 0x73f   : > { %10768 = vmatmul.mubr.bf16.gmra.mrb[36].mxu1 %v16945_v51  ;;  %10622 = vmatprep.mubr.bf16.mxu0 %v16974_v29  ;;  %v9095_v51 = vld [vmem:[#allocation2 + $0x111] sm:$0xff]  ;;  %v9094_v29 = vld [vmem:[#allocation2 + $0x109] sm:$0xff] }
 0x740   : > { %10775 = vmatprep.mubr.bf16.mxu1 %v9553_v19  ;;  %v9580_v41 = vpack.c.bf16 %v9095_v51, %v9094_v29 }
 0x746   : > { %10623 = vmatmul.mubr.bf16.gmra.mrb[12].mxu0 %v9553_v19 }
 0x747   : > { %10776 = vmatmul.mubr.bf16.gmra.mrb[40].mxu1 %v16961_v17  ;;  %10630 = vmatprep.mubr.bf16.mxu0 %v16982_v31  ;;  %v9097_v17 = vld [vmem:[#allocation2 + $0x129] sm:$0xff]  ;;  %v9096_v31 = vld [vmem:[#allocation2 + $0x121] sm:$0xff] }
 0x748   : > { %10783 = vmatprep.mubr.bf16.mxu1 %v9562_v4  ;;  %v9589_v53 = vpack.c.bf16 %v9097_v17, %v9096_v31 }
 0x74e   : > { %10631 = vmatmul.mubr.bf16.gmra.mrb[16].mxu0 %v9562_v4 }
 0x74f   : > { %10784 = vmatmul.mubr.bf16.gmra.mrb[44].mxu1 %v16969_v35  ;;  %10638 = vmatprep.mubr.bf16.mxu0 %v16990_v22  ;;  %v9099_v35 = vld [vmem:[#allocation2 + $0x141] sm:$0xff]  ;;  %v9098_v22 = vld [vmem:[#allocation2 + $0x139] sm:$0xff] }
 0x750   : > { %10791 = vmatprep.mubr.bf16.mxu1 %v9571_v57  ;;  %v9598_v56 = vpack.c.bf16 %v9099_v35, %v9098_v22 }
 0x756   : > { %10639 = vmatmul.mubr.bf16.gmra.mrb[20].mxu0 %v9571_v57  ;;  %v8979_v57 = vld [vmem:[#allocation2 + $0x18a] sm:$0xff] }
 0x757   : > { %10792 = vmatmul.mubr.bf16.gmra.mrb[144].mxu1 %v16977_v48  ;;  %10646 = vmatprep.mubr.bf16.mxu0 %v16998_v58 }
 0x758   : > { %10799 = vmatprep.mubr.bf16.mxu1 %v9580_v41 }
 0x75e   : > { %10647 = vmatmul.mubr.bf16.gmra.mrb[24].mxu0 %v9580_v41  ;;  %v9105_v41 = vld [vmem:[#allocation2 + $0x189] sm:$0xff] }
 0x75f   : > { %10800 = vmatmul.mubr.bf16.gmra.mrb[148].mxu1 %v16985_v28  ;;  %10654 = vmatprep.mubr.bf16.mxu0 %v17006_v0  ;;  %v10247_v28 = vadd.f32 %v16106_v32, %v16952_v11 }
 0x760   : > { %10807 = vmatprep.mubr.bf16.mxu1 %v9589_v53 }
 0x766   : > { %10655 = vmatmul.mubr.bf16.gmra.mrb[28].mxu0 %v9589_v53 }
 0x767   : > { %10808 = vmatmul.mubr.bf16.gmra.mrb[152].mxu1 %v16993_v43  ;;  %10662 = vmatprep.mubr.bf16.mxu0 %v17014_v36  ;;  %v10250_v43 = vadd.f32 %v16116_v50, %v16954_v18 }
 0x768   : > { %10815 = vmatprep.mubr.bf16.mxu1 %v9598_v56 }
 0x769   : > { %v12977_v48 = vpop.f32.mrb[180].mxu0 }
 0x76a   : > { %v13083_v58 = vpop.f32.mrb[208].mxu1  ;;  %v12978_v62 = vpop.f32.mrb[181].mxu0 }
 0x76b   : > { %v12979_v63 = vadd.f32 %v12978_v62, %v12977_v48  ;;  %v13084_v24 = vpop.f32.mrb[209].mxu1  ;;  %v12980_v13 = vpop.f32.mrb[182].mxu0 }
 0x76c   : > { %v13085_v0 = vadd.f32 %v13084_v24, %v13083_v58  ;;  %v13086_v42 = vpop.f32.mrb[210].mxu1  ;;  %v12981_v10 = vpop.f32.mrb[183].mxu0 }
 0x76d   : > { %v12982_v59 = vadd.f32 %v12981_v10, %v12980_v13  ;;  %v13087_v55 = vpop.f32.mrb[211].mxu1  ;;  %v10255_v50 = vadd.f32 %v16098_v47, %v12979_v63  ;;  %v9106_v13 = vld [vmem:[#allocation2 + $0x199] sm:$0xff] }
 0x76e   : > { %v17060_v36 = vadd.f32 %v13085_v0, %v10247_v28  ;;  %v13088_v49 = vadd.f32 %v13087_v55, %v13086_v42  ;;  %10663 = vmatmul.mubr.bf16.gmra.mrb[32].mxu0 %v9598_v56  ;;  %v9104_v56 = vld [vmem:[#allocation2 + $0x181] sm:$0xff]  ;;  %v9140_v42 = vld [vmem:[#allocation2 + $0x32] sm:$0xff] }
 0x76f   : > { %10816 = vmatmul.mubr.bf16.gmra.mrb[156].mxu1 %v17001_v12  ;;  %10670 = vmatprep.mubr.bf16.mxu0 %v17022_v6  ;;  %v9102_v12 = vld [vmem:[#allocation2 + $0x169] sm:$0xff]  ;;  %v10258_v6 = vadd.f32 %v16111_v23, %v12982_v59  ;;  %v9625_v63 = vpack.c.bf16 %v9105_v41, %v9104_v56  ;;  %v9141_v10 = vld [vmem:[#allocation2 + $0x3a] sm:$0xff] }
 0x770   : > { %v17064_v40 = vadd.f32 %v13088_v49, %v10250_v43  ;;  %10823 = vmatprep.mubr.bf16.mxu1 %v9607_v39  ;;  %v9616_v34 = vpack.c.bf16 %v9103_v44, %v9102_v12  ;;  %v9144_v12 = vld [vmem:[#allocation2 + $0x62] sm:$0xff] }
 0x771   : > { %v12983_v32 = vpop.f32.mrb[184].mxu0 }
 0x772   : > { %v13089_v11 = vpop.f32.mrb[212].mxu1  ;;  %v12984_v60 = vpop.f32.mrb[185].mxu0 }
 0x773   : > { %v12985_v9 = vadd.f32 %v12984_v60, %v12983_v32  ;;  %v13090_v25 = vpop.f32.mrb[213].mxu1  ;;  %v12986_v14 = vpop.f32.mrb[186].mxu0  ;;  %v9500_v60 = vpack.c.bf16 %v9141_v10, %v9140_v42 }
 0x774   : > { %v13091_v18 = vadd.f32 %v13090_v25, %v13089_v11  ;;  %v13092_v8 = vpop.f32.mrb[214].mxu1  ;;  %v12987_v33 = vpop.f32.mrb[187].mxu0 }
 0x775   : > { %v12988_v16 = vadd.f32 %v12987_v33, %v12986_v14  ;;  %v13093_v26 = vpop.f32.mrb[215].mxu1  ;;  %v10263_v17 = vadd.f32 %v16133_v7, %v12985_v9  ;;  %v9143_v33 = vld [vmem:[#allocation2 + $0x52] sm:$0xff] }
 0x776   : > { %v17068_v54 = vadd.f32 %v13091_v18, %v10255_v50  ;;  %v13094_v19 = vadd.f32 %v13093_v26, %v13092_v8  ;;  %10671 = vmatmul.mubr.bf16.gmra.mrb[36].mxu0 %v9607_v39  ;;  %v9634_v39 = vpack.c.bf16 %v9107_v46, %v9106_v13  ;;  %v9043_v50 = vld [vmem:[#allocation2 + $0x1a0] sm:$0xff]  ;;  %v9142_v8 = vld [vmem:[#allocation2 + $0x4a] sm:$0xff] }
 0x777   : > { %10824 = vmatmul.mubr.bf16.gmra.mrb[160].mxu1 %v17009_v27  ;;  %10678 = vmatprep.mubr.bf16.mxu0 %v17030_v1  ;;  %v17075_v1 = vpack.c.bf16 %v8979_v57, %v8978_v21  ;;  %v10266_v48 = vadd.f32 %v16143_v37, %v12988_v16  ;;  %v9509_v57 = vpack.c.bf16 %v9143_v33, %v9142_v8  ;;  %v17510_v8 = vld [vmem:[#allocation23_spill] sm:$0xff] }
 0x778   : > { %v17072_v15 = vadd.f32 %v13094_v19, %v10258_v6  ;;  %10831 = vmatprep.mubr.bf16.mxu1 %v9616_v34  ;;  %v9145_v6 = vld [vmem:[#allocation2 + $0x6a] sm:$0xff] }
 0x779   : > { %v12989_v47 = vpop.f32.mrb[188].mxu0 }
 0x77a   : > { %v13095_v4 = vpop.f32.mrb[216].mxu1  ;;  %v12990_v38 = vpop.f32.mrb[189].mxu0 }
 0x77b   : > { %v12991_v51 = vadd.f32 %v12990_v38, %v12989_v47  ;;  %v13096_v29 = vpop.f32.mrb[217].mxu1  ;;  %v12992_v23 = vpop.f32.mrb[190].mxu0 }
 0x77c   : > { %v13097_v31 = vadd.f32 %v13096_v29, %v13095_v4  ;;  %v13098_v53 = vpop.f32.mrb[218].mxu1  ;;  %v12993_v35 = vpop.f32.mrb[191].mxu0 }
 0x77d   : > { %v12994_v27 = vadd.f32 %v12993_v35, %v12992_v23  ;;  %v13099_v22 = vpop.f32.mrb[219].mxu1  ;;  %v10271_v45 = vadd.f32 %v16130_v3, %v12991_v51  ;;  %v9042_v3 = vld [vmem:[#allocation2 + $0x198] sm:$0xff]  ;;  %v9518_v23 = vpack.c.bf16 %v9145_v6, %v9144_v12 }
 0x77e   : > { %v17078_v58 = vadd.f32 %v13097_v31, %v10263_v17  ;;  %v13100_v62 = vadd.f32 %v13099_v22, %v13098_v53  ;;  %10679 = vmatmul.mubr.bf16.gmra.mrb[40].mxu0 %v9616_v34  ;;  %v9633_v47 = vpack.c.bf16 %v9043_v50, %v9042_v3 }
 0x77f   : > { %10832 = vmatmul.mubr.bf16.gmra.mrb[164].mxu1 %v17017_v2  ;;  %10686 = vmatprep.mubr.bf16.mxu0 %v17075_v1  ;;  %v10274_v9 = vadd.f32 %v16138_v61, %v12994_v27  ;;  %v9146_v27 = vld [vmem:[#allocation2 + $0x7a] sm:$0xff] }
 0x780   : > { %v17082_v7 = vadd.f32 %v13100_v62, %v10266_v48  ;;  %10839 = vmatprep.mubr.bf16.mxu1 %v9625_v63  ;;  %v9148_v48 = vld [vmem:[#allocation2 + $0x92] sm:$0xff]  ;;  %v9149_v62 = vld [vmem:[#allocation2 + $0x9a] sm:$0xff] }
 0x781   : > { %v12995_v24 = vpop.f32.mrb[192].mxu0 }
 0x782   : > { %v13101_v28 = vpop.f32.mrb[220].mxu1  ;;  %v12996_v0 = vpop.f32.mrb[193].mxu0 }
 0x783   : > { %v12997_v37 = vadd.f32 %v12996_v0, %v12995_v24  ;;  %v13102_v59 = vpop.f32.mrb[221].mxu1  ;;  %v12998_v55 = vpop.f32.mrb[194].mxu0 }
 0x784   : > { %v13103_v43 = vadd.f32 %v13102_v59, %v13101_v28  ;;  %v13104_v49 = vpop.f32.mrb[222].mxu1  ;;  %v12999_v2 = vpop.f32.mrb[195].mxu0  ;;  %v9536_v59 = vpack.c.bf16 %v9149_v62, %v9148_v48 }
 0x785   : > { %v13000_v32 = vadd.f32 %v12999_v2, %v12998_v55  ;;  %v13105_v11 = vpop.f32.mrb[223].mxu1  ;;  %v10279_v4 = vadd.f32 %v16176_v52, %v12997_v37  ;;  %v9147_v52 = vld [vmem:[#allocation2 + $0x82] sm:$0xff]  ;;  %v17509_v55 = vld [vmem:[#allocation21_spill] sm:$0xff] }
 0x786   : > { %v17086_v25 = vadd.f32 %v13103_v43, %v10271_v45  ;;  %v13106_v14 = vadd.f32 %v13105_v11, %v13104_v49  ;;  %10687 = vmatmul.mubr.bf16.gmra.mrb[44].mxu0 %v9625_v63  ;;  %v9527_v42 = vpack.c.bf16 %v9147_v52, %v9146_v27  ;;  %v9151_v11 = vld [vmem:[#allocation2 + $0xb2] sm:$0xff] }
 0x787   : > { %10840 = vmatmul.mubr.bf16.gmra.mrb[168].mxu1 %v17025_v30  ;;  %13635 = vmatprep.mubr.bf16.mxu0 %v9500_v60  ;;  %v10282_v41 = vadd.f32 %v16188_v20, %v13000_v32  ;;  %v9150_v32 = vld [vmem:[#allocation2 + $0xaa] sm:$0xff] }
 0x788   : > { %v17089_v44 = vadd.f32 %v13106_v14, %v10274_v9  ;;  %10847 = vmatprep.mubr.bf16.mxu1 %v9634_v39  ;;  %v9152_v9 = vld [vmem:[#allocation2 + $0xc2] sm:$0xff]  ;;  %v9153_v14 = vld [vmem:[#allocation2 + $0xca] sm:$0xff]  ;;  %v9545_v6 = vpack.c.bf16 %v9151_v11, %v9150_v32 }
 0x789   : > { %v13001_v18 = vpop.f32.mrb[196].mxu0  ;;  %v9160_v11 = vld [vmem:[#allocation2 + $0x122] sm:$0xff] }
 0x78a   : > { %v13107_v16 = vpop.f32.mrb[224].mxu1  ;;  %v13002_v26 = vpop.f32.mrb[197].mxu0 }
 0x78b   : > { %v13003_v61 = vadd.f32 %v13002_v26, %v13001_v18  ;;  %v13108_v19 = vpop.f32.mrb[225].mxu1  ;;  %v13004_v34 = vpop.f32.mrb[198].mxu0 }
 0x78c   : > { %v13109_v30 = vadd.f32 %v13108_v19, %v13107_v16  ;;  %v13110_v38 = vpop.f32.mrb[226].mxu1  ;;  %v13005_v21 = vpop.f32.mrb[199].mxu0 }
 0x78d   : > { %v13006_v51 = vadd.f32 %v13005_v21, %v13004_v34  ;;  %v13111_v29 = vpop.f32.mrb[227].mxu1  ;;  %v10287_v20 = vadd.f32 %v16169_v5, %v13003_v61  ;;  %v9554_v34 = vpack.c.bf16 %v9153_v14, %v9152_v9 }
 0x78e   : > { %v17093_v17 = vadd.f32 %v13109_v30, %v10279_v4  ;;  %v13112_v31 = vadd.f32 %v13111_v29, %v13110_v38  ;;  %13636 = vmatmul.mubr.bf16.vlgmr.msra.gmra.mrb[48].mxu0 %v9509_v57  ;;  %v9155_v29 = vld [vmem:[#allocation2 + $0xe2] sm:$0xff] }
 0x78f   : > { %10848 = vmatmul.mubr.bf16.gmra.mrb[172].mxu1 %v9633_v47  ;;  %13639 = vmatprep.mubr.bf16.mxu0 %v9518_v23  ;;  %v10290_v45 = vadd.f32 %v17509_v55, %v13006_v51  ;;  %v17511_v47 = vld [vmem:[#allocation25_spill] sm:$0xff]  ;;  %v9154_v51 = vld [vmem:[#allocation2 + $0xda] sm:$0xff] }
 0x790   : > { %v17095_v53 = vadd.f32 %v13112_v31, %v10282_v41  ;;  %v9156_v31 = vld [vmem:[#allocation2 + $0xf2] sm:$0xff] }
 0x791   : > { %v13007_v35 = vpop.f32.mrb[200].mxu0 }
 0x792   : > { %v13113_v22 = vpop.f32.mrb[228].mxu1  ;;  %v13008_v56 = vpop.f32.mrb[201].mxu0 }
 0x793   : > { %v13009_v63 = vadd.f32 %v13008_v56, %v13007_v35  ;;  %v13114_v24 = vpop.f32.mrb[229].mxu1  ;;  %v13010_v13 = vpop.f32.mrb[202].mxu0  ;;  %v9157_v35 = vld [vmem:[#allocation2 + $0xfa] sm:$0xff] }
 0x794   : > { %v13115_v46 = vadd.f32 %v13114_v24, %v13113_v22  ;;  %v13116_v28 = vpop.f32.mrb[230].mxu1  ;;  %v13011_v0 = vpop.f32.mrb[203].mxu0  ;;  %v17512_v56 = vld [vmem:[#allocation22_spill] sm:$0xff] }
 0x795   : > { %v13012_v10 = vadd.f32 %v13011_v0, %v13010_v13  ;;  %v13117_v37 = vpop.f32.mrb[231].mxu1  ;;  %v10295_v33 = vadd.f32 %v17510_v8, %v13009_v63  ;;  %v9563_v13 = vpack.c.bf16 %v9155_v29, %v9154_v51  ;;  %v17513_v0 = vld [vmem:[#allocation24_spill] sm:$0xff] }
 0x796   : > { %v17099_v43 = vadd.f32 %v13115_v46, %v10287_v20  ;;  %v13118_v49 = vadd.f32 %v13117_v37, %v13116_v28  ;;  %13640 = vmatmul.mubr.bf16.gmra.mrb[52].mxu0 %v9527_v42  ;;  %v9572_v28 = vpack.c.bf16 %v9157_v35, %v9156_v31  ;;  %v9163_v51 = vld [vmem:[#allocation2 + $0x142] sm:$0xff]  ;;  %v9165_v31 = vld [vmem:[#allocation2 + $0x15a] sm:$0xff] }
 0x797   : > { %13643 = vmatprep.mubr.bf16.mxu0 %v9536_v59  ;;  %v10298_v4 = vadd.f32 %v17511_v47, %v13012_v10 }
 0x798   : > { %v17101_v2 = vadd.f32 %v13118_v49, %v10290_v45  ;;  %v9158_v45 = vld [vmem:[#allocation2 + $0x10a] sm:$0xff]  ;;  %v9159_v49 = vld [vmem:[#allocation2 + $0x112] sm:$0xff] }
 0x799   : > { %v13013_v39 = vpop.f32.mrb[204].mxu0 }
 0x79a   : > { %v13119_v5 = vpop.f32.mrb[232].mxu1  ;;  %v13014_v60 = vpop.f32.mrb[205].mxu0 }
 0x79b   : > { %v13015_v3 = vadd.f32 %v13014_v60, %v13013_v39  ;;  %v13120_v50 = vpop.f32.mrb[233].mxu1  ;;  %v13016_v18 = vpop.f32.mrb[206].mxu0 }
 0x79c   : > { %v13121_v16 = vadd.f32 %v13120_v50, %v13119_v5  ;;  %v13122_v26 = vpop.f32.mrb[234].mxu1  ;;  %v13017_v12 = vpop.f32.mrb[207].mxu0  ;;  %v9161_v5 = vld [vmem:[#allocation2 + $0x12a] sm:$0xff] }
 0x79d   : > { %v13018_v61 = vadd.f32 %v13017_v12, %v13016_v18  ;;  %v13123_v19 = vpop.f32.mrb[235].mxu1  ;;  %v10303_v48 = vadd.f32 %v17512_v56, %v13015_v3  ;;  %v17514_v3 = vld [vmem:[#allocation27_spill] sm:$0xff] }
 0x79e   : > { %v17105_v30 = vadd.f32 %v13121_v16, %v10295_v33  ;;  %v13124_v38 = vadd.f32 %v13123_v19, %v13122_v26  ;;  %13644 = vmatmul.mubr.bf16.gmra.mrb[56].mxu0 %v9545_v6  ;;  %v9581_v16 = vpack.c.bf16 %v9159_v49, %v9158_v45  ;;  %v9590_v6 = vpack.c.bf16 %v9161_v5, %v9160_v11  ;;  %v9166_v49 = vld [vmem:[#allocation2 + $0x16a] sm:$0xff] }
 0x79f   : > { %13647 = vmatprep.mubr.bf16.mxu0 %v9554_v34  ;;  %v10306_v42 = vadd.f32 %v17513_v0, %v13018_v61  ;;  %v17515_v61 = vld [vmem:[#allocation29_spill] sm:$0xff] }
 0x7a0   : > { %v17107_v21 = vadd.f32 %v13124_v38, %v10298_v4 }
 0x7a1   : > { %v13019_v57 = vpop.f32.mrb[208].mxu0 }
 0x7a2   : > { %v13125_v23 = vpop.f32.mrb[236].mxu1  ;;  %v13020_v41 = vpop.f32.mrb[209].mxu0 }
 0x7a3   : > { %v13021_v27 = vadd.f32 %v13020_v41, %v13019_v57  ;;  %v13126_v52 = vpop.f32.mrb[237].mxu1  ;;  %v13022_v22 = vpop.f32.mrb[210].mxu0  ;;  %v9162_v57 = vld [vmem:[#allocation2 + $0x13a] sm:$0xff]  ;;  %v9164_v41 = vld [vmem:[#allocation2 + $0x152] sm:$0xff] }
 0x7a4   : > { %v13127_v62 = vadd.f32 %v13126_v52, %v13125_v23  ;;  %v13128_v63 = vpop.f32.mrb[238].mxu1  ;;  %v13023_v24 = vpop.f32.mrb[211].mxu0 }
 0x7a5   : > { %v13024_v20 = vadd.f32 %v13023_v24, %v13022_v22  ;;  %v13129_v46 = vpop.f32.mrb[239].mxu1  ;;  %v10311_v50 = vadd.f32 %v17514_v3, %v13021_v27  ;;  %v17516_v22 = vld [vmem:[#allocation26_spill] sm:$0xff]  ;;  %v9599_v24 = vpack.c.bf16 %v9163_v51, %v9162_v57 }
 0x7a6   : > { %v17111_v10 = vadd.f32 %v13127_v62, %v10303_v48  ;;  %v13130_v37 = vadd.f32 %v13129_v46, %v13128_v63  ;;  %13648 = vmatmul.mubr.bf16.gmra.mrb[60].mxu0 %v9563_v13  ;;  %v9608_v46 = vpack.c.bf16 %v9165_v31, %v9164_v41 }
 0x7a7   : > { %13651 = vmatprep.mubr.bf16.mxu0 %v9572_v28  ;;  %v10314_v19 = vadd.f32 %v17515_v61, %v13024_v20  ;;  %v17517_v28 = vld [vmem:[#allocation28_spill] sm:$0xff] }
 0x7a8   : > { %v17113_v59 = vadd.f32 %v13130_v37, %v10306_v42 }
 0x7a9   : > { %v13025_v55 = vpop.f32.mrb[212].mxu0 }
 0x7aa   : > { %v13131_v39 = vpop.f32.mrb[240].mxu1  ;;  %v13026_v32 = vpop.f32.mrb[213].mxu0 }
 0x7ab   : > { %v13027_v60 = vadd.f32 %v13026_v32, %v13025_v55  ;;  %v13132_v9 = vpop.f32.mrb[241].mxu1  ;;  %v13028_v14 = vpop.f32.mrb[214].mxu0 }
 0x7ac   : > { %v13133_v18 = vadd.f32 %v13132_v9, %v13131_v39  ;;  %v13134_v8 = vpop.f32.mrb[242].mxu1  ;;  %v13029_v33 = vpop.f32.mrb[215].mxu0  ;;  %v9167_v39 = vld [vmem:[#allocation2 + $0x172] sm:$0xff] }
 0x7ad   : > { %v13030_v26 = vadd.f32 %v13029_v33, %v13028_v14  ;;  %v13135_v12 = vpop.f32.mrb[243].mxu1  ;;  %v10319_v56 = vadd.f32 %v17516_v22, %v13027_v60  ;;  %v17518_v14 = vld [vmem:[#allocation31_spill] sm:$0xff]  ;;  %v9617_v33 = vpack.c.bf16 %v9167_v39, %v9166_v49 }
 0x7ae   : > { %v17117_v34 = vadd.f32 %v13133_v18, %v10311_v50  ;;  %v13136_v47 = vadd.f32 %v13135_v12, %v13134_v8  ;;  %13652 = vmatmul.mubr.bf16.gmra.mrb[64].mxu0 %v9581_v16  ;;  %v17519_v12 = vld [vmem:[#allocation33_spill] sm:$0xff] }
 0x7af   : > { %13655 = vmatprep.mubr.bf16.mxu0 %v9590_v6  ;;  %v10322_v0 = vadd.f32 %v17517_v28, %v13030_v26 }
 0x7b0   : > { %v17119_v4 = vadd.f32 %v13136_v47, %v10314_v19  ;;  %v9170_v47 = vld [vmem:[#allocation2 + $0x19a] sm:$0xff] }
 0x7b1   : > { %v13031_v38 = vpop.f32.mrb[216].mxu0 }
 0x7b2   : > { %v13137_v29 = vpop.f32.mrb[244].mxu1  ;;  %v13032_v23 = vpop.f32.mrb[217].mxu0 }
 0x7b3   : > { %v13033_v35 = vadd.f32 %v13032_v23, %v13031_v38  ;;  %v13138_v27 = vpop.f32.mrb[245].mxu1  ;;  %v13034_v52 = vpop.f32.mrb[218].mxu0  ;;  %v9171_v38 = vld [vmem:[#allocation2 + $0x1a2] sm:$0xff] }
 0x7b4   : > { %v13139_v48 = vadd.f32 %v13138_v27, %v13137_v29  ;;  %v13140_v62 = vpop.f32.mrb[246].mxu1  ;;  %v13035_v63 = vpop.f32.mrb[219].mxu0  ;;  %v9635_v41 = vpack.c.bf16 %v9171_v38, %v9170_v47 }
 0x7b5   : > { %v13036_v13 = vadd.f32 %v13035_v63, %v13034_v52  ;;  %v13141_v20 = vpop.f32.mrb[247].mxu1  ;;  %v10327_v3 = vadd.f32 %v17518_v14, %v13033_v35  ;;  %v17520_v52 = vld [vmem:[#allocation30_spill] sm:$0xff] }
 0x7b6   : > { %v17123_v42 = vadd.f32 %v13139_v48, %v10319_v56  ;;  %v13142_v37 = vadd.f32 %v13141_v20, %v13140_v62  ;;  %13656 = vmatmul.mubr.bf16.gmra.mrb[68].mxu0 %v9599_v24 }
 0x7b7   : > { %13659 = vmatprep.mubr.bf16.mxu0 %v9608_v46  ;;  %v10330_v6 = vadd.f32 %v17519_v12, %v13036_v13  ;;  %v17521_v13 = vld [vmem:[#allocation32_spill] sm:$0xff] }
 0x7b8   : > { %v17125_v55 = vadd.f32 %v13142_v37, %v10322_v0 }
 0x7b9   : > { %v13037_v45 = vpop.f32.mrb[220].mxu0 }
 0x7ba   : > { %v13143_v32 = vpop.f32.mrb[248].mxu1  ;;  %v13038_v11 = vpop.f32.mrb[221].mxu0 }
 0x7bb   : > { %v13039_v5 = vadd.f32 %v13038_v11, %v13037_v45  ;;  %v13144_v60 = vpop.f32.mrb[249].mxu1  ;;  %v13040_v9 = vpop.f32.mrb[222].mxu0  ;;  %v17522_v11 = vld [vmem:[#allocation35_spill] sm:$0xff] }
 0x7bc   : > { %v13145_v50 = vadd.f32 %v13144_v60, %v13143_v32  ;;  %v13146_v18 = vpop.f32.mrb[250].mxu1  ;;  %v13041_v8 = vpop.f32.mrb[223].mxu0 }
 0x7bd   : > { %v13042_v16 = vadd.f32 %v13041_v8, %v13040_v9  ;;  %v13147_v26 = vpop.f32.mrb[251].mxu1  ;;  %v10335_v22 = vadd.f32 %v17520_v52, %v13039_v5 }
 0x7be   : > { %v17129_v61 = vadd.f32 %v13145_v50, %v10327_v3  ;;  %v13148_v19 = vadd.f32 %v13147_v26, %v13146_v18  ;;  %13660 = vmatmul.mubr.bf16.gmra.mrb[72].mxu0 %v9617_v33  ;;  %v17523_v18 = vld [vmem:[#allocation37_spill] sm:$0xff] }
 0x7bf   : > { %13663 = vmatprep.mubr.bf16.mxu0 %v17075_v1  ;;  %v10338_v1 = vadd.f32 %v17521_v13, %v13042_v16 }
 0x7c0   : > { %v17132_v57 = vadd.f32 %v13148_v19, %v10330_v6 }
 0x7c1   : > { %v13043_v51 = vpop.f32.mrb[224].mxu0 }
 0x7c2   : > { %v13149_v29 = vpop.f32.mrb[252].mxu1  ;;  %v13044_v23 = vpop.f32.mrb[225].mxu0 }
 0x7c3   : > { %v13045_v31 = vadd.f32 %v13044_v23, %v13043_v51  ;;  %v13150_v35 = vpop.f32.mrb[253].mxu1  ;;  %v13046_v27 = vpop.f32.mrb[226].mxu0 }
 0x7c4   : > { %v13151_v56 = vadd.f32 %v13150_v35, %v13149_v29  ;;  %v13152_v48 = vpop.f32.mrb[254].mxu1  ;;  %v13047_v62 = vpop.f32.mrb[227].mxu0  ;;  %v17524_v29 = vld [vmem:[#allocation34_spill] sm:$0xff] }
 0x7c5   : > { %v13048_v63 = vadd.f32 %v13047_v62, %v13046_v27  ;;  %v13153_v24 = vpop.f32.mrb[255].mxu1  ;;  %v10343_v5 = vadd.f32 %v17522_v11, %v13045_v31 }
 0x7c6   : > { %v17136_v20 = vadd.f32 %v13151_v56, %v10335_v22  ;;  %v13154_v46 = vadd.f32 %v13153_v24, %v13152_v48  ;;  %13664 = vmatmul.mubr.bf16.gmra.mrb[76].mxu0 %v9635_v41  ;;  %v17525_v22 = vld [vmem:[#allocation36_spill] sm:$0xff] }
 0x7c7   : > { %v10346_v8 = vadd.f32 %v17523_v18, %v13048_v63 }
 0x7c8   : > { %v17138_v28 = vadd.f32 %v13154_v46, %v10338_v1 }
 0x7c9   : > { %v13049_v0 = vpop.f32.mrb[228].mxu0 }
 0x7ca   : > { %v13155_v37 = vpop.f32.mrb[0].mxu1  ;;  %v13050_v45 = vpop.f32.mrb[229].mxu0 }
 0x7cb   : > { %v13051_v49 = vadd.f32 %v13050_v45, %v13049_v0  ;;  %v13156_v39 = vpop.f32.mrb[1].mxu1  ;;  %v13052_v32 = vpop.f32.mrb[230].mxu0  ;;  %v17526_v45 = vld [vmem:[#allocation39_spill] sm:$0xff] }
 0x7cc   : > { %v13157_v60 = vadd.f32 %v13156_v39, %v13155_v37  ;;  %v13158_v9 = vpop.f32.mrb[2].mxu1  ;;  %v13053_v14 = vpop.f32.mrb[231].mxu0 }
 0x7cd   : > { %v13054_v3 = vadd.f32 %v13053_v14, %v13052_v32  ;;  %v13159_v50 = vpop.f32.mrb[3].mxu1  ;;  %v10351_v23 = vadd.f32 %v17524_v29, %v13051_v49 }
 0x7ce   : > { %v17142_v33 = vadd.f32 %v13157_v60, %v10343_v5  ;;  %v13160_v16 = vadd.f32 %v13159_v50, %v13158_v9  ;;  %v17527_v9 = vld [vmem:[#allocation41_spill] sm:$0xff] }
 0x7cf   : > { %v10354_v56 = vadd.f32 %v17525_v22, %v13054_v3 }
 0x7d0   : > { %v17144_v26 = vadd.f32 %v13160_v16, %v10346_v8 }
 0x7d1   : > { %v13055_v12 = vpop.f32.mrb[232].mxu0 }
 0x7d2   : > { %v13161_v6 = vpop.f32.mrb[4].mxu1  ;;  %v13056_v19 = vpop.f32.mrb[233].mxu0 }
 0x7d3   : > { %v13057_v47 = vadd.f32 %v13056_v19, %v13055_v12  ;;  %v13162_v38 = vpop.f32.mrb[5].mxu1  ;;  %v13058_v51 = vpop.f32.mrb[234].mxu0 }
 0x7d4   : > { %v13163_v41 = vadd.f32 %v13162_v38, %v13161_v6  ;;  %v13164_v31 = vpop.f32.mrb[6].mxu1  ;;  %v13059_v35 = vpop.f32.mrb[235].mxu0 }
 0x7d5   : > { %v13060_v27 = vadd.f32 %v13059_v35, %v13058_v51  ;;  %v13165_v52 = vpop.f32.mrb[7].mxu1  ;;  %v10359_v49 = vadd.f32 %v17526_v45, %v13057_v47  ;;  %v17528_v51 = vld [vmem:[#allocation38_spill] sm:$0xff] }
 0x7d6   : > { %v17148_v48 = vadd.f32 %v13163_v41, %v10351_v23  ;;  %v13166_v62 = vadd.f32 %v13165_v52, %v13164_v31  ;;  %v17529_v52 = vld [vmem:[#allocation40_spill] sm:$0xff] }
 0x7d7   : > { %v10362_v14 = vadd.f32 %v17527_v9, %v13060_v27 }
 0x7d8   : > { %v17150_v63 = vadd.f32 %v13166_v62, %v10354_v56 }
 0x7d9   : > { %v13061_v24 = vpop.f32.mrb[236].mxu0 }
 0x7da   : > { %v13167_v13 = vpop.f32.mrb[8].mxu1  ;;  %v13062_v1 = vpop.f32.mrb[237].mxu0 }
 0x7db   : > { %v13063_v46 = vadd.f32 %v13062_v1, %v13061_v24  ;;  %v13168_v0 = vpop.f32.mrb[9].mxu1  ;;  %v13064_v37 = vpop.f32.mrb[238].mxu0 }
 0x7dc   : > { %v13169_v39 = vadd.f32 %v13168_v0, %v13167_v13  ;;  %v13170_v32 = vpop.f32.mrb[10].mxu1  ;;  %v13065_v11 = vpop.f32.mrb[239].mxu0 }
 0x7dd   : > { %v13066_v5 = vadd.f32 %v13065_v11, %v13064_v37  ;;  %v13171_v60 = vpop.f32.mrb[11].mxu1  ;;  %v10367_v47 = vadd.f32 %v17528_v51, %v13063_v46 }
 0x7de   : > { %v17154_v3 = vadd.f32 %v13169_v39, %v10359_v49  ;;  %v13172_v50 = vadd.f32 %v13171_v60, %v13170_v32 }
 0x7df   : > { %v10370_v22 = vadd.f32 %v17529_v52, %v13066_v5 }
 0x7e0   : > { %v17156_v18 = vadd.f32 %v13172_v50, %v10362_v14 }
 0x7e1   : > { %v13195_v8 = vpop.f32.mrb[240].mxu0 }
 0x7e2   : > { %v13173_v16 = vpop.f32.mrb[12].mxu1  ;;  %v13196_v12 = vpop.f32.mrb[241].mxu0 }
 0x7e3   : > { %v13174_v6 = vpop.f32.mrb[13].mxu1  ;;  %v13197_v19 = vadd.f32 %v13196_v12, %v13195_v8  ;;  %v13198_v38 = vpop.f32.mrb[242].mxu0 }
 0x7e4   : > { %v13175_v29 = vadd.f32 %v13174_v6, %v13173_v16  ;;  %v13176_v23 = vpop.f32.mrb[14].mxu1  ;;  %v13199_v41 = vpop.f32.mrb[243].mxu0 }
 0x7e5   : > { %v10569_v31 = vadd.f32 %v13197_v19, %v17060_v36  ;;  %v13177_v35 = vpop.f32.mrb[15].mxu1  ;;  %v13200_v27 = vadd.f32 %v13199_v41, %v13198_v38 }
 0x7e6   : > { %v17161_v56 = vadd.f32 %v13175_v29, %v10367_v47  ;;  %v13178_v62 = vadd.f32 %v13177_v35, %v13176_v23 }
 0x7e7   : > { %v10572_v24 = vadd.f32 %v13200_v27, %v17064_v40 }
 0x7e8   : > { %v17164_v13 = vadd.f32 %v13178_v62, %v10370_v22 }
 0x7e9   : > { %v13201_v1 = vpop.f32.mrb[244].mxu0 }
 0x7ea   : > { %v13307_v0 = vpop.f32.mrb[16].mxu1  ;;  %v13202_v37 = vpop.f32.mrb[245].mxu0 }
 0x7eb   : > { %v13203_v46 = vadd.f32 %v13202_v37, %v13201_v1  ;;  %v13308_v45 = vpop.f32.mrb[17].mxu1  ;;  %v13204_v49 = vpop.f32.mrb[246].mxu0 }
 0x7ec   : > { %v13309_v39 = vadd.f32 %v13308_v45, %v13307_v0  ;;  %v13310_v32 = vpop.f32.mrb[18].mxu1  ;;  %v13205_v36 = vpop.f32.mrb[247].mxu0 }
 0x7ed   : > { %v10577_v11 = vadd.f32 %v13203_v46, %v17068_v54  ;;  %v13206_v60 = vadd.f32 %v13205_v36, %v13204_v49  ;;  %v13311_v5 = vpop.f32.mrb[19].mxu1 }
 0x7ee   : > { %v13312_v9 = vadd.f32 %v13311_v5, %v13310_v32  ;;  %v17167_v14 = vadd.f32 %v13309_v39, %v10569_v31 }
 0x7ef   : > { %v10580_v40 = vadd.f32 %v13206_v60, %v17072_v15 }
 0x7f0   : > { %v17170_v50 = vadd.f32 %v13312_v9, %v10572_v24 }
 0x7f1   : > { %v13207_v8 = vpop.f32.mrb[248].mxu0 }
 0x7f2   : > { %v13313_v16 = vpop.f32.mrb[20].mxu1  ;;  %v13208_v12 = vpop.f32.mrb[249].mxu0 }
 0x7f3   : > { %v13209_v6 = vadd.f32 %v13208_v12, %v13207_v8  ;;  %v13314_v19 = vpop.f32.mrb[21].mxu1  ;;  %v13210_v38 = vpop.f32.mrb[250].mxu0 }
 0x7f4   : > { %v13315_v51 = vadd.f32 %v13314_v19, %v13313_v16  ;;  %v13316_v47 = vpop.f32.mrb[22].mxu1  ;;  %v13211_v29 = vpop.f32.mrb[251].mxu0 }
 0x7f5   : > { %v10585_v54 = vadd.f32 %v13209_v6, %v17078_v58  ;;  %v13212_v23 = vadd.f32 %v13211_v29, %v13210_v38  ;;  %v13317_v41 = vpop.f32.mrb[23].mxu1 }
 0x7f6   : > { %v13318_v35 = vadd.f32 %v13317_v41, %v13316_v47  ;;  %v17173_v31 = vadd.f32 %v13315_v51, %v10577_v11 }
 0x7f7   : > { %v10588_v15 = vadd.f32 %v13212_v23, %v17082_v7 }
 0x7f8   : > { %v17176_v27 = vadd.f32 %v13318_v35, %v10580_v40 }
 0x7f9   : > { %v13213_v52 = vpop.f32.mrb[252].mxu0 }
 0x7fa   : > { %v13319_v22 = vpop.f32.mrb[24].mxu1  ;;  %v13214_v62 = vpop.f32.mrb[253].mxu0 }
 0x7fb   : > { %v13215_v24 = vadd.f32 %v13214_v62, %v13213_v52  ;;  %v13320_v1 = vpop.f32.mrb[25].mxu1  ;;  %v13216_v0 = vpop.f32.mrb[254].mxu0 }
 0x7fc   : > { %v13321_v37 = vadd.f32 %v13320_v1, %v13319_v22  ;;  %v13322_v46 = vpop.f32.mrb[26].mxu1  ;;  %v13217_v45 = vpop.f32.mrb[255].mxu0 }
 0x7fd   : > { %v10593_v58 = vadd.f32 %v13215_v24, %v17086_v25  ;;  %v13218_v49 = vadd.f32 %v13217_v45, %v13216_v0  ;;  %v13323_v39 = vpop.f32.mrb[27].mxu1 }
 0x7fe   : > { %v13324_v32 = vadd.f32 %v13323_v39, %v13322_v46  ;;  %v17179_v36 = vadd.f32 %v13321_v37, %v10585_v54 }
 0x7ff   : > { %v10596_v7 = vadd.f32 %v13218_v49, %v17089_v44 }
 0x800   : > { %v17182_v11 = vadd.f32 %v13324_v32, %v10588_v15 }
 0x801   : > { %v13219_v60 = vpop.f32.mrb[0].mxu0 }
 0x802   : > { %v13325_v5 = vpop.f32.mrb[28].mxu1  ;;  %v13220_v9 = vpop.f32.mrb[1].mxu0 }
 0x803   : > { %v13221_v40 = vadd.f32 %v13220_v9, %v13219_v60  ;;  %v13326_v8 = vpop.f32.mrb[29].mxu1  ;;  %v13222_v16 = vpop.f32.mrb[2].mxu0 }
 0x804   : > { %v13327_v12 = vadd.f32 %v13326_v8, %v13325_v5  ;;  %v13328_v6 = vpop.f32.mrb[30].mxu1  ;;  %v13223_v19 = vpop.f32.mrb[3].mxu0 }
 0x805   : > { %v10601_v25 = vadd.f32 %v13221_v40, %v17093_v17  ;;  %v13224_v38 = vadd.f32 %v13223_v19, %v13222_v16  ;;  %v13329_v51 = vpop.f32.mrb[31].mxu1 }
 0x806   : > { %v13330_v47 = vadd.f32 %v13329_v51, %v13328_v6  ;;  %v17185_v29 = vadd.f32 %v13327_v12, %v10593_v58 }
 0x807   : > { %v10604_v44 = vadd.f32 %v13224_v38, %v17095_v53 }
 0x808   : > { %v17188_v54 = vadd.f32 %v13330_v47, %v10596_v7 }
 0x809   : > { %v13225_v23 = vpop.f32.mrb[4].mxu0 }
 0x80a   : > { %v13331_v41 = vpop.f32.mrb[32].mxu1  ;;  %v13226_v35 = vpop.f32.mrb[5].mxu0 }
 0x80b   : > { %v13227_v15 = vadd.f32 %v13226_v35, %v13225_v23  ;;  %v13332_v52 = vpop.f32.mrb[33].mxu1  ;;  %v13228_v22 = vpop.f32.mrb[6].mxu0 }
 0x80c   : > { %v13333_v62 = vadd.f32 %v13332_v52, %v13331_v41  ;;  %v13334_v24 = vpop.f32.mrb[34].mxu1  ;;  %v13229_v1 = vpop.f32.mrb[7].mxu0 }
 0x80d   : > { %v10609_v17 = vadd.f32 %v13227_v15, %v17099_v43  ;;  %v13230_v0 = vadd.f32 %v13229_v1, %v13228_v22  ;;  %v13335_v37 = vpop.f32.mrb[35].mxu1 }
 0x80e   : > { %v13336_v46 = vadd.f32 %v13335_v37, %v13334_v24  ;;  %v17191_v45 = vadd.f32 %v13333_v62, %v10601_v25 }
 0x80f   : > { %v10612_v53 = vadd.f32 %v13230_v0, %v17101_v2 }
 0x810   : > { %v17194_v58 = vadd.f32 %v13336_v46, %v10604_v44 }
 0x811   : > { %v13231_v49 = vpop.f32.mrb[8].mxu0 }
 0x812   : > { %v13337_v39 = vpop.f32.mrb[36].mxu1  ;;  %v13232_v32 = vpop.f32.mrb[9].mxu0 }
 0x813   : > { %v13233_v7 = vadd.f32 %v13232_v32, %v13231_v49  ;;  %v13338_v60 = vpop.f32.mrb[37].mxu1  ;;  %v13234_v5 = vpop.f32.mrb[10].mxu0 }
 0x814   : > { %v13339_v9 = vadd.f32 %v13338_v60, %v13337_v39  ;;  %v13340_v40 = vpop.f32.mrb[38].mxu1  ;;  %v13235_v8 = vpop.f32.mrb[11].mxu0 }
 0x815   : > { %v10617_v43 = vadd.f32 %v13233_v7, %v17105_v30  ;;  %v13236_v16 = vadd.f32 %v13235_v8, %v13234_v5  ;;  %v13341_v12 = vpop.f32.mrb[39].mxu1 }
 0x816   : > { %v13342_v6 = vadd.f32 %v13341_v12, %v13340_v40  ;;  %v17197_v19 = vadd.f32 %v13339_v9, %v10609_v17 }
 0x817   : > { %v10620_v2 = vadd.f32 %v13236_v16, %v17107_v21 }
 0x818   : > { %v17200_v25 = vadd.f32 %v13342_v6, %v10612_v53 }
 0x819   : > { %v13237_v38 = vpop.f32.mrb[12].mxu0 }
 0x81a   : > { %v13343_v51 = vpop.f32.mrb[40].mxu1  ;;  %v13238_v47 = vpop.f32.mrb[13].mxu0 }
 0x81b   : > { %v13239_v44 = vadd.f32 %v13238_v47, %v13237_v38  ;;  %v13344_v23 = vpop.f32.mrb[41].mxu1  ;;  %v13240_v41 = vpop.f32.mrb[14].mxu0 }
 0x81c   : > { %v13345_v35 = vadd.f32 %v13344_v23, %v13343_v51  ;;  %v13346_v15 = vpop.f32.mrb[42].mxu1  ;;  %v13241_v52 = vpop.f32.mrb[15].mxu0 }
 0x81d   : > { %v10625_v30 = vadd.f32 %v13239_v44, %v17111_v10  ;;  %v13242_v22 = vadd.f32 %v13241_v52, %v13240_v41  ;;  %v13347_v62 = vpop.f32.mrb[43].mxu1 }
 0x81e   : > { %v13348_v24 = vadd.f32 %v13347_v62, %v13346_v15  ;;  %v17203_v1 = vadd.f32 %v13345_v35, %v10617_v43 }
 0x81f   : > { %v10628_v21 = vadd.f32 %v13242_v22, %v17113_v59 }
 0x820   : > { %v17206_v17 = vadd.f32 %v13348_v24, %v10620_v2 }
 0x821   : > { %v13243_v0 = vpop.f32.mrb[16].mxu0 }
 0x822   : > { %v13349_v37 = vpop.f32.mrb[44].mxu1  ;;  %v13244_v46 = vpop.f32.mrb[17].mxu0 }
 0x823   : > { %v13245_v53 = vadd.f32 %v13244_v46, %v13243_v0  ;;  %v13350_v49 = vpop.f32.mrb[45].mxu1  ;;  %v13246_v39 = vpop.f32.mrb[18].mxu0 }
 0x824   : > { %v13351_v32 = vadd.f32 %v13350_v49, %v13349_v37  ;;  %v13352_v7 = vpop.f32.mrb[46].mxu1  ;;  %v13247_v60 = vpop.f32.mrb[19].mxu0 }
 0x825   : > { %v10633_v10 = vadd.f32 %v13245_v53, %v17117_v34  ;;  %v13248_v5 = vadd.f32 %v13247_v60, %v13246_v39  ;;  %v13353_v9 = vpop.f32.mrb[47].mxu1 }
 0x826   : > { %v13354_v40 = vadd.f32 %v13353_v9, %v13352_v7  ;;  %v17209_v8 = vadd.f32 %v13351_v32, %v10625_v30 }
 0x827   : > { %v10636_v59 = vadd.f32 %v13248_v5, %v17119_v4 }
 0x828   : > { %v17212_v43 = vadd.f32 %v13354_v40, %v10628_v21 }
 0x829   : > { %v13249_v16 = vpop.f32.mrb[20].mxu0 }
 0x82a   : > { %v13355_v12 = vpop.f32.mrb[144].mxu1  ;;  %v13250_v6 = vpop.f32.mrb[21].mxu0 }
 0x82b   : > { %v13251_v2 = vadd.f32 %v13250_v6, %v13249_v16  ;;  %v13356_v38 = vpop.f32.mrb[145].mxu1  ;;  %v13252_v51 = vpop.f32.mrb[22].mxu0 }
 0x82c   : > { %v13357_v47 = vadd.f32 %v13356_v38, %v13355_v12  ;;  %v13358_v44 = vpop.f32.mrb[146].mxu1  ;;  %v13253_v23 = vpop.f32.mrb[23].mxu0 }
 0x82d   : > { %v10641_v34 = vadd.f32 %v13251_v2, %v17123_v42  ;;  %v13254_v41 = vadd.f32 %v13253_v23, %v13252_v51  ;;  %v13359_v35 = vpop.f32.mrb[147].mxu1 }
 0x82e   : > { %v13360_v15 = vadd.f32 %v13359_v35, %v13358_v44  ;;  %v17215_v52 = vadd.f32 %v13357_v47, %v10633_v10 }
 0x82f   : > { %v10644_v4 = vadd.f32 %v13254_v41, %v17125_v55 }
 0x830   : > { %v17218_v30 = vadd.f32 %v13360_v15, %v10636_v59 }
 0x831   : > { %v13255_v22 = vpop.f32.mrb[24].mxu0 }
 0x832   : > { %v13361_v62 = vpop.f32.mrb[148].mxu1  ;;  %v13256_v24 = vpop.f32.mrb[25].mxu0 }
 0x833   : > { %v13257_v21 = vadd.f32 %v13256_v24, %v13255_v22  ;;  %v13362_v0 = vpop.f32.mrb[149].mxu1  ;;  %v13258_v37 = vpop.f32.mrb[26].mxu0 }
 0x834   : > { %v13363_v46 = vadd.f32 %v13362_v0, %v13361_v62  ;;  %v13364_v53 = vpop.f32.mrb[150].mxu1  ;;  %v13259_v49 = vpop.f32.mrb[27].mxu0 }
 0x835   : > { %v10649_v42 = vadd.f32 %v13257_v21, %v17129_v61  ;;  %v13260_v39 = vadd.f32 %v13259_v49, %v13258_v37  ;;  %v13365_v32 = vpop.f32.mrb[151].mxu1 }
 0x836   : > { %v13366_v7 = vadd.f32 %v13365_v32, %v13364_v53  ;;  %v17221_v60 = vadd.f32 %v13363_v46, %v10641_v34 }
 0x837   : > { %v10652_v55 = vadd.f32 %v13260_v39, %v17132_v57 }
 0x838   : > { %v17224_v10 = vadd.f32 %v13366_v7, %v10644_v4 }
 0x839   : > { %v13261_v5 = vpop.f32.mrb[28].mxu0 }
 0x83a   : > { %v13367_v9 = vpop.f32.mrb[152].mxu1  ;;  %v13262_v40 = vpop.f32.mrb[29].mxu0 }
 0x83b   : > { %v13263_v59 = vadd.f32 %v13262_v40, %v13261_v5  ;;  %v13368_v16 = vpop.f32.mrb[153].mxu1  ;;  %v13264_v12 = vpop.f32.mrb[30].mxu0 }
 0x83c   : > { %v13369_v6 = vadd.f32 %v13368_v16, %v13367_v9  ;;  %v13370_v2 = vpop.f32.mrb[154].mxu1  ;;  %v13265_v38 = vpop.f32.mrb[31].mxu0 }
 0x83d   : > { %v10657_v61 = vadd.f32 %v13263_v59, %v17136_v20  ;;  %v13266_v51 = vadd.f32 %v13265_v38, %v13264_v12  ;;  %v13371_v47 = vpop.f32.mrb[155].mxu1 }
 0x83e   : > { %v13372_v44 = vadd.f32 %v13371_v47, %v13370_v2  ;;  %v17227_v23 = vadd.f32 %v13369_v6, %v10649_v42 }
 0x83f   : > { %v10660_v57 = vadd.f32 %v13266_v51, %v17138_v28 }
 0x840   : > { %v17230_v34 = vadd.f32 %v13372_v44, %v10652_v55 }
 0x841   : > { %v13267_v41 = vpop.f32.mrb[32].mxu0 }
 0x842   : > { %v13373_v35 = vpop.f32.mrb[156].mxu1  ;;  %v13268_v15 = vpop.f32.mrb[33].mxu0 }
 0x843   : > { %v13269_v4 = vadd.f32 %v13268_v15, %v13267_v41  ;;  %v13374_v22 = vpop.f32.mrb[157].mxu1  ;;  %v13270_v62 = vpop.f32.mrb[34].mxu0 }
 0x844   : > { %v13375_v24 = vadd.f32 %v13374_v22, %v13373_v35  ;;  %v13376_v21 = vpop.f32.mrb[158].mxu1  ;;  %v13271_v0 = vpop.f32.mrb[35].mxu0 }
 0x845   : > { %v10665_v20 = vadd.f32 %v13269_v4, %v17142_v33  ;;  %v13272_v37 = vadd.f32 %v13271_v0, %v13270_v62  ;;  %v13377_v46 = vpop.f32.mrb[159].mxu1 }
 0x846   : > { %v13378_v53 = vadd.f32 %v13377_v46, %v13376_v21  ;;  %v17233_v49 = vadd.f32 %v13375_v24, %v10657_v61 }
 0x847   : > { %v10668_v28 = vadd.f32 %v13272_v37, %v17144_v26 }
 0x848   : > { %v17236_v42 = vadd.f32 %v13378_v53, %v10660_v57 }
 0x849   : > { %v13273_v39 = vpop.f32.mrb[36].mxu0 }
 0x84a   : > { %v13379_v32 = vpop.f32.mrb[160].mxu1  ;;  %v13274_v7 = vpop.f32.mrb[37].mxu0 }
 0x84b   : > { %v13275_v55 = vadd.f32 %v13274_v7, %v13273_v39  ;;  %v13380_v5 = vpop.f32.mrb[161].mxu1  ;;  %v13276_v9 = vpop.f32.mrb[38].mxu0 }
 0x84c   : > { %v13381_v40 = vadd.f32 %v13380_v5, %v13379_v32  ;;  %v13382_v59 = vpop.f32.mrb[162].mxu1  ;;  %v13277_v16 = vpop.f32.mrb[39].mxu0 }
 0x84d   : > { %v10673_v33 = vadd.f32 %v13275_v55, %v17148_v48  ;;  %v13278_v12 = vadd.f32 %v13277_v16, %v13276_v9  ;;  %v13383_v6 = vpop.f32.mrb[163].mxu1 }
 0x84e   : > { %v13384_v2 = vadd.f32 %v13383_v6, %v13382_v59  ;;  %v17239_v38 = vadd.f32 %v13381_v40, %v10665_v20 }
 0x84f   : > { %v10676_v26 = vadd.f32 %v13278_v12, %v17150_v63 }
 0x850   : > { %v17242_v61 = vadd.f32 %v13384_v2, %v10668_v28 }
 0x851   : > { %v13279_v51 = vpop.f32.mrb[40].mxu0 }
 0x852   : > { %v13385_v47 = vpop.f32.mrb[164].mxu1  ;;  %v13280_v44 = vpop.f32.mrb[41].mxu0 }
 0x853   : > { %v13281_v57 = vadd.f32 %v13280_v44, %v13279_v51  ;;  %v13386_v41 = vpop.f32.mrb[165].mxu1  ;;  %v13282_v35 = vpop.f32.mrb[42].mxu0 }
 0x854   : > { %v13387_v15 = vadd.f32 %v13386_v41, %v13385_v47  ;;  %v13388_v4 = vpop.f32.mrb[166].mxu1  ;;  %v13283_v22 = vpop.f32.mrb[43].mxu0 }
 0x855   : > { %v10681_v48 = vadd.f32 %v13281_v57, %v17154_v3  ;;  %v13284_v62 = vadd.f32 %v13283_v22, %v13282_v35  ;;  %v13389_v24 = vpop.f32.mrb[167].mxu1 }
 0x856   : > { %v13390_v21 = vadd.f32 %v13389_v24, %v13388_v4  ;;  %v17245_v0 = vadd.f32 %v13387_v15, %v10673_v33 }
 0x857   : > { %v10684_v63 = vadd.f32 %v13284_v62, %v17156_v18 }
 0x858   : > { %v17248_v20 = vadd.f32 %v13390_v21, %v10676_v26 }
 0x859   : > { %v13285_v37 = vpop.f32.mrb[44].mxu0 }
 0x85a   : > { %v13391_v46 = vpop.f32.mrb[168].mxu1  ;;  %v13286_v53 = vpop.f32.mrb[45].mxu0 }
 0x85b   : > { %v13287_v28 = vadd.f32 %v13286_v53, %v13285_v37  ;;  %v13392_v39 = vpop.f32.mrb[169].mxu1  ;;  %v13288_v32 = vpop.f32.mrb[46].mxu0 }
 0x85c   : > { %v13393_v7 = vadd.f32 %v13392_v39, %v13391_v46  ;;  %v13394_v55 = vpop.f32.mrb[170].mxu1  ;;  %v13289_v5 = vpop.f32.mrb[47].mxu0 }
 0x85d   : > { %v10689_v3 = vadd.f32 %v13287_v28, %v17161_v56  ;;  %v13290_v9 = vadd.f32 %v13289_v5, %v13288_v32  ;;  %v13395_v40 = vpop.f32.mrb[171].mxu1 }
 0x85e   : > { %v13396_v59 = vadd.f32 %v13395_v40, %v13394_v55  ;;  %v17251_v16 = vadd.f32 %v13393_v7, %v10681_v48 }
 0x85f   : > { %v10692_v18 = vadd.f32 %v13290_v9, %v17164_v13 }
 0x860   : > { %v17254_v33 = vadd.f32 %v13396_v59, %v10684_v63 }
 0x861   : > { %v13637_v12 = vpop.f32.mrb[48].mxu0 }
 0x862   : > { %v13397_v6 = vpop.f32.mrb[172].mxu1  ;;  %v10899_v2 = vadd.f32 %v13637_v12, %v17173_v31  ;;  %v10890_v26 = vpop.f32.mrb[49].mxu0 }
 0x863   : > { %v13398_v51 = vpop.f32.mrb[173].mxu1  ;;  %v10891_v56 = vadd.f32 %v10890_v26, %v17167_v14  ;;  %v13638_v47 = vpop.f32.mrb[50].mxu0 }
 0x864   : > { %11019 = vst [vmem:[%s14883_s20 + $0x10] sm:$0xff] %v10899_v2  ;;  %v13399_v44 = vadd.f32 %v13398_v51, %v13397_v6  ;;  %v13400_v57 = vpop.f32.mrb[174].mxu1  ;;  %v10902_v41 = vadd.f32 %v13638_v47, %v17176_v27  ;;  %v10893_v13 = vpop.f32.mrb[51].mxu0 }
 0x865   : > { %11017 = vst [vmem:[%s14883_s20] sm:$0xff] %v10891_v56  ;;  %v13401_v35 = vpop.f32.mrb[175].mxu1  ;;  %v10894_v15 = vadd.f32 %v10893_v13, %v17170_v50 }
 0x866   : > { %11020 = vst [vmem:[%s14883_s20 + $0x18] sm:$0xff] %v10902_v41  ;;  %v13402_v31 = vadd.f32 %v13401_v35, %v13400_v57  ;;  %v17263_v4 = vadd.f32 %v13399_v44, %v10689_v3 }
 0x867   : > { %11018 = vst [vmem:[%s14883_s20 + $0x8] sm:$0xff] %v10894_v15 }
 0x868   : > { %v17266_v14 = vadd.f32 %v13402_v31, %v10692_v18 }
 0x869   : > { %v13641_v22 = vpop.f32.mrb[52].mxu0 }
 0x86a   : > { %v10915_v48 = vadd.f32 %v13641_v22, %v17185_v29  ;;  %v10906_v27 = vpop.f32.mrb[53].mxu0 }
 0x86b   : > { %v10907_v62 = vadd.f32 %v10906_v27, %v17179_v36  ;;  %v13642_v24 = vpop.f32.mrb[54].mxu0 }
 0x86c   : > { %11023 = vst [vmem:[%s14883_s20 + $0x30] sm:$0xff] %v10915_v48  ;;  %v10918_v50 = vadd.f32 %v13642_v24, %v17188_v54  ;;  %v10909_v21 = vpop.f32.mrb[55].mxu0 }
 0x86d   : > { %11021 = vst [vmem:[%s14883_s20 + $0x20] sm:$0xff] %v10907_v62  ;;  %v10910_v63 = vadd.f32 %v10909_v21, %v17182_v11 }
 0x86e   : > { %11024 = vst [vmem:[%s14883_s20 + $0x38] sm:$0xff] %v10918_v50 }
 0x86f   : > { %11022 = vst [vmem:[%s14883_s20 + $0x28] sm:$0xff] %v10910_v63 }
 0x871   : > { %v13645_v37 = vpop.f32.mrb[56].mxu0 }
 0x872   : > { %v10931_v29 = vadd.f32 %v13645_v37, %v17197_v19  ;;  %v10922_v46 = vpop.f32.mrb[57].mxu0 }
 0x873   : > { %v10923_v36 = vadd.f32 %v10922_v46, %v17191_v45  ;;  %v13646_v53 = vpop.f32.mrb[58].mxu0 }
 0x874   : > { %11027 = vst [vmem:[%s14883_s20 + $0x50] sm:$0xff] %v10931_v29  ;;  %v10934_v54 = vadd.f32 %v13646_v53, %v17200_v25  ;;  %v10925_v28 = vpop.f32.mrb[59].mxu0 }
 0x875   : > { %11025 = vst [vmem:[%s14883_s20 + $0x40] sm:$0xff] %v10923_v36  ;;  %v10926_v11 = vadd.f32 %v10925_v28, %v17194_v58 }
 0x876   : > { %11028 = vst [vmem:[%s14883_s20 + $0x58] sm:$0xff] %v10934_v54 }
 0x877   : > { %11026 = vst [vmem:[%s14883_s20 + $0x48] sm:$0xff] %v10926_v11 }
 0x879   : > { %v13649_v39 = vpop.f32.mrb[60].mxu0 }
 0x87a   : > { %v10947_v19 = vadd.f32 %v13649_v39, %v17209_v8  ;;  %v10938_v32 = vpop.f32.mrb[61].mxu0 }
 0x87b   : > { %v10939_v45 = vadd.f32 %v10938_v32, %v17203_v1  ;;  %v13650_v7 = vpop.f32.mrb[62].mxu0 }
 0x87c   : > { %11031 = vst [vmem:[%s14883_s20 + $0x70] sm:$0xff] %v10947_v19  ;;  %v10950_v25 = vadd.f32 %v13650_v7, %v17212_v43  ;;  %v10941_v55 = vpop.f32.mrb[63].mxu0 }
 0x87d   : > { %11029 = vst [vmem:[%s14883_s20 + $0x60] sm:$0xff] %v10939_v45  ;;  %v10942_v58 = vadd.f32 %v10941_v55, %v17206_v17 }
 0x87e   : > { %11032 = vst [vmem:[%s14883_s20 + $0x78] sm:$0xff] %v10950_v25 }
 0x87f   : > { %11030 = vst [vmem:[%s14883_s20 + $0x68] sm:$0xff] %v10942_v58 }
 0x881   : > { %v13653_v5 = vpop.f32.mrb[64].mxu0 }
 0x882   : > { %v10963_v8 = vadd.f32 %v13653_v5, %v17221_v60  ;;  %v10954_v3 = vpop.f32.mrb[65].mxu0 }
 0x883   : > { %v10955_v1 = vadd.f32 %v10954_v3, %v17215_v52  ;;  %v13654_v9 = vpop.f32.mrb[66].mxu0 }
 0x884   : > { %11035 = vst [vmem:[%s14883_s20 + $0x90] sm:$0xff] %v10963_v8  ;;  %v10966_v43 = vadd.f32 %v13654_v9, %v17224_v10  ;;  %v10957_v40 = vpop.f32.mrb[67].mxu0 }
 0x885   : > { %11033 = vst [vmem:[%s14883_s20 + $0x80] sm:$0xff] %v10955_v1  ;;  %v10958_v17 = vadd.f32 %v10957_v40, %v17218_v30 }
 0x886   : > { %11036 = vst [vmem:[%s14883_s20 + $0x98] sm:$0xff] %v10966_v43 }
 0x887   : > { %11034 = vst [vmem:[%s14883_s20 + $0x88] sm:$0xff] %v10958_v17 }
 0x889   : > { %v13657_v59 = vpop.f32.mrb[68].mxu0 }
 0x88a   : > { %v10979_v60 = vadd.f32 %v13657_v59, %v17233_v49  ;;  %v10970_v18 = vpop.f32.mrb[69].mxu0 }
 0x88b   : > { %v10971_v52 = vadd.f32 %v10970_v18, %v17227_v23  ;;  %v13658_v12 = vpop.f32.mrb[70].mxu0 }
 0x88c   : > { %11039 = vst [vmem:[%s14883_s20 + $0xb0] sm:$0xff] %v10979_v60  ;;  %v10982_v10 = vadd.f32 %v13658_v12, %v17236_v42  ;;  %v10973_v6 = vpop.f32.mrb[71].mxu0 }
 0x88d   : > { %11037 = vst [vmem:[%s14883_s20 + $0xa0] sm:$0xff] %v10971_v52  ;;  %v10974_v30 = vadd.f32 %v10973_v6, %v17230_v34 }
 0x88e   : > { %11040 = vst [vmem:[%s14883_s20 + $0xb8] sm:$0xff] %v10982_v10 }
 0x88f   : > { %11038 = vst [vmem:[%s14883_s20 + $0xa8] sm:$0xff] %v10974_v30 }
 0x891   : > { %v13661_v49 = vpop.f32.mrb[72].mxu0 }
 0x892   : > { %v10995_v2 = vadd.f32 %v13661_v49, %v17245_v0  ;;  %v10986_v26 = vpop.f32.mrb[73].mxu0 }
 0x893   : > { %v10987_v23 = vadd.f32 %v10986_v26, %v17239_v38  ;;  %v13662_v51 = vpop.f32.mrb[74].mxu0 }
 0x894   : > { %11043 = vst [vmem:[%s14883_s20 + $0xd0] sm:$0xff] %v10995_v2  ;;  %v10998_v42 = vadd.f32 %v13662_v51, %v17248_v20  ;;  %v10989_v56 = vpop.f32.mrb[75].mxu0 }
 0x895   : > { %11041 = vst [vmem:[%s14883_s20 + $0xc0] sm:$0xff] %v10987_v23  ;;  %v10990_v34 = vadd.f32 %v10989_v56, %v17242_v61 }
 0x896   : > { %11044 = vst [vmem:[%s14883_s20 + $0xd8] sm:$0xff] %v10998_v42 }
 0x897   : > { %11042 = vst [vmem:[%s14883_s20 + $0xc8] sm:$0xff] %v10990_v34 }
 0x899   : > { %v13665_v47 = vpop.f32.mrb[76].mxu0 }
 0x89a   : > { %v11011_v38 = vadd.f32 %v13665_v47, %v17263_v4  ;;  %v11002_v0 = vpop.f32.mrb[77].mxu0 }
 0x89b   : > { %v11003_v44 = vadd.f32 %v11002_v0, %v17251_v16  ;;  %v13666_v20 = vpop.f32.mrb[78].mxu0 }
 0x89c   : > { %11047 = vst [vmem:[%s14883_s20 + $0xf0] sm:$0xff] %v11011_v38  ;;  %v11014_v57 = vadd.f32 %v13666_v20, %v17266_v14  ;;  %v11005_v41 = vpop.f32.mrb[79].mxu0 }
 0x89d   : > { %11045 = vst [vmem:[%s14883_s20 + $0xe0] sm:$0xff] %v11003_v44  ;;  %v11006_v61 = vadd.f32 %v11005_v41, %v17254_v33 }
 0x89e   : > { %11048 = vst [vmem:[%s14883_s20 + $0xf8] sm:$0xff] %v11014_v57 }
 0x89f   : > { %11046 = vst [vmem:[%s14883_s20 + $0xe8] sm:$0xff] %v11006_v61 }
 0x8a0   : > { %14458 = shalt.err (!%p14455_p7)
}
 0x8a1   : > { %s14459_s20 = scalar_lea.hbm %s17325_s9, 4096  ;;  %s14463_s14 = scalar_lea.hbm %s17530_s22, 8192 }
 0x8a2   : > { %p14460_p5 = scmp.ne.s32.totalorder %s17325_s9, %s14459_s20  ;;  %p14464_p6 = scmp.lt.u32.totalorder %s17325_s9, %s17530_s22 }
 0x8a3   : > { %p14465_p10 = scmp.lt.u32.totalorder %s14463_s14, %s14459_s20  ;;  %p14467_p3 = scmp.lt.u32.totalorder %s14459_s20, %s17325_s9 }
 0x8a4   : > { %p14461_p11 = pnand %p14460_p5, %p17531_p12 }
 0x8a5   : > { %p14466_p8 = por %p14465_p10, %p14464_p6 }
 0x8a6   : > { %p14462_p4 = pneg %p14461_p11 }
 0x8a7   : > { %p14468_p1 = por %p14467_p3, %p14466_p8 }
 0x8a9   : > { %p14469_p13 = pnand %p14468_p1, %p14462_p4 }
 0x8ab   : > { %14472 = shalt.err (!%p14469_p13)
}
 0x8ac   : > { %s14537_s25 = smov 128   ;;  %s14538_s23 = smov 8  }
 0x8ad   : > { %13865 = dma.vmem_to_hbm [thread:$0]  (%p17531_p12), %s17327_s12, 4096, %s17325_s9, %s11050_s19, %s14537_s25, %s14537_s25, %s14538_s23  }
 0x8ae PF: > { %s11078_s5 = sand.u32 1, %s14511_s29   ;;  %p17532_p0 = scmp.ne.s32.totalorder %s17451_s27, 0 }
 0x8af   : > { %p17533_p2 = scmp.ge.s32.totalorder %s14523_s16, 2  ;;  %s11079_s28 = scalar_lea.sflag [#allocation6], %s11078_s5 }
 0x8b1   : > { %p13888_p9 = pnand %p17533_p2, %p17532_p0 }
 0x8b3   : > { %14506 = dma.done.wait (!%p13888_p9), %s11079_s28, 4096  }
 0x8b4   : > { %14508 = vsyncadd (!%p13888_p9), %s11079_s28, 4294963200  ;;  %p30_p7 = scmp.ge.s32.totalorder %s14788_s21, 4   ;;  %s17534_s29 = smov %s14515_s30 }
 0x8b5   : > { %s17535_s30 = smov %s14519_s15  ;;  %s17536_s15 = smov %s14800_s8 }
 0x8b6   : > { %s17537_s16 = smov %s14788_s21  ;;  %32 = sbr.rel (!%p30_p7) target bundleno = 16 (0x10), region = 147 }
 0x8bd   :  { %11084 = vsyncpa [#allocation5], 1 }
 0x8be   :  { %11086 = vsyncpa [#allocation5 + $0x1], 1 }
 0x8bf   :  { %11087 = vsyncpa [#allocation8], 1 }
 0x8c0   :  { %11088 = vsyncpa [#allocation11], 1 }
 0x8c1   :  { %11089 = vsyncpa [#allocation14], 1 }
 0x8c2   :  { %11090 = vsyncpa [#allocation6], 1 }
 0x8c3   :  { %11092 = vsyncpa [#allocation6 + $0x1], 1 }

</bundles_post_ra>
